<compile_context>
chip_gen: v7x
topology: tpu7x:2x2x1
jax: 0.10.0
libtpu: 0.0.40
codegen_flags: <defaults>
</compile_context>

<pallas_src>
import functools
import math

import numpy as np
import jax
import jax.numpy as jnp
from jax.experimental import pallas as pl
from jax.experimental.pallas import tpu as pltpu

# ----------------------------- configuration ------------------------------
# Scaled-down but structurally faithful config (original: B=4, H=16, D=768,
# d_ff=3072, 100 sentence tokens + 42 extra tokens = 142).  DK is chosen =128
# so every per-head slice / concat is lane-aligned on TPU.
B = 4            # module hardcodes batch=4 (expand(4, 16, ...), repeat b=4)
H = 2            # attention heads        (16 in original)
D = 256          # d_model                (768 in original)
DK = D // H      # per-head dim = 128
D_FF = 512       # feed-forward dim       (3072 in original)
S_SENT = 8       # sentence tokens        (100 in original)
N_IMG = 5        # image_one tokens       (39 in original)
EXTRA = N_IMG + 3                 # img + se + ee + cls   (42 in original)
S1 = S_SENT + EXTRA               # 16                    (142 in original)
S5 = 1 + 1 + S_SENT               # cls5 + ee + sentence  (102 in original)
M = B * S1                        # flattened token rows per encoder
EPS = 1e-6
NEG = -1000000000.0


# ------------------------------ Pallas kernels -----------------------------
def _f_w3_kernel(s_ref, g_ref, wa_ref, wb_ref, b_ref, o_ref):
    """f_W3(cat([sentence, global], -1)) == sentence @ W[:D] + global @ W[D:] + b, ReLU.

    Avoids ever materialising the repeated global_image or the 2D-wide concat.
    One grid step per batch element; weights stay resident across steps.
    """
    gproj = jnp.dot(g_ref[0], wb_ref[...], preferred_element_type=jnp.float32)   # (1, Dout)
    y = (jnp.dot(s_ref[0], wa_ref[...], preferred_element_type=jnp.float32)
         + gproj + b_ref[...])
    o_ref[0] = jnp.maximum(y, 0.0)                                               # ReLU


def f_w3(sentence, global_image, wa, wb, b2d):
    Bm, S, Din = sentence.shape
    Dout = wa.shape[1]
    return pl.pallas_call(
        _f_w3_kernel,
        out_shape=jax.ShapeDtypeStruct((Bm, S, Dout), jnp.float32),
        grid=(Bm,),
        in_specs=[pl.BlockSpec((1, S, Din), lambda i: (i, 0, 0)),
                  pl.BlockSpec((1, 1, Din), lambda i: (i, 0, 0)),
                  pl.BlockSpec((Din, Dout), lambda i: (0, 0)),
                  pl.BlockSpec((Din, Dout), lambda i: (0, 0)),
                  pl.BlockSpec((1, Dout), lambda i: (0, 0))],
        out_specs=pl.BlockSpec((1, S, Dout), lambda i: (i, 0, 0)),
        compiler_params=pltpu.CompilerParams(dimension_semantics=("parallel",)),
    )(sentence, global_image.reshape(Bm, 1, Din), wa, wb, b2d)


def _encoder_kernel(x_ref, m_ref, wqkv_ref, bqkv_ref, wo_ref, bo_ref,
                    w1_ref, b1_ref, w2_ref, b2_ref,
                    ln1a_ref, ln1b_ref, ln2a_ref, ln2b_ref, lnfa_ref, lnfb_ref,
                    o_ref):
    """One full Encoder (1 EncoderLayer + final LayerNorm), fully fused.

    Works on the flattened, lane-dense (M, D) = (B*S1, D) activation tile.
    The 1/sqrt(d_k) attention scale is pre-folded into Wq/bq at staging time.
    """
    x = x_ref[0]                           # (M, D)
    mask_is_zero = m_ref[0] == 0.0         # (M, M) block-diagonal combined mask
    wqkv = wqkv_ref[0]                     # (D, 3D)   fused Wq|Wk|Wv (Wq pre-scaled)
    bqkv = bqkv_ref[0]                     # (1, 3D)
    wo, bo = wo_ref[0], bo_ref[0]
    w1, b1 = w1_ref[0], b1_ref[0]
    w2, b2 = w2_ref[0], b2_ref[0]

    def layer_norm(v, a_ref_, b_ref_):
        a = a_ref_[0]                      # (1, D)
        bb = b_ref_[0]                     # (1, D)
        mean = jnp.mean(v, axis=-1, keepdims=True)
        d = v - mean
        # torch x.std(-1) is the unbiased estimator (divide by D-1); eps added to std.
        std = jnp.sqrt(jnp.sum(d * d, axis=-1, keepdims=True) / (v.shape[-1] - 1))
        return a * d / (std + EPS) + bb

    def rep_first(sub):
        # reproduces `x + sublayer(norm(x))[0]`: broadcast batch-0 rows to all batches.
        first = sub[0:S1, :]               # batch-0 rows (S1, D) — sublane-aligned slice
        return jnp.concatenate([first] * B, axis=0)

    # ---- sublayer 0: multi-headed self-attention (pre-norm) ----
    nx = layer_norm(x, ln1a_ref, ln1b_ref)
    qkv = jnp.dot(nx, wqkv, preferred_element_type=jnp.float32) + bqkv   # (M, 3D)
    heads = []
    for h in range(H):                                         # DK=128 -> aligned slices
        qh = qkv[:, h * DK:(h + 1) * DK]                       # (M, DK) (already scaled)
        kh = qkv[:, D + h * DK:D + (h + 1) * DK]               # (M, DK)
        vh = qkv[:, 2 * D + h * DK:2 * D + (h + 1) * DK]       # (M, DK)
        s = jax.lax.dot_general(qh, kh, (((1,), (1,)), ((), ())),
                                preferred_element_type=jnp.float32)
        s = jnp.where(mask_is_zero, NEG, s)                    # masked_fill(mask==0, -1e9)
        s = s - jnp.max(s, axis=-1, keepdims=True)             # stable softmax (equivalent)
        e = jnp.exp(s)
        p = e * pl.reciprocal(jnp.sum(e, axis=-1, keepdims=True), approx=True)
        heads.append(jnp.dot(p, vh, preferred_element_type=jnp.float32))
    attn = jnp.concatenate(heads, axis=-1)                     # (M, D) lane-dense
    attn = jnp.dot(attn, wo, preferred_element_type=jnp.float32) + bo
    x = x + rep_first(attn)                                    # residual quirk

    # ---- sublayer 1: position-wise feed-forward (pre-norm) ----
    nx = layer_norm(x, ln2a_ref, ln2b_ref)
    hmid = jnp.maximum(jnp.dot(nx, w1, preferred_element_type=jnp.float32) + b1, 0.0)
    ff = jnp.dot(hmid, w2, preferred_element_type=jnp.float32) + b2
    x = x + rep_first(ff)                                      # residual quirk

    # ---- Encoder final LayerNorm ----
    o_ref[0] = layer_norm(x, lnfa_ref, lnfb_ref)


def _enc_spec(d1, d2):
    return pl.BlockSpec((1, d1, d2), lambda e: (e, 0, 0))


def run_encoders(x_stack, masks, ep):
    """All 5 independent encoders in ONE pallas_call, grid over the encoder index."""
    return pl.pallas_call(
        _encoder_kernel,
        out_shape=jax.ShapeDtypeStruct((5, M, D), jnp.float32),
        grid=(5,),
        in_specs=[
            _enc_spec(M, D),         # x
            _enc_spec(M, M),         # combined block-diagonal mask
            _enc_spec(D, 3 * D),     # wqkv
            _enc_spec(1, 3 * D),     # bqkv
            _enc_spec(D, D),         # wo
            _enc_spec(1, D),         # bo
            _enc_spec(D, D_FF),      # w1
            _enc_spec(1, D_FF),      # b1
            _enc_spec(D_FF, D),      # w2
            _enc_spec(1, D),         # b2
            _enc_spec(1, D), _enc_spec(1, D),    # ln1_a, ln1_b
            _enc_spec(1, D), _enc_spec(1, D),    # ln2_a, ln2_b
            _enc_spec(1, D), _enc_spec(1, D),    # lnf_a, lnf_b
        ],
        out_specs=_enc_spec(M, D),
        compiler_params=pltpu.CompilerParams(dimension_semantics=("parallel",)),
    )(x_stack, masks, ep["wqkv"], ep["bqkv"], ep["wo"], ep["bo"],
      ep["w1"], ep["b1"], ep["w2"], ep["b2"],
      ep["ln1_a"], ep["ln1_b"], ep["ln2_a"], ep["ln2_b"], ep["lnf_a"], ep["lnf_b"])


def _s2tsa_kernel(x_ref, w1_ref, b1_ref, w_ref, b_ref, o_ref):
    """source2token self-attention on the full (B, T, D) block in one grid step."""
    w1 = w1_ref[...]
    b1 = b1_ref[...]
    w = w_ref[...]
    b = b_ref[...]
    for bi in range(x_ref.shape[0]):                                    # B=4, static loop
        xb = x_ref[bi]                                                  # (T, D)
        f = jnp.maximum(jnp.dot(xb, w1, preferred_element_type=jnp.float32) + b1, 0.0)
        g = jnp.dot(f, w, preferred_element_type=jnp.float32) + b
        g = g - jnp.max(g, axis=0, keepdims=True)                       # softmax over dim=-2
        e = jnp.exp(g)
        p = e * pl.reciprocal(jnp.sum(e, axis=0, keepdims=True), approx=True)
        o_ref[bi, :] = jnp.sum(p * xb, axis=0)


def s2tsa(x, w1, b1, w, b):
    """x: (B, T, D) -> (B, D), single grid step."""
    Bm, T, Dm = x.shape
    return pl.pallas_call(
        _s2tsa_kernel,
        out_shape=jax.ShapeDtypeStruct((Bm, Dm), jnp.float32),
        grid=(1,),
        in_specs=[pl.BlockSpec((Bm, T, Dm), lambda i: (0, 0, 0)),
                  pl.BlockSpec((Dm, Dm), lambda i: (0, 0)),
                  pl.BlockSpec((1, Dm), lambda i: (0, 0)),
                  pl.BlockSpec((Dm, Dm), lambda i: (0, 0)),
                  pl.BlockSpec((1, Dm), lambda i: (0, 0))],
        out_specs=pl.BlockSpec((Bm, Dm), lambda i: (0, 0)),
    )(x, w1, b1, w, b)


# --------------------------- mask / weight staging ---------------------------
def build_masks():
    """Per-encoder combined (M, M) masks: block-diagonal over batch x within-seq mask.

    Static -> built once with numpy (hoisted out of the traced forward).
    """
    def band(lo, hi):
        tri = (np.triu(np.ones((S_SENT, S_SENT), np.float32), lo)
               - np.triu(np.ones((S_SENT, S_SENT), np.float32), hi))
        top = np.concatenate([tri, np.ones((S_SENT, EXTRA), np.float32)], axis=1)
        bot = np.ones((EXTRA, S1), np.float32)          # self.zeros (actually ones)
        return np.concatenate([top, bot], axis=0)       # (S1, S1)

    ones = np.ones((S1, S1), np.float32)                # mask=None (Encoder3)
    pad5 = np.zeros((S1, S1), np.float32)               # Encoder7: padded to S1,
    pad5[:, :S5] = 1.0                                  # mask out padded key columns
    within = np.stack([ones, band(-1, 2), band(-2, 3), band(-3, 4), pad5])  # (5,S1,S1)
    eye = np.eye(B, dtype=np.float32)                   # forbid cross-batch attention
    big = np.einsum('bc,eij->ebicj', eye, within).reshape(5, M, M)
    return jnp.asarray(big)


def prepare(params):
    """One-time staging of weights into kernel-friendly layouts (outside the jit)."""
    scale = 1.0 / math.sqrt(DK)                         # folded into Wq / bq
    encs = [params["enc3"], params["enc4"], params["enc5"], params["enc6"], params["enc7"]]

    def stk(fn):
        return jnp.stack([fn(p) for p in encs], axis=0)

    enc = dict(
        wqkv=stk(lambda p: jnp.concatenate([p["wq"] * scale, p["wk"], p["wv"]], axis=1)),
        bqkv=stk(lambda p: jnp.concatenate([p["bq"] * scale, p["bk"], p["bv"]])[None, :]),
        wo=stk(lambda p: p["wo"]), bo=stk(lambda p: p["bo"][None, :]),
        w1=stk(lambda p: p["w1"]), b1=stk(lambda p: p["b1"][None, :]),
        w2=stk(lambda p: p["w2"]), b2=stk(lambda p: p["b2"][None, :]),
        ln1_a=stk(lambda p: p["ln1_a"][None, :]), ln1_b=stk(lambda p: p["ln1_b"][None, :]),
        ln2_a=stk(lambda p: p["ln2_a"][None, :]), ln2_b=stk(lambda p: p["ln2_b"][None, :]),
        lnf_a=stk(lambda p: p["lnf_a"][None, :]), lnf_b=stk(lambda p: p["lnf_b"][None, :]),
    )
    return dict(
        masks=build_masks(),
        enc=enc,
        f_w3_wa=params["f_W3_w"][:D], f_w3_wb=params["f_W3_w"][D:],
        f_w3_b=params["f_W3_b"].reshape(1, D),
        s2t_w1=params["s2t_W1_w"], s2t_b1=params["s2t_W1_b"].reshape(1, D),
        s2t_w=params["s2t_W_w"], s2t_b=params["s2t_W_b"].reshape(1, D),
        cls=[params["cls1"], params["cls2"], params["cls3"], params["cls4"], params["cls5"]],
    )


# ------------------------------- forward pass -------------------------------
def sentence_four_forward(prep, sentence_feature, image_one, global_image,
                          missing_img_prompt_ee, missing_img_prompt_se):
    Bm = sentence_feature.shape[0]

    # f_W3( cat([sentence, global_image repeated], dim=2) ) with ReLU (split-weight form)
    sf = f_w3(sentence_feature, global_image,
              prep["f_w3_wa"], prep["f_w3_wb"], prep["f_w3_b"])       # (B, S_SENT, D)

    def cls(tok):
        return jnp.broadcast_to(tok, (Bm, 1, D))

    base = [sf, image_one, missing_img_prompt_se, missing_img_prompt_ee]
    g14 = [jnp.concatenate(base + [cls(prep["cls"][i])], axis=1) for i in range(4)]
    # Encoder7's input (S5 tokens) zero-padded to S1; mask keeps valid rows exact.
    g5 = jnp.concatenate([cls(prep["cls"][4]), missing_img_prompt_ee, sf,
                          jnp.zeros((Bm, S1 - S5, D), jnp.float32)], axis=1)

    x_stack = jnp.stack(g14 + [g5], axis=0).reshape(5, Bm * S1, D)
    outs = run_encoders(x_stack, prep["masks"], prep["enc"]).reshape(5, Bm, S1, D)

    u22 = jnp.concatenate([outs[i][:, -1:, :] for i in range(4)], axis=1)   # (B, 4, D)
    s = s2tsa(u22, prep["s2t_w1"], prep["s2t_b1"], prep["s2t_w"], prep["s2t_b"])
    return s, outs[4][:, 0, :]


# ------------------------------ parameter init ------------------------------
def init_params(key):
    keys = iter(jax.random.split(key, 128))

    def w(shape, scale=0.02):
        return scale * jax.random.normal(next(keys), shape, dtype=jnp.float32)

    def enc():
        return dict(
            wq=w((D, D)), bq=w((D,)), wk=w((D, D)), bk=w((D,)),
            wv=w((D, D)), bv=w((D,)), wo=w((D, D)), bo=w((D,)),
            w1=w((D, D_FF)), b1=w((D_FF,)), w2=w((D_FF, D)), b2=w((D,)),
            ln1_a=jnp.ones((D,), jnp.float32), ln1_b=jnp.zeros((D,), jnp.float32),
            ln2_a=jnp.ones((D,), jnp.float32), ln2_b=jnp.zeros((D,), jnp.float32),
            lnf_a=jnp.ones((D,), jnp.float32), lnf_b=jnp.zeros((D,), jnp.float32),
        )

    return dict(
        f_W3_w=w((2 * D, D)), f_W3_b=jnp.zeros((D,), jnp.float32),   # bias init 0
        s2t_W1_w=w((D, D)), s2t_W1_b=jnp.zeros((D,), jnp.float32),
        s2t_W_w=w((D, D)), s2t_W_b=jnp.zeros((D,), jnp.float32),
        cls1=w((1, 1, D), 1.0), cls2=w((1, 1, D), 1.0), cls3=w((1, 1, D), 1.0),
        cls4=w((1, 1, D), 1.0), cls5=w((1, 1, D), 1.0),
        enc3=enc(), enc4=enc(), enc5=enc(), enc6=enc(), enc7=enc(),
    )


# ----------------------------------- main -----------------------------------
if __name__ == "__main__":
    root = jax.random.PRNGKey(0)
    pkey, dkey = jax.random.split(root)
    params = init_params(pkey)
    prep = prepare(params)      # static weight/mask staging; done once, outside the jit

    k1, k2, k3, k4, k5 = jax.random.split(dkey, 5)
    sentence_feature = jax.random.normal(k1, (B, S_SENT, D), jnp.float32)
    image_one = jax.random.normal(k2, (B, N_IMG, D), jnp.float32)
    global_image = jax.random.normal(k3, (B, D), jnp.float32)
    missing_img_prompt_ee = jax.random.normal(k4, (B, 1, D), jnp.float32)
    missing_img_prompt_se = jax.random.normal(k5, (B, 1, D), jnp.float32)

    fwd = jax.jit(functools.partial(sentence_four_forward, prep))
    s_out, cls_out = fwd(sentence_feature, image_one, global_image,
                         missing_img_prompt_ee, missing_img_prompt_se)
    jax.block_until_ready((s_out, cls_out))
    assert s_out.shape == (B, D) and cls_out.shape == (B, D)
    assert bool(jnp.all(jnp.isfinite(s_out))) and bool(jnp.all(jnp.isfinite(cls_out)))
    print("KERNEL_OK")
</pallas_src>

<mosaic_0001>
module attributes {stable_mosaic.version = 11 : i64} {
  func.func @_f_w3_kernel(%arg0: i32, %arg1: memref<1x8x256xf32, #tpu.memory_space<vmem>>, %arg2: memref<1x1x256xf32, #tpu.memory_space<vmem>>, %arg3: memref<256x256xf32, #tpu.memory_space<vmem>>, %arg4: memref<256x256xf32, #tpu.memory_space<vmem>>, %arg5: memref<1x256xf32, #tpu.memory_space<vmem>>, %arg6: memref<1x8x256xf32, #tpu.memory_space<vmem>>) attributes {dimension_semantics = [#tpu.dimension_semantics<parallel>], iteration_bounds = array<i64: 4>, scalar_prefetch = 0 : i64, scratch_operands = 0 : i64, tpu.core_type = #tpu.core_type<tc>, window_params = [{transform_indices = @transform_0, window_bounds = array<i64: 1, 8, 256>}, {transform_indices = @transform_1, window_bounds = array<i64: 1, 1, 256>}, {pipeline_mode = #tpu.pipeline_mode<synchronous>, transform_indices = @transform_2, window_bounds = array<i64: 256, 256>}, {pipeline_mode = #tpu.pipeline_mode<synchronous>, transform_indices = @transform_3, window_bounds = array<i64: 256, 256>}, {pipeline_mode = #tpu.pipeline_mode<synchronous>, transform_indices = @transform_4, window_bounds = array<i64: 1, 256>}, {transform_indices = @transform_5, window_bounds = array<i64: 1, 8, 256>}]} {
    %c0 = arith.constant 0 : index
    %c0_0 = arith.constant 0 : index
    %c0_1 = arith.constant 0 : index
    %0 = vector.load %arg2[%c0, %c0_0, %c0_1] : memref<1x1x256xf32, #tpu.memory_space<vmem>>, vector<1x1x256xf32>
    %1 = vector.shape_cast %0 : vector<1x1x256xf32> to vector<1x256xf32>
    %c0_2 = arith.constant 0 : index
    %c0_3 = arith.constant 0 : index
    %2 = vector.load %arg4[%c0_2, %c0_3] : memref<256x256xf32, #tpu.memory_space<vmem>>, vector<256x256xf32>
    %cst = arith.constant dense<0.000000e+00> : vector<1x256xf32>
    %3 = tpu.matmul %1, %2, %cst {dimension_numbers = #tpu.dot_dimension_numbers<[1], [0], [0], [1], [0, 0, 1, 1], [], []>} : vector<1x256xf32>, vector<256x256xf32>, vector<1x256xf32> -> vector<1x256xf32>
    %c0_4 = arith.constant 0 : index
    %c0_5 = arith.constant 0 : index
    %c0_6 = arith.constant 0 : index
    %4 = vector.load %arg1[%c0_4, %c0_5, %c0_6] : memref<1x8x256xf32, #tpu.memory_space<vmem>>, vector<1x8x256xf32>
    %5 = vector.shape_cast %4 : vector<1x8x256xf32> to vector<8x256xf32>
    %c0_7 = arith.constant 0 : index
    %c0_8 = arith.constant 0 : index
    %6 = vector.load %arg3[%c0_7, %c0_8] : memref<256x256xf32, #tpu.memory_space<vmem>>, vector<256x256xf32>
    %cst_9 = arith.constant dense<0.000000e+00> : vector<8x256xf32>
    %7 = tpu.matmul %5, %6, %cst_9 {dimension_numbers = #tpu.dot_dimension_numbers<[1], [0], [0], [1], [0, 0, 1, 1], [], []>} : vector<8x256xf32>, vector<256x256xf32>, vector<8x256xf32> -> vector<8x256xf32>
    %8 = vector.broadcast %3 : vector<1x256xf32> to vector<8x256xf32>
    %9 = arith.addf %7, %8 : vector<8x256xf32>
    %c0_10 = arith.constant 0 : index
    %c0_11 = arith.constant 0 : index
    %10 = vector.load %arg5[%c0_10, %c0_11] : memref<1x256xf32, #tpu.memory_space<vmem>>, vector<1x256xf32>
    %11 = vector.broadcast %10 : vector<1x256xf32> to vector<8x256xf32>
    %12 = arith.addf %9, %11 : vector<8x256xf32>
    %cst_12 = arith.constant 0.000000e+00 : f32
    %13 = vector.broadcast %cst_12 : f32 to vector<8x256xf32>
    %14 = arith.maximumf %12, %13 : vector<8x256xf32>
    %c0_13 = arith.constant 0 : index
    %c0_14 = arith.constant 0 : index
    %c0_15 = arith.constant 0 : index
    %15 = vector.load %arg6[%c0_13, %c0_14, %c0_15] : memref<1x8x256xf32, #tpu.memory_space<vmem>>, vector<1x8x256xf32>
    %16 = vector.shape_cast %15 : vector<1x8x256xf32> to vector<8x256xf32>
    %17 = vector.shape_cast %14 : vector<8x256xf32> to vector<1x8x256xf32>
    tpu.vector_store %arg6[%c0_13, %c0_14, %c0_15], %17 {strides = array<i32>} : memref<1x8x256xf32, #tpu.memory_space<vmem>>, vector<1x8x256xf32>,
    return
  }
  func.func @transform_0(%arg0: i32) -> (i32, i32, i32) {
    %c0_i32 = arith.constant 0 : i32
    %c0_i32_0 = arith.constant 0 : i32
    %c0_i32_1 = arith.constant 0 : i32
    return %arg0, %c0_i32, %c0_i32_0 : i32, i32, i32
  }
  func.func @transform_1(%arg0: i32) -> (i32, i32, i32) {
    %c0_i32 = arith.constant 0 : i32
    %c0_i32_0 = arith.constant 0 : i32
    %c0_i32_1 = arith.constant 0 : i32
    return %arg0, %c0_i32, %c0_i32_0 : i32, i32, i32
  }
  func.func @transform_2(%arg0: i32) -> (i32, i32) {
    %c0_i32 = arith.constant 0 : i32
    %c0_i32_0 = arith.constant 0 : i32
    %c0_i32_1 = arith.constant 0 : i32
    return %c0_i32, %c0_i32_0 : i32, i32
  }
  func.func @transform_3(%arg0: i32) -> (i32, i32) {
    %c0_i32 = arith.constant 0 : i32
    %c0_i32_0 = arith.constant 0 : i32
    %c0_i32_1 = arith.constant 0 : i32
    return %c0_i32, %c0_i32_0 : i32, i32
  }
  func.func @transform_4(%arg0: i32) -> (i32, i32) {
    %c0_i32 = arith.constant 0 : i32
    %c0_i32_0 = arith.constant 0 : i32
    %c0_i32_1 = arith.constant 0 : i32
    return %c0_i32, %c0_i32_0 : i32, i32
  }
  func.func @transform_5(%arg0: i32) -> (i32, i32, i32) {
    %c0_i32 = arith.constant 0 : i32
    %c0_i32_0 = arith.constant 0 : i32
    %c0_i32_1 = arith.constant 0 : i32
    return %arg0, %c0_i32, %c0_i32_0 : i32, i32, i32
  }
}

module attributes {stable_mosaic.version = 11 : i64} {
  func.func @_encoder_kernel(%arg0: i32, %arg1: memref<1x64x256xf32, #tpu.memory_space<vmem>>, %arg2: memref<1x64x64xf32, #tpu.memory_space<vmem>>, %arg3: memref<1x256x768xf32, #tpu.memory_space<vmem>>, %arg4: memref<1x1x768xf32, #tpu.memory_space<vmem>>, %arg5: memref<1x256x256xf32, #tpu.memory_space<vmem>>, %arg6: memref<1x1x256xf32, #tpu.memory_space<vmem>>, %arg7: memref<1x256x512xf32, #tpu.memory_space<vmem>>, %arg8: memref<1x1x512xf32, #tpu.memory_space<vmem>>, %arg9: memref<1x512x256xf32, #tpu.memory_space<vmem>>, %arg10: memref<1x1x256xf32, #tpu.memory_space<vmem>>, %arg11: memref<1x1x256xf32, #tpu.memory_space<vmem>>, %arg12: memref<1x1x256xf32, #tpu.memory_space<vmem>>, %arg13: memref<1x1x256xf32, #tpu.memory_space<vmem>>, %arg14: memref<1x1x256xf32, #tpu.memory_space<vmem>>, %arg15: memref<1x1x256xf32, #tpu.memory_space<vmem>>, %arg16: memref<1x1x256xf32, #tpu.memory_space<vmem>>, %arg17: memref<1x64x256xf32, #tpu.memory_space<vmem>>) attributes {dimension_semantics = [#tpu.dimension_semantics<parallel>], iteration_bounds = array<i64: 5>, scalar_prefetch = 0 : i64, scratch_operands = 0 : i64, tpu.core_type = #tpu.core_type<tc>, window_params = [{transform_indices = @transform_0, window_bounds = array<i64: 1, 64, 256>}, {transform_indices = @transform_1, window_bounds = array<i64: 1, 64, 64>}, {transform_indices = @transform_2, window_bounds = array<i64: 1, 256, 768>}, {transform_indices = @transform_3, window_bounds = array<i64: 1, 1, 768>}, {transform_indices = @transform_4, window_bounds = array<i64: 1, 256, 256>}, {transform_indices = @transform_5, window_bounds = array<i64: 1, 1, 256>}, {transform_indices = @transform_6, window_bounds = array<i64: 1, 256, 512>}, {transform_indices = @transform_7, window_bounds = array<i64: 1, 1, 512>}, {transform_indices = @transform_8, window_bounds = array<i64: 1, 512, 256>}, {transform_indices = @transform_9, window_bounds = array<i64: 1, 1, 256>}, {transform_indices = @transform_10, window_bounds = array<i64: 1, 1, 256>}, {transform_indices = @transform_11, window_bounds = array<i64: 1, 1, 256>}, {transform_indices = @transform_12, window_bounds = array<i64: 1, 1, 256>}, {transform_indices = @transform_13, window_bounds = array<i64: 1, 1, 256>}, {transform_indices = @transform_14, window_bounds = array<i64: 1, 1, 256>}, {transform_indices = @transform_15, window_bounds = array<i64: 1, 1, 256>}, {transform_indices = @transform_16, window_bounds = array<i64: 1, 64, 256>}]} {
    %c0 = arith.constant 0 : index
    %c0_0 = arith.constant 0 : index
    %c0_1 = arith.constant 0 : index
    %0 = vector.load %arg1[%c0, %c0_0, %c0_1] : memref<1x64x256xf32, #tpu.memory_space<vmem>>, vector<1x64x256xf32>
    %1 = vector.shape_cast %0 : vector<1x64x256xf32> to vector<64x256xf32>
    %c0_2 = arith.constant 0 : index
    %c0_3 = arith.constant 0 : index
    %c0_4 = arith.constant 0 : index
    %2 = vector.load %arg2[%c0_2, %c0_3, %c0_4] : memref<1x64x64xf32, #tpu.memory_space<vmem>>, vector<1x64x64xf32>
    %3 = vector.shape_cast %2 : vector<1x64x64xf32> to vector<64x64xf32>
    %cst = arith.constant 0.000000e+00 : f32
    %4 = vector.broadcast %cst : f32 to vector<64x64xf32>
    %5 = arith.cmpf oeq, %3, %4 : vector<64x64xf32>
    %c0_5 = arith.constant 0 : index
    %c0_6 = arith.constant 0 : index
    %c0_7 = arith.constant 0 : index
    %6 = vector.load %arg3[%c0_5, %c0_6, %c0_7] : memref<1x256x768xf32, #tpu.memory_space<vmem>>, vector<1x256x768xf32>
    %7 = vector.shape_cast %6 : vector<1x256x768xf32> to vector<256x768xf32>
    %c0_8 = arith.constant 0 : index
    %c0_9 = arith.constant 0 : index
    %c0_10 = arith.constant 0 : index
    %8 = vector.load %arg4[%c0_8, %c0_9, %c0_10] : memref<1x1x768xf32, #tpu.memory_space<vmem>>, vector<1x1x768xf32>
    %9 = vector.shape_cast %8 : vector<1x1x768xf32> to vector<1x768xf32>
    %c0_11 = arith.constant 0 : index
    %c0_12 = arith.constant 0 : index
    %c0_13 = arith.constant 0 : index
    %10 = vector.load %arg5[%c0_11, %c0_12, %c0_13] : memref<1x256x256xf32, #tpu.memory_space<vmem>>, vector<1x256x256xf32>
    %11 = vector.shape_cast %10 : vector<1x256x256xf32> to vector<256x256xf32>
    %c0_14 = arith.constant 0 : index
    %c0_15 = arith.constant 0 : index
    %c0_16 = arith.constant 0 : index
    %12 = vector.load %arg6[%c0_14, %c0_15, %c0_16] : memref<1x1x256xf32, #tpu.memory_space<vmem>>, vector<1x1x256xf32>
    %13 = vector.shape_cast %12 : vector<1x1x256xf32> to vector<1x256xf32>
    %c0_17 = arith.constant 0 : index
    %c0_18 = arith.constant 0 : index
    %c0_19 = arith.constant 0 : index
    %14 = vector.load %arg7[%c0_17, %c0_18, %c0_19] : memref<1x256x512xf32, #tpu.memory_space<vmem>>, vector<1x256x512xf32>
    %15 = vector.shape_cast %14 : vector<1x256x512xf32> to vector<256x512xf32>
    %c0_20 = arith.constant 0 : index
    %c0_21 = arith.constant 0 : index
    %c0_22 = arith.constant 0 : index
    %16 = vector.load %arg8[%c0_20, %c0_21, %c0_22] : memref<1x1x512xf32, #tpu.memory_space<vmem>>, vector<1x1x512xf32>
    %17 = vector.shape_cast %16 : vector<1x1x512xf32> to vector<1x512xf32>
    %c0_23 = arith.constant 0 : index
    %c0_24 = arith.constant 0 : index
    %c0_25 = arith.constant 0 : index
    %18 = vector.load %arg9[%c0_23, %c0_24, %c0_25] : memref<1x512x256xf32, #tpu.memory_space<vmem>>, vector<1x512x256xf32>
    %19 = vector.shape_cast %18 : vector<1x512x256xf32> to vector<512x256xf32>
    %c0_26 = arith.constant 0 : index
    %c0_27 = arith.constant 0 : index
    %c0_28 = arith.constant 0 : index
    %20 = vector.load %arg10[%c0_26, %c0_27, %c0_28] : memref<1x1x256xf32, #tpu.memory_space<vmem>>, vector<1x1x256xf32>
    %21 = vector.shape_cast %20 : vector<1x1x256xf32> to vector<1x256xf32>
    %c0_29 = arith.constant 0 : index
    %c0_30 = arith.constant 0 : index
    %c0_31 = arith.constant 0 : index
    %22 = vector.load %arg11[%c0_29, %c0_30, %c0_31] : memref<1x1x256xf32, #tpu.memory_space<vmem>>, vector<1x1x256xf32>
    %23 = vector.shape_cast %22 : vector<1x1x256xf32> to vector<1x256xf32>
    %c0_32 = arith.constant 0 : index
    %c0_33 = arith.constant 0 : index
    %c0_34 = arith.constant 0 : index
    %24 = vector.load %arg12[%c0_32, %c0_33, %c0_34] : memref<1x1x256xf32, #tpu.memory_space<vmem>>, vector<1x1x256xf32>
    %25 = vector.shape_cast %24 : vector<1x1x256xf32> to vector<1x256xf32>
    %cst_35 = arith.constant dense<0.000000e+00> : vector<64xf32>
    %26 = vector.multi_reduction <add>, %1, %cst_35 [1] : vector<64x256xf32> to vector<64xf32>
    %27 = vector.shape_cast %26 : vector<64xf32> to vector<64x1xf32>
    %cst_36 = arith.constant 2.560000e+02 : f32
    %28 = vector.broadcast %cst_36 : f32 to vector<64x1xf32>
    %29 = arith.divf %27, %28 : vector<64x1xf32>
    %30 = vector.broadcast %29 : vector<64x1xf32> to vector<64x256xf32>
    %31 = arith.subf %1, %30 : vector<64x256xf32>
    %32 = arith.mulf %31, %31 : vector<64x256xf32>
    %cst_37 = arith.constant dense<0.000000e+00> : vector<64xf32>
    %33 = vector.multi_reduction <add>, %32, %cst_37 [1] : vector<64x256xf32> to vector<64xf32>
    %34 = vector.shape_cast %33 : vector<64xf32> to vector<64x1xf32>
    %cst_38 = arith.constant 2.550000e+02 : f32
    %35 = vector.broadcast %cst_38 : f32 to vector<64x1xf32>
    %36 = arith.divf %34, %35 : vector<64x1xf32>
    %37 = math.sqrt %36 : vector<64x1xf32>
    %38 = vector.broadcast %23 : vector<1x256xf32> to vector<64x256xf32>
    %39 = arith.mulf %38, %31 : vector<64x256xf32>
    %cst_39 = arith.constant 9.99999997E-7 : f32
    %40 = vector.broadcast %cst_39 : f32 to vector<64x1xf32>
    %41 = arith.addf %37, %40 : vector<64x1xf32>
    %42 = vector.broadcast %41 : vector<64x1xf32> to vector<64x256xf32>
    %43 = arith.divf %39, %42 : vector<64x256xf32>
    %44 = vector.broadcast %25 : vector<1x256xf32> to vector<64x256xf32>
    %45 = arith.addf %43, %44 : vector<64x256xf32>
    %cst_40 = arith.constant dense<0.000000e+00> : vector<64x768xf32>
    %46 = tpu.matmul %45, %7, %cst_40 {dimension_numbers = #tpu.dot_dimension_numbers<[1], [0], [0], [1], [0, 0, 1, 1], [], []>} : vector<64x256xf32>, vector<256x768xf32>, vector<64x768xf32> -> vector<64x768xf32>
    %47 = vector.broadcast %9 : vector<1x768xf32> to vector<64x768xf32>
    %48 = arith.addf %46, %47 : vector<64x768xf32>
    %49 = vector.extract_strided_slice %48 {offsets = [0, 0], sizes = [64, 128], strides = [1, 1]} : vector<64x768xf32> to vector<64x128xf32>
    %50 = vector.extract_strided_slice %48 {offsets = [0, 256], sizes = [64, 128], strides = [1, 1]} : vector<64x768xf32> to vector<64x128xf32>
    %51 = vector.extract_strided_slice %48 {offsets = [0, 512], sizes = [64, 128], strides = [1, 1]} : vector<64x768xf32> to vector<64x128xf32>
    %cst_41 = arith.constant dense<0.000000e+00> : vector<64x64xf32>
    %52 = tpu.matmul %49, %50, %cst_41 {dimension_numbers = #tpu.dot_dimension_numbers<[1], [1], [0], [0], [0, 0, 1, 0], [], []>} : vector<64x128xf32>, vector<64x128xf32>, vector<64x64xf32> -> vector<64x64xf32>
    %cst_42 = arith.constant -1.000000e+09 : f32
    %53 = vector.broadcast %cst_42 : f32 to vector<64x64xf32>
    %54 = arith.select %5, %53, %52 : vector<64x64xi1>, vector<64x64xf32>
    %cst_43 = arith.constant dense<0xFF800000> : vector<64xf32>
    %55 = vector.multi_reduction <maximumf>, %54, %cst_43 [1] : vector<64x64xf32> to vector<64xf32>
    %56 = vector.shape_cast %55 : vector<64xf32> to vector<64x1xf32>
    %57 = vector.broadcast %56 : vector<64x1xf32> to vector<64x64xf32>
    %58 = arith.subf %54, %57 : vector<64x64xf32>
    %59 = math.exp %58 : vector<64x64xf32>
    %cst_44 = arith.constant dense<0.000000e+00> : vector<64xf32>
    %60 = vector.multi_reduction <add>, %59, %cst_44 [1] : vector<64x64xf32> to vector<64xf32>
    %61 = vector.shape_cast %60 : vector<64xf32> to vector<64x1xf32>
    %62 = tpu.reciprocal %61 {approx = true} : vector<64x1xf32> -> vector<64x1xf32>
    %63 = vector.broadcast %62 : vector<64x1xf32> to vector<64x64xf32>
    %64 = arith.mulf %59, %63 : vector<64x64xf32>
    %cst_45 = arith.constant dense<0.000000e+00> : vector<64x128xf32>
    %65 = tpu.matmul %64, %51, %cst_45 {dimension_numbers = #tpu.dot_dimension_numbers<[1], [0], [0], [1], [0, 0, 1, 1], [], []>} : vector<64x64xf32>, vector<64x128xf32>, vector<64x128xf32> -> vector<64x128xf32>
    %66 = vector.extract_strided_slice %48 {offsets = [0, 128], sizes = [64, 128], strides = [1, 1]} : vector<64x768xf32> to vector<64x128xf32>
    %67 = vector.extract_strided_slice %48 {offsets = [0, 384], sizes = [64, 128], strides = [1, 1]} : vector<64x768xf32> to vector<64x128xf32>
    %68 = vector.extract_strided_slice %48 {offsets = [0, 640], sizes = [64, 128], strides = [1, 1]} : vector<64x768xf32> to vector<64x128xf32>
    %cst_46 = arith.constant dense<0.000000e+00> : vector<64x64xf32>
    %69 = tpu.matmul %66, %67, %cst_46 {dimension_numbers = #tpu.dot_dimension_numbers<[1], [1], [0], [0], [0, 0, 1, 0], [], []>} : vector<64x128xf32>, vector<64x128xf32>, vector<64x64xf32> -> vector<64x64xf32>
    %cst_47 = arith.constant -1.000000e+09 : f32
    %70 = vector.broadcast %cst_47 : f32 to vector<64x64xf32>
    %71 = arith.select %5, %70, %69 : vector<64x64xi1>, vector<64x64xf32>
    %cst_48 = arith.constant dense<0xFF800000> : vector<64xf32>
    %72 = vector.multi_reduction <maximumf>, %71, %cst_48 [1] : vector<64x64xf32> to vector<64xf32>
    %73 = vector.shape_cast %72 : vector<64xf32> to vector<64x1xf32>
    %74 = vector.broadcast %73 : vector<64x1xf32> to vector<64x64xf32>
    %75 = arith.subf %71, %74 : vector<64x64xf32>
    %76 = math.exp %75 : vector<64x64xf32>
    %cst_49 = arith.constant dense<0.000000e+00> : vector<64xf32>
    %77 = vector.multi_reduction <add>, %76, %cst_49 [1] : vector<64x64xf32> to vector<64xf32>
    %78 = vector.shape_cast %77 : vector<64xf32> to vector<64x1xf32>
    %79 = tpu.reciprocal %78 {approx = true} : vector<64x1xf32> -> vector<64x1xf32>
    %80 = vector.broadcast %79 : vector<64x1xf32> to vector<64x64xf32>
    %81 = arith.mulf %76, %80 : vector<64x64xf32>
    %cst_50 = arith.constant dense<0.000000e+00> : vector<64x128xf32>
    %82 = tpu.matmul %81, %68, %cst_50 {dimension_numbers = #tpu.dot_dimension_numbers<[1], [0], [0], [1], [0, 0, 1, 1], [], []>} : vector<64x64xf32>, vector<64x128xf32>, vector<64x128xf32> -> vector<64x128xf32>
    %83 = tpu.concatenate %65, %82 in 1 : vector<64x128xf32>, vector<64x128xf32> -> vector<64x256xf32>
    %cst_51 = arith.constant dense<0.000000e+00> : vector<64x256xf32>
    %84 = tpu.matmul %83, %11, %cst_51 {dimension_numbers = #tpu.dot_dimension_numbers<[1], [0], [0], [1], [0, 0, 1, 1], [], []>} : vector<64x256xf32>, vector<256x256xf32>, vector<64x256xf32> -> vector<64x256xf32>
    %85 = vector.broadcast %13 : vector<1x256xf32> to vector<64x256xf32>
    %86 = arith.addf %84, %85 : vector<64x256xf32>
    %87 = vector.extract_strided_slice %86 {offsets = [0, 0], sizes = [16, 256], strides = [1, 1]} : vector<64x256xf32> to vector<16x256xf32>
    %88 = tpu.concatenate %87, %87, %87, %87 in 0 : vector<16x256xf32>, vector<16x256xf32>, vector<16x256xf32>, vector<16x256xf32> -> vector<64x256xf32>
    %89 = arith.addf %1, %88 : vector<64x256xf32>
    %c0_52 = arith.constant 0 : index
    %c0_53 = arith.constant 0 : index
    %c0_54 = arith.constant 0 : index
    %90 = vector.load %arg13[%c0_52, %c0_53, %c0_54] : memref<1x1x256xf32, #tpu.memory_space<vmem>>, vector<1x1x256xf32>
    %91 = vector.shape_cast %90 : vector<1x1x256xf32> to vector<1x256xf32>
    %c0_55 = arith.constant 0 : index
    %c0_56 = arith.constant 0 : index
    %c0_57 = arith.constant 0 : index
    %92 = vector.load %arg14[%c0_55, %c0_56, %c0_57] : memref<1x1x256xf32, #tpu.memory_space<vmem>>, vector<1x1x256xf32>
    %93 = vector.shape_cast %92 : vector<1x1x256xf32> to vector<1x256xf32>
    %cst_58 = arith.constant dense<0.000000e+00> : vector<64xf32>
    %94 = vector.multi_reduction <add>, %89, %cst_58 [1] : vector<64x256xf32> to vector<64xf32>
    %95 = vector.shape_cast %94 : vector<64xf32> to vector<64x1xf32>
    %cst_59 = arith.constant 2.560000e+02 : f32
    %96 = vector.broadcast %cst_59 : f32 to vector<64x1xf32>
    %97 = arith.divf %95, %96 : vector<64x1xf32>
    %98 = vector.broadcast %97 : vector<64x1xf32> to vector<64x256xf32>
    %99 = arith.subf %89, %98 : vector<64x256xf32>
    %100 = arith.mulf %99, %99 : vector<64x256xf32>
    %cst_60 = arith.constant dense<0.000000e+00> : vector<64xf32>
    %101 = vector.multi_reduction <add>, %100, %cst_60 [1] : vector<64x256xf32> to vector<64xf32>
    %102 = vector.shape_cast %101 : vector<64xf32> to vector<64x1xf32>
    %cst_61 = arith.constant 2.550000e+02 : f32
    %103 = vector.broadcast %cst_61 : f32 to vector<64x1xf32>
    %104 = arith.divf %102, %103 : vector<64x1xf32>
    %105 = math.sqrt %104 : vector<64x1xf32>
    %106 = vector.broadcast %91 : vector<1x256xf32> to vector<64x256xf32>
    %107 = arith.mulf %106, %99 : vector<64x256xf32>
    %cst_62 = arith.constant 9.99999997E-7 : f32
    %108 = vector.broadcast %cst_62 : f32 to vector<64x1xf32>
    %109 = arith.addf %105, %108 : vector<64x1xf32>
    %110 = vector.broadcast %109 : vector<64x1xf32> to vector<64x256xf32>
    %111 = arith.divf %107, %110 : vector<64x256xf32>
    %112 = vector.broadcast %93 : vector<1x256xf32> to vector<64x256xf32>
    %113 = arith.addf %111, %112 : vector<64x256xf32>
    %cst_63 = arith.constant dense<0.000000e+00> : vector<64x512xf32>
    %114 = tpu.matmul %113, %15, %cst_63 {dimension_numbers = #tpu.dot_dimension_numbers<[1], [0], [0], [1], [0, 0, 1, 1], [], []>} : vector<64x256xf32>, vector<256x512xf32>, vector<64x512xf32> -> vector<64x512xf32>
    %115 = vector.broadcast %17 : vector<1x512xf32> to vector<64x512xf32>
    %116 = arith.addf %114, %115 : vector<64x512xf32>
    %cst_64 = arith.constant 0.000000e+00 : f32
    %117 = vector.broadcast %cst_64 : f32 to vector<64x512xf32>
    %118 = arith.maximumf %116, %117 : vector<64x512xf32>
    %cst_65 = arith.constant dense<0.000000e+00> : vector<64x256xf32>
    %119 = tpu.matmul %118, %19, %cst_65 {dimension_numbers = #tpu.dot_dimension_numbers<[1], [0], [0], [1], [0, 0, 1, 1], [], []>} : vector<64x512xf32>, vector<512x256xf32>, vector<64x256xf32> -> vector<64x256xf32>
    %120 = vector.broadcast %21 : vector<1x256xf32> to vector<64x256xf32>
    %121 = arith.addf %119, %120 : vector<64x256xf32>
    %122 = vector.extract_strided_slice %121 {offsets = [0, 0], sizes = [16, 256], strides = [1, 1]} : vector<64x256xf32> to vector<16x256xf32>
    %123 = tpu.concatenate %122, %122, %122, %122 in 0 : vector<16x256xf32>, vector<16x256xf32>, vector<16x256xf32>, vector<16x256xf32> -> vector<64x256xf32>
    %124 = arith.addf %89, %123 : vector<64x256xf32>
    %c0_66 = arith.constant 0 : index
    %c0_67 = arith.constant 0 : index
    %c0_68 = arith.constant 0 : index
    %125 = vector.load %arg15[%c0_66, %c0_67, %c0_68] : memref<1x1x256xf32, #tpu.memory_space<vmem>>, vector<1x1x256xf32>
    %126 = vector.shape_cast %125 : vector<1x1x256xf32> to vector<1x256xf32>
    %c0_69 = arith.constant 0 : index
    %c0_70 = arith.constant 0 : index
    %c0_71 = arith.constant 0 : index
    %127 = vector.load %arg16[%c0_69, %c0_70, %c0_71] : memref<1x1x256xf32, #tpu.memory_space<vmem>>, vector<1x1x256xf32>
    %128 = vector.shape_cast %127 : vector<1x1x256xf32> to vector<1x256xf32>
    %cst_72 = arith.constant dense<0.000000e+00> : vector<64xf32>
    %129 = vector.multi_reduction <add>, %124, %cst_72 [1] : vector<64x256xf32> to vector<64xf32>
    %130 = vector.shape_cast %129 : vector<64xf32> to vector<64x1xf32>
    %cst_73 = arith.constant 2.560000e+02 : f32
    %131 = vector.broadcast %cst_73 : f32 to vector<64x1xf32>
    %132 = arith.divf %130, %131 : vector<64x1xf32>
    %133 = vector.broadcast %132 : vector<64x1xf32> to vector<64x256xf32>
    %134 = arith.subf %124, %133 : vector<64x256xf32>
    %135 = arith.mulf %134, %134 : vector<64x256xf32>
    %cst_74 = arith.constant dense<0.000000e+00> : vector<64xf32>
    %136 = vector.multi_reduction <add>, %135, %cst_74 [1] : vector<64x256xf32> to vector<64xf32>
    %137 = vector.shape_cast %136 : vector<64xf32> to vector<64x1xf32>
    %cst_75 = arith.constant 2.550000e+02 : f32
    %138 = vector.broadcast %cst_75 : f32 to vector<64x1xf32>
    %139 = arith.divf %137, %138 : vector<64x1xf32>
    %140 = math.sqrt %139 : vector<64x1xf32>
    %141 = vector.broadcast %126 : vector<1x256xf32> to vector<64x256xf32>
    %142 = arith.mulf %141, %134 : vector<64x256xf32>
    %cst_76 = arith.constant 9.99999997E-7 : f32
    %143 = vector.broadcast %cst_76 : f32 to vector<64x1xf32>
    %144 = arith.addf %140, %143 : vector<64x1xf32>
    %145 = vector.broadcast %144 : vector<64x1xf32> to vector<64x256xf32>
    %146 = arith.divf %142, %145 : vector<64x256xf32>
    %147 = vector.broadcast %128 : vector<1x256xf32> to vector<64x256xf32>
    %148 = arith.addf %146, %147 : vector<64x256xf32>
    %c0_77 = arith.constant 0 : index
    %c0_78 = arith.constant 0 : index
    %c0_79 = arith.constant 0 : index
    %149 = vector.load %arg17[%c0_77, %c0_78, %c0_79] : memref<1x64x256xf32, #tpu.memory_space<vmem>>, vector<1x64x256xf32>
    %150 = vector.shape_cast %149 : vector<1x64x256xf32> to vector<64x256xf32>
    %151 = vector.shape_cast %148 : vector<64x256xf32> to vector<1x64x256xf32>
    tpu.vector_store %arg17[%c0_77, %c0_78, %c0_79], %151 {strides = array<i32>} : memref<1x64x256xf32, #tpu.memory_space<vmem>>, vector<1x64x256xf32>,
    return
  }
  func.func @transform_0(%arg0: i32) -> (i32, i32, i32) {
    %c0_i32 = arith.constant 0 : i32
    %c0_i32_0 = arith.constant 0 : i32
    %c0_i32_1 = arith.constant 0 : i32
    return %arg0, %c0_i32, %c0_i32_0 : i32, i32, i32
  }
  func.func @transform_1(%arg0: i32) -> (i32, i32, i32) {
    %c0_i32 = arith.constant 0 : i32
    %c0_i32_0 = arith.constant 0 : i32
    %c0_i32_1 = arith.constant 0 : i32
    return %arg0, %c0_i32, %c0_i32_0 : i32, i32, i32
  }
  func.func @transform_2(%arg0: i32) -> (i32, i32, i32) {
    %c0_i32 = arith.constant 0 : i32
    %c0_i32_0 = arith.constant 0 : i32
    %c0_i32_1 = arith.constant 0 : i32
    return %arg0, %c0_i32, %c0_i32_0 : i32, i32, i32
  }
  func.func @transform_3(%arg0: i32) -> (i32, i32, i32) {
    %c0_i32 = arith.constant 0 : i32
    %c0_i32_0 = arith.constant 0 : i32
    %c0_i32_1 = arith.constant 0 : i32
    return %arg0, %c0_i32, %c0_i32_0 : i32, i32, i32
  }
  func.func @transform_4(%arg0: i32) -> (i32, i32, i32) {
    %c0_i32 = arith.constant 0 : i32
    %c0_i32_0 = arith.constant 0 : i32
    %c0_i32_1 = arith.constant 0 : i32
    return %arg0, %c0_i32, %c0_i32_0 : i32, i32, i32
  }
  func.func @transform_5(%arg0: i32) -> (i32, i32, i32) {
    %c0_i32 = arith.constant 0 : i32
    %c0_i32_0 = arith.constant 0 : i32
    %c0_i32_1 = arith.constant 0 : i32
    return %arg0, %c0_i32, %c0_i32_0 : i32, i32, i32
  }
  func.func @transform_6(%arg0: i32) -> (i32, i32, i32) {
    %c0_i32 = arith.constant 0 : i32
    %c0_i32_0 = arith.constant 0 : i32
    %c0_i32_1 = arith.constant 0 : i32
    return %arg0, %c0_i32, %c0_i32_0 : i32, i32, i32
  }
  func.func @transform_7(%arg0: i32) -> (i32, i32, i32) {
    %c0_i32 = arith.constant 0 : i32
    %c0_i32_0 = arith.constant 0 : i32
    %c0_i32_1 = arith.constant 0 : i32
    return %arg0, %c0_i32, %c0_i32_0 : i32, i32, i32
  }
  func.func @transform_8(%arg0: i32) -> (i32, i32, i32) {
    %c0_i32 = arith.constant 0 : i32
    %c0_i32_0 = arith.constant 0 : i32
    %c0_i32_1 = arith.constant 0 : i32
    return %arg0, %c0_i32, %c0_i32_0 : i32, i32, i32
  }
  func.func @transform_9(%arg0: i32) -> (i32, i32, i32) {
    %c0_i32 = arith.constant 0 : i32
    %c0_i32_0 = arith.constant 0 : i32
    %c0_i32_1 = arith.constant 0 : i32
    return %arg0, %c0_i32, %c0_i32_0 : i32, i32, i32
  }
  func.func @transform_10(%arg0: i32) -> (i32, i32, i32) {
    %c0_i32 = arith.constant 0 : i32
    %c0_i32_0 = arith.constant 0 : i32
    %c0_i32_1 = arith.constant 0 : i32
    return %arg0, %c0_i32, %c0_i32_0 : i32, i32, i32
  }
  func.func @transform_11(%arg0: i32) -> (i32, i32, i32) {
    %c0_i32 = arith.constant 0 : i32
    %c0_i32_0 = arith.constant 0 : i32
    %c0_i32_1 = arith.constant 0 : i32
    return %arg0, %c0_i32, %c0_i32_0 : i32, i32, i32
  }
  func.func @transform_12(%arg0: i32) -> (i32, i32, i32) {
    %c0_i32 = arith.constant 0 : i32
    %c0_i32_0 = arith.constant 0 : i32
    %c0_i32_1 = arith.constant 0 : i32
    return %arg0, %c0_i32, %c0_i32_0 : i32, i32, i32
  }
  func.func @transform_13(%arg0: i32) -> (i32, i32, i32) {
    %c0_i32 = arith.constant 0 : i32
    %c0_i32_0 = arith.constant 0 : i32
    %c0_i32_1 = arith.constant 0 : i32
    return %arg0, %c0_i32, %c0_i32_0 : i32, i32, i32
  }
  func.func @transform_14(%arg0: i32) -> (i32, i32, i32) {
    %c0_i32 = arith.constant 0 : i32
    %c0_i32_0 = arith.constant 0 : i32
    %c0_i32_1 = arith.constant 0 : i32
    return %arg0, %c0_i32, %c0_i32_0 : i32, i32, i32
  }
  func.func @transform_15(%arg0: i32) -> (i32, i32, i32) {
    %c0_i32 = arith.constant 0 : i32
    %c0_i32_0 = arith.constant 0 : i32
    %c0_i32_1 = arith.constant 0 : i32
    return %arg0, %c0_i32, %c0_i32_0 : i32, i32, i32
  }
  func.func @transform_16(%arg0: i32) -> (i32, i32, i32) {
    %c0_i32 = arith.constant 0 : i32
    %c0_i32_0 = arith.constant 0 : i32
    %c0_i32_1 = arith.constant 0 : i32
    return %arg0, %c0_i32, %c0_i32_0 : i32, i32, i32
  }
}

module attributes {stable_mosaic.version = 11 : i64} {
  func.func @_s2tsa_kernel(%arg0: i32, %arg1: memref<4x4x256xf32, #tpu.memory_space<vmem>>, %arg2: memref<256x256xf32, #tpu.memory_space<vmem>>, %arg3: memref<1x256xf32, #tpu.memory_space<vmem>>, %arg4: memref<256x256xf32, #tpu.memory_space<vmem>>, %arg5: memref<1x256xf32, #tpu.memory_space<vmem>>, %arg6: memref<4x256xf32, #tpu.memory_space<vmem>>) attributes {dimension_semantics = [#tpu.dimension_semantics<arbitrary>], iteration_bounds = array<i64: 1>, scalar_prefetch = 0 : i64, scratch_operands = 0 : i64, tpu.core_type = #tpu.core_type<tc>, window_params = [{pipeline_mode = #tpu.pipeline_mode<synchronous>, transform_indices = @transform_0, window_bounds = array<i64: 4, 4, 256>}, {pipeline_mode = #tpu.pipeline_mode<synchronous>, transform_indices = @transform_1, window_bounds = array<i64: 256, 256>}, {pipeline_mode = #tpu.pipeline_mode<synchronous>, transform_indices = @transform_2, window_bounds = array<i64: 1, 256>}, {pipeline_mode = #tpu.pipeline_mode<synchronous>, transform_indices = @transform_3, window_bounds = array<i64: 256, 256>}, {pipeline_mode = #tpu.pipeline_mode<synchronous>, transform_indices = @transform_4, window_bounds = array<i64: 1, 256>}, {pipeline_mode = #tpu.pipeline_mode<synchronous>, transform_indices = @transform_5, window_bounds = array<i64: 4, 256>}]} {
    %c0 = arith.constant 0 : index
    %c0_0 = arith.constant 0 : index
    %0 = vector.load %arg2[%c0, %c0_0] : memref<256x256xf32, #tpu.memory_space<vmem>>, vector<256x256xf32>
    %c0_1 = arith.constant 0 : index
    %c0_2 = arith.constant 0 : index
    %1 = vector.load %arg3[%c0_1, %c0_2] : memref<1x256xf32, #tpu.memory_space<vmem>>, vector<1x256xf32>
    %c0_3 = arith.constant 0 : index
    %c0_4 = arith.constant 0 : index
    %2 = vector.load %arg4[%c0_3, %c0_4] : memref<256x256xf32, #tpu.memory_space<vmem>>, vector<256x256xf32>
    %c0_5 = arith.constant 0 : index
    %c0_6 = arith.constant 0 : index
    %3 = vector.load %arg5[%c0_5, %c0_6] : memref<1x256xf32, #tpu.memory_space<vmem>>, vector<1x256xf32>
    %c0_7 = arith.constant 0 : index
    %c0_8 = arith.constant 0 : index
    %c0_9 = arith.constant 0 : index
    %4 = vector.load %arg1[%c0_7, %c0_8, %c0_9] : memref<4x4x256xf32, #tpu.memory_space<vmem>>, vector<1x4x256xf32>
    %5 = vector.shape_cast %4 : vector<1x4x256xf32> to vector<4x256xf32>
    %cst = arith.constant dense<0.000000e+00> : vector<4x256xf32>
    %6 = tpu.matmul %5, %0, %cst {dimension_numbers = #tpu.dot_dimension_numbers<[1], [0], [0], [1], [0, 0, 1, 1], [], []>} : vector<4x256xf32>, vector<256x256xf32>, vector<4x256xf32> -> vector<4x256xf32>
    %7 = vector.broadcast %1 : vector<1x256xf32> to vector<4x256xf32>
    %8 = arith.addf %6, %7 : vector<4x256xf32>
    %cst_10 = arith.constant 0.000000e+00 : f32
    %9 = vector.broadcast %cst_10 : f32 to vector<4x256xf32>
    %10 = arith.maximumf %8, %9 : vector<4x256xf32>
    %cst_11 = arith.constant dense<0.000000e+00> : vector<4x256xf32>
    %11 = tpu.matmul %10, %2, %cst_11 {dimension_numbers = #tpu.dot_dimension_numbers<[1], [0], [0], [1], [0, 0, 1, 1], [], []>} : vector<4x256xf32>, vector<256x256xf32>, vector<4x256xf32> -> vector<4x256xf32>
    %12 = vector.broadcast %3 : vector<1x256xf32> to vector<4x256xf32>
    %13 = arith.addf %11, %12 : vector<4x256xf32>
    %cst_12 = arith.constant dense<0xFF800000> : vector<256xf32>
    %14 = vector.multi_reduction <maximumf>, %13, %cst_12 [0] : vector<4x256xf32> to vector<256xf32>
    %15 = vector.shape_cast %14 : vector<256xf32> to vector<1x256xf32>
    %16 = vector.broadcast %15 : vector<1x256xf32> to vector<4x256xf32>
    %17 = arith.subf %13, %16 : vector<4x256xf32>
    %18 = math.exp %17 : vector<4x256xf32>
    %cst_13 = arith.constant dense<0.000000e+00> : vector<256xf32>
    %19 = vector.multi_reduction <add>, %18, %cst_13 [0] : vector<4x256xf32> to vector<256xf32>
    %20 = vector.shape_cast %19 : vector<256xf32> to vector<1x256xf32>
    %21 = tpu.reciprocal %20 {approx = true} : vector<1x256xf32> -> vector<1x256xf32>
    %22 = vector.broadcast %21 : vector<1x256xf32> to vector<4x256xf32>
    %23 = arith.mulf %18, %22 : vector<4x256xf32>
    %24 = arith.mulf %23, %5 : vector<4x256xf32>
    %cst_14 = arith.constant dense<0.000000e+00> : vector<256xf32>
    %25 = vector.multi_reduction <add>, %24, %cst_14 [0] : vector<4x256xf32> to vector<256xf32>
    %c0_15 = arith.constant 0 : index
    %c0_16 = arith.constant 0 : index
    %26 = vector.load %arg6[%c0_15, %c0_16] : memref<4x256xf32, #tpu.memory_space<vmem>>, vector<1x256xf32>
    %27 = vector.shape_cast %26 : vector<1x256xf32> to vector<256xf32>
    %28 = vector.shape_cast %25 : vector<256xf32> to vector<1x256xf32>
    tpu.vector_store %arg6[%c0_15, %c0_16], %28 {strides = array<i32>} : memref<4x256xf32, #tpu.memory_space<vmem>>, vector<1x256xf32>,
    %c1 = arith.constant 1 : index
    %c0_17 = arith.constant 0 : index
    %c0_18 = arith.constant 0 : index
    %29 = vector.load %arg1[%c1, %c0_17, %c0_18] : memref<4x4x256xf32, #tpu.memory_space<vmem>>, vector<1x4x256xf32>
    %30 = vector.shape_cast %29 : vector<1x4x256xf32> to vector<4x256xf32>
    %cst_19 = arith.constant dense<0.000000e+00> : vector<4x256xf32>
    %31 = tpu.matmul %30, %0, %cst_19 {dimension_numbers = #tpu.dot_dimension_numbers<[1], [0], [0], [1], [0, 0, 1, 1], [], []>} : vector<4x256xf32>, vector<256x256xf32>, vector<4x256xf32> -> vector<4x256xf32>
    %32 = vector.broadcast %1 : vector<1x256xf32> to vector<4x256xf32>
    %33 = arith.addf %31, %32 : vector<4x256xf32>
    %cst_20 = arith.constant 0.000000e+00 : f32
    %34 = vector.broadcast %cst_20 : f32 to vector<4x256xf32>
    %35 = arith.maximumf %33, %34 : vector<4x256xf32>
    %cst_21 = arith.constant dense<0.000000e+00> : vector<4x256xf32>
    %36 = tpu.matmul %35, %2, %cst_21 {dimension_numbers = #tpu.dot_dimension_numbers<[1], [0], [0], [1], [0, 0, 1, 1], [], []>} : vector<4x256xf32>, vector<256x256xf32>, vector<4x256xf32> -> vector<4x256xf32>
    %37 = vector.broadcast %3 : vector<1x256xf32> to vector<4x256xf32>
    %38 = arith.addf %36, %37 : vector<4x256xf32>
    %cst_22 = arith.constant dense<0xFF800000> : vector<256xf32>
    %39 = vector.multi_reduction <maximumf>, %38, %cst_22 [0] : vector<4x256xf32> to vector<256xf32>
    %40 = vector.shape_cast %39 : vector<256xf32> to vector<1x256xf32>
    %41 = vector.broadcast %40 : vector<1x256xf32> to vector<4x256xf32>
    %42 = arith.subf %38, %41 : vector<4x256xf32>
    %43 = math.exp %42 : vector<4x256xf32>
    %cst_23 = arith.constant dense<0.000000e+00> : vector<256xf32>
    %44 = vector.multi_reduction <add>, %43, %cst_23 [0] : vector<4x256xf32> to vector<256xf32>
    %45 = vector.shape_cast %44 : vector<256xf32> to vector<1x256xf32>
    %46 = tpu.reciprocal %45 {approx = true} : vector<1x256xf32> -> vector<1x256xf32>
    %47 = vector.broadcast %46 : vector<1x256xf32> to vector<4x256xf32>
    %48 = arith.mulf %43, %47 : vector<4x256xf32>
    %49 = arith.mulf %48, %30 : vector<4x256xf32>
    %cst_24 = arith.constant dense<0.000000e+00> : vector<256xf32>
    %50 = vector.multi_reduction <add>, %49, %cst_24 [0] : vector<4x256xf32> to vector<256xf32>
    %c1_25 = arith.constant 1 : index
    %c0_26 = arith.constant 0 : index
    %51 = vector.load %arg6[%c1_25, %c0_26] : memref<4x256xf32, #tpu.memory_space<vmem>>, vector<1x256xf32>
    %52 = vector.shape_cast %51 : vector<1x256xf32> to vector<256xf32>
    %53 = vector.shape_cast %50 : vector<256xf32> to vector<1x256xf32>
    tpu.vector_store %arg6[%c1_25, %c0_26], %53 {strides = array<i32>} : memref<4x256xf32, #tpu.memory_space<vmem>>, vector<1x256xf32>,
    %c2 = arith.constant 2 : index
    %c0_27 = arith.constant 0 : index
    %c0_28 = arith.constant 0 : index
    %54 = vector.load %arg1[%c2, %c0_27, %c0_28] : memref<4x4x256xf32, #tpu.memory_space<vmem>>, vector<1x4x256xf32>
    %55 = vector.shape_cast %54 : vector<1x4x256xf32> to vector<4x256xf32>
    %cst_29 = arith.constant dense<0.000000e+00> : vector<4x256xf32>
    %56 = tpu.matmul %55, %0, %cst_29 {dimension_numbers = #tpu.dot_dimension_numbers<[1], [0], [0], [1], [0, 0, 1, 1], [], []>} : vector<4x256xf32>, vector<256x256xf32>, vector<4x256xf32> -> vector<4x256xf32>
    %57 = vector.broadcast %1 : vector<1x256xf32> to vector<4x256xf32>
    %58 = arith.addf %56, %57 : vector<4x256xf32>
    %cst_30 = arith.constant 0.000000e+00 : f32
    %59 = vector.broadcast %cst_30 : f32 to vector<4x256xf32>
    %60 = arith.maximumf %58, %59 : vector<4x256xf32>
    %cst_31 = arith.constant dense<0.000000e+00> : vector<4x256xf32>
    %61 = tpu.matmul %60, %2, %cst_31 {dimension_numbers = #tpu.dot_dimension_numbers<[1], [0], [0], [1], [0, 0, 1, 1], [], []>} : vector<4x256xf32>, vector<256x256xf32>, vector<4x256xf32> -> vector<4x256xf32>
    %62 = vector.broadcast %3 : vector<1x256xf32> to vector<4x256xf32>
    %63 = arith.addf %61, %62 : vector<4x256xf32>
    %cst_32 = arith.constant dense<0xFF800000> : vector<256xf32>
    %64 = vector.multi_reduction <maximumf>, %63, %cst_32 [0] : vector<4x256xf32> to vector<256xf32>
    %65 = vector.shape_cast %64 : vector<256xf32> to vector<1x256xf32>
    %66 = vector.broadcast %65 : vector<1x256xf32> to vector<4x256xf32>
    %67 = arith.subf %63, %66 : vector<4x256xf32>
    %68 = math.exp %67 : vector<4x256xf32>
    %cst_33 = arith.constant dense<0.000000e+00> : vector<256xf32>
    %69 = vector.multi_reduction <add>, %68, %cst_33 [0] : vector<4x256xf32> to vector<256xf32>
    %70 = vector.shape_cast %69 : vector<256xf32> to vector<1x256xf32>
    %71 = tpu.reciprocal %70 {approx = true} : vector<1x256xf32> -> vector<1x256xf32>
    %72 = vector.broadcast %71 : vector<1x256xf32> to vector<4x256xf32>
    %73 = arith.mulf %68, %72 : vector<4x256xf32>
    %74 = arith.mulf %73, %55 : vector<4x256xf32>
    %cst_34 = arith.constant dense<0.000000e+00> : vector<256xf32>
    %75 = vector.multi_reduction <add>, %74, %cst_34 [0] : vector<4x256xf32> to vector<256xf32>
    %c2_35 = arith.constant 2 : index
    %c0_36 = arith.constant 0 : index
    %76 = vector.load %arg6[%c2_35, %c0_36] : memref<4x256xf32, #tpu.memory_space<vmem>>, vector<1x256xf32>
    %77 = vector.shape_cast %76 : vector<1x256xf32> to vector<256xf32>
    %78 = vector.shape_cast %75 : vector<256xf32> to vector<1x256xf32>
    tpu.vector_store %arg6[%c2_35, %c0_36], %78 {strides = array<i32>} : memref<4x256xf32, #tpu.memory_space<vmem>>, vector<1x256xf32>,
    %c3 = arith.constant 3 : index
    %c0_37 = arith.constant 0 : index
    %c0_38 = arith.constant 0 : index
    %79 = vector.load %arg1[%c3, %c0_37, %c0_38] : memref<4x4x256xf32, #tpu.memory_space<vmem>>, vector<1x4x256xf32>
    %80 = vector.shape_cast %79 : vector<1x4x256xf32> to vector<4x256xf32>
    %cst_39 = arith.constant dense<0.000000e+00> : vector<4x256xf32>
    %81 = tpu.matmul %80, %0, %cst_39 {dimension_numbers = #tpu.dot_dimension_numbers<[1], [0], [0], [1], [0, 0, 1, 1], [], []>} : vector<4x256xf32>, vector<256x256xf32>, vector<4x256xf32> -> vector<4x256xf32>
    %82 = vector.broadcast %1 : vector<1x256xf32> to vector<4x256xf32>
    %83 = arith.addf %81, %82 : vector<4x256xf32>
    %cst_40 = arith.constant 0.000000e+00 : f32
    %84 = vector.broadcast %cst_40 : f32 to vector<4x256xf32>
    %85 = arith.maximumf %83, %84 : vector<4x256xf32>
    %cst_41 = arith.constant dense<0.000000e+00> : vector<4x256xf32>
    %86 = tpu.matmul %85, %2, %cst_41 {dimension_numbers = #tpu.dot_dimension_numbers<[1], [0], [0], [1], [0, 0, 1, 1], [], []>} : vector<4x256xf32>, vector<256x256xf32>, vector<4x256xf32> -> vector<4x256xf32>
    %87 = vector.broadcast %3 : vector<1x256xf32> to vector<4x256xf32>
    %88 = arith.addf %86, %87 : vector<4x256xf32>
    %cst_42 = arith.constant dense<0xFF800000> : vector<256xf32>
    %89 = vector.multi_reduction <maximumf>, %88, %cst_42 [0] : vector<4x256xf32> to vector<256xf32>
    %90 = vector.shape_cast %89 : vector<256xf32> to vector<1x256xf32>
    %91 = vector.broadcast %90 : vector<1x256xf32> to vector<4x256xf32>
    %92 = arith.subf %88, %91 : vector<4x256xf32>
    %93 = math.exp %92 : vector<4x256xf32>
    %cst_43 = arith.constant dense<0.000000e+00> : vector<256xf32>
    %94 = vector.multi_reduction <add>, %93, %cst_43 [0] : vector<4x256xf32> to vector<256xf32>
    %95 = vector.shape_cast %94 : vector<256xf32> to vector<1x256xf32>
    %96 = tpu.reciprocal %95 {approx = true} : vector<1x256xf32> -> vector<1x256xf32>
    %97 = vector.broadcast %96 : vector<1x256xf32> to vector<4x256xf32>
    %98 = arith.mulf %93, %97 : vector<4x256xf32>
    %99 = arith.mulf %98, %80 : vector<4x256xf32>
    %cst_44 = arith.constant dense<0.000000e+00> : vector<256xf32>
    %100 = vector.multi_reduction <add>, %99, %cst_44 [0] : vector<4x256xf32> to vector<256xf32>
    %c3_45 = arith.constant 3 : index
    %c0_46 = arith.constant 0 : index
    %101 = vector.load %arg6[%c3_45, %c0_46] : memref<4x256xf32, #tpu.memory_space<vmem>>, vector<1x256xf32>
    %102 = vector.shape_cast %101 : vector<1x256xf32> to vector<256xf32>
    %103 = vector.shape_cast %100 : vector<256xf32> to vector<1x256xf32>
    tpu.vector_store %arg6[%c3_45, %c0_46], %103 {strides = array<i32>} : memref<4x256xf32, #tpu.memory_space<vmem>>, vector<1x256xf32>,
    return
  }
  func.func @transform_0(%arg0: i32) -> (i32, i32, i32) {
    %c0_i32 = arith.constant 0 : i32
    %c0_i32_0 = arith.constant 0 : i32
    %c0_i32_1 = arith.constant 0 : i32
    %c0_i32_2 = arith.constant 0 : i32
    return %c0_i32, %c0_i32_0, %c0_i32_1 : i32, i32, i32
  }
  func.func @transform_1(%arg0: i32) -> (i32, i32) {
    %c0_i32 = arith.constant 0 : i32
    %c0_i32_0 = arith.constant 0 : i32
    %c0_i32_1 = arith.constant 0 : i32
    return %c0_i32, %c0_i32_0 : i32, i32
  }
  func.func @transform_2(%arg0: i32) -> (i32, i32) {
    %c0_i32 = arith.constant 0 : i32
    %c0_i32_0 = arith.constant 0 : i32
    %c0_i32_1 = arith.constant 0 : i32
    return %c0_i32, %c0_i32_0 : i32, i32
  }
  func.func @transform_3(%arg0: i32) -> (i32, i32) {
    %c0_i32 = arith.constant 0 : i32
    %c0_i32_0 = arith.constant 0 : i32
    %c0_i32_1 = arith.constant 0 : i32
    return %c0_i32, %c0_i32_0 : i32, i32
  }
  func.func @transform_4(%arg0: i32) -> (i32, i32) {
    %c0_i32 = arith.constant 0 : i32
    %c0_i32_0 = arith.constant 0 : i32
    %c0_i32_1 = arith.constant 0 : i32
    return %c0_i32, %c0_i32_0 : i32, i32
  }
  func.func @transform_5(%arg0: i32) -> (i32, i32) {
    %c0_i32 = arith.constant 0 : i32
    %c0_i32_0 = arith.constant 0 : i32
    %c0_i32_1 = arith.constant 0 : i32
    return %c0_i32, %c0_i32_0 : i32, i32
  }
}

</mosaic_0001>

<bundles_post_ra>
// kernel: sentence_four_forward.3
= control target key start
LH: loop header
LB: loop body
LE: loop exit
PB: predicated region body
PF: predicated region fallthrough
CT: control target
= control target key end

     0   :  { %10 = vsyncpa [#allocation3], 0  ;;  %s1270_s0 = inlined_call_operand.hbm [shape: f32[4,8,256], index: 0, kind: input, shape index: {}]   ;;  %s1271_s1 = inlined_call_operand.vmem [shape: f32[4,1,256], index: 1, kind: input, shape index: {}]   ;;  %s1272_s2 = inlined_call_operand.hbm [shape: f32[256,256], index: 2, kind: input, shape index: {}]   ;;  %s1273_s3 = inlined_call_operand.hbm [shape: f32[256,256], index: 3, kind: input, shape index: {}]   ;;  %s1274_s4 = inlined_call_operand.vmem [shape: f32[1,256], index: 4, kind: input, shape index: {}]   ;;  %s1275_s5 = inlined_call_operand.vmem [shape: f32[4,8,256], index: 5, kind: output, shape index: {}]  }
   0x1   :  { %12 = vsyncpa [#allocation3 + $0x1], 0 }
   0x2   :  { %13 = vsyncpa [#allocation5], 0  ;;  %s1067_s18 = smov 0   ;;  %s1069_s19 = smov 0  }
   0x3   :  { %s1071_s20 = smov 0   ;;  %s1073_s21 = smov 0  }
   0x4 LB: > { %s1086_s22 = sadd.s32 4294967295, %s1030_s21   ;;  %p39_p0 = scmp.ne.s32.totalorder %s1022_s19, %s1018_s18  ;;  %s1030_s21 = sphi %s1073_s21, %s1290_s21   ;;  %s1026_s20 = sphi %s1071_s20, %s1289_s20   ;;  %s1022_s19 = sphi %s1069_s19, %s1288_s19   ;;  %s1018_s18 = sphi %s1067_s18, %s1287_s18  }
   0x5   : > { %p1276_p1 = scmp.eq.s32.totalorder %s1086_s22, 0  ;;  %p698_p2 = scmp.ge.s32.totalorder %s1030_s21, 1 }
   0x6   : > { %p165_p3 = scmp.lt.s32.totalorder %s1030_s21, 5  ;;  %s1032_s25 = smov [#allocation4]  }
   0x7   : > { %p1094_p4 = por %p1276_p1, %p39_p0  ;;  %s177_s26 = sshll.u32 %s1032_s25, 4  ;;  %s178_s26 = int_to_ptr.vmem [resolvable:$true] %s177_s26 }
   0x8   : > { %p1098_p5 = pnand %p698_p2, %p165_p3  ;;  %s1033_s28 = smov [#allocation6]  }
   0x9   : > { %s1279_s23 = scalar_select %p1094_p4, 1, 0 }
   0xa   : > { %s1280_s24 = scalar_select %p1098_p5, 1, 0 }
   0xb   : > { %p854_p6 = pneg %p1098_p5  ;;  %s190_s29 = sshll.u32 %s1033_s28, 4  ;;  %s1110_s29 = int_to_ptr.vmem [resolvable:$true] %s190_s29 }
   0xc   : > { %s906_s7 = scalar_lea.hbm %s1272_s2, 8192 }
   0xd   : > { %p1106_p7 = pnand %p854_p6, %p1276_p1  ;;  %p907_p8 = scmp.ne.s32.totalorder %s1272_s2, %s906_s7 }
   0xe   : > { %p913_p12 = scmp.lt.u32.totalorder %s906_s7, %s1272_s2 }
   0xf   : > { %p908_p9 = pneg %p1106_p7 }
  0x11   : > { %p909_p10 = pnand %p908_p9, %p907_p8 }
  0x13   : > { %p910_p11 = pneg %p909_p10 }
  0x15   : > { %p915_p13 = pnand %p913_p12, %p910_p11 }
  0x17   : > { %918 = shalt.err (!%p915_p13)
}
  0x18   : > { %s919_s12 = scalar_lea.vmem %s178_s26, 8192  ;;  %p927_p6 = scmp.lt.s32.totalorder %s178_s26, %s178_s26 }
  0x19   : > { %p920_p0 = scmp.ne.s32.totalorder %s178_s26, %s919_s12  ;;  %p928_p1 = scmp.lt.s32.totalorder %s919_s12, %s919_s12 }
  0x1b   : > { %p922_p2 = pnand %p920_p0, %p908_p9  ;;  %p929_p4 = por %p928_p1, %p927_p6 }
  0x1d   : > { %p923_p3 = pneg %p922_p2 }
  0x1f   : > { %p930_p5 = pnand %p929_p4, %p923_p3 }
  0x21   : > { %933 = shalt.err (!%p930_p5)
}
  0x22   : > { %s1034_s13 = smov 256   ;;  %s1035_s14 = smov 16  }
  0x23   : > { %857 = dma.hbm_to_vmem [thread:$0]  (!%p1106_p7), %s1272_s2, 8192, %s178_s26, [#allocation5], %s1034_s13, %s1034_s13, %s1035_s14  }
  0x24   : > { %s934_s25 = scalar_lea.hbm %s1273_s3, 8192 }
  0x25   : > { %p935_p8 = scmp.ne.s32.totalorder %s1273_s3, %s934_s25  ;;  %p941_p5 = scmp.lt.u32.totalorder %s934_s25, %s1273_s3 }
  0x27   : > { %p937_p1 = pnand %p935_p8, %p908_p9 }
  0x29   : > { %p938_p4 = pneg %p937_p1 }
  0x2b   : > { %p943_p10 = pnand %p941_p5, %p938_p4 }
  0x2d   : > { %946 = shalt.err (!%p943_p10)
}
  0x2e   : > { %s947_s26 = scalar_lea.vmem %s1110_s29, 8192  ;;  %p955_p0 = scmp.lt.s32.totalorder %s1110_s29, %s1110_s29 }
  0x2f   : > { %p948_p11 = scmp.ne.s32.totalorder %s1110_s29, %s947_s26  ;;  %p956_p2 = scmp.lt.s32.totalorder %s947_s26, %s947_s26 }
  0x31   : > { %p950_p12 = pnand %p948_p11, %p908_p9  ;;  %p957_p3 = por %p956_p2, %p955_p0 }
  0x33   : > { %p951_p13 = pneg %p950_p12 }
  0x35   : > { %p958_p6 = pnand %p957_p3, %p951_p13 }
  0x37   : > { %961 = shalt.err (!%p958_p6)
}
  0x38   : > { %860 = dma.hbm_to_vmem [thread:$0]  (!%p1106_p7), %s1273_s3, 8192, %s1110_s29, [#allocation5], %s1034_s13, %s1034_s13, %s1035_s14  }
  0x39   : > { %s1160_s10 = sadd.s32 1, %s1030_s21   ;;  %s26_s11 = sadd.s32 1, %s1026_s20 }
  0x3a   : > { %s23_s27 = ssub.s32 %s1030_s21, %s1160_s10  ;;  %p33_p9 = scmp.ne.s32.totalorder %s1026_s20, %s1022_s19 }
  0x3b   : > { %p24_p8 = scmp.eq.s32.totalorder %s23_s27, 0  ;;  %p34_p1 = scmp.eq.s32.totalorder %s1030_s21, 0 }
  0x3c   : > { %p867_p4 = scmp.lt.s32.totalorder %s1030_s21, 4  ;;  %s207_s12 = sand.u32 1, %s1026_s20  }
  0x3d   : > { %s1171_s15 = scalar_select %p24_p8, %s1026_s20, %s26_s11  }
  0x3e   : > { %p35_p5 = por %p34_p1, %p33_p9  ;;  %s702_s16 = sshll.u32 %s207_s12, 4 }
  0x3f   : > { %s714_s17 = sshll.u32 %s1030_s21, 8  ;;  %s211_s29 = scalar_lea.vmem [#allocation2], %s702_s16 }
  0x40   : > { %s1177_s28 = scalar_lea.hbm %s1270_s0, %s714_s17  ;;  %s219_s13 = sshll.u32 %s211_s29, 4  ;;  %s1183_s13 = int_to_ptr.vmem [resolvable:$true] %s219_s13 }
  0x41   : > { %p1179_p7 = pnand %p867_p4, %p35_p5  ;;  %s208_s21 = scalar_lea.sflag [#allocation3], %s207_s12 }
  0x42   : > { %s962_s30 = scalar_lea.hbm %s1177_s28, 256  ;;  %s967_s26 = scalar_lea.hbm %s1270_s0, 1024 }
  0x43   : > { %p963_p10 = scmp.ne.s32.totalorder %s1177_s28, %s962_s30  ;;  %p964_p11 = pneg %p1179_p7 }
  0x44   : > { %p968_p0 = scmp.lt.u32.totalorder %s1177_s28, %s1270_s0  ;;  %p969_p2 = scmp.lt.u32.totalorder %s967_s26, %s962_s30 }
  0x45   : > { %p965_p12 = pnand %p964_p11, %p963_p10  ;;  %p971_p6 = scmp.lt.u32.totalorder %s962_s30, %s1177_s28 }
  0x46   : > { %p970_p3 = por %p969_p2, %p968_p0 }
  0x47   : > { %p966_p13 = pneg %p965_p12 }
  0x48   : > { %p972_p9 = por %p971_p6, %p970_p3 }
  0x4a   : > { %p973_p8 = pnand %p972_p9, %p966_p13 }
  0x4c   : > { %976 = shalt.err (!%p973_p8)
}
  0x4d   : > { %s977_s11 = scalar_lea.vmem %s1183_s13, 256  ;;  %s1036_s27 = smov [#allocation2]  }
  0x4e   : > { %p978_p1 = scmp.ne.s32.totalorder %s1183_s13, %s977_s11  ;;  %s982_s12 = sshll.u32 %s1036_s27, 4  ;;  %s983_s12 = int_to_ptr.vmem [resolvable:$false] %s982_s12 }
  0x4f   : > { %s984_s16 = scalar_lea.vmem %s983_s12, 512  ;;  %p985_p10 = scmp.lt.s32.totalorder %s1183_s13, %s983_s12 }
  0x50   : > { %p980_p4 = pnand %p978_p1, %p964_p11  ;;  %p986_p12 = scmp.lt.s32.totalorder %s984_s16, %s977_s11 }
  0x52   : > { %p981_p5 = pneg %p980_p4  ;;  %p987_p0 = por %p986_p12, %p985_p10 }
  0x54   : > { %p988_p2 = pnand %p987_p0, %p981_p5 }
  0x56   : > { %991 = shalt.err (!%p988_p2)
}
  0x57   : > { %864 = dma.hbm_to_vmem [thread:$0]  (!%p1179_p7), %s1177_s28, 256, %s1183_s13, %s208_s21  }
  0x58   : > { %p1283_p13 = scmp.ne.s32.totalorder %s1280_s24, 0 }
  0x59   : > { %s237_s17 = sand.u32 (!%p1283_p13), 1, %s1022_s19   ;;  %p1284_p11 = scmp.ne.s32.totalorder (!%p1283_p13), %s1279_s23, 0 }
  0x5a   : > { %235 = sbr.rel (%p1283_p13) target bundleno = 390 (0x186), region = 40  ;;  %s1213_s18 = sshll.u32 (!%p1283_p13), %s237_s17, 4 }
  0x5b   : > { %s238_s25 = scalar_lea.sflag (!%p1283_p13), [#allocation3], %s237_s17  ;;  %s241_s29 = scalar_lea.vmem (!%p1283_p13), [#allocation2], %s1213_s18 }
  0x61   : > { %1009 = dma.done.wait (%p1284_p11), %s238_s25, 256  }
  0x62   : > { %1011 = vsyncadd (%p1284_p11), %s238_s25, 4294967040  ;;  %p1285_p3 = scmp.eq.s32.totalorder %s1086_s22, 0 }
  0x64   : > { %1013 = dma.done.wait (%p1285_p3), [#allocation5], 16384   ;;  %p1286_p7 = pmov %p1285_p3 }
  0x65   : > { %v291_v0 = vld [vmem:[#allocation6 + $0x8] sm:$0xff]  ;;  %v293_v1 = vld [vmem:[#allocation6 + $0x18] sm:$0xff]  ;;  %v290_v2 = vld [vmem:[#allocation6] sm:$0xff]  ;;  %p280_p6 = scmp.lt.s32.totalorder %s1086_s22, 3 }
  0x66   : > { %1015 = vsyncadd (%p1286_p7), [#allocation5], 4294950912  ;;  %v716_v3 = vpack.c.bf16 %v293_v1, %v291_v0  ;;  %v292_v4 = vld [vmem:[#allocation6 + $0x10] sm:$0xff]  ;;  %v439_v5 = vld [vmem:[#allocation4 + $0x8] sm:$0xff] }
  0x67   : > { %v441_v6 = vld [vmem:[#allocation4 + $0x18] sm:$0xff]  ;;  %v718_v7 = vpack.c.bf16 %v292_v4, %v290_v2  ;;  %v438_v9 = vld [vmem:[#allocation4] sm:$0xff]  ;;  %v440_v10 = vld [vmem:[#allocation4 + $0x10] sm:$0xff]  ;;  %s1292_s22 = smov (!%p280_p6, %s1086_s22), 3 }
  0x68   : > { %v780_v8 = vpack.c.bf16 %v441_v6, %v439_v5  ;;  %v295_v11 = vld [vmem:[#allocation6 + $0x28] sm:$0xff]  ;;  %717 = vmatprep.subr.bf16.mxu0 %v716_v3  ;;  %v782_v12 = vpack.c.bf16 %v440_v10, %v438_v9  ;;  %v297_v13 = vld [vmem:[#allocation6 + $0x38] sm:$0xff]  ;;  %v294_v14 = vld [vmem:[#allocation6 + $0x20] sm:$0xff]  ;;  %s709_s23 = sshll.u32 %s1292_s22, 1  ;;  %s715_s30 = sshll.u32 %s1292_s22, 4 }
  0x69   : > { %v296_v15 = vld [vmem:[#allocation6 + $0x30] sm:$0xff]  ;;  %719 = vmatpush1.bf16.msra.mxu0 %v718_v7  ;;  %v720_v16 = vpack.c.bf16 %v297_v13, %v295_v11  ;;  %v443_v18 = vld [vmem:[#allocation4 + $0x28] sm:$0xff]  ;;  %v445_v19 = vld [vmem:[#allocation4 + $0x38] sm:$0xff]  ;;  %s283_s13 = scalar_lea.vmem %s1271_s1, %s709_s23  ;;  %s288_s26 = scalar_lea.vmem %s1275_s5, %s715_s30 }
  0x6a   : > { %781 = vmatprep.subr.bf16.mxu1 %v780_v8  ;;  %v722_v17 = vpack.c.bf16 %v296_v15, %v294_v14  ;;  %v442_v20 = vld [vmem:[#allocation4 + $0x20] sm:$0xff]  ;;  %v784_v21 = vpack.c.bf16 %v445_v19, %v443_v18  ;;  %v444_v22 = vld [vmem:[#allocation4 + $0x30] sm:$0xff]  ;;  %v299_v23 = vld [vmem:[#allocation6 + $0x48] sm:$0xff] }
  0x6b   : > { %783 = vmatpush1.bf16.msra.mxu1 %v782_v12  ;;  %v301_v24 = vld [vmem:[#allocation6 + $0x58] sm:$0xff]  ;;  %721 = vmatprep.subr.bf16.mxu0 %v720_v16  ;;  %v786_v25 = vpack.c.bf16 %v444_v22, %v442_v20  ;;  %v298_v27 = vld [vmem:[#allocation6 + $0x40] sm:$0xff]  ;;  %v300_v28 = vld [vmem:[#allocation6 + $0x50] sm:$0xff] }
  0x6c   : > { %v724_v26 = vpack.c.bf16 %v301_v24, %v299_v23  ;;  %v447_v29 = vld [vmem:[#allocation4 + $0x48] sm:$0xff]  ;;  %785 = vmatprep.subr.bf16.mxu1 %v784_v21  ;;  %v449_v30 = vld [vmem:[#allocation4 + $0x58] sm:$0xff]  ;;  %v446_v31 = vld [vmem:[#allocation4 + $0x40] sm:$0xff]  ;;  %v726_v33 = vpack.c.bf16 %v300_v28, %v298_v27 }
  0x6d   : > { %v448_v32 = vld [vmem:[#allocation4 + $0x50] sm:$0xff]  ;;  %723 = vmatpush1.bf16.msra.mxu0 %v722_v17  ;;  %v788_v34 = vpack.c.bf16 %v449_v30, %v447_v29  ;;  %v303_v35 = vld [vmem:[#allocation6 + $0x68] sm:$0xff]  ;;  %v305_v36 = vld [vmem:[#allocation6 + $0x78] sm:$0xff] }
  0x6e   : > { %v302_v37 = vld [vmem:[#allocation6 + $0x60] sm:$0xff]  ;;  %725 = vmatprep.subr.bf16.mxu0 %v724_v26  ;;  %v790_v38 = vpack.c.bf16 %v448_v32, %v446_v31  ;;  %v728_v39 = vpack.c.bf16 %v305_v36, %v303_v35  ;;  %v304_v40 = vld [vmem:[#allocation6 + $0x70] sm:$0xff]  ;;  %v451_v41 = vld [vmem:[#allocation4 + $0x68] sm:$0xff] }
  0x6f   : > { %787 = vmatpush1.bf16.msra.mxu1 %v786_v25  ;;  %v453_v42 = vld [vmem:[#allocation4 + $0x78] sm:$0xff]  ;;  %v450_v44 = vld [vmem:[#allocation4 + $0x60] sm:$0xff]  ;;  %v452_v45 = vld [vmem:[#allocation4 + $0x70] sm:$0xff]  ;;  %v730_v48 = vpack.c.bf16 %v304_v40, %v302_v37 }
  0x70   : > { %789 = vmatprep.subr.bf16.mxu1 %v788_v34  ;;  %v792_v43 = vpack.c.bf16 %v453_v42, %v451_v41  ;;  %v307_v46 = vld [vmem:[#allocation6 + $0x88] sm:$0xff]  ;;  %v309_v47 = vld [vmem:[#allocation6 + $0x98] sm:$0xff]  ;;  %v794_v51 = vpack.c.bf16 %v452_v45, %v450_v44  ;;  %v306_v53 = vld [vmem:[#allocation6 + $0x80] sm:$0xff] }
  0x71   : > { %727 = vmatpush1.bf16.msra.mxu0 %v726_v33  ;;  %v455_v49 = vld [vmem:[#allocation4 + $0x88] sm:$0xff]  ;;  %v457_v50 = vld [vmem:[#allocation4 + $0x98] sm:$0xff]  ;;  %v732_v52 = vpack.c.bf16 %v309_v47, %v307_v46  ;;  %v308_v54 = vld [vmem:[#allocation6 + $0x90] sm:$0xff]  ;;  %v355_v46 = vlaneseq }
  0x72   : > { %729 = vmatprep.subr.bf16.mxu0 %v728_v39  ;;  %v454_v55 = vld [vmem:[#allocation4 + $0x80] sm:$0xff]  ;;  %v796_v56 = vpack.c.bf16 %v457_v50, %v455_v49  ;;  %v456_v57 = vld [vmem:[#allocation4 + $0x90] sm:$0xff]  ;;  %v311_v58 = vld [vmem:[#allocation6 + $0xa8] sm:$0xff]  ;;  %v734_v62 = vpack.c.bf16 %v308_v54, %v306_v53 }
  0x73   : > { %791 = vmatpush1.bf16.msra.mxu1 %v790_v38  ;;  %v313_v59 = vld [vmem:[#allocation6 + $0xb8] sm:$0xff]  ;;  %v459_v60 = vld [vmem:[#allocation4 + $0xa8] sm:$0xff]  ;;  %v798_v63 = vpack.c.bf16 %v456_v57, %v454_v55  ;;  %v310_v1 = vld [vmem:[#allocation6 + $0xa0] sm:$0xff] }
  0x74   : > { %793 = vmatprep.subr.bf16.mxu1 %v792_v43  ;;  %v461_v61 = vld [vmem:[#allocation4 + $0xb8] sm:$0xff]  ;;  %v736_v0 = vpack.c.bf16 %v313_v59, %v311_v58  ;;  %v312_v2 = vld [vmem:[#allocation6 + $0xb0] sm:$0xff]  ;;  %v458_v3 = vld [vmem:[#allocation4 + $0xa0] sm:$0xff]  ;;  %v1230_v59 = vshrl.u32 %v355_v46, 7 }
  0x75   : > { %731 = vmatpush1.bf16.msra.mxu0 %v730_v48  ;;  %v800_v4 = vpack.c.bf16 %v461_v61, %v459_v60  ;;  %v460_v5 = vld [vmem:[#allocation4 + $0xb0] sm:$0xff]  ;;  %v315_v6 = vld [vmem:[#allocation6 + $0xc8] sm:$0xff]  ;;  %v317_v7 = vld [vmem:[#allocation6 + $0xd8] sm:$0xff]  ;;  %v738_v10 = vpack.c.bf16 %v312_v2, %v310_v1 }
  0x76   : > { %733 = vmatprep.subr.bf16.mxu0 %v732_v52  ;;  %v463_v8 = vld [vmem:[#allocation4 + $0xc8] sm:$0xff]  ;;  %v465_v9 = vld [vmem:[#allocation4 + $0xd8] sm:$0xff]  ;;  %v802_v11 = vpack.c.bf16 %v460_v5, %v458_v3  ;;  %v740_v12 = vpack.c.bf16 %v317_v7, %v315_v6  ;;  %v314_v13 = vld [vmem:[#allocation6 + $0xc0] sm:$0xff] }
  0x77   : > { %795 = vmatpush1.bf16.msra.mxu1 %v794_v51  ;;  %v316_v14 = vld [vmem:[#allocation6 + $0xd0] sm:$0xff]  ;;  %v462_v15 = vld [vmem:[#allocation4 + $0xc0] sm:$0xff]  ;;  %v804_v16 = vpack.c.bf16 %v465_v9, %v463_v8  ;;  %v319_v18 = vld [vmem:[#allocation6 + $0xe8] sm:$0xff]  ;;  %v361_v8 = vsub.s32 1, %v1230_v59 }
  0x78   : > { %797 = vmatprep.subr.bf16.mxu1 %v796_v56  ;;  %v464_v17 = vld [vmem:[#allocation4 + $0xd0] sm:$0xff]  ;;  %v321_v19 = vld [vmem:[#allocation6 + $0xf8] sm:$0xff]  ;;  %v467_v20 = vld [vmem:[#allocation4 + $0xe8] sm:$0xff]  ;;  %v742_v22 = vpack.c.bf16 %v316_v14, %v314_v13 }
  0x79   : > { %735 = vmatpush1.bf16.msra.mxu0 %v734_v62  ;;  %v469_v21 = vld [vmem:[#allocation4 + $0xf8] sm:$0xff]  ;;  %v806_v23 = vpack.c.bf16 %v464_v17, %v462_v15  ;;  %v744_v24 = vpack.c.bf16 %v321_v19, %v319_v18  ;;  %v318_v25 = vld [vmem:[#allocation6 + $0xe0] sm:$0xff]  ;;  %v320_v26 = vld [vmem:[#allocation6 + $0xf0] sm:$0xff] }
  0x7a   : > { %737 = vmatprep.subr.bf16.mxu0 %v736_v0  ;;  %v466_v27 = vld [vmem:[#allocation4 + $0xe0] sm:$0xff]  ;;  %v808_v28 = vpack.c.bf16 %v469_v21, %v467_v20  ;;  %v468_v29 = vld [vmem:[#allocation4 + $0xf0] sm:$0xff]  ;;  %v323_v30 = vld [vmem:[#allocation6 + $0x108] sm:$0xff]  ;;  %v746_v34 = vpack.c.bf16 %v320_v26, %v318_v25 }
  0x7b   : > { %799 = vmatpush1.bf16.msra.mxu1 %v798_v63  ;;  %v325_v31 = vld [vmem:[#allocation6 + $0x118] sm:$0xff]  ;;  %v471_v32 = vld [vmem:[#allocation4 + $0x108] sm:$0xff]  ;;  %v810_v35 = vpack.c.bf16 %v468_v29, %v466_v27  ;;  %v322_v37 = vld [vmem:[#allocation6 + $0x100] sm:$0xff] }
  0x7c   : > { %801 = vmatprep.subr.bf16.mxu1 %v800_v4  ;;  %v473_v33 = vld [vmem:[#allocation4 + $0x118] sm:$0xff]  ;;  %v748_v36 = vpack.c.bf16 %v325_v31, %v323_v30  ;;  %v324_v38 = vld [vmem:[#allocation6 + $0x110] sm:$0xff]  ;;  %v470_v39 = vld [vmem:[#allocation4 + $0x100] sm:$0xff] }
  0x7d   : > { %739 = vmatpush1.bf16.msra.mxu0 %v738_v10  ;;  %v812_v40 = vpack.c.bf16 %v473_v33, %v471_v32  ;;  %v472_v41 = vld [vmem:[#allocation4 + $0x110] sm:$0xff]  ;;  %v327_v42 = vld [vmem:[#allocation6 + $0x128] sm:$0xff]  ;;  %v329_v43 = vld [vmem:[#allocation6 + $0x138] sm:$0xff]  ;;  %v750_v47 = vpack.c.bf16 %v324_v38, %v322_v37 }
  0x7e   : > { %741 = vmatprep.subr.bf16.mxu0 %v740_v12  ;;  %v475_v44 = vld [vmem:[#allocation4 + $0x128] sm:$0xff]  ;;  %v477_v45 = vld [vmem:[#allocation4 + $0x138] sm:$0xff]  ;;  %v814_v48 = vpack.c.bf16 %v472_v41, %v470_v39  ;;  %v752_v49 = vpack.c.bf16 %v329_v43, %v327_v42  ;;  %v326_v50 = vld [vmem:[#allocation6 + $0x120] sm:$0xff] }
  0x7f   : > { %803 = vmatpush1.bf16.msra.mxu1 %v802_v11  ;;  %v328_v51 = vld [vmem:[#allocation6 + $0x130] sm:$0xff]  ;;  %v474_v52 = vld [vmem:[#allocation4 + $0x120] sm:$0xff]  ;;  %v816_v53 = vpack.c.bf16 %v477_v45, %v475_v44  ;;  %v331_v55 = vld [vmem:[#allocation6 + $0x148] sm:$0xff] }
  0x80   : > { %805 = vmatprep.subr.bf16.mxu1 %v804_v16  ;;  %v476_v54 = vld [vmem:[#allocation4 + $0x130] sm:$0xff]  ;;  %v333_v56 = vld [vmem:[#allocation6 + $0x158] sm:$0xff]  ;;  %v479_v57 = vld [vmem:[#allocation4 + $0x148] sm:$0xff]  ;;  %v754_v60 = vpack.c.bf16 %v328_v51, %v326_v50 }
  0x81   : > { %743 = vmatpush1.bf16.msra.mxu0 %v742_v22  ;;  %v481_v58 = vld [vmem:[#allocation4 + $0x158] sm:$0xff]  ;;  %v818_v61 = vpack.c.bf16 %v476_v54, %v474_v52  ;;  %v756_v62 = vpack.c.bf16 %v333_v56, %v331_v55  ;;  %v330_v63 = vld [vmem:[#allocation6 + $0x140] sm:$0xff]  ;;  %v332_v0 = vld [vmem:[#allocation6 + $0x150] sm:$0xff] }
  0x82   : > { %745 = vmatprep.subr.bf16.mxu0 %v744_v24  ;;  %v478_v1 = vld [vmem:[#allocation4 + $0x140] sm:$0xff]  ;;  %v820_v2 = vpack.c.bf16 %v481_v58, %v479_v57  ;;  %v480_v3 = vld [vmem:[#allocation4 + $0x150] sm:$0xff]  ;;  %v335_v4 = vld [vmem:[#allocation6 + $0x168] sm:$0xff]  ;;  %v758_v9 = vpack.c.bf16 %v332_v0, %v330_v63 }
  0x83   : > { %807 = vmatpush1.bf16.msra.mxu1 %v806_v23  ;;  %v337_v5 = vld [vmem:[#allocation6 + $0x178] sm:$0xff]  ;;  %v483_v6 = vld [vmem:[#allocation4 + $0x168] sm:$0xff]  ;;  %v334_v10 = vld [vmem:[#allocation6 + $0x160] sm:$0xff]  ;;  %v822_v11 = vpack.c.bf16 %v480_v3, %v478_v1 }
  0x84   : > { %809 = vmatprep.subr.bf16.mxu1 %v808_v28  ;;  %v485_v7 = vld [vmem:[#allocation4 + $0x178] sm:$0xff]  ;;  %v760_v12 = vpack.c.bf16 %v337_v5, %v335_v4  ;;  %v336_v13 = vld [vmem:[#allocation6 + $0x170] sm:$0xff]  ;;  %v482_v14 = vld [vmem:[#allocation4 + $0x160] sm:$0xff]  ;;  %v357_v5 = vsub.s32 0, %v1230_v59 }
  0x85   : > { %747 = vmatpush1.bf16.msra.mxu0 %v746_v34  ;;  %v484_v15 = vld [vmem:[#allocation4 + $0x170] sm:$0xff]  ;;  %v824_v16 = vpack.c.bf16 %v485_v7, %v483_v6  ;;  %v339_v17 = vld [vmem:[#allocation6 + $0x188] sm:$0xff]  ;;  %v341_v18 = vld [vmem:[#allocation6 + $0x198] sm:$0xff]  ;;  %v762_v24 = vpack.c.bf16 %v336_v13, %v334_v10 }
  0x86   : > { %749 = vmatprep.subr.bf16.mxu0 %v748_v36  ;;  %v1237_v19 = vld [vmem:[%s283_s13] sm:$0x3]  ;;  %v487_v20 = vld [vmem:[#allocation4 + $0x188] sm:$0xff]  ;;  %v489_v21 = vld [vmem:[#allocation4 + $0x198] sm:$0xff]  ;;  %v826_v25 = vpack.c.bf16 %v484_v15, %v482_v14  ;;  %v764_v26 = vpack.c.bf16 %v341_v18, %v339_v17 }
  0x87   : > { %811 = vmatpush1.bf16.msra.mxu1 %v810_v35  ;;  %v362_v22 = vrot.slane %v1237_v19, %v361_v8  ;;  %v437_v23 = vld [vmem:[%s241_s29 + $0x8] sm:$0xff]  ;;  %v338_v27 = vld [vmem:[#allocation6 + $0x180] sm:$0xff]  ;;  %v340_v28 = vld [vmem:[#allocation6 + $0x190] sm:$0xff]  ;;  %v828_v30 = vpack.c.bf16 %v489_v21, %v487_v20 }
  0x88   : > { %813 = vmatprep.subr.bf16.mxu1 %v812_v40  ;;  %574 = vmatprep.mubr.f32.mxu1 %v437_v23  ;;  %v486_v29 = vld [vmem:[#allocation4 + $0x180] sm:$0xff]  ;;  %v488_v31 = vld [vmem:[#allocation4 + $0x190] sm:$0xff]  ;;  %v343_v32 = vld [vmem:[#allocation6 + $0x1a8] sm:$0xff]  ;;  %v766_v36 = vpack.c.bf16 %v340_v28, %v338_v27 }
  0x89   : > { %751 = vmatpush1.bf16.msra.mxu0 %v750_v47  ;;  %v345_v33 = vld [vmem:[#allocation6 + $0x1b8] sm:$0xff]  ;;  %429 = vmatprep.mubr.f32.mxu0 %v362_v22  ;;  %v491_v34 = vld [vmem:[#allocation4 + $0x1a8] sm:$0xff]  ;;  %v830_v37 = vpack.c.bf16 %v488_v31, %v486_v29  ;;  %v342_v39 = vld [vmem:[#allocation6 + $0x1a0] sm:$0xff] }
  0x8a   : > { %753 = vmatprep.subr.bf16.mxu0 %v752_v49  ;;  %v493_v35 = vld [vmem:[#allocation4 + $0x1b8] sm:$0xff]  ;;  %v768_v38 = vpack.c.bf16 %v345_v33, %v343_v32  ;;  %v344_v40 = vld [vmem:[#allocation6 + $0x1b0] sm:$0xff]  ;;  %v490_v41 = vld [vmem:[#allocation4 + $0x1a0] sm:$0xff] }
  0x8b   : > { %815 = vmatpush1.bf16.msra.mxu1 %v814_v48  ;;  %v832_v42 = vpack.c.bf16 %v493_v35, %v491_v34  ;;  %v492_v43 = vld [vmem:[#allocation4 + $0x1b0] sm:$0xff]  ;;  %v347_v44 = vld [vmem:[#allocation6 + $0x1c8] sm:$0xff]  ;;  %v349_v45 = vld [vmem:[#allocation6 + $0x1d8] sm:$0xff]  ;;  %v770_v48 = vpack.c.bf16 %v344_v40, %v342_v39 }
  0x8c   : > { %817 = vmatprep.subr.bf16.mxu1 %v816_v53  ;;  %v495_v46 = vld [vmem:[#allocation4 + $0x1c8] sm:$0xff]  ;;  %v497_v47 = vld [vmem:[#allocation4 + $0x1d8] sm:$0xff]  ;;  %v834_v49 = vpack.c.bf16 %v492_v43, %v490_v41  ;;  %v772_v50 = vpack.c.bf16 %v349_v45, %v347_v44  ;;  %v346_v51 = vld [vmem:[#allocation6 + $0x1c0] sm:$0xff] }
  0x8d   : > { %755 = vmatpush1.bf16.msra.mxu0 %v754_v60  ;;  %v348_v52 = vld [vmem:[#allocation6 + $0x1d0] sm:$0xff]  ;;  %v494_v53 = vld [vmem:[#allocation4 + $0x1c0] sm:$0xff]  ;;  %v836_v54 = vpack.c.bf16 %v497_v47, %v495_v46  ;;  %v351_v56 = vld [vmem:[#allocation6 + $0x1e8] sm:$0xff] }
  0x8e   : > { %757 = vmatprep.subr.bf16.mxu0 %v756_v62  ;;  %v496_v55 = vld [vmem:[#allocation4 + $0x1d0] sm:$0xff]  ;;  %v353_v57 = vld [vmem:[#allocation6 + $0x1f8] sm:$0xff]  ;;  %v499_v58 = vld [vmem:[#allocation4 + $0x1e8] sm:$0xff] }
  0x8f   : > { %819 = vmatpush1.bf16.msra.mxu1 %v818_v61  ;;  %v501_v60 = vld [vmem:[#allocation4 + $0x1f8] sm:$0xff]  ;;  %v774_v61 = vpack.c.bf16 %v348_v52, %v346_v51  ;;  %v838_v62 = vpack.c.bf16 %v496_v55, %v494_v53  ;;  %v776_v63 = vpack.c.bf16 %v353_v57, %v351_v56  ;;  %v350_v0 = vld [vmem:[#allocation6 + $0x1e0] sm:$0xff]  ;;  %v352_v1 = vld [vmem:[#allocation6 + $0x1f0] sm:$0xff] }
  0x90   : > { %821 = vmatprep.subr.bf16.mxu1 %v820_v2  ;;  %v840_v2 = vpack.c.bf16 %v501_v60, %v499_v58  ;;  %v498_v3 = vld [vmem:[#allocation4 + $0x1e0] sm:$0xff]  ;;  %v500_v4 = vld [vmem:[#allocation4 + $0x1f0] sm:$0xff]  ;;  %v778_v6 = vpack.c.bf16 %v352_v1, %v350_v0 }
  0x91   : > { %759 = vmatpush1.bf16.msra.mxu0 %v758_v9  ;;  %v842_v7 = vpack.c.bf16 %v500_v4, %v498_v3  ;;  %v358_v9 = vrot.slane %v1237_v19, %v357_v5  ;;  %v436_v10 = vld [vmem:[%s241_s29] sm:$0xff] }
  0x92   : > { %761 = vmatprep.subr.bf16.mxu0 %v760_v12 }
  0x93   : > { %823 = vmatpush1.bf16.msra.mxu1 %v822_v11  ;;  %v581_v11 = vld [vmem:[%s1274_s4] sm:$0x3] }
  0x94   : > { %825 = vmatprep.subr.bf16.mxu1 %v824_v16  ;;  %v586_v16 = vrot.slane %v581_v11, %v357_v5  ;;  %v590_v17 = vrot.slane %v581_v11, %v361_v8 }
  0x95   : > { %763 = vmatpush1.bf16.msra.mxu0 %v762_v24 }
  0x96   : > { %765 = vmatprep.subr.bf16.mxu0 %v764_v26 }
  0x97   : > { %827 = vmatpush1.bf16.msra.mxu1 %v826_v25 }
  0x98   : > { %829 = vmatprep.subr.bf16.mxu1 %v828_v30 }
  0x99   : > { %767 = vmatpush1.bf16.msra.mxu0 %v766_v36 }
  0x9a   : > { %769 = vmatprep.subr.bf16.mxu0 %v768_v38 }
  0x9b   : > { %831 = vmatpush1.bf16.msra.mxu1 %v830_v37 }
  0x9c   : > { %833 = vmatprep.subr.bf16.mxu1 %v832_v42 }
  0x9d   : > { %771 = vmatpush1.bf16.msra.mxu0 %v770_v48 }
  0x9e   : > { %773 = vmatprep.subr.bf16.mxu0 %v772_v50 }
  0x9f   : > { %835 = vmatpush1.bf16.msra.mxu1 %v834_v49 }
  0xa0   : > { %837 = vmatprep.subr.bf16.mxu1 %v836_v54 }
  0xa1   : > { %775 = vmatpush1.bf16.msra.mxu0 %v774_v61 }
  0xa2   : > { %777 = vmatprep.subr.bf16.mxu0 %v776_v63 }
  0xa3   : > { %839 = vmatpush1.bf16.msra.mxu1 %v838_v62 }
  0xa4   : > { %841 = vmatprep.subr.bf16.mxu1 %v840_v2 }
  0xa5   : > { %779 = vmatpush1.bf16.msra.mxu0 %v778_v6 }
  0xa7   : > { %843 = vmatpush1.bf16.msra.mxu1 %v842_v7 }
  0xa8   : > { %430 = vmatmul.mubr.f32.vlgmr.msra.gmra.mrb[0].mxu0 %v358_v9 }
  0xaa   : > { %575 = vmatmul.mubr.f32.vlgmr.msra.gmra.mrb[0].mxu1 %v436_v10 }
 0x17b   : > { %v431_v12 = vpop.f32.mrb[0].mxu0 }
 0x17c   : > { %v505_v13 = vrot.slane %v431_v12, %v357_v5  ;;  %v433_v14 = vpop.f32.mrb[1].mxu0 }
 0x17d   : > { %v576_v15 = vpop.f32.mrb[0].mxu1  ;;  %v509_v18 = vrot.slane %v433_v14, %v357_v5 }
 0x17e   : > { %v578_v19 = vpop.f32.mrb[1].mxu1  ;;  %v577_v20 = vadd.f32 %v576_v15, %v505_v13 }
 0x17f   : > { %v579_v21 = vadd.f32 %v578_v19, %v509_v18 }
 0x180   : > { %v593_v22 = vadd.f32 %v586_v16, %v577_v20 }
 0x181   : > { %v594_v23 = vadd.f32 %v590_v17, %v579_v21 }
 0x182   : > { %v595_v24 = vmax.f32 %v593_v22, 0.0 }
 0x183   : > { %v596_v25 = vmax.f32 %v594_v23, 0.0 }
 0x184   : > { %597 = vst [vmem:[%s288_s26] sm:$0xff] %v595_v24 }
 0x185   : > { %598 = vst [vmem:[%s288_s26 + $0x8] sm:$0xff] %v596_v25 }
 0x186 PF: > { %p16_p9 = scmp.ge.s32.totalorder %s1160_s10, 6   ;;  %s1287_s18 = smov %s1022_s19 }
 0x187   : > { %s1288_s19 = smov %s1026_s20  ;;  %s1289_s20 = smov %s1171_s15 }
 0x188   : > { %s1290_s21 = smov %s1160_s10  ;;  %18 = sbr.rel (!%p16_p9) target bundleno = 4 (0x4), region = 91 }
 0x18f   :  { %620 = vsyncpa [#allocation3], 1 }
 0x190   :  { %622 = vsyncpa [#allocation3 + $0x1], 1 }
 0x191   :  { %623 = vsyncpa [#allocation5], 1 }

// kernel: sentence_four_forward.5
= control target key start
LH: loop header
LB: loop body
LE: loop exit
PB: predicated region body
PF: predicated region fallthrough
CT: control target
= control target key end

     0   :  { %s2614_s0 = inlined_call_operand.vmem [shape: f32[4,4,256], index: 0, kind: input, shape index: {}]   ;;  %s2615_s1 = inlined_call_operand.vmem [shape: f32[256,256], index: 1, kind: input, shape index: {}]   ;;  %s2616_s2 = inlined_call_operand.vmem [shape: f32[1,256], index: 2, kind: input, shape index: {}, may-alias: {2,4}]   ;;  %s2617_s3 = inlined_call_operand.vmem [shape: f32[256,256], index: 3, kind: input, shape index: {}]   ;;  %s2618_s4 = inlined_call_operand.vmem [shape: f32[1,256], index: 4, kind: input, shape index: {}, may-alias: {2,4}]   ;;  %s2619_s5 = inlined_call_operand.hbm [shape: f32[4,256], index: 5, kind: output, shape index: {}]  }
   0x1   :  { %v22_v0 = vld [vmem:[%s2615_s1 + $0x8] sm:$0xff]  ;;  %v24_v1 = vld [vmem:[%s2615_s1 + $0x18] sm:$0xff]  ;;  %v21_v2 = vld [vmem:[%s2615_s1] sm:$0xff] }
   0x2   :  { %v1700_v3 = vpack.c.bf16 %v24_v1, %v22_v0  ;;  %v23_v4 = vld [vmem:[%s2615_s1 + $0x10] sm:$0xff]  ;;  %v26_v5 = vld [vmem:[%s2615_s1 + $0x28] sm:$0xff]  ;;  %v28_v6 = vld [vmem:[%s2615_s1 + $0x38] sm:$0xff] }
   0x3   :  { %v1711_v7 = vpack.c.bf16 %v23_v4, %v21_v2  ;;  %v1713_v8 = vpack.c.bf16 %v28_v6, %v26_v5  ;;  %v25_v9 = vld [vmem:[%s2615_s1 + $0x20] sm:$0xff]  ;;  %v27_v10 = vld [vmem:[%s2615_s1 + $0x30] sm:$0xff]  ;;  %v30_v11 = vld [vmem:[%s2615_s1 + $0x48] sm:$0xff] }
   0x4   :  { %1086 = vmatprep.subr.bf16.mxu0 %v1700_v3  ;;  %v32_v12 = vld [vmem:[%s2615_s1 + $0x58] sm:$0xff]  ;;  %v1729_v13 = vpack.c.bf16 %v27_v10, %v25_v9  ;;  %v29_v15 = vld [vmem:[%s2615_s1 + $0x40] sm:$0xff]  ;;  %v31_v16 = vld [vmem:[%s2615_s1 + $0x50] sm:$0xff] }
   0x5   :  { %1088 = vmatpush1.bf16.msra.mxu0 %v1711_v7  ;;  %v1732_v14 = vpack.c.bf16 %v32_v12, %v30_v11  ;;  %v34_v17 = vld [vmem:[%s2615_s1 + $0x68] sm:$0xff]  ;;  %v36_v18 = vld [vmem:[%s2615_s1 + $0x78] sm:$0xff]  ;;  %v1747_v19 = vpack.c.bf16 %v31_v16, %v29_v15  ;;  %v33_v21 = vld [vmem:[%s2615_s1 + $0x60] sm:$0xff] }
   0x6   :  { %1090 = vmatprep.subr.bf16.mxu0 %v1713_v8  ;;  %v1750_v20 = vpack.c.bf16 %v36_v18, %v34_v17  ;;  %v35_v22 = vld [vmem:[%s2615_s1 + $0x70] sm:$0xff]  ;;  %v38_v23 = vld [vmem:[%s2615_s1 + $0x88] sm:$0xff]  ;;  %v40_v24 = vld [vmem:[%s2615_s1 + $0x98] sm:$0xff] }
   0x7   :  { %v1765_v25 = vpack.c.bf16 %v35_v22, %v33_v21  ;;  %v1768_v26 = vpack.c.bf16 %v40_v24, %v38_v23  ;;  %v37_v27 = vld [vmem:[%s2615_s1 + $0x80] sm:$0xff]  ;;  %v39_v28 = vld [vmem:[%s2615_s1 + $0x90] sm:$0xff]  ;;  %v42_v29 = vld [vmem:[%s2615_s1 + $0xa8] sm:$0xff] }
   0x8   :  { %v44_v30 = vld [vmem:[%s2615_s1 + $0xb8] sm:$0xff]  ;;  %v1783_v31 = vpack.c.bf16 %v39_v28, %v37_v27  ;;  %v41_v33 = vld [vmem:[%s2615_s1 + $0xa0] sm:$0xff]  ;;  %v43_v34 = vld [vmem:[%s2615_s1 + $0xb0] sm:$0xff] }
   0x9   :  { %1092 = vmatpush1.bf16.msra.mxu0 %v1729_v13  ;;  %v1786_v32 = vpack.c.bf16 %v44_v30, %v42_v29  ;;  %v46_v35 = vld [vmem:[%s2615_s1 + $0xc8] sm:$0xff]  ;;  %v48_v36 = vld [vmem:[%s2615_s1 + $0xd8] sm:$0xff]  ;;  %v1801_v37 = vpack.c.bf16 %v43_v34, %v41_v33  ;;  %v45_v39 = vld [vmem:[%s2615_s1 + $0xc0] sm:$0xff] }
   0xa   :  { %1094 = vmatprep.subr.bf16.mxu0 %v1732_v14  ;;  %v1804_v38 = vpack.c.bf16 %v48_v36, %v46_v35  ;;  %v47_v40 = vld [vmem:[%s2615_s1 + $0xd0] sm:$0xff]  ;;  %v1815_v41 = vld [vmem:[%s2614_s0] sm:$0xff]  ;;  %v50_v42 = vld [vmem:[%s2615_s1 + $0xe8] sm:$0xff] }
   0xb   :  { %2635 = vst [vmem:[#allocation5_spill] sm:$0xff] %v1815_v41  ;;  %v52_v43 = vld [vmem:[%s2615_s1 + $0xf8] sm:$0xff]  ;;  %v1825_v44 = vcombine.high %v1815_v41, %v1815_v41 }
   0xd   :  { %1096 = vmatpush1.bf16.msra.mxu0 %v1747_v19  ;;  %2636 = vst [vmem:[#allocation6_spill] sm:$0xff] %v1825_v44 }
   0xe   :  { %1098 = vmatprep.subr.bf16.mxu0 %v1750_v20 }
  0x11   :  { %1100 = vmatpush1.bf16.msra.mxu0 %v1765_v25 }
  0x12   :  { %1102 = vmatprep.subr.bf16.mxu0 %v1768_v26 }
  0x15   :  { %1104 = vmatpush1.bf16.msra.mxu0 %v1783_v31 }
  0x16   :  { %1106 = vmatprep.subr.bf16.mxu0 %v1786_v32 }
  0x17   :  { %10 = vsyncpa [#allocation3], 0  ;;  %v1828_v45 = vpack.c.bf16 %v47_v40, %v45_v39  ;;  %230 = vmatprep.mubr.f32.mxu0 %v1825_v44  ;;  %v1832_v46 = vpack.c.bf16 %v52_v43, %v50_v42  ;;  %v49_v47 = vld [vmem:[%s2615_s1 + $0xe0] sm:$0xff]  ;;  %v51_v48 = vld [vmem:[%s2615_s1 + $0xf0] sm:$0xff]  ;;  %vm321_vm0 = vcmask 1043456  }
  0x18   :  { %v54_v49 = vld [vmem:[%s2615_s1 + $0x108] sm:$0xff]  ;;  %v56_v50 = vld [vmem:[%s2615_s1 + $0x118] sm:$0xff]  ;;  %v1847_v51 = vpack.c.bf16 %v51_v48, %v49_v47  ;;  %v53_v53 = vld [vmem:[%s2615_s1 + $0x100] sm:$0xff] }
  0x19   :  { %1108 = vmatpush1.bf16.msra.mxu0 %v1801_v37  ;;  %v1850_v52 = vpack.c.bf16 %v56_v50, %v54_v49  ;;  %v55_v54 = vld [vmem:[%s2615_s1 + $0x110] sm:$0xff]  ;;  %v58_v55 = vld [vmem:[%s2615_s1 + $0x128] sm:$0xff]  ;;  %v60_v56 = vld [vmem:[%s2615_s1 + $0x138] sm:$0xff] }
  0x1a   :  { %1110 = vmatprep.subr.bf16.mxu0 %v1804_v38  ;;  %v1865_v57 = vpack.c.bf16 %v55_v54, %v53_v53  ;;  %v1868_v58 = vpack.c.bf16 %v60_v56, %v58_v55  ;;  %v57_v59 = vld [vmem:[%s2615_s1 + $0x120] sm:$0xff]  ;;  %v59_v60 = vld [vmem:[%s2615_s1 + $0x130] sm:$0xff]  ;;  %v62_v61 = vld [vmem:[%s2615_s1 + $0x148] sm:$0xff] }
  0x1b   :  { %v64_v62 = vld [vmem:[%s2615_s1 + $0x158] sm:$0xff]  ;;  %v1883_v63 = vpack.c.bf16 %v59_v60, %v57_v59  ;;  %v61_v1 = vld [vmem:[%s2615_s1 + $0x140] sm:$0xff]  ;;  %v63_v2 = vld [vmem:[%s2615_s1 + $0x150] sm:$0xff] }
  0x1c   :  { %v1886_v0 = vpack.c.bf16 %v64_v62, %v62_v61  ;;  %v66_v4 = vld [vmem:[%s2615_s1 + $0x168] sm:$0xff]  ;;  %v68_v5 = vld [vmem:[%s2615_s1 + $0x178] sm:$0xff]  ;;  %v1901_v6 = vpack.c.bf16 %v63_v2, %v61_v1  ;;  %v65_v10 = vld [vmem:[%s2615_s1 + $0x160] sm:$0xff] }
  0x1d   :  { %1112 = vmatpush1.bf16.msra.mxu0 %v1828_v45  ;;  %v1904_v9 = vpack.c.bf16 %v68_v5, %v66_v4  ;;  %v67_v11 = vld [vmem:[%s2615_s1 + $0x170] sm:$0xff]  ;;  %v70_v12 = vld [vmem:[%s2615_s1 + $0x188] sm:$0xff]  ;;  %v72_v15 = vld [vmem:[%s2615_s1 + $0x198] sm:$0xff] }
  0x1e   :  { %1114 = vmatprep.subr.bf16.mxu0 %v1832_v46  ;;  %v1919_v16 = vpack.c.bf16 %v67_v11, %v65_v10  ;;  %v1922_v17 = vpack.c.bf16 %v72_v15, %v70_v12  ;;  %v69_v18 = vld [vmem:[%s2615_s1 + $0x180] sm:$0xff]  ;;  %v71_v21 = vld [vmem:[%s2615_s1 + $0x190] sm:$0xff]  ;;  %v74_v22 = vld [vmem:[%s2615_s1 + $0x1a8] sm:$0xff] }
  0x1f   :  { %v76_v23 = vld [vmem:[%s2615_s1 + $0x1b8] sm:$0xff]  ;;  %v1937_v24 = vpack.c.bf16 %v71_v21, %v69_v18  ;;  %v73_v28 = vld [vmem:[%s2615_s1 + $0x1a0] sm:$0xff]  ;;  %v75_v29 = vld [vmem:[%s2615_s1 + $0x1b0] sm:$0xff] }
  0x20   :  { %v1940_v27 = vpack.c.bf16 %v76_v23, %v74_v22  ;;  %v78_v30 = vld [vmem:[%s2615_s1 + $0x1c8] sm:$0xff]  ;;  %v80_v33 = vld [vmem:[%s2615_s1 + $0x1d8] sm:$0xff]  ;;  %v1955_v34 = vpack.c.bf16 %v75_v29, %v73_v28  ;;  %v77_v36 = vld [vmem:[%s2615_s1 + $0x1c0] sm:$0xff] }
  0x21   :  { %1116 = vmatpush1.bf16.msra.mxu0 %v1847_v51  ;;  %v1958_v35 = vpack.c.bf16 %v80_v33, %v78_v30  ;;  %v79_v39 = vld [vmem:[%s2615_s1 + $0x1d0] sm:$0xff]  ;;  %v82_v40 = vld [vmem:[%s2615_s1 + $0x1e8] sm:$0xff]  ;;  %v84_v42 = vld [vmem:[%s2615_s1 + $0x1f8] sm:$0xff] }
  0x22   :  { %1118 = vmatprep.subr.bf16.mxu0 %v1850_v52  ;;  %v1973_v43 = vpack.c.bf16 %v79_v39, %v77_v36  ;;  %v1976_v47 = vpack.c.bf16 %v84_v42, %v82_v40  ;;  %v81_v48 = vld [vmem:[%s2615_s1 + $0x1e0] sm:$0xff]  ;;  %v83_v49 = vld [vmem:[%s2615_s1 + $0x1f0] sm:$0xff]  ;;  %v1991_v53 = vld [vmem:[%s2614_s0 + $0x8] sm:$0xff] }
  0x23   :  { %v1985_v50 = vpack.c.bf16 %v83_v49, %v81_v48  ;;  %2637 = vst [vmem:[#allocation7_spill] sm:$0xff] %v1991_v53  ;;  %v1996_v54 = vcombine.high %v1991_v53, %v1991_v53  ;;  %v87_v55 = vld [vmem:[%s2617_s3 + $0x8] sm:$0xff]  ;;  %v89_v56 = vld [vmem:[%s2617_s3 + $0x18] sm:$0xff]  ;;  %v86_v60 = vld [vmem:[%s2617_s3] sm:$0xff] }
  0x24   :  { %v2019_v59 = vpack.c.bf16 %v89_v56, %v87_v55  ;;  %v88_v61 = vld [vmem:[%s2617_s3 + $0x10] sm:$0xff]  ;;  %v91_v1 = vld [vmem:[%s2617_s3 + $0x28] sm:$0xff]  ;;  %v93_v2 = vld [vmem:[%s2617_s3 + $0x38] sm:$0xff] }
  0x25   :  { %1120 = vmatpush1.bf16.msra.mxu0 %v1865_v57  ;;  %2638 = vst [vmem:[#allocation8_spill] sm:$0xff] %v1996_v54  ;;  %v2028_v62 = vpack.c.bf16 %v88_v61, %v86_v60  ;;  %v2039_v4 = vpack.c.bf16 %v93_v2, %v91_v1  ;;  %v90_v5 = vld [vmem:[%s2617_s3 + $0x20] sm:$0xff]  ;;  %v92_v10 = vld [vmem:[%s2617_s3 + $0x30] sm:$0xff]  ;;  %v95_v12 = vld [vmem:[%s2617_s3 + $0x48] sm:$0xff] }
  0x26   :  { %1122 = vmatprep.subr.bf16.mxu0 %v1868_v58  ;;  %1150 = vmatprep.subr.bf16.mxu1 %v2019_v59  ;;  %v2048_v11 = vpack.c.bf16 %v92_v10, %v90_v5  ;;  %v97_v15 = vld [vmem:[%s2617_s3 + $0x58] sm:$0xff]  ;;  %v94_v21 = vld [vmem:[%s2617_s3 + $0x40] sm:$0xff]  ;;  %v96_v22 = vld [vmem:[%s2617_s3 + $0x50] sm:$0xff] }
  0x27   :  { %1152 = vmatpush1.bf16.msra.mxu1 %v2028_v62  ;;  %v2059_v18 = vpack.c.bf16 %v97_v15, %v95_v12  ;;  %v2068_v23 = vpack.c.bf16 %v96_v22, %v94_v21  ;;  %v99_v28 = vld [vmem:[%s2617_s3 + $0x68] sm:$0xff]  ;;  %v101_v29 = vld [vmem:[%s2617_s3 + $0x78] sm:$0xff]  ;;  %v98_v33 = vld [vmem:[%s2617_s3 + $0x60] sm:$0xff] }
  0x28   :  { %1154 = vmatprep.subr.bf16.mxu1 %v2039_v4  ;;  %v2079_v30 = vpack.c.bf16 %v101_v29, %v99_v28  ;;  %v100_v36 = vld [vmem:[%s2617_s3 + $0x70] sm:$0xff]  ;;  %v103_v40 = vld [vmem:[%s2617_s3 + $0x88] sm:$0xff]  ;;  %v105_v42 = vld [vmem:[%s2617_s3 + $0x98] sm:$0xff] }
  0x29   :  { %1124 = vmatpush1.bf16.msra.mxu0 %v1883_v63  ;;  %v2088_v39 = vpack.c.bf16 %v100_v36, %v98_v33  ;;  %v2099_v48 = vpack.c.bf16 %v105_v42, %v103_v40  ;;  %v102_v49 = vld [vmem:[%s2617_s3 + $0x80] sm:$0xff]  ;;  %v104_v55 = vld [vmem:[%s2617_s3 + $0x90] sm:$0xff]  ;;  %v107_v60 = vld [vmem:[%s2617_s3 + $0xa8] sm:$0xff] }
  0x2a   :  { %1126 = vmatprep.subr.bf16.mxu0 %v1886_v0  ;;  %v2108_v56 = vpack.c.bf16 %v104_v55, %v102_v49  ;;  %v109_v61 = vld [vmem:[%s2617_s3 + $0xb8] sm:$0xff]  ;;  %v106_v2 = vld [vmem:[%s2617_s3 + $0xa0] sm:$0xff]  ;;  %v108_v5 = vld [vmem:[%s2617_s3 + $0xb0] sm:$0xff] }
  0x2b   :  { %1156 = vmatpush1.bf16.msra.mxu1 %v2048_v11  ;;  %v2119_v1 = vpack.c.bf16 %v109_v61, %v107_v60  ;;  %v2128_v10 = vpack.c.bf16 %v108_v5, %v106_v2  ;;  %v111_v12 = vld [vmem:[%s2617_s3 + $0xc8] sm:$0xff]  ;;  %v113_v15 = vld [vmem:[%s2617_s3 + $0xd8] sm:$0xff]  ;;  %v110_v22 = vld [vmem:[%s2617_s3 + $0xc0] sm:$0xff] }
  0x2c   :  { %1158 = vmatprep.subr.bf16.mxu1 %v2059_v18  ;;  %v2139_v21 = vpack.c.bf16 %v113_v15, %v111_v12  ;;  %v112_v28 = vld [vmem:[%s2617_s3 + $0xd0] sm:$0xff]  ;;  %v115_v33 = vld [vmem:[%s2617_s3 + $0xe8] sm:$0xff]  ;;  %v117_v36 = vld [vmem:[%s2617_s3 + $0xf8] sm:$0xff] }
  0x2d   :  { %1128 = vmatpush1.bf16.msra.mxu0 %v1901_v6  ;;  %v2148_v29 = vpack.c.bf16 %v112_v28, %v110_v22  ;;  %v2159_v40 = vpack.c.bf16 %v117_v36, %v115_v33  ;;  %v114_v42 = vld [vmem:[%s2617_s3 + $0xe0] sm:$0xff]  ;;  %v116_v49 = vld [vmem:[%s2617_s3 + $0xf0] sm:$0xff]  ;;  %v119_v60 = vld [vmem:[%s2617_s3 + $0x108] sm:$0xff] }
  0x2e   :  { %1130 = vmatprep.subr.bf16.mxu0 %v1904_v9  ;;  %v2168_v55 = vpack.c.bf16 %v116_v49, %v114_v42  ;;  %v121_v61 = vld [vmem:[%s2617_s3 + $0x118] sm:$0xff]  ;;  %v118_v5 = vld [vmem:[%s2617_s3 + $0x100] sm:$0xff]  ;;  %v120_v12 = vld [vmem:[%s2617_s3 + $0x110] sm:$0xff] }
  0x2f   :  { %1160 = vmatpush1.bf16.msra.mxu1 %v2068_v23  ;;  %v2179_v2 = vpack.c.bf16 %v121_v61, %v119_v60  ;;  %v2188_v15 = vpack.c.bf16 %v120_v12, %v118_v5  ;;  %v2194_v22 = vld [vmem:[%s2614_s0 + $0x10] sm:$0xff]  ;;  %v123_v28 = vld [vmem:[%s2617_s3 + $0x128] sm:$0xff]  ;;  %v125_v33 = vld [vmem:[%s2617_s3 + $0x138] sm:$0xff] }
  0x30   :  { %1162 = vmatprep.subr.bf16.mxu1 %v2079_v30  ;;  %v2204_v36 = vpack.c.bf16 %v125_v33, %v123_v28  ;;  %v122_v42 = vld [vmem:[%s2617_s3 + $0x120] sm:$0xff]  ;;  %v124_v49 = vld [vmem:[%s2617_s3 + $0x130] sm:$0xff]  ;;  %v2215_v60 = vcombine.high %v2194_v22, %v2194_v22  ;;  %v127_v5 = vld [vmem:[%s2617_s3 + $0x148] sm:$0xff] }
  0x31   :  { %1132 = vmatpush1.bf16.msra.mxu0 %v1919_v16  ;;  %v2217_v61 = vpack.c.bf16 %v124_v49, %v122_v42  ;;  %v129_v12 = vld [vmem:[%s2617_s3 + $0x158] sm:$0xff]  ;;  %v126_v33 = vld [vmem:[%s2617_s3 + $0x140] sm:$0xff]  ;;  %v128_v42 = vld [vmem:[%s2617_s3 + $0x150] sm:$0xff] }
  0x32   :  { %1134 = vmatprep.subr.bf16.mxu0 %v1922_v17  ;;  %2639 = vst [vmem:[#allocation9_spill] sm:$0xff] %v2215_v60  ;;  %v2229_v28 = vpack.c.bf16 %v129_v12, %v127_v5  ;;  %v131_v49 = vld [vmem:[%s2617_s3 + $0x168] sm:$0xff]  ;;  %v133_v5 = vld [vmem:[%s2617_s3 + $0x178] sm:$0xff]  ;;  %v130_v12 = vld [vmem:[%s2617_s3 + $0x160] sm:$0xff] }
  0x33   :  { %1164 = vmatpush1.bf16.msra.mxu1 %v2088_v39  ;;  %v2255_v44 = vpack.c.bf16 %v133_v5, %v131_v49  ;;  %v134_v49 = vld [vmem:[%s2617_s3 + $0x180] sm:$0xff]  ;;  %v136_v5 = vld [vmem:[%s2617_s3 + $0x190] sm:$0xff] }
  0x34   :  { %1166 = vmatprep.subr.bf16.mxu1 %v2099_v48 }
  0x35   :  { %1136 = vmatpush1.bf16.msra.mxu0 %v1937_v24  ;;  %2641 = vst [vmem:[#allocation11_spill] sm:$0xff] %v2255_v44 }
  0x36   :  { %1138 = vmatprep.subr.bf16.mxu0 %v1940_v27 }
  0x37   :  { %1168 = vmatpush1.bf16.msra.mxu1 %v2108_v56 }
  0x38   :  { %1170 = vmatprep.subr.bf16.mxu1 %v2119_v1 }
  0x39   :  { %1140 = vmatpush1.bf16.msra.mxu0 %v1955_v34 }
  0x3a   :  { %1142 = vmatprep.subr.bf16.mxu0 %v1958_v35 }
  0x3b   :  { %1172 = vmatpush1.bf16.msra.mxu1 %v2128_v10 }
  0x3c   :  { %1174 = vmatprep.subr.bf16.mxu1 %v2139_v21 }
  0x3d   :  { %1144 = vmatpush1.bf16.msra.mxu0 %v1973_v43 }
  0x3e   :  { %1146 = vmatprep.subr.bf16.mxu0 %v1976_v47 }
  0x3f   :  { %1176 = vmatpush1.bf16.msra.mxu1 %v2148_v29 }
  0x40   :  { %1178 = vmatprep.subr.bf16.mxu1 %v2159_v40 }
  0x41   :  { %1148 = vmatpush1.bf16.msra.mxu0 %v1985_v50 }
  0x42   :  { %1214 = vmatprep.subr.bf16.mxu0 %v1700_v3 }
  0x43   :  { %1180 = vmatpush1.bf16.msra.mxu1 %v2168_v55 }
  0x44   :  { %231 = vmatmul.mubr.f32.vlgmr.msra.gmra.mrb[0].mxu0 %v1815_v41  ;;  %1182 = vmatprep.subr.bf16.mxu1 %v2179_v2 }
  0x45   :  { %1216 = vmatpush1.bf16.msra.mxu0 %v1711_v7  ;;  %468 = vmatprep.mubr.f32.mxu0 %v1996_v54  ;;  %v2242_v54 = vpack.c.bf16 %v128_v42, %v126_v33  ;;  %v135_v33 = vld [vmem:[%s2617_s3 + $0x188] sm:$0xff]  ;;  %v137_v42 = vld [vmem:[%s2617_s3 + $0x198] sm:$0xff] }
  0x46   :  { %1218 = vmatprep.subr.bf16.mxu0 %v1713_v8  ;;  %v2267_v41 = vpack.c.bf16 %v137_v42, %v135_v33  ;;  %v138_v42 = vld [vmem:[%s2617_s3 + $0x1a0] sm:$0xff] }
  0x47   :  { %1184 = vmatpush1.bf16.msra.mxu1 %v2188_v15  ;;  %2640 = vst [vmem:[#allocation10_spill] sm:$0xff] %v2242_v54 }
  0x48   :  { %1186 = vmatprep.subr.bf16.mxu1 %v2204_v36 }
  0x49   :  { %1220 = vmatpush1.bf16.msra.mxu0 %v1729_v13 }
  0x4a   :  { %1222 = vmatprep.subr.bf16.mxu0 %v1732_v14 }
  0x4b   :  { %1188 = vmatpush1.bf16.msra.mxu1 %v2217_v61 }
  0x4c   :  { %1190 = vmatprep.subr.bf16.mxu1 %v2229_v28 }
  0x4d   :  { %1224 = vmatpush1.bf16.msra.mxu0 %v1747_v19 }
  0x4e   :  { %1226 = vmatprep.subr.bf16.mxu0 %v1750_v20 }
  0x4f   :  { %1192 = vmatpush1.bf16.msra.mxu1 %v2242_v54  ;;  %v139_v54 = vld [vmem:[%s2617_s3 + $0x1a8] sm:$0xff] }
  0x50   :  { %1194 = vmatprep.subr.bf16.mxu1 %v2255_v44  ;;  %v140_v44 = vld [vmem:[%s2617_s3 + $0x1b0] sm:$0xff] }
  0x51   :  { %1228 = vmatpush1.bf16.msra.mxu0 %v1765_v25 }
  0x52   :  { %1230 = vmatprep.subr.bf16.mxu0 %v1768_v26 }
  0x55   :  { %1232 = vmatpush1.bf16.msra.mxu0 %v1783_v31 }
  0x56   :  { %1234 = vmatprep.subr.bf16.mxu0 %v1786_v32 }
  0x59   :  { %1236 = vmatpush1.bf16.msra.mxu0 %v1801_v37 }
  0x5a   :  { %1238 = vmatprep.subr.bf16.mxu0 %v1804_v38 }
  0x5d   :  { %1240 = vmatpush1.bf16.msra.mxu0 %v1828_v45 }
  0x5e   :  { %1242 = vmatprep.subr.bf16.mxu0 %v1832_v46 }
  0x61   :  { %1244 = vmatpush1.bf16.msra.mxu0 %v1847_v51 }
  0x62   :  { %1246 = vmatprep.subr.bf16.mxu0 %v1850_v52 }
  0x65   :  { %1248 = vmatpush1.bf16.msra.mxu0 %v1865_v57 }
  0x66   :  { %1250 = vmatprep.subr.bf16.mxu0 %v1868_v58 }
  0x69   :  { %1252 = vmatpush1.bf16.msra.mxu0 %v1883_v63 }
  0x6a   :  { %1254 = vmatprep.subr.bf16.mxu0 %v1886_v0 }
  0x6d   :  { %1256 = vmatpush1.bf16.msra.mxu0 %v1901_v6 }
  0x6e   :  { %1258 = vmatprep.subr.bf16.mxu0 %v1904_v9 }
  0x71   :  { %1260 = vmatpush1.bf16.msra.mxu0 %v1919_v16 }
  0x72   :  { %1262 = vmatprep.subr.bf16.mxu0 %v1922_v17 }
  0x75   :  { %1264 = vmatpush1.bf16.msra.mxu0 %v1937_v24 }
  0x76   :  { %1266 = vmatprep.subr.bf16.mxu0 %v1940_v27 }
  0x79   :  { %1268 = vmatpush1.bf16.msra.mxu0 %v1955_v34 }
  0x7a   :  { %1270 = vmatprep.subr.bf16.mxu0 %v1958_v35 }
  0x7d   :  { %1272 = vmatpush1.bf16.msra.mxu0 %v1973_v43 }
  0x7e   :  { %1274 = vmatprep.subr.bf16.mxu0 %v1976_v47 }
  0x81   :  { %1276 = vmatpush1.bf16.msra.mxu0 %v1985_v50 }
  0x82   :  { %1342 = vmatprep.subr.bf16.mxu0 %v1700_v3 }
  0x84   :  { %469 = vmatmul.mubr.f32.vlgmr.msra.gmra.mrb[2].mxu0 %v1991_v53  ;;  %v132_v53 = vld [vmem:[%s2617_s3 + $0x170] sm:$0xff] }
  0x85   :  { %1344 = vmatpush1.bf16.msra.mxu0 %v1711_v7  ;;  %691 = vmatprep.mubr.f32.mxu0 %v2215_v60  ;;  %v2264_v60 = vpack.c.bf16 %v132_v53, %v130_v12  ;;  %v141_v53 = vld [vmem:[%s2617_s3 + $0x1b8] sm:$0xff]  ;;  %v2284_v12 = vpack.c.bf16 %v136_v5, %v134_v49 }
  0x86   :  { %1346 = vmatprep.subr.bf16.mxu0 %v1713_v8  ;;  %v2287_v33 = vpack.c.bf16 %v141_v53, %v139_v54  ;;  %v145_v49 = vld [vmem:[%s2617_s3 + $0x1d8] sm:$0xff]  ;;  %v2304_v54 = vpack.c.bf16 %v140_v44, %v138_v42  ;;  %v142_v53 = vld [vmem:[%s2617_s3 + $0x1c0] sm:$0xff]  ;;  %v144_v44 = vld [vmem:[%s2617_s3 + $0x1d0] sm:$0xff] }
  0x87   :  { %2642 = vst [vmem:[#allocation12_spill] sm:$0xff] %v2264_v60  ;;  %1196 = vmatpush1.bf16.msra.mxu1 %v2264_v60  ;;  %v143_v60 = vld [vmem:[%s2617_s3 + $0x1c8] sm:$0xff] }
  0x88   :  { %1198 = vmatprep.subr.bf16.mxu1 %v2267_v41  ;;  %2643 = vst [vmem:[#allocation13_spill] sm:$0xff] %v2304_v54  ;;  %v2307_v5 = vpack.c.bf16 %v145_v49, %v143_v60  ;;  %v2320_v60 = vpack.c.bf16 %v144_v44, %v142_v53  ;;  %v147_v42 = vld [vmem:[%s2617_s3 + $0x1e8] sm:$0xff]  ;;  %v149_v49 = vld [vmem:[%s2617_s3 + $0x1f8] sm:$0xff]  ;;  %v148_v53 = vld [vmem:[%s2617_s3 + $0x1f0] sm:$0xff] }
  0x89   :  { %1348 = vmatpush1.bf16.msra.mxu0 %v1729_v13 }
  0x8a   :  { %1350 = vmatprep.subr.bf16.mxu0 %v1732_v14  ;;  %2644 = vst [vmem:[#allocation14_spill] sm:$0xff] %v2307_v5 }
  0x8b   :  { %1200 = vmatpush1.bf16.msra.mxu1 %v2284_v12 }
  0x8c   :  { %1202 = vmatprep.subr.bf16.mxu1 %v2287_v33 }
  0x8d   :  { %1352 = vmatpush1.bf16.msra.mxu0 %v1747_v19 }
  0x8e   :  { %1354 = vmatprep.subr.bf16.mxu0 %v1750_v20 }
  0x8f   :  { %1204 = vmatpush1.bf16.msra.mxu1 %v2304_v54  ;;  %v146_v54 = vld [vmem:[%s2617_s3 + $0x1e0] sm:$0xff] }
  0x90   :  { %1206 = vmatprep.subr.bf16.mxu1 %v2307_v5  ;;  %v2330_v5 = vpack.c.bf16 %v149_v49, %v147_v42  ;;  %v2339_v44 = vpack.c.bf16 %v148_v53, %v146_v54  ;;  %v2366_v54 = vld [vmem:[%s2614_s0 + $0x18] sm:$0xff] }
  0x91   :  { %1356 = vmatpush1.bf16.msra.mxu0 %v1765_v25  ;;  %v2371_v42 = vcombine.high %v2366_v54, %v2366_v54 }
  0x92   :  { %1358 = vmatprep.subr.bf16.mxu0 %v1768_v26 }
  0x93   :  { %1208 = vmatpush1.bf16.msra.mxu1 %v2320_v60 }
  0x94   :  { %1210 = vmatprep.subr.bf16.mxu1 %v2330_v5 }
  0x95   :  { %1360 = vmatpush1.bf16.msra.mxu0 %v1783_v31 }
  0x96   :  { %1362 = vmatprep.subr.bf16.mxu0 %v1786_v32 }
  0x97   :  { %1212 = vmatpush1.bf16.msra.mxu1 %v2339_v44 }
  0x98   :  { %1278 = vmatprep.subr.bf16.mxu1 %v2019_v59 }
  0x99   :  { %1364 = vmatpush1.bf16.msra.mxu0 %v1801_v37 }
  0x9a   :  { %1366 = vmatprep.subr.bf16.mxu0 %v1804_v38 }
  0x9d   :  { %1368 = vmatpush1.bf16.msra.mxu0 %v1828_v45 }
  0x9e   :  { %1370 = vmatprep.subr.bf16.mxu0 %v1832_v46 }
  0xa1   :  { %1372 = vmatpush1.bf16.msra.mxu0 %v1847_v51 }
  0xa2   :  { %1374 = vmatprep.subr.bf16.mxu0 %v1850_v52 }
  0xa5   :  { %1376 = vmatpush1.bf16.msra.mxu0 %v1865_v57 }
  0xa6   :  { %1378 = vmatprep.subr.bf16.mxu0 %v1868_v58 }
  0xa9   :  { %1380 = vmatpush1.bf16.msra.mxu0 %v1883_v63 }
  0xaa   :  { %1382 = vmatprep.subr.bf16.mxu0 %v1886_v0 }
  0xad   :  { %1384 = vmatpush1.bf16.msra.mxu0 %v1901_v6 }
  0xae   :  { %1386 = vmatprep.subr.bf16.mxu0 %v1904_v9 }
  0xb1   :  { %1388 = vmatpush1.bf16.msra.mxu0 %v1919_v16 }
  0xb2   :  { %1390 = vmatprep.subr.bf16.mxu0 %v1922_v17 }
  0xb5   :  { %1392 = vmatpush1.bf16.msra.mxu0 %v1937_v24 }
  0xb6   :  { %1394 = vmatprep.subr.bf16.mxu0 %v1940_v27 }
  0xb9   :  { %1396 = vmatpush1.bf16.msra.mxu0 %v1955_v34 }
  0xba   :  { %1398 = vmatprep.subr.bf16.mxu0 %v1958_v35 }
  0xbd   :  { %1400 = vmatpush1.bf16.msra.mxu0 %v1973_v43 }
  0xbe   :  { %1402 = vmatprep.subr.bf16.mxu0 %v1976_v47 }
  0xc1   :  { %1404 = vmatpush1.bf16.msra.mxu0 %v1985_v50 }
  0xc2   :  { %1470 = vmatprep.subr.bf16.mxu0 %v1700_v3  ;;  %v153_v3 = vlaneseq }
  0xc4   :  { %692 = vmatmul.mubr.f32.vlgmr.msra.gmra.mrb[4].mxu0 %v2194_v22  ;;  %vm2557_vm1 = vcmp.lt.s32.totalorder %v153_v3, 256 }
  0xc5   :  { %1472 = vmatpush1.bf16.msra.mxu0 %v1711_v7  ;;  %914 = vmatprep.mubr.f32.mxu0 %v2371_v42  ;;  %v2409_v7 = vshrl.u32 %v153_v3, 7 }
  0xc6   :  { %1474 = vmatprep.subr.bf16.mxu0 %v1713_v8 }
  0xc7   :  { %v155_v8 = vsub.s32 0, %v2409_v7 }
  0xc9   :  { %1476 = vmatpush1.bf16.msra.mxu0 %v1729_v13  ;;  %v85_v13 = vld [vmem:[%s2616_s2] sm:$0x3] }
  0xca   :  { %1478 = vmatprep.subr.bf16.mxu0 %v1732_v14  ;;  %v159_v14 = vsub.s32 1, %v2409_v7 }
  0xcd   :  { %1480 = vmatpush1.bf16.msra.mxu0 %v1747_v19  ;;  %v2418_v19 = vrot.slane %v85_v13, %v155_v8 }
  0xce   :  { %1482 = vmatprep.subr.bf16.mxu0 %v1750_v20  ;;  %v2422_v20 = vrot.slane %v85_v13, %v159_v14 }
  0xd1   :  { %1484 = vmatpush1.bf16.msra.mxu0 %v1765_v25 }
  0xd2   :  { %1486 = vmatprep.subr.bf16.mxu0 %v1768_v26 }
  0xd5   :  { %1488 = vmatpush1.bf16.msra.mxu0 %v1783_v31 }
  0xd6   :  { %1490 = vmatprep.subr.bf16.mxu0 %v1786_v32 }
  0xd9   :  { %1492 = vmatpush1.bf16.msra.mxu0 %v1801_v37 }
  0xda   :  { %1494 = vmatprep.subr.bf16.mxu0 %v1804_v38 }
  0xdd   :  { %1496 = vmatpush1.bf16.msra.mxu0 %v1828_v45  ;;  %v2645_v45 = vld [vmem:[#allocation10_spill] sm:$0xff] }
  0xde   :  { %1498 = vmatprep.subr.bf16.mxu0 %v1832_v46  ;;  %v2646_v46 = vld [vmem:[#allocation11_spill] sm:$0xff] }
  0xe1   :  { %1500 = vmatpush1.bf16.msra.mxu0 %v1847_v51  ;;  %v2647_v51 = vld [vmem:[#allocation12_spill] sm:$0xff] }
  0xe2   :  { %1502 = vmatprep.subr.bf16.mxu0 %v1850_v52  ;;  %v2648_v52 = vld [vmem:[#allocation13_spill] sm:$0xff] }
  0xe5   :  { %1504 = vmatpush1.bf16.msra.mxu0 %v1865_v57  ;;  %v2649_v57 = vld [vmem:[#allocation14_spill] sm:$0xff] }
  0xe6   :  { %1506 = vmatprep.subr.bf16.mxu0 %v1868_v58 }
  0xe9   :  { %1508 = vmatpush1.bf16.msra.mxu0 %v1883_v63 }
  0xea   :  { %1510 = vmatprep.subr.bf16.mxu0 %v1886_v0 }
  0xed   :  { %1512 = vmatpush1.bf16.msra.mxu0 %v1901_v6 }
  0xee   :  { %1514 = vmatprep.subr.bf16.mxu0 %v1904_v9 }
  0xf1   :  { %1516 = vmatpush1.bf16.msra.mxu0 %v1919_v16 }
  0xf2   :  { %1518 = vmatprep.subr.bf16.mxu0 %v1922_v17 }
  0xf5   :  { %1520 = vmatpush1.bf16.msra.mxu0 %v1937_v24 }
  0xf6   :  { %1522 = vmatprep.subr.bf16.mxu0 %v1940_v27 }
  0xf9   :  { %1524 = vmatpush1.bf16.msra.mxu0 %v1955_v34 }
  0xfa   :  { %1526 = vmatprep.subr.bf16.mxu0 %v1958_v35 }
  0xfd   :  { %1528 = vmatpush1.bf16.msra.mxu0 %v1973_v43 }
  0xfe   :  { %1530 = vmatprep.subr.bf16.mxu0 %v1976_v47 }
 0x101   :  { %1532 = vmatpush1.bf16.msra.mxu0 %v1985_v50 }
 0x104   :  { %915 = vmatmul.mubr.f32.vlgmr.msra.gmra.mrb[6].mxu0 %v2366_v54 }
 0x117   :  { %v232_v25 = vpop.f32.mrb[0].mxu0 }
 0x118   :  { %v233_v26 = vadd.f32 %v232_v25, %v2418_v19  ;;  %v234_v31 = vpop.f32.mrb[1].mxu0 }
 0x119   :  { %v235_v32 = vadd.f32 %v234_v31, %v2422_v20 }
 0x11a   :  { %v237_v37 = vmax.f32 %v233_v26, 0.0 }
 0x11b   :  { %v238_v38 = vmax.f32 %v235_v32, 0.0 }
 0x11d   :  { %314 = vmatprep.mubr.f32.mxu1 %v238_v38 }
 0x11e   :  { %315 = vmatmul.mubr.f32.vlgmr.msra.gmra.mrb[0].mxu1 %v237_v37 }
 0x11f   :  { %1280 = vmatpush1.bf16.msra.mxu1 %v2028_v62 }
 0x120   :  { %1282 = vmatprep.subr.bf16.mxu1 %v2039_v4 }
 0x123   :  { %1284 = vmatpush1.bf16.msra.mxu1 %v2048_v11 }
 0x124   :  { %1286 = vmatprep.subr.bf16.mxu1 %v2059_v18 }
 0x127   :  { %1288 = vmatpush1.bf16.msra.mxu1 %v2068_v23 }
 0x128   :  { %1290 = vmatprep.subr.bf16.mxu1 %v2079_v30 }
 0x12b   :  { %1292 = vmatpush1.bf16.msra.mxu1 %v2088_v39 }
 0x12c   :  { %1294 = vmatprep.subr.bf16.mxu1 %v2099_v48 }
 0x12f   :  { %1296 = vmatpush1.bf16.msra.mxu1 %v2108_v56 }
 0x130   :  { %1298 = vmatprep.subr.bf16.mxu1 %v2119_v1 }
 0x133   :  { %1300 = vmatpush1.bf16.msra.mxu1 %v2128_v10 }
 0x134   :  { %1302 = vmatprep.subr.bf16.mxu1 %v2139_v21 }
 0x137   :  { %1304 = vmatpush1.bf16.msra.mxu1 %v2148_v29 }
 0x138   :  { %1306 = vmatprep.subr.bf16.mxu1 %v2159_v40 }
 0x13b   :  { %1308 = vmatpush1.bf16.msra.mxu1 %v2168_v55 }
 0x13c   :  { %1310 = vmatprep.subr.bf16.mxu1 %v2179_v2 }
 0x13f   :  { %1312 = vmatpush1.bf16.msra.mxu1 %v2188_v15 }
 0x140   :  { %1314 = vmatprep.subr.bf16.mxu1 %v2204_v36 }
 0x143   :  { %1316 = vmatpush1.bf16.msra.mxu1 %v2217_v61 }
 0x144   :  { %1318 = vmatprep.subr.bf16.mxu1 %v2229_v28 }
 0x147   :  { %1320 = vmatpush1.bf16.msra.mxu1 %v2645_v45 }
 0x148   :  { %1322 = vmatprep.subr.bf16.mxu1 %v2646_v46 }
 0x14b   :  { %1324 = vmatpush1.bf16.msra.mxu1 %v2647_v51 }
 0x14c   :  { %1326 = vmatprep.subr.bf16.mxu1 %v2267_v41 }
 0x14f   :  { %1328 = vmatpush1.bf16.msra.mxu1 %v2284_v12 }
 0x150   :  { %1330 = vmatprep.subr.bf16.mxu1 %v2287_v33 }
 0x153   :  { %1332 = vmatpush1.bf16.msra.mxu1 %v2648_v52 }
 0x154   :  { %1334 = vmatprep.subr.bf16.mxu1 %v2649_v57 }
 0x157   :  { %v470_v58 = vpop.f32.mrb[2].mxu0  ;;  %1336 = vmatpush1.bf16.msra.mxu1 %v2320_v60 }
 0x158   :  { %v471_v63 = vadd.f32 %v470_v58, %v2418_v19  ;;  %v472_v0 = vpop.f32.mrb[3].mxu0  ;;  %1338 = vmatprep.subr.bf16.mxu1 %v2330_v5 }
 0x159   :  { %v473_v6 = vadd.f32 %v472_v0, %v2422_v20 }
 0x15a   :  { %v475_v9 = vmax.f32 %v471_v63, 0.0 }
 0x15b   :  { %v476_v16 = vmax.f32 %v473_v6, 0.0  ;;  %1340 = vmatpush1.bf16.msra.mxu1 %v2339_v44 }
 0x15c   :  { %1406 = vmatprep.subr.bf16.mxu1 %v2019_v59 }
 0x15d   :  { %541 = vmatprep.mubr.f32.mxu1 %v476_v16 }
 0x15e   :  { %542 = vmatmul.mubr.f32.vlgmr.msra.gmra.mrb[2].mxu1 %v475_v9  ;;  %v2650_v9 = vld [vmem:[#allocation5_spill] sm:$0xff] }
 0x15f   :  { %1408 = vmatpush1.bf16.msra.mxu1 %v2028_v62 }
 0x160   :  { %1410 = vmatprep.subr.bf16.mxu1 %v2039_v4 }
 0x163   :  { %1412 = vmatpush1.bf16.msra.mxu1 %v2048_v11 }
 0x164   :  { %1414 = vmatprep.subr.bf16.mxu1 %v2059_v18 }
 0x167   :  { %1416 = vmatpush1.bf16.msra.mxu1 %v2068_v23 }
 0x168   :  { %1418 = vmatprep.subr.bf16.mxu1 %v2079_v30 }
 0x16b   :  { %1420 = vmatpush1.bf16.msra.mxu1 %v2088_v39 }
 0x16c   :  { %1422 = vmatprep.subr.bf16.mxu1 %v2099_v48 }
 0x16f   :  { %1424 = vmatpush1.bf16.msra.mxu1 %v2108_v56 }
 0x170   :  { %1426 = vmatprep.subr.bf16.mxu1 %v2119_v1 }
 0x173   :  { %1428 = vmatpush1.bf16.msra.mxu1 %v2128_v10 }
 0x174   :  { %1430 = vmatprep.subr.bf16.mxu1 %v2139_v21 }
 0x177   :  { %1432 = vmatpush1.bf16.msra.mxu1 %v2148_v29 }
 0x178   :  { %1434 = vmatprep.subr.bf16.mxu1 %v2159_v40 }
 0x17b   :  { %1436 = vmatpush1.bf16.msra.mxu1 %v2168_v55 }
 0x17c   :  { %1438 = vmatprep.subr.bf16.mxu1 %v2179_v2 }
 0x17f   :  { %1440 = vmatpush1.bf16.msra.mxu1 %v2188_v15 }
 0x180   :  { %1442 = vmatprep.subr.bf16.mxu1 %v2204_v36 }
 0x183   :  { %1444 = vmatpush1.bf16.msra.mxu1 %v2217_v61 }
 0x184   :  { %1446 = vmatprep.subr.bf16.mxu1 %v2229_v28 }
 0x187   :  { %1448 = vmatpush1.bf16.msra.mxu1 %v2645_v45 }
 0x188   :  { %1450 = vmatprep.subr.bf16.mxu1 %v2646_v46 }
 0x18b   :  { %1452 = vmatpush1.bf16.msra.mxu1 %v2647_v51 }
 0x18c   :  { %1454 = vmatprep.subr.bf16.mxu1 %v2267_v41 }
 0x18f   :  { %1456 = vmatpush1.bf16.msra.mxu1 %v2284_v12 }
 0x190   :  { %1458 = vmatprep.subr.bf16.mxu1 %v2287_v33 }
 0x193   :  { %1460 = vmatpush1.bf16.msra.mxu1 %v2648_v52 }
 0x194   :  { %1462 = vmatprep.subr.bf16.mxu1 %v2649_v57 }
 0x197   :  { %v693_v17 = vpop.f32.mrb[4].mxu0  ;;  %1464 = vmatpush1.bf16.msra.mxu1 %v2320_v60 }
 0x198   :  { %v694_v24 = vadd.f32 %v693_v17, %v2418_v19  ;;  %v695_v27 = vpop.f32.mrb[5].mxu0  ;;  %1466 = vmatprep.subr.bf16.mxu1 %v2330_v5  ;;  %v2651_v17 = vld [vmem:[#allocation6_spill] sm:$0xff] }
 0x199   :  { %v696_v34 = vadd.f32 %v695_v27, %v2422_v20 }
 0x19a   :  { %v698_v35 = vmax.f32 %v694_v24, 0.0 }
 0x19b   :  { %v699_v43 = vmax.f32 %v696_v34, 0.0  ;;  %1468 = vmatpush1.bf16.msra.mxu1 %v2339_v44 }
 0x19c   :  { %1534 = vmatprep.subr.bf16.mxu1 %v2019_v59 }
 0x19d   :  { %764 = vmatprep.mubr.f32.mxu1 %v699_v43 }
 0x19e   :  { %765 = vmatmul.mubr.f32.vlgmr.msra.gmra.mrb[4].mxu1 %v698_v35 }
 0x19f   :  { %1536 = vmatpush1.bf16.msra.mxu1 %v2028_v62 }
 0x1a0   :  { %1538 = vmatprep.subr.bf16.mxu1 %v2039_v4 }
 0x1a3   :  { %1540 = vmatpush1.bf16.msra.mxu1 %v2048_v11  ;;  %v150_v11 = vld [vmem:[%s2618_s4] sm:$0x3]  ;;  %s1660_s4 = smov [#allocation2]  }
 0x1a4   :  { %1542 = vmatprep.subr.bf16.mxu1 %v2059_v18  ;;  %v2532_v18 = vrot.slane %v150_v11, %v155_v8  ;;  %s1074_s27 = sshll.u32 %s1660_s4, 4  ;;  %s1075_s27 = int_to_ptr.vmem [resolvable:$true] %s1074_s27 }
 0x1a5   :  { %s1635_s28 = scalar_lea.vmem %s1075_s27, 128  ;;  %p1640_p1 = scmp.lt.s32.totalorder %s1075_s27, %s1075_s27 }
 0x1a6   :  { %p1636_p0 = scmp.ne.s32.totalorder %s1075_s27, %s1635_s28  ;;  %p1641_p2 = scmp.lt.s32.totalorder %s1635_s28, %s1635_s28 }
 0x1a7   :  { %1544 = vmatpush1.bf16.msra.mxu1 %v2068_v23  ;;  %v2536_v23 = vrot.slane %v150_v11, %v159_v14 }
 0x1a8   :  { %1546 = vmatprep.subr.bf16.mxu1 %v2079_v30  ;;  %p1642_p3 = por %p1641_p2, %p1640_p1 }
 0x1aa   :  { %p1643_p4 = pnand %p1642_p3, %p1636_p0 }
 0x1ab   :  { %1548 = vmatpush1.bf16.msra.mxu1 %v2088_v39 }
 0x1ac   :  { %1550 = vmatprep.subr.bf16.mxu1 %v2099_v48 }
 0x1af   :  { %1552 = vmatpush1.bf16.msra.mxu1 %v2108_v56 }
 0x1b0   :  { %1554 = vmatprep.subr.bf16.mxu1 %v2119_v1 }
 0x1b3   :  { %1556 = vmatpush1.bf16.msra.mxu1 %v2128_v10 }
 0x1b4   :  { %1558 = vmatprep.subr.bf16.mxu1 %v2139_v21 }
 0x1b7   :  { %1560 = vmatpush1.bf16.msra.mxu1 %v2148_v29 }
 0x1b8   :  { %1562 = vmatprep.subr.bf16.mxu1 %v2159_v40 }
 0x1bb   :  { %1564 = vmatpush1.bf16.msra.mxu1 %v2168_v55 }
 0x1bc   :  { %1566 = vmatprep.subr.bf16.mxu1 %v2179_v2 }
 0x1bf   :  { %1568 = vmatpush1.bf16.msra.mxu1 %v2188_v15 }
 0x1c0   :  { %1570 = vmatprep.subr.bf16.mxu1 %v2204_v36 }
 0x1c3   :  { %1572 = vmatpush1.bf16.msra.mxu1 %v2217_v61 }
 0x1c4   :  { %1574 = vmatprep.subr.bf16.mxu1 %v2229_v28 }
 0x1c7   :  { %1576 = vmatpush1.bf16.msra.mxu1 %v2645_v45 }
 0x1c8   :  { %1578 = vmatprep.subr.bf16.mxu1 %v2646_v46 }
 0x1cb   :  { %1580 = vmatpush1.bf16.msra.mxu1 %v2647_v51 }
 0x1cc   :  { %1582 = vmatprep.subr.bf16.mxu1 %v2267_v41 }
 0x1cf   :  { %1584 = vmatpush1.bf16.msra.mxu1 %v2284_v12 }
 0x1d0   :  { %1586 = vmatprep.subr.bf16.mxu1 %v2287_v33 }
 0x1d3   :  { %1588 = vmatpush1.bf16.msra.mxu1 %v2648_v52 }
 0x1d4   :  { %1590 = vmatprep.subr.bf16.mxu1 %v2649_v57 }
 0x1d7   :  { %v916_v47 = vpop.f32.mrb[6].mxu0  ;;  %1592 = vmatpush1.bf16.msra.mxu1 %v2320_v60 }
 0x1d8   :  { %v917_v50 = vadd.f32 %v916_v47, %v2418_v19  ;;  %v918_v59 = vpop.f32.mrb[7].mxu0  ;;  %1594 = vmatprep.subr.bf16.mxu1 %v2330_v5 }
 0x1d9   :  { %v919_v62 = vadd.f32 %v918_v59, %v2422_v20 }
 0x1da   :  { %v921_v41 = vmax.f32 %v917_v50, 0.0  ;;  %v1659_v50 = vmov 1966171168  }
 0x1db   :  { %v922_v4 = vmax.f32 %v919_v62, 0.0  ;;  %1596 = vmatpush1.bf16.msra.mxu1 %v2339_v44  ;;  %v380_v59 = vunpack.c.l.s4 %v1659_v50  ;;  %v2654_v50 = vld [vmem:[#allocation7_spill] sm:$0xff] }
 0x1dd   :  { %987 = vmatprep.mubr.f32.mxu1 %v922_v4 }
 0x1de   :  { %988 = vmatmul.mubr.f32.vlgmr.msra.gmra.mrb[6].mxu1 %v921_v41 }
 0x1f1   :  { %v316_v30 = vpop.f32.mrb[0].mxu1 }
 0x1f2   :  { %v317_v39 = vadd.f32 %v316_v30, %v2532_v18  ;;  %v318_v48 = vpop.f32.mrb[1].mxu1 }
 0x1f3   :  { %v319_v56 = vadd.f32 %v318_v48, %v2536_v23 }
 0x1f4   :  { %v322_v1 = vsel %vm321_vm0, %v317_v39, -inf }
 0x1f5   :  { %v323_v10 = vrot.slane %v322_v1, 4  ;;  %v329_v21 = vsel %vm321_vm0, %v319_v56, -inf }
 0x1f6   :  { %v330_v29 = vrot.slane %v329_v21, 4 }
 0x1f7   :  { %v324_v40 = vmax.f32 %v322_v1, %v323_v10  ;;  %v381_v1 = vunpack.c.0.s8 %v380_v59 }
 0x1f8   :  { %v331_v55 = vmax.f32 %v329_v21, %v330_v29 }
 0x1f9   :  { %v325_v2 = vrot.slane %v324_v40, 2 }
 0x1fa   :  { %v332_v15 = vrot.slane %v331_v55, 2 }
 0x1fb   :  { %v326_v36 = vmax.f32 %v324_v40, %v325_v2 }
 0x1fc   :  { %v333_v61 = vmax.f32 %v331_v55, %v332_v15 }
 0x1fd   :  { %v327_v28 = vrot.slane %v326_v36, 1 }
 0x1fe   :  { %v334_v12 = vrot.slane %v333_v61, 1 }
 0x1ff   :  { %v328_v33 = vmax.f32 %v326_v36, %v327_v28  ;;  %v2553_v28 = vsub.s32 %v381_v1, %v2409_v7 }
 0x200   :  { %v335_v5 = vmax.f32 %v333_v61, %v334_v12 }
 0x201   :  { %v336_v60 = vsub.f32 %v317_v39, %v328_v33 }
 0x202   :  { %v337_v49 = vsub.f32 %v319_v56, %v335_v5 }
 0x203   :  { %v338_v53 = vmul.f32 1.442695, %v336_v60 }
 0x204   :  { %v340_v44 = vmul.f32 1.442695, %v337_v49 }
 0x205   :  { %1603 = vpow2.f32 %v338_v53 }
 0x206   :  { %1605 = vpow2.f32 %v340_v44 }
 0x20f   :  { %v1604_v8 = vpop.eup %1603 }
 0x210   :  { %v1606_v13 = vpop.eup %1605  ;;  %v342_v14 = vsel %vm321_vm0, %v1604_v8, 0.0 }
 0x211   :  { %v343_v19 = vrot.slane %v342_v14, 4  ;;  %v349_v20 = vsel %vm321_vm0, %v1606_v13, 0.0 }
 0x212   :  { %v350_v25 = vrot.slane %v349_v20, 4 }
 0x213   :  { %v344_v26 = vadd.f32 %v343_v19, %v342_v14 }
 0x214   :  { %v351_v31 = vadd.f32 %v350_v25, %v349_v20 }
 0x215   :  { %v345_v32 = vrot.slane %v344_v26, 2 }
 0x216   :  { %v352_v37 = vrot.slane %v351_v31, 2 }
 0x217   :  { %v346_v38 = vadd.f32 %v345_v32, %v344_v26 }
 0x218   :  { %v353_v45 = vadd.f32 %v352_v37, %v351_v31 }
 0x219   :  { %v347_v46 = vrot.slane %v346_v38, 1 }
 0x21a   :  { %v354_v51 = vrot.slane %v353_v45, 1 }
 0x21b   :  { %v348_v52 = vadd.f32 %v347_v46, %v346_v38 }
 0x21c   :  { %v355_v57 = vadd.f32 %v354_v51, %v353_v45 }
 0x21d   :  { %1607 = vrcp.f32 %v348_v52 }
 0x21e   :  { %1609 = vrcp.f32 %v355_v57 }
 0x227   :  { %v1608_v58 = vpop.eup %1607 }
 0x228   :  { %v1610_v63 = vpop.eup %1609  ;;  %v358_v0 = vmul.f32 %v1608_v58, %v1604_v8 }
 0x229   :  { %v359_v6 = vmul.f32 %v1610_v63, %v1606_v13 }
 0x22a   :  { %v360_v16 = vmul.f32 %v358_v0, %v2650_v9 }
 0x22b   :  { %v361_v24 = vmul.f32 %v359_v6, %v2651_v17 }
 0x22c   :  { %v362_v27 = vsel %vm321_vm0, %v360_v16, 0.0 }
 0x22d   :  { %v363_v34 = vrot.slane %v362_v27, 4  ;;  %v369_v35 = vsel %vm321_vm0, %v361_v24, 0.0 }
 0x22e   :  { %v370_v43 = vrot.slane %v369_v35, 4 }
 0x22f   :  { %v364_v47 = vadd.f32 %v363_v34, %v362_v27 }
 0x230   :  { %v371_v62 = vadd.f32 %v370_v43, %v369_v35 }
 0x231   :  { %v543_v4 = vpop.f32.mrb[2].mxu1  ;;  %v365_v41 = vrot.slane %v364_v47, 2 }
 0x232   :  { %v544_v11 = vadd.f32 %v543_v4, %v2532_v18  ;;  %v545_v30 = vpop.f32.mrb[3].mxu1  ;;  %v372_v39 = vrot.slane %v371_v62, 2 }
 0x233   :  { %v546_v48 = vadd.f32 %v545_v30, %v2536_v23  ;;  %v366_v56 = vadd.f32 %v365_v41, %v364_v47 }
 0x234   :  { %v548_v10 = vsel %vm321_vm0, %v544_v11, -inf  ;;  %v373_v21 = vadd.f32 %v372_v39, %v371_v62  ;;  %v2655_v62 = vld [vmem:[#allocation8_spill] sm:$0xff] }
 0x235   :  { %v549_v29 = vrot.slane %v548_v10, 4  ;;  %v555_v40 = vsel %vm321_vm0, %v546_v48, -inf  ;;  %v367_v55 = vrot.slane %v366_v56, 1 }
 0x236   :  { %v556_v2 = vrot.slane %v555_v40, 4  ;;  %v374_v15 = vrot.slane %v373_v21, 1 }
 0x237   :  { %v550_v36 = vmax.f32 %v548_v10, %v549_v29  ;;  %v368_v61 = vadd.f32 %v367_v55, %v366_v56 }
 0x238   :  { %v557_v12 = vmax.f32 %v555_v40, %v556_v2  ;;  %v375_v33 = vadd.f32 %v374_v15, %v373_v21 }
 0x239   :  { %v551_v5 = vrot.slane %v550_v36, 2 }
 0x23a   :  { %v558_v60 = vrot.slane %v557_v12, 2  ;;  %v378_v49 = vcombine.low %v368_v61, %v375_v33 }
 0x23b   :  { %v552_v53 = vmax.f32 %v550_v36, %v551_v5 }
 0x23c   :  { %v559_v44 = vmax.f32 %v557_v12, %v558_v60  ;;  %v385_v8 = vrot.slane %v378_v49, %v2553_v28 }
 0x23d   :  { %v553_v13 = vrot.slane %v552_v53, 1 }
 0x23e   :  { %v560_v19 = vrot.slane %v559_v44, 1  ;;  %v392_v20 = vrot.slane %v385_v8, %v2553_v28 }
 0x23f   :  { %v554_v7 = vmax.f32 %v552_v53, %v553_v13 }
 0x240   :  { %v561_v25 = vmax.f32 %v559_v44, %v560_v19  ;;  %398 = vst.msk [vmem:[#allocation2] ss:$4 sm:$0x3] %vm2557_vm1, %v392_v20 }
 0x241   :  { %v562_v26 = vsub.f32 %v544_v11, %v554_v7 }
 0x242   :  { %v563_v31 = vsub.f32 %v546_v48, %v561_v25 }
 0x243   :  { %v564_v32 = vmul.f32 1.442695, %v562_v26 }
 0x244   :  { %v566_v37 = vmul.f32 1.442695, %v563_v31 }
 0x245   :  { %1611 = vpow2.f32 %v564_v32 }
 0x246   :  { %1613 = vpow2.f32 %v566_v37 }
 0x24f   :  { %v1612_v38 = vpop.eup %1611 }
 0x250   :  { %v1614_v45 = vpop.eup %1613  ;;  %v568_v3 = vsel %vm321_vm0, %v1612_v38, 0.0 }
 0x251   :  { %v569_v46 = vrot.slane %v568_v3, 4  ;;  %v575_v51 = vsel %vm321_vm0, %v1614_v45, 0.0 }
 0x252   :  { %v576_v52 = vrot.slane %v575_v51, 4 }
 0x253   :  { %v570_v57 = vadd.f32 %v569_v46, %v568_v3 }
 0x254   :  { %v577_v58 = vadd.f32 %v576_v52, %v575_v51 }
 0x255   :  { %v571_v63 = vrot.slane %v570_v57, 2 }
 0x256   :  { %v578_v0 = vrot.slane %v577_v58, 2 }
 0x257   :  { %v572_v6 = vadd.f32 %v571_v63, %v570_v57 }
 0x258   :  { %v579_v9 = vadd.f32 %v578_v0, %v577_v58 }
 0x259   :  { %v573_v16 = vrot.slane %v572_v6, 1 }
 0x25a   :  { %v580_v17 = vrot.slane %v579_v9, 1 }
 0x25b   :  { %v574_v24 = vadd.f32 %v573_v16, %v572_v6 }
 0x25c   :  { %v581_v27 = vadd.f32 %v580_v17, %v579_v9 }
 0x25d   :  { %1615 = vrcp.f32 %v574_v24 }
 0x25e   :  { %1617 = vrcp.f32 %v581_v27 }
 0x267   :  { %v1616_v34 = vpop.eup %1615 }
 0x268   :  { %v1618_v35 = vpop.eup %1617  ;;  %v584_v43 = vmul.f32 %v1616_v34, %v1612_v38 }
 0x269   :  { %v585_v47 = vmul.f32 %v1618_v35, %v1614_v45 }
 0x26a   :  { %v586_v59 = vmul.f32 %v2654_v50, %v584_v43 }
 0x26b   :  { %v587_v4 = vmul.f32 %v585_v47, %v2655_v62 }
 0x26c   :  { %v588_v41 = vsel %vm321_vm0, %v586_v59, 0.0 }
 0x26d   :  { %v589_v11 = vrot.slane %v588_v41, 4  ;;  %v595_v30 = vsel %vm321_vm0, %v587_v4, 0.0 }
 0x26e   :  { %v596_v39 = vrot.slane %v595_v30, 4 }
 0x26f   :  { %v590_v48 = vadd.f32 %v589_v11, %v588_v41 }
 0x270   :  { %v597_v56 = vadd.f32 %v596_v39, %v595_v30  ;;  %v2656_v39 = vld [vmem:[#allocation9_spill] sm:$0xff] }
 0x271   :  { %v766_v1 = vpop.f32.mrb[4].mxu1  ;;  %v591_v10 = vrot.slane %v590_v48, 2 }
 0x272   :  { %v767_v21 = vadd.f32 %v766_v1, %v2532_v18  ;;  %v768_v29 = vpop.f32.mrb[5].mxu1  ;;  %v598_v40 = vrot.slane %v597_v56, 2 }
 0x273   :  { %v769_v55 = vadd.f32 %v768_v29, %v2536_v23  ;;  %v592_v2 = vadd.f32 %v591_v10, %v590_v48 }
 0x274   :  { %v771_v15 = vsel %vm321_vm0, %v767_v21, -inf  ;;  %v599_v36 = vadd.f32 %v598_v40, %v597_v56 }
 0x275   :  { %v772_v61 = vrot.slane %v771_v15, 4  ;;  %v778_v12 = vsel %vm321_vm0, %v769_v55, -inf  ;;  %v593_v33 = vrot.slane %v592_v2, 1 }
 0x276   :  { %v779_v5 = vrot.slane %v778_v12, 4  ;;  %v600_v60 = vrot.slane %v599_v36, 1 }
 0x277   :  { %v773_v49 = vmax.f32 %v771_v15, %v772_v61  ;;  %v594_v53 = vadd.f32 %v593_v33, %v592_v2 }
 0x278   :  { %v780_v44 = vmax.f32 %v778_v12, %v779_v5  ;;  %v601_v8 = vadd.f32 %v600_v60, %v599_v36 }
 0x279   :  { %v774_v13 = vrot.slane %v773_v49, 2 }
 0x27a   :  { %v781_v19 = vrot.slane %v780_v44, 2  ;;  %v604_v20 = vcombine.low %v594_v53, %v601_v8 }
 0x27b   :  { %v775_v7 = vmax.f32 %v773_v49, %v774_v13 }
 0x27c   :  { %v782_v25 = vmax.f32 %v780_v44, %v781_v19  ;;  %v611_v26 = vrot.slane %v604_v20, %v2553_v28 }
 0x27d   :  { %v776_v31 = vrot.slane %v775_v7, 1 }
 0x27e   :  { %v783_v32 = vrot.slane %v782_v25, 1  ;;  %v618_v37 = vrot.slane %v611_v26, %v2553_v28 }
 0x27f   :  { %v777_v38 = vmax.f32 %v775_v7, %v776_v31 }
 0x280   :  { %v784_v45 = vmax.f32 %v782_v25, %v783_v32  ;;  %621 = vst.msk [vmem:[#allocation2 + $0x1] ss:$4 sm:$0x3] %vm2557_vm1, %v618_v37 }
 0x281   :  { %v785_v3 = vsub.f32 %v767_v21, %v777_v38 }
 0x282   :  { %v786_v46 = vsub.f32 %v769_v55, %v784_v45 }
 0x283   :  { %v787_v51 = vmul.f32 1.442695, %v785_v3 }
 0x284   :  { %v789_v52 = vmul.f32 1.442695, %v786_v46 }
 0x285   :  { %1619 = vpow2.f32 %v787_v51 }
 0x286   :  { %1621 = vpow2.f32 %v789_v52 }
 0x28f   :  { %v1620_v57 = vpop.eup %1619 }
 0x290   :  { %v1622_v58 = vpop.eup %1621  ;;  %v791_v63 = vsel %vm321_vm0, %v1620_v57, 0.0 }
 0x291   :  { %v792_v0 = vrot.slane %v791_v63, 4  ;;  %v798_v6 = vsel %vm321_vm0, %v1622_v58, 0.0 }
 0x292   :  { %v799_v9 = vrot.slane %v798_v6, 4 }
 0x293   :  { %v793_v16 = vadd.f32 %v792_v0, %v791_v63 }
 0x294   :  { %v800_v17 = vadd.f32 %v799_v9, %v798_v6 }
 0x295   :  { %v794_v24 = vrot.slane %v793_v16, 2 }
 0x296   :  { %v801_v27 = vrot.slane %v800_v17, 2 }
 0x297   :  { %v795_v34 = vadd.f32 %v794_v24, %v793_v16 }
 0x298   :  { %v802_v35 = vadd.f32 %v801_v27, %v800_v17 }
 0x299   :  { %v796_v43 = vrot.slane %v795_v34, 1 }
 0x29a   :  { %v803_v47 = vrot.slane %v802_v35, 1 }
 0x29b   :  { %v797_v50 = vadd.f32 %v796_v43, %v795_v34 }
 0x29c   :  { %v804_v59 = vadd.f32 %v803_v47, %v802_v35 }
 0x29d   :  { %1623 = vrcp.f32 %v797_v50 }
 0x29e   :  { %1625 = vrcp.f32 %v804_v59 }
 0x2a7   :  { %v1624_v62 = vpop.eup %1623 }
 0x2a8   :  { %v1626_v4 = vpop.eup %1625  ;;  %v807_v41 = vmul.f32 %v1624_v62, %v1620_v57 }
 0x2a9   :  { %v808_v11 = vmul.f32 %v1626_v4, %v1622_v58 }
 0x2aa   :  { %v809_v30 = vmul.f32 %v2194_v22, %v807_v41 }
 0x2ab   :  { %v810_v48 = vmul.f32 %v808_v11, %v2656_v39 }
 0x2ac   :  { %v811_v56 = vsel %vm321_vm0, %v809_v30, 0.0 }
 0x2ad   :  { %v812_v1 = vrot.slane %v811_v56, 4  ;;  %v818_v10 = vsel %vm321_vm0, %v810_v48, 0.0 }
 0x2ae   :  { %v819_v21 = vrot.slane %v818_v10, 4 }
 0x2af   :  { %v813_v29 = vadd.f32 %v812_v1, %v811_v56 }
 0x2b0   :  { %v820_v40 = vadd.f32 %v819_v21, %v818_v10 }
 0x2b1   :  { %v989_v55 = vpop.f32.mrb[6].mxu1  ;;  %v814_v2 = vrot.slane %v813_v29, 2 }
 0x2b2   :  { %v990_v15 = vadd.f32 %v989_v55, %v2532_v18  ;;  %v991_v36 = vpop.f32.mrb[7].mxu1  ;;  %v821_v61 = vrot.slane %v820_v40, 2 }
 0x2b3   :  { %v992_v12 = vadd.f32 %v991_v36, %v2536_v23  ;;  %v815_v33 = vadd.f32 %v814_v2, %v813_v29 }
 0x2b4   :  { %v994_v22 = vsel %vm321_vm0, %v990_v15, -inf  ;;  %v822_v5 = vadd.f32 %v821_v61, %v820_v40 }
 0x2b5   :  { %v995_v60 = vrot.slane %v994_v22, 4  ;;  %v1001_v49 = vsel %vm321_vm0, %v992_v12, -inf  ;;  %v816_v53 = vrot.slane %v815_v33, 1 }
 0x2b6   :  { %v1002_v44 = vrot.slane %v1001_v49, 4  ;;  %v823_v8 = vrot.slane %v822_v5, 1 }
 0x2b7   :  { %v996_v13 = vmax.f32 %v994_v22, %v995_v60  ;;  %v817_v19 = vadd.f32 %v816_v53, %v815_v33 }
 0x2b8   :  { %v1003_v20 = vmax.f32 %v1001_v49, %v1002_v44  ;;  %v824_v7 = vadd.f32 %v823_v8, %v822_v5 }
 0x2b9   :  { %v997_v25 = vrot.slane %v996_v13, 2 }
 0x2ba   :  { %v1004_v18 = vrot.slane %v1003_v20, 2  ;;  %v827_v26 = vcombine.low %v817_v19, %v824_v7 }
 0x2bb   :  { %v998_v31 = vmax.f32 %v996_v13, %v997_v25 }
 0x2bc   :  { %v1005_v32 = vmax.f32 %v1003_v20, %v1004_v18  ;;  %v834_v23 = vrot.slane %v827_v26, %v2553_v28 }
 0x2bd   :  { %v999_v37 = vrot.slane %v998_v31, 1 }
 0x2be   :  { %v1006_v38 = vrot.slane %v1005_v32, 1  ;;  %v841_v45 = vrot.slane %v834_v23, %v2553_v28 }
 0x2bf   :  { %v1000_v3 = vmax.f32 %v998_v31, %v999_v37 }
 0x2c0   :  { %v1007_v46 = vmax.f32 %v1005_v32, %v1006_v38  ;;  %844 = vst.msk [vmem:[#allocation2 + $0x2] ss:$4 sm:$0x3] %vm2557_vm1, %v841_v45 }
 0x2c1   :  { %v1008_v51 = vsub.f32 %v990_v15, %v1000_v3 }
 0x2c2   :  { %v1009_v52 = vsub.f32 %v992_v12, %v1007_v46 }
 0x2c3   :  { %v1010_v57 = vmul.f32 1.442695, %v1008_v51 }
 0x2c4   :  { %v1012_v58 = vmul.f32 1.442695, %v1009_v52 }
 0x2c5   :  { %1627 = vpow2.f32 %v1010_v57 }
 0x2c6   :  { %1629 = vpow2.f32 %v1012_v58 }
 0x2cf   :  { %v1628_v63 = vpop.eup %1627 }
 0x2d0   :  { %v1630_v0 = vpop.eup %1629  ;;  %v1014_v6 = vsel %vm321_vm0, %v1628_v63, 0.0 }
 0x2d1   :  { %v1015_v9 = vrot.slane %v1014_v6, 4  ;;  %v1021_v16 = vsel %vm321_vm0, %v1630_v0, 0.0 }
 0x2d2   :  { %v1022_v17 = vrot.slane %v1021_v16, 4 }
 0x2d3   :  { %v1016_v24 = vadd.f32 %v1015_v9, %v1014_v6 }
 0x2d4   :  { %v1023_v27 = vadd.f32 %v1022_v17, %v1021_v16 }
 0x2d5   :  { %v1017_v34 = vrot.slane %v1016_v24, 2 }
 0x2d6   :  { %v1024_v35 = vrot.slane %v1023_v27, 2 }
 0x2d7   :  { %v1018_v43 = vadd.f32 %v1017_v34, %v1016_v24 }
 0x2d8   :  { %v1025_v47 = vadd.f32 %v1024_v35, %v1023_v27 }
 0x2d9   :  { %v1019_v50 = vrot.slane %v1018_v43, 1 }
 0x2da   :  { %v1026_v59 = vrot.slane %v1025_v47, 1 }
 0x2db   :  { %v1020_v62 = vadd.f32 %v1019_v50, %v1018_v43 }
 0x2dc   :  { %v1027_v4 = vadd.f32 %v1026_v59, %v1025_v47 }
 0x2dd   :  { %1631 = vrcp.f32 %v1020_v62 }
 0x2de   :  { %1633 = vrcp.f32 %v1027_v4 }
 0x2e7   :  { %v1632_v41 = vpop.eup %1631 }
 0x2e8   :  { %v1634_v11 = vpop.eup %1633  ;;  %v1030_v30 = vmul.f32 %v1632_v41, %v1628_v63 }
 0x2e9   :  { %v1031_v39 = vmul.f32 %v1634_v11, %v1630_v0 }
 0x2ea   :  { %v1032_v48 = vmul.f32 %v2366_v54, %v1030_v30 }
 0x2eb   :  { %v1033_v56 = vmul.f32 %v1031_v39, %v2371_v42 }
 0x2ec   :  { %v1034_v1 = vsel %vm321_vm0, %v1032_v48, 0.0 }
 0x2ed   :  { %v1035_v10 = vrot.slane %v1034_v1, 4  ;;  %v1041_v21 = vsel %vm321_vm0, %v1033_v56, 0.0 }
 0x2ee   :  { %v1042_v29 = vrot.slane %v1041_v21, 4 }
 0x2ef   :  { %v1036_v40 = vadd.f32 %v1035_v10, %v1034_v1 }
 0x2f0   :  { %v1043_v55 = vadd.f32 %v1042_v29, %v1041_v21 }
 0x2f1   :  { %v1037_v2 = vrot.slane %v1036_v40, 2 }
 0x2f2   :  { %v1044_v15 = vrot.slane %v1043_v55, 2 }
 0x2f3   :  { %v1038_v36 = vadd.f32 %v1037_v2, %v1036_v40 }
 0x2f4   :  { %v1045_v61 = vadd.f32 %v1044_v15, %v1043_v55 }
 0x2f5   :  { %v1039_v12 = vrot.slane %v1038_v36, 1 }
 0x2f6   :  { %v1046_v33 = vrot.slane %v1045_v61, 1 }
 0x2f7   :  { %v1040_v22 = vadd.f32 %v1039_v12, %v1038_v36 }
 0x2f8   :  { %v1047_v5 = vadd.f32 %v1046_v33, %v1045_v61 }
 0x2fa   :  { %v1050_v60 = vcombine.low %v1040_v22, %v1047_v5 }
 0x2fc   :  { %v1057_v54 = vrot.slane %v1050_v60, %v2553_v28 }
 0x2fe   :  { %v1064_v42 = vrot.slane %v1057_v54, %v2553_v28 }
 0x300   :  { %1067 = vst.msk [vmem:[#allocation2 + $0x3] ss:$4 sm:$0x3] %vm2557_vm1, %v1064_v42 }
 0x301   :  { %1646 = shalt.err (!%p1643_p4)
}
 0x302   :  { %s1647_s6 = scalar_lea.hbm %s2619_s5, 128 }
 0x303   :  { %p1648_p5 = scmp.ne.s32.totalorder %s2619_s5, %s1647_s6  ;;  %p1651_p6 = scmp.lt.u32.totalorder %s1647_s6, %s2619_s5 }
 0x305   :  { %p1653_p7 = pnand %p1651_p6, %p1648_p5 }
 0x307   :  { %1656 = shalt.err (!%p1653_p7)
}
 0x308   :  { %1077 = dma.vmem_to_hbm [thread:$0]  %s1075_s27, 128, %s2619_s5, [#allocation3]  }
 0x309   :  { %1657 = dma.done.wait [#allocation3], 128  }
 0x30a   :  { %1658 = vsyncadd [#allocation3], 4294967168 }
 0x30b   :  { %1081 = vsyncpa [#allocation3], 1 }

// kernel: sentence_four_forward.4
= control target key start
LH: loop header
LB: loop body
LE: loop exit
PB: predicated region body
PF: predicated region fallthrough
CT: control target
= control target key end

     0   :  { %s7765_s0 = inlined_call_operand.vmem [shape: f32[5,64,256], index: 0, kind: input, shape index: {}]   ;;  %s7766_s1 = inlined_call_operand.hbm [shape: f32[5,64,64], index: 1, kind: input, shape index: {}]   ;;  %s7767_s2 = inlined_call_operand.hbm [shape: f32[5,256,768], index: 2, kind: input, shape index: {}]   ;;  %s7768_s3 = inlined_call_operand.hbm [shape: f32[5,1,768], index: 3, kind: input, shape index: {}]   ;;  %s7769_s4 = inlined_call_operand.vmem [shape: f32[5,256,256], index: 4, kind: input, shape index: {}]   ;;  %s7770_s5 = inlined_call_operand.hbm [shape: f32[5,1,256], index: 5, kind: input, shape index: {}]   ;;  %s7771_s6 = inlined_call_operand.hbm [shape: f32[5,256,512], index: 6, kind: input, shape index: {}]   ;;  %s7772_s7 = inlined_call_operand.hbm [shape: f32[5,1,512], index: 7, kind: input, shape index: {}]   ;;  %s7773_s8 = inlined_call_operand.hbm [shape: f32[5,512,256], index: 8, kind: input, shape index: {}]   ;;  %s7774_s9 = inlined_call_operand.hbm [shape: f32[5,1,256], index: 9, kind: input, shape index: {}]   ;;  %s7775_s10 = inlined_call_operand.vmem [shape: f32[5,1,256], index: 10, kind: input, shape index: {}, may-alias: {10,12,14}]   ;;  %s7776_s11 = inlined_call_operand.vmem [shape: f32[5,1,256], index: 11, kind: input, shape index: {}, may-alias: {11,13,15}]   ;;  %s7777_s12 = inlined_call_operand.vmem [shape: f32[5,1,256], index: 12, kind: input, shape index: {}, may-alias: {10,12,14}]   ;;  %s7778_s13 = inlined_call_operand.vmem [shape: f32[5,1,256], index: 13, kind: input, shape index: {}, may-alias: {11,13,15}]   ;;  %s7779_s14 = inlined_call_operand.vmem [shape: f32[5,1,256], index: 14, kind: input, shape index: {}, may-alias: {10,12,14}]   ;;  %s7780_s15 = inlined_call_operand.vmem [shape: f32[5,1,256], index: 15, kind: input, shape index: {}, may-alias: {11,13,15}]   ;;  %s7781_s16 = inlined_call_operand.vmem [shape: f32[5,64,256], index: 16, kind: output, shape index: {}]  }
   0x1   :  { %7794 = sst [smem:[#allocation23_spill]] %s7765_s0 }
   0x2   :  { %7795 = sst [smem:[#allocation24_spill]] %s7766_s1 }
   0x3   :  { %7796 = sst [smem:[#allocation25_spill]] %s7767_s2 }
   0x4   :  { %7797 = sst [smem:[#allocation26_spill]] %s7769_s4 }
   0x5   :  { %7798 = sst [smem:[#allocation27_spill]] %s7770_s5 }
   0x6   :  { %7799 = sst [smem:[#allocation28_spill]] %s7772_s7 }
   0x7   :  { %7800 = sst [smem:[#allocation29_spill]] %s7777_s12 }
   0x8   :  { %7801 = sst [smem:[#allocation30_spill]] %s7778_s13 }
   0x9   :  { %7802 = sst [smem:[#allocation31_spill]] %s7779_s14 }
   0xa   :  { %7803 = sst [smem:[#allocation32_spill]] %s7780_s15 }
   0xb   :  { %7804 = sst [smem:[#allocation33_spill]] %s7781_s16 }
   0xc   :  { %21 = vsyncpa [#allocation3], 0 }
   0xd   :  { %23 = vsyncpa [#allocation3 + $0x1], 0 }
   0xe   :  { %24 = vsyncpa [#allocation5], 0 }
   0xf   :  { %26 = vsyncpa [#allocation5 + $0x1], 0 }
  0x10   :  { %27 = vsyncpa [#allocation8], 0 }
  0x11   :  { %29 = vsyncpa [#allocation8 + $0x1], 0 }
  0x12   :  { %30 = vsyncpa [#allocation11], 0 }
  0x13   :  { %32 = vsyncpa [#allocation11 + $0x1], 0 }
  0x14   :  { %33 = vsyncpa [#allocation14], 0 }
  0x15   :  { %35 = vsyncpa [#allocation14 + $0x1], 0  ;;  %s5701_s21 = smov 0   ;;  %s5703_s22 = smov 0  }
  0x16   :  { %s5705_s23 = smov 0   ;;  %s5707_s24 = smov 0  }
  0x17 LB: > { %7805 = sst [smem:[#allocation20_spill]] %s5594_s23  ;;  %s5720_s25 = sadd.s32 4294967295, %s5598_s24   ;;  %s5598_s24 = sphi %s5707_s24, %s7835_s24   ;;  %s5594_s23 = sphi %s5705_s23, %s7837_s23   ;;  %s5590_s22 = sphi %s5703_s22, %s7839_s22   ;;  %s5586_s21 = sphi %s5701_s21, %s7838_s21  }
  0x18   : > { %s5723_s26 = sadd.s32 1, %s5598_s24   ;;  %s74_s28 = sadd.s32 1, %s5594_s23 }
  0x19   : > { %7806 = sst [smem:[#allocation21_spill]] %s5723_s26  ;;  %s71_s27 = ssub.s32 %s5598_s24, %s5723_s26 }
  0x1a   : > { %p72_p0 = scmp.eq.s32.totalorder %s71_s27, 0  ;;  %p81_p1 = scmp.ne.s32.totalorder %s5594_s23, %s5590_s22 }
  0x1b   : > { %p82_p2 = scmp.eq.s32.totalorder %s5598_s24, 0  ;;  %p87_p3 = scmp.ne.s32.totalorder %s5590_s22, %s5586_s21 }
  0x1c   : > { %s5733_s29 = scalar_select %p72_p0, %s5594_s23, %s74_s28  }
  0x1d   : > { %p83_p4 = por %p82_p2, %p81_p1  ;;  %p88_p5 = scmp.eq.s32.totalorder %s5720_s25, 0 }
  0x1e   : > { %7807 = sst [smem:[#allocation22_spill]] %s5733_s29  ;;  %p5091_p6 = scmp.lt.s32.totalorder %s5598_s24, 5 }
  0x1f   : > { %p5737_p7 = por %p88_p5, %p87_p3  ;;  %s5742_s0 = sand.u32 1, %s5594_s23  }
  0x20   : > { %p5744_p8 = pnand %p5091_p6, %p83_p4  ;;  %s5749_s18 = sand.u32 1, %s5598_s24  }
  0x21   : > { %s7808_s30 = scalar_select %p5737_p7, 1, 0 }
  0x22   : > { %s7809_s17 = scalar_select %p5744_p8, 1, 0 }
  0x23   : > { %s5044_s19 = smul.u32 1536, %s5742_s0  ;;  %s7810_s2 = sld [smem:[#allocation25_spill]] }
  0x24   : > { %s5045_s20 = smul.u32 24576, %s5598_s24  ;;  %p5765_p10 = pneg %p5744_p8 }
  0x25   : > { %s534_s29 = scalar_lea.vmem [#allocation4], %s5044_s19 }
  0x26   : > { %s541_s23 = sshll.u32 %s534_s29, 4  ;;  %s5758_s23 = int_to_ptr.vmem [resolvable:$true] %s541_s23 }
  0x29   : > { %s5756_s28 = scalar_lea.hbm %s7810_s2, %s5045_s20  ;;  %s5313_s27 = scalar_lea.hbm %s7810_s2, 122880 }
  0x2a   : > { %s5308_s16 = scalar_lea.hbm %s5756_s28, 24576  ;;  %p5314_p13 = scmp.lt.u32.totalorder %s5756_s28, %s7810_s2 }
  0x2b   : > { %p5309_p9 = scmp.ne.s32.totalorder %s5756_s28, %s5308_s16  ;;  %p5315_p0 = scmp.lt.u32.totalorder %s5313_s27, %s5308_s16 }
  0x2c   : > { %p5317_p2 = scmp.lt.u32.totalorder %s5308_s16, %s5756_s28 }
  0x2d   : > { %p5311_p11 = pnand %p5765_p10, %p5309_p9  ;;  %p5316_p1 = por %p5315_p0, %p5314_p13 }
  0x2f   : > { %p5312_p12 = pneg %p5311_p11  ;;  %p5318_p3 = por %p5317_p2, %p5316_p1 }
  0x31   : > { %p5319_p4 = pnand %p5318_p3, %p5312_p12 }
  0x33   : > { %5322 = shalt.err (!%p5319_p4)
}
  0x34   : > { %s5323_s26 = scalar_lea.vmem %s5758_s23, 24576  ;;  %s5600_s20 = smov [#allocation4]  }
  0x35   : > { %p5324_p5 = scmp.ne.s32.totalorder %s5758_s23, %s5323_s26  ;;  %s5328_s21 = sshll.u32 %s5600_s20, 4  ;;  %s5329_s21 = int_to_ptr.vmem [resolvable:$false] %s5328_s21 }
  0x36   : > { %s5330_s19 = scalar_lea.vmem %s5329_s21, 49152  ;;  %p5331_p11 = scmp.lt.s32.totalorder %s5758_s23, %s5329_s21 }
  0x37   : > { %p5326_p6 = pnand %p5324_p5, %p5765_p10  ;;  %p5332_p7 = scmp.lt.s32.totalorder %s5330_s19, %s5323_s26 }
  0x39   : > { %p5327_p9 = pneg %p5326_p6  ;;  %p5333_p13 = por %p5332_p7, %p5331_p11 }
  0x3b   : > { %p5334_p0 = pnand %p5333_p13, %p5327_p9 }
  0x3d   : > { %5337 = shalt.err (!%p5334_p0)
}
  0x3e   : > { %s5601_s16 = smov 768   ;;  %s5602_s27 = smov 48  }
  0x3f   : > { %s7812_s29 = scalar_lea.sflag [#allocation5], %s5749_s18  ;;  %p4238_p7 = scmp.ge.s32.totalorder %s5598_s24, 1 }
  0x40   : > { %5072 = dma.hbm_to_vmem [thread:$0]  (!%p5744_p8), %s5756_s28, 24576, %s5758_s23, %s7812_s29, %s5601_s16, %s5601_s16, %s5602_s27  }
  0x41   : > { %p717_p12 = scmp.lt.s32.totalorder %s5598_s24, 6  ;;  %s7786_s26 = sshll.u32 %s5742_s0, 1 }
  0x42   : > { %s7787_s21 = sshll.u32 %s5598_s24, 5  ;;  %s582_s19 = scalar_lea.vmem [#allocation7], %s7786_s26 }
  0x43   : > { %p5793_p1 = pnand %p4238_p7, %p717_p12  ;;  %s590_s2 = sshll.u32 %s582_s19, 4  ;;  %s591_s2 = int_to_ptr.vmem [resolvable:$true] %s590_s2 }
  0x44   : > { %s7814_s5 = sld [smem:[#allocation27_spill]]  ;;  %s7790_s23 = scalar_lea.sflag [#allocation8], %s5749_s18 }
  0x45   : > { %s7813_s20 = scalar_select %p5793_p1, 1, 0 }
  0x4a   : > { %s5805_s12 = scalar_lea.hbm %s7814_s5, %s7787_s21  ;;  %s5343_s29 = scalar_lea.hbm %s7814_s5, 160 }
  0x4b   : > { %s5338_s28 = scalar_lea.hbm %s5805_s12, 32  ;;  %p5344_p5 = scmp.lt.u32.totalorder %s5805_s12, %s7814_s5 }
  0x4c   : > { %p5339_p2 = scmp.ne.s32.totalorder %s5805_s12, %s5338_s28  ;;  %p5345_p6 = scmp.lt.u32.totalorder %s5343_s29, %s5338_s28 }
  0x4d   : > { %p5347_p11 = scmp.lt.u32.totalorder %s5338_s28, %s5805_s12 }
  0x4e   : > { %p5341_p3 = pnand %p5339_p2, %p5765_p10  ;;  %p5346_p9 = por %p5345_p6, %p5344_p5 }
  0x50   : > { %p5342_p4 = pneg %p5341_p3  ;;  %p5348_p13 = por %p5347_p11, %p5346_p9 }
  0x52   : > { %p5349_p0 = pnand %p5348_p13, %p5342_p4 }
  0x54   : > { %5352 = shalt.err (!%p5349_p0)
}
  0x55   : > { %s5353_s13 = scalar_lea.vmem %s591_s2, 32  ;;  %s5603_s14 = smov [#allocation7]  }
  0x56   : > { %p5354_p7 = scmp.ne.s32.totalorder %s591_s2, %s5353_s13  ;;  %s5358_s21 = sshll.u32 %s5603_s14, 4  ;;  %s5359_s21 = int_to_ptr.vmem [resolvable:$false] %s5358_s21 }
  0x57   : > { %s5360_s16 = scalar_lea.vmem %s5359_s21, 64  ;;  %p5361_p3 = scmp.lt.s32.totalorder %s591_s2, %s5359_s21 }
  0x58   : > { %p5356_p12 = pnand %p5354_p7, %p5765_p10  ;;  %p5362_p1 = scmp.lt.s32.totalorder %s5360_s16, %s5353_s13 }
  0x5a   : > { %p5357_p2 = pneg %p5356_p12  ;;  %p5363_p8 = por %p5362_p1, %p5361_p3 }
  0x5c   : > { %p5364_p5 = pnand %p5363_p8, %p5357_p2 }
  0x5e   : > { %5367 = shalt.err (!%p5364_p5)
}
  0x5f   : > { %p7815_p6 = scmp.ne.s32.totalorder %s7809_s17, 0  ;;  %s4229_s26 = sshll.u32 %s5742_s0, 2 }
  0x60   : > { %s4278_s28 = sshll.u32 %s5598_s24, 6  ;;  %s7816_s7 = sld [smem:[#allocation28_spill]] }
  0x61   : > { %5078 = dma.hbm_to_vmem [thread:$0]  (!%p7815_p6), %s5805_s12, 32, %s591_s2, %s7790_s23  }
  0x62   : > { %s622_s19 = scalar_lea.vmem [#allocation10], %s4229_s26  ;;  %s7791_s14 = scalar_lea.sflag [#allocation11], %s5749_s18 }
  0x63   : > { %s630_s13 = sshll.u32 %s622_s19, 4  ;;  %s631_s13 = int_to_ptr.vmem [resolvable:$true] %s630_s13 }
  0x66   : > { %s5832_s21 = scalar_lea.hbm %s7816_s7, %s4278_s28  ;;  %s5373_s23 = scalar_lea.hbm %s7816_s7, 320 }
  0x67   : > { %s5368_s16 = scalar_lea.hbm %s5832_s21, 64  ;;  %p5374_p9 = scmp.lt.u32.totalorder %s5832_s21, %s7816_s7 }
  0x68   : > { %p5369_p8 = scmp.ne.s32.totalorder %s5832_s21, %s5368_s16  ;;  %p5375_p11 = scmp.lt.u32.totalorder %s5373_s23, %s5368_s16 }
  0x69   : > { %p5377_p0 = scmp.lt.u32.totalorder %s5368_s16, %s5832_s21 }
  0x6a   : > { %p5371_p1 = pnand %p5369_p8, %p5765_p10  ;;  %p5376_p13 = por %p5375_p11, %p5374_p9 }
  0x6c   : > { %p5372_p4 = pneg %p5371_p1  ;;  %p5378_p7 = por %p5377_p0, %p5376_p13 }
  0x6e   : > { %p5379_p12 = pnand %p5378_p7, %p5372_p4 }
  0x70   : > { %5382 = shalt.err (!%p5379_p12)
}
  0x71   : > { %s5383_s26 = scalar_lea.vmem %s631_s13, 64  ;;  %s5604_s29 = smov [#allocation10]  }
  0x72   : > { %p5384_p2 = scmp.ne.s32.totalorder %s631_s13, %s5383_s26  ;;  %s5388_s19 = sshll.u32 %s5604_s29, 4  ;;  %s5389_s19 = int_to_ptr.vmem [resolvable:$false] %s5388_s19 }
  0x73   : > { %s5390_s2 = scalar_lea.vmem %s5389_s19, 128  ;;  %p5391_p8 = scmp.lt.s32.totalorder %s631_s13, %s5389_s19 }
  0x74   : > { %p5386_p3 = pnand %p5384_p2, %p5765_p10  ;;  %p5392_p1 = scmp.lt.s32.totalorder %s5390_s2, %s5383_s26 }
  0x76   : > { %p5387_p5 = pneg %p5386_p3  ;;  %p5393_p6 = por %p5392_p1, %p5391_p8 }
  0x78   : > { %p5394_p9 = pnand %p5393_p6, %p5387_p5 }
  0x7a   : > { %5397 = shalt.err (!%p5394_p9)
}
  0x7b   : > { %p7817_p11 = scmp.ne.s32.totalorder %s7809_s17, 0  ;;  %s4218_s23 = sshll.u32 %s5742_s0, 6 }
  0x7c   : > { %s4275_s16 = sshll.u32 %s5598_s24, 10  ;;  %s7818_s1 = sld [smem:[#allocation24_spill]] }
  0x7d   : > { %5084 = dma.hbm_to_vmem [thread:$0]  (!%p7817_p11), %s5832_s21, 64, %s631_s13, %s7791_s14  }
  0x7e   : > { %s513_s26 = scalar_lea.vmem [#allocation2], %s4218_s23  ;;  %s510_s19 = scalar_lea.sflag [#allocation3], %s5742_s0 }
  0x7f   : > { %s520_s29 = sshll.u32 %s513_s26, 4  ;;  %s5861_s29 = int_to_ptr.vmem [resolvable:$true] %s520_s29 }
  0x82   : > { %s5859_s28 = scalar_lea.hbm %s7818_s1, %s4275_s16  ;;  %s5403_s12 = scalar_lea.hbm %s7818_s1, 5120 }
  0x83   : > { %s5398_s2 = scalar_lea.hbm %s5859_s28, 1024  ;;  %p5404_p0 = scmp.lt.u32.totalorder %s5859_s28, %s7818_s1 }
  0x84   : > { %p5399_p6 = scmp.ne.s32.totalorder %s5859_s28, %s5398_s2  ;;  %p5405_p7 = scmp.lt.u32.totalorder %s5403_s12, %s5398_s2 }
  0x85   : > { %p5407_p2 = scmp.lt.u32.totalorder %s5398_s2, %s5859_s28 }
  0x86   : > { %p5401_p4 = pnand %p5399_p6, %p5765_p10  ;;  %p5406_p12 = por %p5405_p7, %p5404_p0 }
  0x88   : > { %p5402_p13 = pneg %p5401_p4  ;;  %p5408_p3 = por %p5407_p2, %p5406_p12 }
  0x8a   : > { %p5409_p5 = pnand %p5408_p3, %p5402_p13 }
  0x8c   : > { %5412 = shalt.err (!%p5409_p5)
}
  0x8d   : > { %s5413_s23 = scalar_lea.vmem %s5861_s29, 1024  ;;  %s5605_s26 = smov [#allocation2]  }
  0x8e   : > { %p5414_p8 = scmp.ne.s32.totalorder %s5861_s29, %s5413_s23  ;;  %s5418_s21 = sshll.u32 %s5605_s26, 4  ;;  %s5419_s21 = int_to_ptr.vmem [resolvable:$false] %s5418_s21 }
  0x8f   : > { %s5420_s13 = scalar_lea.vmem %s5419_s21, 2048  ;;  %p5421_p6 = scmp.lt.s32.totalorder %s5861_s29, %s5419_s21 }
  0x90   : > { %p5416_p1 = pnand %p5414_p8, %p5765_p10  ;;  %p5422_p4 = scmp.lt.s32.totalorder %s5420_s13, %s5413_s23 }
  0x92   : > { %p5417_p9 = pneg %p5416_p1  ;;  %p5423_p0 = por %p5422_p4, %p5421_p6 }
  0x94   : > { %p5424_p7 = pnand %p5423_p0, %p5417_p9 }
  0x96   : > { %5427 = shalt.err (!%p5424_p7)
}
  0x97   : > { %s5606_s2 = smov 128   ;;  %s5607_s12 = smov 8  }
  0x98   : > { %5069 = dma.hbm_to_vmem [thread:$0]  (!%p7817_p11), %s5859_s28, 1024, %s5861_s29, %s510_s19, %s5606_s2, %s5606_s2, %s5607_s12  }
  0x99   : > { %s5046_s16 = smul.u32 6, %s5742_s0  ;;  %s4226_s27 = sshll.u32 %s5742_s0, 10 }
  0x9a   : > { %s5047_s23 = smul.u32 96, %s5598_s24  ;;  %s4277_s26 = sshll.u32 %s5598_s24, 14 }
  0x9b   : > { %s555_s1 = scalar_lea.vmem [#allocation6], %s5046_s16  ;;  %s5901_s28 = scalar_lea.hbm %s7771_s6, %s4277_s26 }
  0x9c   : > { %s5894_s14 = scalar_lea.hbm %s7768_s3, %s5047_s23  ;;  %s563_s5 = sshll.u32 %s555_s1, 4  ;;  %s564_s5 = int_to_ptr.vmem [resolvable:$true] %s563_s5 }
  0x9d   : > { %s5428_s29 = scalar_lea.hbm %s5894_s14, 96  ;;  %s5433_s12 = scalar_lea.hbm %s7768_s3, 480 }
  0x9e   : > { %p5429_p13 = scmp.ne.s32.totalorder %s5894_s14, %s5428_s29  ;;  %p5434_p3 = scmp.lt.u32.totalorder %s5894_s14, %s7768_s3 }
  0x9f   : > { %p5435_p5 = scmp.lt.u32.totalorder %s5433_s12, %s5428_s29  ;;  %p5437_p1 = scmp.lt.u32.totalorder %s5428_s29, %s5894_s14 }
  0xa0   : > { %p5431_p12 = pnand %p5429_p13, %p5765_p10 }
  0xa1   : > { %p5436_p8 = por %p5435_p5, %p5434_p3 }
  0xa2   : > { %p5432_p2 = pneg %p5431_p12 }
  0xa3   : > { %p5438_p9 = por %p5437_p1, %p5436_p8 }
  0xa5   : > { %p5439_p6 = pnand %p5438_p9, %p5432_p2 }
  0xa7   : > { %5442 = shalt.err (!%p5439_p6)
}
  0xa8   : > { %s5443_s1 = scalar_lea.vmem %s564_s5, 96  ;;  %s5608_s4 = smov [#allocation6]  }
  0xa9   : > { %p5444_p4 = scmp.ne.s32.totalorder %s564_s5, %s5443_s1  ;;  %s5448_s7 = sshll.u32 %s5608_s4, 4  ;;  %s5449_s7 = int_to_ptr.vmem [resolvable:$false] %s5448_s7 }
  0xaa   : > { %s5450_s16 = scalar_lea.vmem %s5449_s7, 192  ;;  %p5451_p13 = scmp.lt.s32.totalorder %s564_s5, %s5449_s7 }
  0xab   : > { %p5446_p0 = pnand %p5444_p4, %p5765_p10  ;;  %p5452_p12 = scmp.lt.s32.totalorder %s5450_s16, %s5443_s1 }
  0xad   : > { %p5447_p7 = pneg %p5446_p0  ;;  %p5453_p11 = por %p5452_p12, %p5451_p13 }
  0xaf   : > { %p5454_p3 = pnand %p5453_p11, %p5447_p7 }
  0xb1   : > { %5457 = shalt.err (!%p5454_p3)
}
  0xb2   : > { %p7819_p5 = scmp.ne.s32.totalorder %s7809_s17, 0  ;;  %s7820_s13 = scalar_lea.sflag [#allocation5], %s5749_s18 }
  0xb3   : > { %s601_s29 = scalar_lea.vmem [#allocation9], %s4226_s27  ;;  %s5458_s2 = scalar_lea.hbm %s5901_s28, 16384 }
  0xb4   : > { %5075 = dma.hbm_to_vmem [thread:$0]  (!%p7819_p5), %s5894_s14, 96, %s564_s5, %s7820_s13  }
  0xb5   : > { %s608_s19 = sshll.u32 %s601_s29, 4  ;;  %p5459_p11 = scmp.ne.s32.totalorder %s5901_s28, %s5458_s2  ;;  %s5924_s19 = int_to_ptr.vmem [resolvable:$true] %s608_s19 }
  0xb6   : > { %s5463_s21 = scalar_lea.hbm %s7771_s6, 81920  ;;  %p5464_p1 = scmp.lt.u32.totalorder %s5901_s28, %s7771_s6 }
  0xb7   : > { %p5461_p2 = pnand %p5459_p11, %p5765_p10  ;;  %p5465_p9 = scmp.lt.u32.totalorder %s5463_s21, %s5458_s2 }
  0xb8   : > { %p5467_p4 = scmp.lt.u32.totalorder %s5458_s2, %s5901_s28 }
  0xb9   : > { %p5462_p8 = pneg %p5461_p2  ;;  %p5466_p6 = por %p5465_p9, %p5464_p1 }
  0xbb   : > { %p5468_p0 = por %p5467_p4, %p5466_p6 }
  0xbd   : > { %p5469_p7 = pnand %p5468_p0, %p5462_p8 }
  0xbf   : > { %5472 = shalt.err (!%p5469_p7)
}
  0xc0   : > { %s5473_s5 = scalar_lea.vmem %s5924_s19, 16384  ;;  %s5609_s14 = smov [#allocation9]  }
  0xc1   : > { %p5474_p13 = scmp.ne.s32.totalorder %s5924_s19, %s5473_s5  ;;  %s5478_s7 = sshll.u32 %s5609_s14, 4  ;;  %s5479_s7 = int_to_ptr.vmem [resolvable:$false] %s5478_s7 }
  0xc2   : > { %s5480_s16 = scalar_lea.vmem %s5479_s7, 32768  ;;  %p5481_p11 = scmp.lt.s32.totalorder %s5924_s19, %s5479_s7 }
  0xc3   : > { %p5476_p12 = pnand %p5474_p13, %p5765_p10  ;;  %p5482_p2 = scmp.lt.s32.totalorder %s5480_s16, %s5473_s5 }
  0xc5   : > { %p5477_p3 = pneg %p5476_p12  ;;  %p5483_p1 = por %p5482_p2, %p5481_p11 }
  0xc7   : > { %p5484_p9 = pnand %p5483_p1, %p5477_p3 }
  0xc9   : > { %5487 = shalt.err (!%p5484_p9)
}
  0xca   : > { %s5610_s13 = smov 512   ;;  %s5611_s29 = smov 32  }
  0xcb   : > { %s7821_s2 = scalar_lea.sflag [#allocation8], %s5749_s18  ;;  %s5954_s21 = scalar_lea.hbm %s7773_s8, %s4277_s26 }
  0xcc   : > { %5081 = dma.hbm_to_vmem [thread:$0]  (!%p7819_p5), %s5901_s28, 16384, %s5924_s19, %s7821_s2, %s5610_s13, %s5610_s13, %s5611_s29  }
  0xcd   : > { %s641_s1 = scalar_lea.vmem [#allocation12], %s4226_s27  ;;  %s5488_s5 = scalar_lea.hbm %s5954_s21, 16384 }
  0xce   : > { %s648_s4 = sshll.u32 %s641_s1, 4  ;;  %p5489_p8 = scmp.ne.s32.totalorder %s5954_s21, %s5488_s5  ;;  %s5958_s4 = int_to_ptr.vmem [resolvable:$true] %s648_s4 }
  0xcf   : > { %s5493_s14 = scalar_lea.hbm %s7773_s8, 81920  ;;  %p5494_p0 = scmp.lt.u32.totalorder %s5954_s21, %s7773_s8 }
  0xd0   : > { %p5491_p6 = pnand %p5489_p8, %p5765_p10  ;;  %p5495_p7 = scmp.lt.u32.totalorder %s5493_s14, %s5488_s5 }
  0xd1   : > { %p5497_p12 = scmp.lt.u32.totalorder %s5488_s5, %s5954_s21 }
  0xd2   : > { %p5492_p4 = pneg %p5491_p6  ;;  %p5496_p13 = por %p5495_p7, %p5494_p0 }
  0xd4   : > { %p5498_p3 = por %p5497_p12, %p5496_p13 }
  0xd6   : > { %p5499_p11 = pnand %p5498_p3, %p5492_p4 }
  0xd8   : > { %5502 = shalt.err (!%p5499_p11)
}
  0xd9   : > { %s5503_s27 = scalar_lea.vmem %s5958_s4, 16384  ;;  %s5612_s16 = smov [#allocation12]  }
  0xda   : > { %p5504_p2 = scmp.ne.s32.totalorder %s5958_s4, %s5503_s27  ;;  %s5508_s13 = sshll.u32 %s5612_s16, 4  ;;  %s5509_s13 = int_to_ptr.vmem [resolvable:$false] %s5508_s13 }
  0xdb   : > { %s5510_s29 = scalar_lea.vmem %s5509_s13, 32768  ;;  %p5511_p8 = scmp.lt.s32.totalorder %s5958_s4, %s5509_s13 }
  0xdc   : > { %p5506_p1 = pnand %p5504_p2, %p5765_p10  ;;  %p5512_p6 = scmp.lt.s32.totalorder %s5510_s29, %s5503_s27 }
  0xde   : > { %p5507_p9 = pneg %p5506_p1  ;;  %p5513_p0 = por %p5512_p6, %p5511_p8 }
  0xe0   : > { %p5514_p7 = pnand %p5513_p0, %p5507_p9 }
  0xe2   : > { %5517 = shalt.err (!%p5514_p7)
}
  0xe3   : > { %s5613_s2 = smov 256   ;;  %s5614_s12 = smov 16  }
  0xe4   : > { %s7822_s23 = scalar_lea.sflag [#allocation11], %s5749_s18  ;;  %s7823_s1 = sshll.u32 %s5598_s24, 5 }
  0xe5   : > { %5087 = dma.hbm_to_vmem [thread:$0]  (!%p7819_p5), %s5954_s21, 16384, %s5958_s4, %s7822_s23, %s5613_s2, %s5613_s2, %s5614_s12  }
  0xe6   : > { %s5988_s19 = scalar_lea.hbm %s7774_s9, %s7823_s1  ;;  %s7824_s14 = sshll.u32 %s5742_s0, 1 }
  0xe7   : > { %s662_s26 = scalar_lea.vmem [#allocation13], %s7824_s14  ;;  %s659_s27 = scalar_lea.sflag [#allocation14], %s5742_s0 }
  0xe8   : > { %s670_s7 = sshll.u32 %s662_s26, 4  ;;  %s5518_s16 = scalar_lea.hbm %s5988_s19, 32  ;;  %s671_s7 = int_to_ptr.vmem [resolvable:$true] %s670_s7 }
  0xe9   : > { %p5519_p4 = scmp.ne.s32.totalorder %s5988_s19, %s5518_s16  ;;  %s5523_s21 = scalar_lea.hbm %s7774_s9, 160 }
  0xea   : > { %p5524_p3 = scmp.lt.u32.totalorder %s5988_s19, %s7774_s9  ;;  %p5525_p11 = scmp.lt.u32.totalorder %s5523_s21, %s5518_s16 }
  0xeb   : > { %p5521_p13 = pnand %p5519_p4, %p5765_p10  ;;  %p5527_p1 = scmp.lt.u32.totalorder %s5518_s16, %s5988_s19 }
  0xec   : > { %p5526_p2 = por %p5525_p11, %p5524_p3 }
  0xed   : > { %p5522_p12 = pneg %p5521_p13 }
  0xee   : > { %p5528_p9 = por %p5527_p1, %p5526_p2 }
  0xf0   : > { %p5529_p8 = pnand %p5528_p9, %p5522_p12 }
  0xf2   : > { %5532 = shalt.err (!%p5529_p8)
}
  0xf3   : > { %s5533_s0 = scalar_lea.vmem %s671_s7, 32  ;;  %s5615_s29 = smov [#allocation13]  }
  0xf4   : > { %p5534_p6 = scmp.ne.s32.totalorder %s671_s7, %s5533_s0  ;;  %s5538_s2 = sshll.u32 %s5615_s29, 4  ;;  %s5539_s2 = int_to_ptr.vmem [resolvable:$false] %s5538_s2 }
  0xf5   : > { %s5540_s12 = scalar_lea.vmem %s5539_s2, 64  ;;  %p5541_p4 = scmp.lt.s32.totalorder %s671_s7, %s5539_s2 }
  0xf6   : > { %p5536_p0 = pnand %p5534_p6, %p5765_p10  ;;  %p5542_p13 = scmp.lt.s32.totalorder %s5540_s12, %s5533_s0 }
  0xf8   : > { %p5537_p7 = pneg %p5536_p0  ;;  %p5543_p5 = por %p5542_p13, %p5541_p4 }
  0xfa   : > { %p5544_p3 = pnand %p5543_p5, %p5537_p7 }
  0xfc   : > { %5547 = shalt.err (!%p5544_p3)
}
  0xfd   : > { %p7825_p11 = scmp.ne.s32.totalorder %s7809_s17, 0  ;;  %p7826_p12 = scmp.ne.s32.totalorder %s7813_s20, 0 }
  0xfe   : > { %s6013_s15 = sand.u32 (!%p7826_p12), 1, %s5590_s22   ;;  %p7827_p10 = scmp.ne.s32.totalorder (!%p7826_p12), %s7808_s30, 0 }
  0xff   : > { %5090 = dma.hbm_to_vmem [thread:$0]  (!%p7825_p11), %s5988_s19, 32, %s671_s7, %s659_s27  }
 0x100   : > { %721 = sbr.rel (%p7826_p12) target bundleno = 3567 (0xdef), region = 84  ;;  %s4239_s23 = sshll.u32 (!%p7826_p12), %s6013_s15, 6 }
 0x101   : > { %s724_s1 = scalar_lea.sflag (!%p7826_p12), [#allocation3], %s6013_s15  ;;  %s6017_s5 = scalar_lea.vmem (!%p7826_p12), [#allocation2], %s4239_s23 }
 0x107   : > { %5565 = dma.done.wait (%p7827_p10), %s724_s1, 1024  }
 0x108   : > { %5567 = vsyncadd (%p7827_p10), %s724_s1, 4294966272  ;;  %s732_s17 = sand.u32 1, %s5720_s25   ;;  %s5048_s20 = smul.u32 1536, %s6013_s15 }
 0x109   : > { %s733_s28 = scalar_lea.sflag [#allocation5], %s732_s17 }
 0x10a   : > { %s6025_s19 = scalar_lea.vmem [#allocation4], %s5048_s20 }
 0x10b   : > { %5569 = dma.done.wait (%p7827_p10), %s733_s28, 24672  }
 0x10c   : > { %5571 = vsyncadd (%p7827_p10), %s733_s28, 4294942624  ;;  %s5049_s14 = smul.u32 6, %s6013_s15  ;;  %s4240_s26 = sshll.u32 %s6013_s15, 1 }
 0x10d   : > { %s751_s27 = scalar_lea.sflag [#allocation8], %s732_s17  ;;  %s6035_s16 = scalar_lea.vmem [#allocation7], %s4240_s26 }
 0x10e   : > { %s6033_s7 = scalar_lea.vmem [#allocation6], %s5049_s14 }
 0x10f   : > { %5573 = dma.done.wait (%p7827_p10), %s751_s27, 16416  }
 0x110   : > { %5575 = vsyncadd (%p7827_p10), %s751_s27, 4294950880  ;;  %s4241_s24 = sshll.u32 %s6013_s15, 10  ;;  %s4242_s18 = sshll.u32 %s6013_s15, 2 }
 0x111   : > { %s6043_s21 = scalar_lea.vmem [#allocation9], %s4241_s24  ;;  %s769_s4 = scalar_lea.sflag [#allocation11], %s732_s17 }
 0x112   : > { %s6045_s13 = scalar_lea.vmem [#allocation10], %s4242_s18 }
 0x113   : > { %5577 = dma.done.wait (%p7827_p10), %s769_s4, 16448  }
 0x114   : > { %5579 = vsyncadd (%p7827_p10), %s769_s4, 4294950848  ;;  %s6051_s0 = scalar_lea.vmem [#allocation12], %s4241_s24  ;;  %s787_s29 = scalar_lea.sflag [#allocation14], %s6013_s15 }
 0x115   : > { %s6054_s2 = scalar_lea.vmem [#allocation13], %s4240_s26 }
 0x116   : > { %5581 = dma.done.wait (%p7827_p10), %s787_s29, 32  }
 0x117   : > { %5583 = vsyncadd (%p7827_p10), %s787_s29, 4294967264  ;;  %p908_p5 = scmp.lt.s32.totalorder %s5720_s25, 4  ;;  %s7828_s17 = sld [smem:[#allocation23_spill]]  ;;  %v980_v24 = vld [vmem:[%s6025_s19 + $0x8] sm:$0xff]  ;;  %v986_v25 = vld [vmem:[%s6025_s19 + $0x38] sm:$0xff] }
 0x118   : > { %v979_v26 = vld [vmem:[%s6025_s19] sm:$0xff]  ;;  %v4460_v27 = vpack.c.bf16 %v986_v25, %v980_v24  ;;  %v985_v28 = vld [vmem:[%s6025_s19 + $0x30] sm:$0xff]  ;;  %v982_v29 = vld [vmem:[%s6025_s19 + $0x18] sm:$0xff]  ;;  %s7829_s18 = sld [smem:[#allocation26_spill]]  ;;  %s7830_s29 = sld [smem:[#allocation29_spill]] }
 0x119   : > { %s7841_s25 = smov (!%p908_p5, %s5720_s25), 4  ;;  %v988_v30 = vld [vmem:[%s6025_s19 + $0x48] sm:$0xff]  ;;  %v4462_v31 = vpack.c.bf16 %v985_v28, %v979_v26  ;;  %v981_v33 = vld [vmem:[%s6025_s19 + $0x10] sm:$0xff]  ;;  %v987_v34 = vld [vmem:[%s6025_s19 + $0x40] sm:$0xff]  ;;  %s7833_s27 = sld [smem:[#allocation32_spill]] }
 0x11a   : > { %s4281_s12 = sshll.u32 %s7841_s25, 7  ;;  %v4524_v32 = vpack.c.bf16 %v988_v30, %v982_v29  ;;  %v992_v35 = vld [vmem:[%s6025_s19 + $0x68] sm:$0xff]  ;;  %4461 = vmatprep.subr.bf16.mxu0 %v4460_v27  ;;  %v4526_v36 = vpack.c.bf16 %v987_v34, %v981_v33  ;;  %v998_v37 = vld [vmem:[%s6025_s19 + $0x98] sm:$0xff]  ;;  %v991_v38 = vld [vmem:[%s6025_s19 + $0x60] sm:$0xff]  ;;  %s6347_s30 = sshll.u32 %s7841_s25, 1 }
 0x11b   : > { %v997_v39 = vld [vmem:[%s6025_s19 + $0x90] sm:$0xff]  ;;  %4463 = vmatpush1.bf16.msra.mxu0 %v4462_v31  ;;  %v4464_v40 = vpack.c.bf16 %v998_v37, %v992_v35  ;;  %v994_v42 = vld [vmem:[%s6025_s19 + $0x78] sm:$0xff]  ;;  %v1000_v43 = vld [vmem:[%s6025_s19 + $0xa8] sm:$0xff]  ;;  %s921_s14 = scalar_lea.vmem %s7775_s10, %s6347_s30  ;;  %s925_s24 = scalar_lea.vmem %s7776_s11, %s6347_s30 }
 0x11c   : > { %4525 = vmatprep.subr.bf16.mxu1 %v4524_v32  ;;  %v4466_v41 = vpack.c.bf16 %v997_v39, %v991_v38  ;;  %v993_v44 = vld [vmem:[%s6025_s19 + $0x70] sm:$0xff]  ;;  %v4528_v45 = vpack.c.bf16 %v1000_v43, %v994_v42  ;;  %v999_v46 = vld [vmem:[%s6025_s19 + $0xa0] sm:$0xff]  ;;  %v1004_v47 = vld [vmem:[%s6025_s19 + $0xc8] sm:$0xff] }
 0x11d   : > { %s6070_s15 = scalar_lea.vmem %s7828_s17, %s4281_s12  ;;  %4527 = vmatpush1.bf16.msra.mxu1 %v4526_v36  ;;  %v1010_v48 = vld [vmem:[%s6025_s19 + $0xf8] sm:$0xff]  ;;  %4465 = vmatprep.subr.bf16.mxu0 %v4464_v40  ;;  %v4530_v49 = vpack.c.bf16 %v999_v46, %v993_v44  ;;  %v1003_v51 = vld [vmem:[%s6025_s19 + $0xc0] sm:$0xff]  ;;  %v1009_v52 = vld [vmem:[%s6025_s19 + $0xf0] sm:$0xff] }
 0x11e   : > { %v6073_v0 = vld [vmem:[%s6070_s15] sm:$0xff]  ;;  %v6076_v1 = vld [vmem:[%s6070_s15 + $0x8] sm:$0xff]  ;;  %v6087_v5 = vld [vmem:[%s6070_s15 + $0x10] sm:$0xff]  ;;  %v4468_v50 = vpack.c.bf16 %v1010_v48, %v1004_v47  ;;  %4529 = vmatprep.subr.bf16.mxu1 %v4528_v45  ;;  %v4470_v57 = vpack.c.bf16 %v1009_v52, %v1003_v51  ;;  %s929_s23 = scalar_lea.vmem %s7830_s29, %s6347_s30 }
 0x11f   : > { %v6079_v2 = vld [vmem:[%s6070_s15 + $0x20] sm:$0xff]  ;;  %v1497_v3 = vadd.f32 %v6076_v1, %v6073_v0  ;;  %v6084_v4 = vld [vmem:[%s6070_s15 + $0x28] sm:$0xff]  ;;  %v6090_v6 = vld [vmem:[%s6070_s15 + $0x18] sm:$0xff]  ;;  %4467 = vmatpush1.bf16.msra.mxu0 %v4466_v41 }
 0x120   : > { %v1503_v7 = vadd.f32 %v6084_v4, %v6079_v2  ;;  %v6095_v8 = vld [vmem:[%s6070_s15 + $0x30] sm:$0xff]  ;;  %v6098_v9 = vld [vmem:[%s6070_s15 + $0x38] sm:$0xff]  ;;  %v1500_v10 = vadd.f32 %v6090_v6, %v6087_v5  ;;  %v6105_v12 = vld [vmem:[%s6070_s15 + $0x40] sm:$0xff]  ;;  %4469 = vmatprep.subr.bf16.mxu0 %v4468_v50 }
 0x121   : > { %1498 = vadd.xlane.f32.xlu0 %v1497_v3  ;;  %v1506_v11 = vadd.f32 %v6098_v9, %v6095_v8  ;;  %v6108_v13 = vld [vmem:[%s6070_s15 + $0x48] sm:$0xff]  ;;  %v6111_v14 = vld [vmem:[%s6070_s15 + $0x50] sm:$0xff]  ;;  %v6114_v15 = vld [vmem:[%s6070_s15 + $0x58] sm:$0xff]  ;;  %4531 = vmatpush1.bf16.msra.mxu1 %v4530_v49 }
 0x122   : > { %1504 = vadd.xlane.f32.xlu1 %v1503_v7  ;;  %v1509_v16 = vadd.f32 %v6108_v13, %v6105_v12  ;;  %v1512_v17 = vadd.f32 %v6114_v15, %v6111_v14  ;;  %v6121_v18 = vld [vmem:[%s6070_s15 + $0x60] sm:$0xff]  ;;  %v6124_v19 = vld [vmem:[%s6070_s15 + $0x68] sm:$0xff]  ;;  %v6127_v20 = vld [vmem:[%s6070_s15 + $0x70] sm:$0xff] }
 0x123   : > { %v6130_v21 = vld [vmem:[%s6070_s15 + $0x78] sm:$0xff]  ;;  %v1515_v22 = vadd.f32 %v6124_v19, %v6121_v18  ;;  %v1012_v54 = vld [vmem:[%s6025_s19 + $0x108] sm:$0xff]  ;;  %v1005_v55 = vld [vmem:[%s6025_s19 + $0xd0] sm:$0xff]  ;;  %4471 = vmatpush1.bf16.msra.mxu0 %v4470_v57 }
 0x124   : > { %v1518_v23 = vadd.f32 %v6130_v21, %v6127_v20  ;;  %v1006_v53 = vld [vmem:[%s6025_s19 + $0xd8] sm:$0xff]  ;;  %v1011_v56 = vld [vmem:[%s6025_s19 + $0x100] sm:$0xff]  ;;  %v1016_v59 = vld [vmem:[%s6025_s19 + $0x128] sm:$0xff] }
 0x125   : > { %1501 = vadd.xlane.f32.xlu0 %v1500_v10  ;;  %v4532_v58 = vpack.c.bf16 %v1012_v54, %v1006_v53  ;;  %v1022_v60 = vld [vmem:[%s6025_s19 + $0x158] sm:$0xff]  ;;  %v1015_v61 = vld [vmem:[%s6025_s19 + $0x120] sm:$0xff]  ;;  %v4534_v62 = vpack.c.bf16 %v1011_v56, %v1005_v55  ;;  %v1021_v3 = vld [vmem:[%s6025_s19 + $0x150] sm:$0xff] }
 0x126   : > { %1507 = vadd.xlane.f32.xlu1 %v1506_v11  ;;  %v4472_v63 = vpack.c.bf16 %v1022_v60, %v1016_v59  ;;  %v1018_v7 = vld [vmem:[%s6025_s19 + $0x138] sm:$0xff]  ;;  %v1024_v10 = vld [vmem:[%s6025_s19 + $0x168] sm:$0xff]  ;;  %v4474_v24 = vpack.c.bf16 %v1021_v3, %v1015_v61  ;;  %v1027_v29 = vld [vmem:[%s6025_s19 + $0x180] sm:$0xff] }
 0x127   : > { %4533 = vmatprep.subr.bf16.mxu1 %v4532_v58  ;;  %v4536_v11 = vpack.c.bf16 %v1024_v10, %v1018_v7  ;;  %v1030_v25 = vld [vmem:[%s6025_s19 + $0x198] sm:$0xff]  ;;  %v1036_v26 = vld [vmem:[%s6025_s19 + $0x1c8] sm:$0xff]  ;;  %v1033_v30 = vld [vmem:[%s6025_s19 + $0x1b0] sm:$0xff] }
 0x128   : > { %4535 = vmatpush1.bf16.msra.mxu1 %v4534_v62  ;;  %4473 = vmatprep.subr.bf16.mxu0 %v4472_v63  ;;  %v1029_v31 = vld [vmem:[%s6025_s19 + $0x190] sm:$0xff]  ;;  %v4540_v32 = vpack.c.bf16 %v1036_v26, %v1030_v25  ;;  %v1035_v33 = vld [vmem:[%s6025_s19 + $0x1c0] sm:$0xff]  ;;  %v1040_v34 = vld [vmem:[%s6025_s19 + $0x1e8] sm:$0xff]  ;;  %v4478_v38 = vpack.c.bf16 %v1033_v30, %v1027_v29 }
 0x129   : > { %1510 = vadd.xlane.f32.xlu0 %v1509_v16  ;;  %v1017_v16 = vld [vmem:[%s6025_s19 + $0x130] sm:$0xff]  ;;  %4537 = vmatprep.subr.bf16.mxu1 %v4536_v11  ;;  %v1046_v35 = vld [vmem:[%s6025_s19 + $0x218] sm:$0xff]  ;;  %v1048_v37 = vld [vmem:[%s6025_s19 + $0x228] sm:$0xff]  ;;  %v4542_v39 = vpack.c.bf16 %v1035_v33, %v1029_v31 }
 0x12a   : > { %1513 = vadd.xlane.f32.xlu1 %v1512_v17  ;;  %v1023_v17 = vld [vmem:[%s6025_s19 + $0x160] sm:$0xff]  ;;  %v1042_v36 = vld [vmem:[%s6025_s19 + $0x1f8] sm:$0xff]  ;;  %4475 = vmatpush1.bf16.msra.mxu0 %v4474_v24  ;;  %v4480_v40 = vpack.c.bf16 %v1046_v35, %v1040_v34  ;;  %v1045_v42 = vld [vmem:[%s6025_s19 + $0x210] sm:$0xff] }
 0x12b   : > { %v4538_v27 = vpack.c.bf16 %v1023_v17, %v1017_v16  ;;  %v1039_v41 = vld [vmem:[%s6025_s19 + $0x1e0] sm:$0xff]  ;;  %v1041_v43 = vld [vmem:[%s6025_s19 + $0x1f0] sm:$0xff]  ;;  %v4544_v44 = vpack.c.bf16 %v1048_v37, %v1042_v36  ;;  %v1052_v46 = vld [vmem:[%s6025_s19 + $0x248] sm:$0xff] }
 0x12c   : > { %v1047_v45 = vld [vmem:[%s6025_s19 + $0x220] sm:$0xff]  ;;  %v1058_v47 = vld [vmem:[%s6025_s19 + $0x278] sm:$0xff]  ;;  %v1060_v49 = vld [vmem:[%s6025_s19 + $0x288] sm:$0xff]  ;;  %v4482_v50 = vpack.c.bf16 %v1045_v42, %v1039_v41 }
 0x12d   : > { %1516 = vadd.xlane.f32.xlu0 %v1515_v22  ;;  %v1028_v22 = vld [vmem:[%s6025_s19 + $0x188] sm:$0xff]  ;;  %4539 = vmatpush1.bf16.msra.mxu1 %v4538_v27  ;;  %v1054_v48 = vld [vmem:[%s6025_s19 + $0x258] sm:$0xff]  ;;  %v4546_v51 = vpack.c.bf16 %v1047_v45, %v1041_v43  ;;  %v4484_v52 = vpack.c.bf16 %v1058_v47, %v1052_v46  ;;  %v1051_v53 = vld [vmem:[%s6025_s19 + $0x240] sm:$0xff] }
 0x12e   : > { %1519 = vadd.xlane.f32.xlu1 %v1518_v23  ;;  %v1034_v23 = vld [vmem:[%s6025_s19 + $0x1b8] sm:$0xff]  ;;  %4541 = vmatprep.subr.bf16.mxu1 %v4540_v32  ;;  %v1057_v54 = vld [vmem:[%s6025_s19 + $0x270] sm:$0xff]  ;;  %v4548_v56 = vpack.c.bf16 %v1060_v49, %v1054_v48  ;;  %v1059_v57 = vld [vmem:[%s6025_s19 + $0x280] sm:$0xff] }
 0x12f   : > { %v4476_v28 = vpack.c.bf16 %v1034_v23, %v1028_v22  ;;  %v1053_v55 = vld [vmem:[%s6025_s19 + $0x250] sm:$0xff]  ;;  %v1064_v58 = vld [vmem:[%s6025_s19 + $0x2a8] sm:$0xff]  ;;  %v1070_v59 = vld [vmem:[%s6025_s19 + $0x2d8] sm:$0xff]  ;;  %v4486_v62 = vpack.c.bf16 %v1057_v54, %v1051_v53 }
 0x130   : > { %v1066_v60 = vld [vmem:[%s6025_s19 + $0x2b8] sm:$0xff]  ;;  %v1072_v61 = vld [vmem:[%s6025_s19 + $0x2e8] sm:$0xff]  ;;  %v4550_v63 = vpack.c.bf16 %v1059_v57, %v1053_v55  ;;  %v4488_v3 = vpack.c.bf16 %v1070_v59, %v1064_v58  ;;  %v1063_v7 = vld [vmem:[%s6025_s19 + $0x2a0] sm:$0xff] }
 0x131   : > { %4477 = vmatprep.subr.bf16.mxu0 %v4476_v28  ;;  %4543 = vmatpush1.bf16.msra.mxu1 %v4542_v39  ;;  %v1069_v10 = vld [vmem:[%s6025_s19 + $0x2d0] sm:$0xff]  ;;  %v4552_v11 = vpack.c.bf16 %v1072_v61, %v1066_v60  ;;  %v1071_v61 = vld [vmem:[%s6025_s19 + $0x2e0] sm:$0xff] }
 0x132   : > { %4479 = vmatpush1.bf16.msra.mxu0 %v4478_v38  ;;  %4545 = vmatprep.subr.bf16.mxu1 %v4544_v44  ;;  %v4490_v16 = vpack.c.bf16 %v1069_v10, %v1063_v7  ;;  %v1065_v60 = vld [vmem:[%s6025_s19 + $0x2b0] sm:$0xff]  ;;  %v1082_v7 = vld [vmem:[%s6025_s19 + $0x338] sm:$0xff] }
 0x133   : > { %4481 = vmatprep.subr.bf16.mxu0 %v4480_v40 }
 0x135   : > { %4547 = vmatpush1.bf16.msra.mxu1 %v4546_v51 }
 0x136   : > { %4483 = vmatpush1.bf16.msra.mxu0 %v4482_v50  ;;  %4549 = vmatprep.subr.bf16.mxu1 %v4548_v56 }
 0x137   : > { %4485 = vmatprep.subr.bf16.mxu0 %v4484_v52 }
 0x139   : > { %4551 = vmatpush1.bf16.msra.mxu1 %v4550_v63  ;;  %v4554_v63 = vpack.c.bf16 %v1071_v61, %v1065_v60  ;;  %v1113_v60 = vld [vmem:[%s6025_s19 + $0x430] sm:$0xff]  ;;  %v1119_v61 = vld [vmem:[%s6025_s19 + $0x460] sm:$0xff] }
 0x13a   : > { %4487 = vmatpush1.bf16.msra.mxu0 %v4486_v62  ;;  %4553 = vmatprep.subr.bf16.mxu1 %v4552_v11  ;;  %v1075_v11 = vld [vmem:[%s6025_s19 + $0x300] sm:$0xff] }
 0x13b   : > { %4489 = vmatprep.subr.bf16.mxu0 %v4488_v3  ;;  %v1076_v3 = vld [vmem:[%s6025_s19 + $0x308] sm:$0xff] }
 0x13c   : > { %v4492_v10 = vpack.c.bf16 %v1082_v7, %v1076_v3  ;;  %v1124_v3 = vld [vmem:[%s6025_s19 + $0x488] sm:$0xff]  ;;  %v1130_v7 = vld [vmem:[%s6025_s19 + $0x4b8] sm:$0xff] }
 0x13d   : > { %4555 = vmatpush1.bf16.msra.mxu1 %v4554_v63  ;;  %v4570_v63 = vpack.c.bf16 %v1119_v61, %v1113_v60  ;;  %v1161_v60 = vld [vmem:[%s6025_s19 + $0x5b0] sm:$0xff]  ;;  %v1167_v61 = vld [vmem:[%s6025_s19 + $0x5e0] sm:$0xff] }
 0x13e   : > { %4491 = vmatpush1.bf16.msra.mxu0 %v4490_v16  ;;  %v1081_v16 = vld [vmem:[%s6025_s19 + $0x330] sm:$0xff] }
 0x13f   : > { %4493 = vmatprep.subr.bf16.mxu0 %v4492_v10  ;;  %v4508_v10 = vpack.c.bf16 %v1130_v7, %v1124_v3  ;;  %v984_v3 = vld [vmem:[%s6025_s19 + $0x28] sm:$0xff]  ;;  %v990_v7 = vld [vmem:[%s6025_s19 + $0x58] sm:$0xff] }
 0x1ae   : > { %v1499_v17 = vpop.xlane.xlu0 %1498 }
 0x1af   : > { %v1522_v22 = vmul.f32 0.00390625, %v1499_v17  ;;  %v1505_v23 = vpop.xlane.xlu1 %1504  ;;  %v1078_v17 = vld [vmem:[%s6025_s19 + $0x318] sm:$0xff] }
 0x1b0   : > { %v1524_v24 = vmul.f32 0.00390625, %v1505_v23  ;;  %v1084_v23 = vld [vmem:[%s6025_s19 + $0x348] sm:$0xff] }
 0x1b1   : > { %v6199_v25 = vsub.f32 %v6073_v0, %v1522_v22  ;;  %v6202_v26 = vsub.f32 %v6076_v1, %v1522_v22  ;;  %v4494_v22 = vpack.c.bf16 %v1081_v16, %v1075_v11  ;;  %v1123_v11 = vld [vmem:[%s6025_s19 + $0x480] sm:$0xff]  ;;  %v1129_v16 = vld [vmem:[%s6025_s19 + $0x4b0] sm:$0xff] }
 0x1b2   : > { %v6205_v27 = vsub.f32 %v6079_v2, %v1524_v24  ;;  %v6208_v28 = vsub.f32 %v6084_v4, %v1524_v24  ;;  %v1502_v29 = vpop.xlane.xlu0 %1501  ;;  %v1077_v24 = vld [vmem:[%s6025_s19 + $0x310] sm:$0xff] }
 0x1b3   : > { %v1523_v30 = vmul.f32 0.00390625, %v1502_v29  ;;  %v1508_v31 = vpop.xlane.xlu1 %1507  ;;  %v1546_v32 = vmul.f32 %v6199_v25, %v6199_v25  ;;  %v1547_v0 = vmul.f32 %v6202_v26, %v6202_v26  ;;  %v1083_v29 = vld [vmem:[%s6025_s19 + $0x340] sm:$0xff]  ;;  %4495 = vmatpush1.bf16.msra.mxu0 %v4494_v22  ;;  %v4510_v22 = vpack.c.bf16 %v1129_v16, %v1123_v11 }
 0x1b4   : > { %v1525_v33 = vmul.f32 0.00390625, %v1508_v31  ;;  %v1550_v2 = vmul.f32 %v6205_v27, %v6205_v27  ;;  %v1551_v4 = vmul.f32 %v6208_v28, %v6208_v28  ;;  %v4558_v31 = vpack.c.bf16 %v1083_v29, %v1077_v24  ;;  %v1125_v24 = vld [vmem:[%s6025_s19 + $0x490] sm:$0xff]  ;;  %v1131_v29 = vld [vmem:[%s6025_s19 + $0x4c0] sm:$0xff] }
 0x1b5   : > { %v6215_v34 = vsub.f32 %v6087_v5, %v1523_v30  ;;  %v6218_v1 = vsub.f32 %v6090_v6, %v1523_v30  ;;  %v1562_v38 = vadd.f32 %v1547_v0, %v1546_v32  ;;  %v4556_v30 = vpack.c.bf16 %v1084_v23, %v1078_v17  ;;  %v1088_v32 = vld [vmem:[%s6025_s19 + $0x368] sm:$0xff]  ;;  %v1126_v17 = vld [vmem:[%s6025_s19 + $0x498] sm:$0xff] }
 0x1b6   : > { %v6225_v35 = vsub.f32 %v6095_v8, %v1525_v33  ;;  %v6228_v36 = vsub.f32 %v6098_v9, %v1525_v33  ;;  %v1511_v37 = vpop.xlane.xlu0 %1510  ;;  %v1568_v6 = vadd.f32 %v1551_v4, %v1550_v2  ;;  %v1094_v33 = vld [vmem:[%s6025_s19 + $0x398] sm:$0xff]  ;;  %v1087_v2 = vld [vmem:[%s6025_s19 + $0x360] sm:$0xff]  ;;  %v1093_v4 = vld [vmem:[%s6025_s19 + $0x390] sm:$0xff] }
 0x1b7   : > { %v1526_v39 = vmul.f32 0.00390625, %v1511_v37  ;;  %v1514_v5 = vpop.xlane.xlu1 %1513  ;;  %1563 = vadd.xlane.f32.xlu0 %v1562_v38  ;;  %v1548_v41 = vmul.f32 %v6215_v34, %v6215_v34  ;;  %v1549_v8 = vmul.f32 %v6218_v1, %v6218_v1  ;;  %4557 = vmatprep.subr.bf16.mxu1 %v4556_v30  ;;  %v4496_v0 = vpack.c.bf16 %v1094_v33, %v1088_v32  ;;  %v1090_v37 = vld [vmem:[%s6025_s19 + $0x378] sm:$0xff]  ;;  %v1132_v23 = vld [vmem:[%s6025_s19 + $0x4c8] sm:$0xff] }
 0x1b8   : > { %v1527_v40 = vmul.f32 0.00390625, %v1514_v5  ;;  %v1552_v9 = vmul.f32 %v6225_v35, %v6225_v35  ;;  %4559 = vmatpush1.bf16.msra.mxu1 %v4558_v31  ;;  %v4498_v38 = vpack.c.bf16 %v1093_v4, %v1087_v2  ;;  %v4572_v30 = vpack.c.bf16 %v1132_v23, %v1126_v17  ;;  %v1136_v32 = vld [vmem:[%s6025_s19 + $0x4e8] sm:$0xff]  ;;  %v1142_v33 = vld [vmem:[%s6025_s19 + $0x518] sm:$0xff]  ;;  %v1135_v2 = vld [vmem:[%s6025_s19 + $0x4e0] sm:$0xff] }
 0x1b9   : > { %v6233_v42 = vsub.f32 %v6105_v12, %v1526_v39  ;;  %v6236_v43 = vsub.f32 %v6108_v13, %v1526_v39  ;;  %v1553_v12 = vmul.f32 %v6228_v36, %v6228_v36  ;;  %v1565_v48 = vadd.f32 %v1549_v8, %v1548_v41  ;;  %v1096_v39 = vld [vmem:[%s6025_s19 + $0x3a8] sm:$0xff]  ;;  %4497 = vmatprep.subr.bf16.mxu0 %v4496_v0  ;;  %v1141_v4 = vld [vmem:[%s6025_s19 + $0x510] sm:$0xff] }
 0x1ba   : > { %v6243_v44 = vsub.f32 %v6111_v14, %v1527_v40  ;;  %v6246_v45 = vsub.f32 %v6114_v15, %v1527_v40  ;;  %v1517_v46 = vpop.xlane.xlu0 %1516  ;;  %v4560_v5 = vpack.c.bf16 %v1096_v39, %v1090_v37  ;;  %v1089_v40 = vld [vmem:[%s6025_s19 + $0x370] sm:$0xff]  ;;  %4499 = vmatpush1.bf16.msra.mxu0 %v4498_v38  ;;  %v1100_v8 = vld [vmem:[%s6025_s19 + $0x3c8] sm:$0xff]  ;;  %v4574_v31 = vpack.c.bf16 %v1131_v29, %v1125_v24  ;;  %v1138_v37 = vld [vmem:[%s6025_s19 + $0x4f8] sm:$0xff] }
 0x1bb   : > { %v1528_v47 = vmul.f32 0.00390625, %v1517_v46  ;;  %v1520_v13 = vpop.xlane.xlu1 %1519  ;;  %1569 = vadd.xlane.f32.xlu0 %v1568_v6  ;;  %v1571_v50 = vadd.f32 %v1553_v12, %v1552_v9  ;;  %1566 = vadd.xlane.f32.xlu1 %v1565_v48  ;;  %v1554_v14 = vmul.f32 %v6233_v42, %v6233_v42  ;;  %v1555_v15 = vmul.f32 %v6236_v43, %v6236_v43  ;;  %v1095_v6 = vld [vmem:[%s6025_s19 + $0x3a0] sm:$0xff]  ;;  %v1106_v9 = vld [vmem:[%s6025_s19 + $0x3f8] sm:$0xff]  ;;  %v1144_v39 = vld [vmem:[%s6025_s19 + $0x528] sm:$0xff] }
 0x1bc   : > { %v1529_v49 = vmul.f32 0.00390625, %v1520_v13  ;;  %v4562_v41 = vpack.c.bf16 %v1095_v6, %v1089_v40  ;;  %4561 = vmatprep.subr.bf16.mxu1 %v4560_v5  ;;  %v4500_v46 = vpack.c.bf16 %v1106_v9, %v1100_v8  ;;  %v1099_v12 = vld [vmem:[%s6025_s19 + $0x3c0] sm:$0xff]  ;;  %v1102_v48 = vld [vmem:[%s6025_s19 + $0x3d8] sm:$0xff]  ;;  %v4512_v0 = vpack.c.bf16 %v1142_v33, %v1136_v32  ;;  %v1137_v5 = vld [vmem:[%s6025_s19 + $0x4f0] sm:$0xff] }
 0x1bd   : > { %v6251_v51 = vsub.f32 %v6121_v18, %v1528_v47  ;;  %v6254_v52 = vsub.f32 %v6124_v19, %v1528_v47  ;;  %v1556_v18 = vmul.f32 %v6243_v44, %v6243_v44  ;;  %v1557_v19 = vmul.f32 %v6246_v45, %v6246_v45  ;;  %v1105_v47 = vld [vmem:[%s6025_s19 + $0x3f0] sm:$0xff]  ;;  %v1143_v40 = vld [vmem:[%s6025_s19 + $0x520] sm:$0xff]  ;;  %v1148_v8 = vld [vmem:[%s6025_s19 + $0x548] sm:$0xff] }
 0x1be   : > { %v6261_v53 = vsub.f32 %v6127_v20, %v1529_v49  ;;  %v6264_v54 = vsub.f32 %v6130_v21, %v1529_v49  ;;  %v1574_v55 = vadd.f32 %v1555_v15, %v1554_v14  ;;  %4563 = vmatpush1.bf16.msra.mxu1 %v4562_v41  ;;  %v4502_v13 = vpack.c.bf16 %v1105_v47, %v1099_v12  ;;  %v1108_v49 = vld [vmem:[%s6025_s19 + $0x408] sm:$0xff]  ;;  %v1107_v14 = vld [vmem:[%s6025_s19 + $0x400] sm:$0xff]  ;;  %v1154_v9 = vld [vmem:[%s6025_s19 + $0x578] sm:$0xff] }
 0x1bf   : > { %v1558_v56 = vmul.f32 %v6251_v51, %v6251_v51  ;;  %v1559_v57 = vmul.f32 %v6254_v52, %v6254_v52  ;;  %1572 = vadd.xlane.f32.xlu1 %v1571_v50  ;;  %v1577_v20 = vadd.f32 %v1557_v19, %v1556_v18  ;;  %v1101_v50 = vld [vmem:[%s6025_s19 + $0x3d0] sm:$0xff]  ;;  %4501 = vmatprep.subr.bf16.mxu0 %v4500_v46  ;;  %v1112_v19 = vld [vmem:[%s6025_s19 + $0x428] sm:$0xff]  ;;  %v1147_v12 = vld [vmem:[%s6025_s19 + $0x540] sm:$0xff] }
 0x1c0   : > { %1575 = vadd.xlane.f32.xlu0 %v1574_v55  ;;  %v1560_v21 = vmul.f32 %v6261_v53, %v6261_v53  ;;  %v1561_v58 = vmul.f32 %v6264_v54, %v6264_v54  ;;  %v4564_v15 = vpack.c.bf16 %v1108_v49, %v1102_v48  ;;  %v4566_v18 = vpack.c.bf16 %v1107_v14, %v1101_v50  ;;  %v1118_v55 = vld [vmem:[%s6025_s19 + $0x458] sm:$0xff]  ;;  %v1153_v47 = vld [vmem:[%s6025_s19 + $0x570] sm:$0xff]  ;;  %v1156_v49 = vld [vmem:[%s6025_s19 + $0x588] sm:$0xff] }
 0x1c1   : > { %v1580_v59 = vadd.f32 %v1559_v57, %v1558_v56  ;;  %4503 = vmatpush1.bf16.msra.mxu0 %v4502_v13  ;;  %v4504_v56 = vpack.c.bf16 %v1118_v55, %v1112_v19  ;;  %v1111_v57 = vld [vmem:[%s6025_s19 + $0x420] sm:$0xff]  ;;  %v4514_v38 = vpack.c.bf16 %v1141_v4, %v1135_v2  ;;  %v4576_v6 = vpack.c.bf16 %v1144_v39, %v1138_v37  ;;  %v1150_v48 = vld [vmem:[%s6025_s19 + $0x558] sm:$0xff]  ;;  %v1149_v50 = vld [vmem:[%s6025_s19 + $0x550] sm:$0xff] }
 0x1c2   : > { %v1583_v62 = vadd.f32 %v1561_v58, %v1560_v21  ;;  %4565 = vmatprep.subr.bf16.mxu1 %v4564_v15  ;;  %v1114_v21 = vld [vmem:[%s6025_s19 + $0x438] sm:$0xff]  ;;  %v4578_v41 = vpack.c.bf16 %v1143_v40, %v1137_v5  ;;  %v4516_v46 = vpack.c.bf16 %v1154_v9, %v1148_v8  ;;  %v4518_v13 = vpack.c.bf16 %v1153_v47, %v1147_v12  ;;  %v1155_v14 = vld [vmem:[%s6025_s19 + $0x580] sm:$0xff]  ;;  %v1160_v19 = vld [vmem:[%s6025_s19 + $0x5a8] sm:$0xff] }
 0x1c3   : > { %1578 = vadd.xlane.f32.xlu1 %v1577_v20  ;;  %v1117_v20 = vld [vmem:[%s6025_s19 + $0x450] sm:$0xff]  ;;  %4567 = vmatpush1.bf16.msra.mxu1 %v4566_v18  ;;  %v4580_v15 = vpack.c.bf16 %v1156_v49, %v1150_v48  ;;  %v4582_v18 = vpack.c.bf16 %v1155_v14, %v1149_v50  ;;  %v1166_v55 = vld [vmem:[%s6025_s19 + $0x5d8] sm:$0xff]  ;;  %v1495_v5 = vld [vmem:[%s921_s14] sm:$0x3] }
 0x1c4   : > { %1581 = vadd.xlane.f32.xlu0 %v1580_v59  ;;  %v4506_v58 = vpack.c.bf16 %v1117_v20, %v1111_v57  ;;  %v1120_v59 = vld [vmem:[%s6025_s19 + $0x468] sm:$0xff]  ;;  %4505 = vmatprep.subr.bf16.mxu0 %v4504_v56  ;;  %v4520_v56 = vpack.c.bf16 %v1166_v55, %v1160_v19  ;;  %v1159_v57 = vld [vmem:[%s6025_s19 + $0x5a0] sm:$0xff]  ;;  %v1165_v20 = vld [vmem:[%s6025_s19 + $0x5d0] sm:$0xff] }
 0x1c6   : > { %4507 = vmatpush1.bf16.msra.mxu0 %v4506_v58  ;;  %v4522_v58 = vpack.c.bf16 %v1165_v20, %v1159_v57  ;;  %v1496_v57 = vld [vmem:[%s925_s24] sm:$0x3]  ;;  %s941_s24 = scalar_lea.vmem %s7833_s27, %s6347_s30 }
 0x1c7   : > { %1584 = vadd.xlane.f32.xlu1 %v1583_v62  ;;  %v4568_v62 = vpack.c.bf16 %v1120_v59, %v1114_v21  ;;  %4509 = vmatprep.subr.bf16.mxu0 %v4508_v10  ;;  %v1162_v21 = vld [vmem:[%s6025_s19 + $0x5b8] sm:$0xff]  ;;  %v1168_v59 = vld [vmem:[%s6025_s19 + $0x5e8] sm:$0xff]  ;;  %v4588_v10 = vpack.c.bf16 %v990_v7, %v984_v3 }
 0x1c9   : > { %4569 = vmatprep.subr.bf16.mxu1 %v4568_v62  ;;  %v4584_v62 = vpack.c.bf16 %v1168_v59, %v1162_v21 }
 0x1ca   : > { %4571 = vmatpush1.bf16.msra.mxu1 %v4570_v63  ;;  %4511 = vmatpush1.bf16.msra.mxu0 %v4510_v22  ;;  %v4586_v63 = vpack.c.bf16 %v1167_v61, %v1161_v60  ;;  %v1652_v22 = vlaneseq }
 0x1cb   : > { %4573 = vmatprep.subr.bf16.mxu1 %v4572_v30  ;;  %4513 = vmatprep.subr.bf16.mxu0 %v4512_v0 }
 0x1cc   : > { %v6349_v30 = vshrl.u32 %v1652_v22, 7 }
 0x1ce   : > { %4575 = vmatpush1.bf16.msra.mxu1 %v4574_v31  ;;  %4515 = vmatpush1.bf16.msra.mxu0 %v4514_v38  ;;  %v6361_v4 = vsub.s32 0, %v6349_v30  ;;  %v6364_v37 = vsub.s32 1, %v6349_v30 }
 0x1cf   : > { %4577 = vmatprep.subr.bf16.mxu1 %v4576_v6  ;;  %4517 = vmatprep.subr.bf16.mxu0 %v4516_v46 }
 0x1d0   : > { %v6373_v12 = vrot.slane %v1495_v5, %v6361_v4  ;;  %v6376_v47 = vrot.slane %v1495_v5, %v6364_v37  ;;  %v6393_v7 = vrot.slane %v1496_v57, %v6364_v37 }
 0x1d2   : > { %4579 = vmatpush1.bf16.msra.mxu1 %v4578_v41  ;;  %4519 = vmatpush1.bf16.msra.mxu0 %v4518_v13  ;;  %v1662_v59 = vmul.f32 %v6373_v12, %v6199_v25  ;;  %v1663_v60 = vmul.f32 %v6376_v47, %v6202_v26 }
 0x1d3   : > { %4581 = vmatprep.subr.bf16.mxu1 %v4580_v15  ;;  %4521 = vmatprep.subr.bf16.mxu0 %v4520_v56 }
 0x1d6   : > { %4583 = vmatpush1.bf16.msra.mxu1 %v4582_v18  ;;  %4523 = vmatpush1.bf16.msra.mxu0 %v4522_v58 }
 0x1d7   : > { %4585 = vmatprep.subr.bf16.mxu1 %v4584_v62  ;;  %4589 = vmatprep.subr.bf16.mxu0 %v4588_v10 }
 0x1da   : > { %4587 = vmatpush1.bf16.msra.mxu1 %v4586_v63 }
 0x244   : > { %v1564_v11 = vpop.xlane.xlu0 %1563 }
 0x245   : > { %v1587_v16 = vmul.f32 0.003921569, %v1564_v11 }
 0x247   : > { %5132 = vrsqrt.f32 %v1587_v16  ;;  %vm1597_vm0 = vcmp.eq.f32.partialorder %v1587_v16, inf  ;;  %v1600_v9 = vand.u32 2147483648, %v1587_v16  ;;  %vm1599_vm1 = vcmp.eq.f32.partialorder %v1587_v16, 0.0 }
 0x248   : > { %v1570_v17 = vpop.xlane.xlu0 %1569  ;;  %v1567_v23 = vpop.xlane.xlu1 %1566 }
 0x249   : > { %v1589_v24 = vmul.f32 0.003921569, %v1570_v17  ;;  %v1588_v29 = vmul.f32 0.003921569, %v1567_v23 }
 0x24b   : > { %5134 = vrsqrt.f32 %v1589_v24  ;;  %vm1611_vm2 = vcmp.eq.f32.partialorder %v1589_v24, inf  ;;  %vm1613_vm3 = vcmp.eq.f32.partialorder %v1589_v24, 0.0  ;;  %v1614_v18 = vand.u32 2147483648, %v1589_v24 }
 0x24c   : > { %5136 = vrsqrt.f32 %v1588_v29  ;;  %v1573_v31 = vpop.xlane.xlu1 %1572  ;;  %vm1604_vm4 = vcmp.eq.f32.partialorder %v1588_v29, inf  ;;  %v1607_v55 = vand.u32 2147483648, %v1588_v29  ;;  %vm1606_vm5 = vcmp.eq.f32.partialorder %v1588_v29, 0.0 }
 0x24d   : > { %v1576_v32 = vpop.xlane.xlu0 %1575  ;;  %v6351_v33 = vmul.f32 0.003921569, %v1573_v31 }
 0x24e   : > { %v6353_v0 = vmul.f32 0.003921569, %v1576_v32 }
 0x24f   : > { %5138 = vrsqrt.f32 %v6351_v33  ;;  %vm1618_vm6 = vcmp.eq.f32.partialorder %v6351_v33, inf  ;;  %vm1620_vm7 = vcmp.eq.f32.partialorder %v6351_v33, 0.0  ;;  %v1621_v11 = vand.u32 2147483648, %v6351_v33 }
 0x250   : > { %5140 = vrsqrt.f32 %v6353_v0  ;;  %v1579_v38 = vpop.xlane.xlu1 %1578  ;;  %vm1625_vm8 = vcmp.eq.f32.partialorder %v6353_v0, inf  ;;  %vm1627_vm9 = vcmp.eq.f32.partialorder %v6353_v0, 0.0 }
 0x251   : > { %v5133_v2 = vpop.eup %5132  ;;  %v1582_v39 = vpop.xlane.xlu0 %1581  ;;  %v6367_v6 = vmul.f32 0.003921569, %v1579_v38 }
 0x252   : > { %v1596_v40 = vmul.f32 %v5133_v2, %v1587_v16  ;;  %v6369_v41 = vmul.f32 0.003921569, %v1582_v39 }
 0x253   : > { %5142 = vrsqrt.f32 %v6367_v6  ;;  %vm1632_vm10 = vcmp.eq.f32.partialorder %v6367_v6, inf  ;;  %vm1634_vm12 = vcmp.eq.f32.partialorder %v6367_v6, 0.0 }
 0x254   : > { %v1598_v8 = vsel %vm1597_vm0, %v1587_v16, %v1596_v40  ;;  %5144 = vrsqrt.f32 %v6369_v41  ;;  %v1585_v48 = vpop.xlane.xlu1 %1584  ;;  %v1628_v16 = vand.u32 2147483648, %v6353_v0  ;;  %vm1639_vm11 = vcmp.eq.f32.partialorder %v6369_v41, inf }
 0x255   : > { %v5135_v46 = vpop.eup %5134  ;;  %v6383_v50 = vmul.f32 0.003921569, %v1585_v48  ;;  %v1601_v14 = vsel %vm1599_vm1, %v1600_v9, %v1598_v8  ;;  %v1642_v38 = vand.u32 2147483648, %v6369_v41  ;;  %vm1641_vm13 = vcmp.eq.f32.partialorder %v6369_v41, 0.0 }
 0x256   : > { %v5137_v13 = vpop.eup %5136  ;;  %v1610_v49 = vmul.f32 %v5135_v46, %v1589_v24  ;;  %v1678_v19 = vadd.f32 1e-06, %v1601_v14  ;;  %v6415_v8 = vrot.slane %v1496_v57, %v6361_v4  ;;  %v1667_v57 = vmul.f32 %v6376_v47, %v6208_v28 }
 0x257   : > { %v1603_v15 = vmul.f32 %v5137_v13, %v1588_v29  ;;  %5146 = vrsqrt.f32 %v6383_v50  ;;  %vm1646_vm14 = vcmp.eq.f32.partialorder %v6383_v50, inf  ;;  %v1649_v13 = vand.u32 2147483648, %v6383_v50 }
 0x258   : > { %v1612_v56 = vsel %vm1611_vm2, %v1589_v24, %v1610_v49  ;;  %5148 = vrcp.f32 %v1678_v19  ;;  %v989_v49 = vld [vmem:[%s6025_s19 + $0x50] sm:$0xff]  ;;  %vm1648_vm15 = vcmp.eq.f32.partialorder %v6383_v50, 0.0  ;;  %v996_v19 = vld [vmem:[%s6025_s19 + $0x88] sm:$0xff]  ;;  %vm2220_vm2 = vcmask 523264  }
 0x259   : > { %v1605_v20 = vsel %vm1604_vm4, %v1588_v29, %v1603_v15  ;;  %v1615_v21 = vsel %vm1613_vm3, %v1614_v18, %v1612_v56  ;;  %v5139_v58 = vpop.eup %5138 }
 0x25a   : > { %v1608_v61 = vsel %vm1606_vm5, %v1607_v55, %v1605_v20  ;;  %v1680_v62 = vadd.f32 1e-06, %v1615_v21  ;;  %v5141_v63 = vpop.eup %5140  ;;  %v1617_v3 = vmul.f32 %v5139_v58, %v6351_v33  ;;  %v1002_v55 = vld [vmem:[%s6025_s19 + $0xb8] sm:$0xff]  ;;  %v1664_v20 = vmul.f32 %v6373_v12, %v6215_v34  ;;  %v995_v34 = vld [vmem:[%s6025_s19 + $0x80] sm:$0xff] }
 0x25b   : > { %v1679_v10 = vadd.f32 1e-06, %v1608_v61  ;;  %v1624_v25 = vmul.f32 %v5141_v63, %v6353_v0  ;;  %v1001_v63 = vld [vmem:[%s6025_s19 + $0xb0] sm:$0xff] }
 0x25c   : > { %5150 = vrcp.f32 %v1680_v62  ;;  %v1619_v26 = vsel %vm1618_vm6, %v6351_v33, %v1617_v3  ;;  %v1635_v33 = vand.u32 2147483648, %v6367_v6  ;;  %v4592_v62 = vpack.c.bf16 %v1002_v55, %v996_v19 }
 0x25d   : > { %5152 = vrcp.f32 %v1679_v10  ;;  %v5143_v17 = vpop.eup %5142  ;;  %v1626_v22 = vsel %vm1625_vm8, %v6353_v0, %v1624_v25  ;;  %v1622_v23 = vsel %vm1620_vm7, %v1621_v11, %v1619_v26  ;;  %v1008_v26 = vld [vmem:[%s6025_s19 + $0xe8] sm:$0xff]  ;;  %v1670_v55 = vmul.f32 %v6373_v12, %v6233_v42 }
 0x25e   : > { %v5145_v24 = vpop.eup %5144  ;;  %v1631_v29 = vmul.f32 %v5143_v17, %v6367_v6  ;;  %v1681_v31 = vadd.f32 1e-06, %v1622_v23  ;;  %v1629_v32 = vsel %vm1627_vm9, %v1628_v16, %v1626_v22  ;;  %v1014_v16 = vld [vmem:[%s6025_s19 + $0x118] sm:$0xff]  ;;  %v1666_v17 = vmul.f32 %v6373_v12, %v6205_v27 }
 0x25f   : > { %v1638_v2 = vmul.f32 %v5145_v24, %v6369_v41  ;;  %v1682_v39 = vadd.f32 1e-06, %v1629_v32  ;;  %v4594_v24 = vpack.c.bf16 %v1001_v63, %v995_v34  ;;  %v4596_v27 = vpack.c.bf16 %v1014_v16, %v1008_v26  ;;  %v1007_v32 = vld [vmem:[%s6025_s19 + $0xe0] sm:$0xff]  ;;  %v1049_v26 = vld [vmem:[%s6025_s19 + $0x230] sm:$0xff] }
 0x260   : > { %v1633_v0 = vsel %vm1632_vm10, %v6367_v6, %v1631_v29  ;;  %5154 = vrcp.f32 %v1681_v31  ;;  %v983_v6 = vld [vmem:[%s6025_s19 + $0x20] sm:$0xff]  ;;  %v1672_v63 = vmul.f32 %v6373_v12, %v6243_v44 }
 0x261   : > { %v5147_v5 = vpop.eup %5146  ;;  %v1640_v40 = vsel %vm1639_vm11, %v6369_v41, %v1638_v2  ;;  %v1636_v9 = vsel %vm1634_vm12, %v1635_v33, %v1633_v0  ;;  %5156 = vrcp.f32 %v1682_v39  ;;  %v4590_v28 = vpack.c.bf16 %v989_v49, %v983_v6  ;;  %v1013_v33 = vld [vmem:[%s6025_s19 + $0x110] sm:$0xff]  ;;  %v1020_v39 = vld [vmem:[%s6025_s19 + $0x148] sm:$0xff]  ;;  %v1026_v0 = vld [vmem:[%s6025_s19 + $0x178] sm:$0xff] }
 0x262   : > { %v5149_v46 = vpop.eup %5148  ;;  %v1645_v48 = vmul.f32 %v5147_v5, %v6383_v50  ;;  %v1683_v14 = vadd.f32 1e-06, %v1636_v9  ;;  %v1643_v56 = vsel %vm1641_vm13, %v1642_v38, %v1640_v40  ;;  %v1668_v40 = vmul.f32 %v6373_v12, %v6225_v35  ;;  %v1019_v6 = vld [vmem:[%s6025_s19 + $0x140] sm:$0xff]  ;;  %v1025_v49 = vld [vmem:[%s6025_s19 + $0x170] sm:$0xff] }
 0x263   : > { %v1688_v15 = vmul.f32 %v5149_v46, %v1663_v60  ;;  %v1687_v18 = vmul.f32 %v5149_v46, %v1662_v59  ;;  %v1665_v60 = vmul.f32 %v6376_v47, %v6218_v1  ;;  %v1684_v3 = vadd.f32 1e-06, %v1643_v56 }
 0x264   : > { %v1647_v21 = vsel %vm1646_vm14, %v6383_v50, %v1645_v48  ;;  %5158 = vrcp.f32 %v1683_v14  ;;  %v1669_v50 = vmul.f32 %v6376_v47, %v6228_v36  ;;  %v1671_v9 = vmul.f32 %v6376_v47, %v6236_v43  ;;  %v1032_v43 = vld [vmem:[%s6025_s19 + $0x1a8] sm:$0xff] }
 0x265   : > { %v6436_v59 = vadd.f32 %v6393_v7, %v1688_v15  ;;  %v6439_v41 = vadd.f32 %v6415_v8, %v1687_v18  ;;  %v1650_v10 = vsel %vm1648_vm15, %v1649_v13, %v1647_v21  ;;  %5160 = vrcp.f32 %v1684_v3  ;;  %v1038_v18 = vld [vmem:[%s6025_s19 + $0x1d8] sm:$0xff] }
 0x266   : > { %v5151_v58 = vpop.eup %5150  ;;  %v1685_v2 = vadd.f32 1e-06, %v1650_v10  ;;  %v4598_v46 = vpack.c.bf16 %v1013_v33, %v1007_v32  ;;  %v4600_v35 = vpack.c.bf16 %v1026_v0, %v1020_v39  ;;  %v1673_v56 = vmul.f32 %v6376_v47, %v6246_v45  ;;  %v1044_v45 = vld [vmem:[%s6025_s19 + $0x208] sm:$0xff]  ;;  %v1074_v0 = vld [vmem:[%s6025_s19 + $0x2f8] sm:$0xff] }
 0x267   : > { %v5153_v61 = vpop.eup %5152  ;;  %1832 = vmatprep.mubr.f32.mxu0 %v6436_v59  ;;  %1945 = vmatprep.mubr.f32.mxu1 %v6436_v59  ;;  %v1694_v25 = vmul.f32 %v5151_v58, %v1667_v57  ;;  %v1693_v31 = vmul.f32 %v5151_v58, %v1666_v17  ;;  %v4602_v57 = vpack.c.bf16 %v1025_v49, %v1019_v6  ;;  %v1031_v58 = vld [vmem:[%s6025_s19 + $0x1a0] sm:$0xff]  ;;  %v1080_v6 = vld [vmem:[%s6025_s19 + $0x328] sm:$0xff]  ;;  %v1086_v49 = vld [vmem:[%s6025_s19 + $0x358] sm:$0xff] }
 0x268   : > { %v1691_v1 = vmul.f32 %v5153_v61, %v1665_v60  ;;  %v1690_v11 = vmul.f32 %v5153_v61, %v1664_v20  ;;  %1833 = vmatmul.mubr.f32.vlgmr.msra.gmra.mrb[0].mxu0 %v6439_v41  ;;  %1946 = vmatmul.mubr.f32.vlgmr.msra.gmra.mrb[0].mxu1 %v6439_v41  ;;  %5162 = vrcp.f32 %v1685_v2  ;;  %v4604_v42 = vpack.c.bf16 %v1038_v18, %v1032_v43  ;;  %v1037_v60 = vld [vmem:[%s6025_s19 + $0x1d0] sm:$0xff]  ;;  %v1055_v2 = vld [vmem:[%s6025_s19 + $0x260] sm:$0xff] }
 0x269   : > { %4591 = vmatpush1.bf16.msra.mxu0 %v4590_v28  ;;  %v6466_v36 = vadd.f32 %v6393_v7, %v1694_v25  ;;  %v6479_v48 = vadd.f32 %v6415_v8, %v1693_v31  ;;  %v1675_v3 = vmul.f32 %v6376_v47, %v6254_v52  ;;  %v4606_v10 = vpack.c.bf16 %v1037_v60, %v1031_v58  ;;  %v1043_v25 = vld [vmem:[%s6025_s19 + $0x200] sm:$0xff]  ;;  %v1056_v52 = vld [vmem:[%s6025_s19 + $0x268] sm:$0xff]  ;;  %v1110_v60 = vld [vmem:[%s6025_s19 + $0x418] sm:$0xff] }
 0x26a   : > { %v6456_v22 = vadd.f32 %v6393_v7, %v1691_v1  ;;  %v6459_v23 = vadd.f32 %v6415_v8, %v1690_v11  ;;  %v5155_v29 = vpop.eup %5154  ;;  %4593 = vmatprep.subr.bf16.mxu0 %v4592_v62  ;;  %v1050_v62 = vld [vmem:[%s6025_s19 + $0x238] sm:$0xff]  ;;  %v4610_v31 = vpack.c.bf16 %v1049_v26, %v1043_v25  ;;  %v1079_v18 = vld [vmem:[%s6025_s19 + $0x320] sm:$0xff]  ;;  %v1104_v58 = vld [vmem:[%s6025_s19 + $0x3e8] sm:$0xff] }
 0x26b   : > { %v1697_v38 = vmul.f32 %v5155_v29, %v1669_v50  ;;  %v5157_v5 = vpop.eup %5156  ;;  %v1696_v13 = vmul.f32 %v5155_v29, %v1668_v40  ;;  %v4608_v44 = vpack.c.bf16 %v1050_v62, %v1044_v45  ;;  %v1062_v50 = vld [vmem:[%s6025_s19 + $0x298] sm:$0xff]  ;;  %v1674_v29 = vmul.f32 %v6373_v12, %v6251_v51  ;;  %v1103_v62 = vld [vmem:[%s6025_s19 + $0x3e0] sm:$0xff]  ;;  %v1128_v25 = vld [vmem:[%s6025_s19 + $0x4a8] sm:$0xff] }
 0x26c   : > { %1838 = vmatprep.mubr.f32.mxu0 %v6456_v22  ;;  %1951 = vmatprep.mubr.f32.mxu1 %v6456_v22  ;;  %v1700_v15 = vmul.f32 %v5157_v5, %v1671_v9  ;;  %v1699_v21 = vmul.f32 %v5157_v5, %v1670_v55  ;;  %v4612_v51 = vpack.c.bf16 %v1062_v50, %v1056_v52  ;;  %v1092_v55 = vld [vmem:[%s6025_s19 + $0x388] sm:$0xff]  ;;  %v1134_v26 = vld [vmem:[%s6025_s19 + $0x4d8] sm:$0xff]  ;;  %v1127_v50 = vld [vmem:[%s6025_s19 + $0x4a0] sm:$0xff] }
 0x26d   : > { %1839 = vmatmul.mubr.f32.gmra.mrb[2].mxu0 %v6459_v23  ;;  %1952 = vmatmul.mubr.f32.gmra.mrb[2].mxu1 %v6459_v23  ;;  %v6484_v14 = vadd.f32 %v6393_v7, %v1697_v38  ;;  %v6497_v20 = vadd.f32 %v6415_v8, %v1696_v13  ;;  %v1061_v38 = vld [vmem:[%s6025_s19 + $0x290] sm:$0xff]  ;;  %v1676_v5 = vmul.f32 %v6373_v12, %v6261_v53  ;;  %v1067_v13 = vld [vmem:[%s6025_s19 + $0x2c0] sm:$0xff] }
 0x26e   : > { %4595 = vmatpush1.bf16.msra.mxu0 %v4594_v24  ;;  %1844 = vmatprep.mubr.f32.mxu0 %v6466_v36  ;;  %v5159_v19 = vpop.eup %5158  ;;  %v6502_v28 = vadd.f32 %v6393_v7, %v1700_v15  ;;  %v6515_v1 = vadd.f32 %v6415_v8, %v1699_v21  ;;  %v4614_v40 = vpack.c.bf16 %v1061_v38, %v1055_v2  ;;  %v1073_v53 = vld [vmem:[%s6025_s19 + $0x2f0] sm:$0xff]  ;;  %v1152_v38 = vld [vmem:[%s6025_s19 + $0x568] sm:$0xff] }
 0x26f   : > { %1957 = vmatprep.mubr.f32.mxu1 %v6466_v36  ;;  %4597 = vmatprep.subr.bf16.mxu0 %v4596_v27  ;;  %v1703_v61 = vmul.f32 %v5159_v19, %v1673_v56  ;;  %v5161_v34 = vpop.eup %5160  ;;  %v1702_v11 = vmul.f32 %v5159_v19, %v1672_v63  ;;  %v1677_v27 = vmul.f32 %v6376_v47, %v6264_v54  ;;  %v1068_v47 = vld [vmem:[%s6025_s19 + $0x2c8] sm:$0xff]  ;;  %v1085_v19 = vld [vmem:[%s6025_s19 + $0x350] sm:$0xff]  ;;  %v1098_v56 = vld [vmem:[%s6025_s19 + $0x3b8] sm:$0xff] }
 0x270   : > { %v1706_v17 = vmul.f32 %v5161_v34, %v1675_v3  ;;  %v1705_v33 = vmul.f32 %v5161_v34, %v1674_v29  ;;  %v4618_v15 = vpack.c.bf16 %v1073_v53, %v1067_v13  ;;  %v1097_v21 = vld [vmem:[%s6025_s19 + $0x3b0] sm:$0xff]  ;;  %v4628_v45 = vpack.c.bf16 %v1110_v60, %v1104_v58  ;;  %v1122_v63 = vld [vmem:[%s6025_s19 + $0x478] sm:$0xff]  ;;  %v1140_v29 = vld [vmem:[%s6025_s19 + $0x508] sm:$0xff] }
 0x271   : > { %1845 = vmatmul.mubr.f32.gmra.mrb[4].mxu0 %v6479_v48  ;;  %1958 = vmatmul.mubr.f32.gmra.mrb[4].mxu1 %v6479_v48  ;;  %v6520_v16 = vadd.f32 %v6393_v7, %v1703_v61  ;;  %v6533_v32 = vadd.f32 %v6415_v8, %v1702_v11  ;;  %v1109_v34 = vld [vmem:[%s6025_s19 + $0x410] sm:$0xff]  ;;  %v4636_v52 = vpack.c.bf16 %v1134_v26, %v1128_v25 }
 0x272   : > { %4599 = vmatpush1.bf16.msra.mxu0 %v4598_v46  ;;  %1850 = vmatprep.mubr.f32.mxu0 %v6484_v14  ;;  %v5163_v24 = vpop.eup %5162  ;;  %v6538_v39 = vadd.f32 %v6393_v7, %v1706_v17  ;;  %v6549_v9 = vadd.f32 %v6415_v8, %v1705_v33  ;;  %v4616_v46 = vpack.c.bf16 %v1074_v0, %v1068_v47  ;;  %v1121_v11 = vld [vmem:[%s6025_s19 + $0x470] sm:$0xff]  ;;  %v1139_v33 = vld [vmem:[%s6025_s19 + $0x500] sm:$0xff] }
 0x273   : > { %1963 = vmatprep.mubr.f32.mxu1 %v6484_v14  ;;  %4601 = vmatprep.subr.bf16.mxu0 %v4600_v35  ;;  %v1709_v54 = vmul.f32 %v5163_v24, %v1677_v27  ;;  %v1708_v35 = vmul.f32 %v5163_v24, %v1676_v5  ;;  %v4630_v3 = vpack.c.bf16 %v1109_v34, %v1103_v62  ;;  %v1133_v24 = vld [vmem:[%s6025_s19 + $0x4d0] sm:$0xff]  ;;  %v1146_v27 = vld [vmem:[%s6025_s19 + $0x538] sm:$0xff]  ;;  %v1151_v5 = vld [vmem:[%s6025_s19 + $0x560] sm:$0xff] }
 0x274   : > { %v1145_v2 = vld [vmem:[%s6025_s19 + $0x530] sm:$0xff] }
 0x275   : > { %1851 = vmatmul.mubr.f32.gmra.mrb[6].mxu0 %v6497_v20  ;;  %1964 = vmatmul.mubr.f32.gmra.mrb[6].mxu1 %v6497_v20  ;;  %v6554_v12 = vadd.f32 %v6393_v7, %v1709_v54  ;;  %v6563_v43 = vadd.f32 %v6415_v8, %v1708_v35  ;;  %v4620_v7 = vpack.c.bf16 %v1086_v49, %v1080_v6  ;;  %v1158_v54 = vld [vmem:[%s6025_s19 + $0x598] sm:$0xff]  ;;  %v1163_v6 = vld [vmem:[%s6025_s19 + $0x5c0] sm:$0xff]  ;;  %v1169_v49 = vld [vmem:[%s6025_s19 + $0x5f0] sm:$0xff] }
 0x276   : > { %4603 = vmatpush1.bf16.msra.mxu0 %v4602_v57  ;;  %1856 = vmatprep.mubr.f32.mxu0 %v6502_v28  ;;  %v4622_v57 = vpack.c.bf16 %v1085_v19, %v1079_v18  ;;  %v4624_v8 = vpack.c.bf16 %v1098_v56, %v1092_v55  ;;  %v4642_v47 = vpack.c.bf16 %v1145_v2, %v1139_v33  ;;  %v1170_v35 = vld [vmem:[%s6025_s19 + $0x5f8] sm:$0xff] }
 0x277   : > { %1969 = vmatprep.mubr.f32.mxu1 %v6502_v28  ;;  %4605 = vmatprep.subr.bf16.mxu0 %v4604_v42  ;;  %v1091_v42 = vld [vmem:[%s6025_s19 + $0x380] sm:$0xff]  ;;  %v4644_v0 = vpack.c.bf16 %v1158_v54, %v1152_v38 }
 0x278   : > { %v4626_v61 = vpack.c.bf16 %v1097_v21, %v1091_v42 }
 0x279   : > { %1857 = vmatmul.mubr.f32.gmra.mrb[8].mxu0 %v6515_v1  ;;  %1970 = vmatmul.mubr.f32.gmra.mrb[8].mxu1 %v6515_v1 }
 0x27a   : > { %4607 = vmatpush1.bf16.msra.mxu0 %v4606_v10  ;;  %1862 = vmatprep.mubr.f32.mxu0 %v6520_v16 }
 0x27b   : > { %1975 = vmatprep.mubr.f32.mxu1 %v6520_v16  ;;  %4609 = vmatprep.subr.bf16.mxu0 %v4608_v44  ;;  %v1115_v44 = vld [vmem:[%s6025_s19 + $0x440] sm:$0xff] }
 0x27c   : > { %v4634_v17 = vpack.c.bf16 %v1121_v11, %v1115_v44 }
 0x27d   : > { %1863 = vmatmul.mubr.f32.gmra.mrb[10].mxu0 %v6533_v32  ;;  %1976 = vmatmul.mubr.f32.gmra.mrb[10].mxu1 %v6533_v32 }
 0x27e   : > { %4611 = vmatpush1.bf16.msra.mxu0 %v4610_v31  ;;  %1868 = vmatprep.mubr.f32.mxu0 %v6538_v39  ;;  %v4638_v31 = vpack.c.bf16 %v1133_v24, %v1127_v50 }
 0x27f   : > { %1981 = vmatprep.mubr.f32.mxu1 %v6538_v39  ;;  %4613 = vmatprep.subr.bf16.mxu0 %v4612_v51  ;;  %v4640_v51 = vpack.c.bf16 %v1146_v27, %v1140_v29 }
 0x281   : > { %1869 = vmatmul.mubr.f32.gmra.mrb[12].mxu0 %v6549_v9  ;;  %1982 = vmatmul.mubr.f32.gmra.mrb[12].mxu1 %v6549_v9 }
 0x282   : > { %4615 = vmatpush1.bf16.msra.mxu0 %v4614_v40  ;;  %1874 = vmatprep.mubr.f32.mxu0 %v6554_v12  ;;  %v1157_v40 = vld [vmem:[%s6025_s19 + $0x590] sm:$0xff] }
 0x283   : > { %1987 = vmatprep.mubr.f32.mxu1 %v6554_v12  ;;  %4617 = vmatprep.subr.bf16.mxu0 %v4616_v46  ;;  %v1164_v46 = vld [vmem:[%s6025_s19 + $0x5c8] sm:$0xff]  ;;  %v4646_v13 = vpack.c.bf16 %v1157_v40, %v1151_v5 }
 0x284   : > { %v4648_v53 = vpack.c.bf16 %v1170_v35, %v1164_v46 }
 0x285   : > { %1875 = vmatmul.mubr.f32.gmra.mrb[14].mxu0 %v6563_v43  ;;  %1988 = vmatmul.mubr.f32.gmra.mrb[14].mxu1 %v6563_v43 }
 0x286   : > { %4619 = vmatpush1.bf16.msra.mxu0 %v4618_v15  ;;  %2058 = vmatprep.mubr.f32.mxu0 %v6436_v59  ;;  %v1116_v59 = vld [vmem:[%s6025_s19 + $0x448] sm:$0xff]  ;;  %v4650_v15 = vpack.c.bf16 %v1169_v49, %v1163_v6  ;;  %s7834_s19 = sld [smem:[#allocation33_spill]] }
 0x287   : > { %4621 = vmatprep.subr.bf16.mxu0 %v4620_v7  ;;  %v4632_v10 = vpack.c.bf16 %v1122_v63, %v1116_v59 }
 0x28a   : > { %4623 = vmatpush1.bf16.msra.mxu0 %v4622_v57 }
 0x28b   : > { %4625 = vmatprep.subr.bf16.mxu0 %v4624_v8 }
 0x28e   : > { %4627 = vmatpush1.bf16.msra.mxu0 %v4626_v61 }
 0x28f   : > { %4629 = vmatprep.subr.bf16.mxu0 %v4628_v45 }
 0x292   : > { %4631 = vmatpush1.bf16.msra.mxu0 %v4630_v3 }
 0x293   : > { %4633 = vmatprep.subr.bf16.mxu0 %v4632_v10 }
 0x296   : > { %4635 = vmatpush1.bf16.msra.mxu0 %v4634_v17 }
 0x297   : > { %4637 = vmatprep.subr.bf16.mxu0 %v4636_v52 }
 0x29a   : > { %4639 = vmatpush1.bf16.msra.mxu0 %v4638_v31 }
 0x29b   : > { %4641 = vmatprep.subr.bf16.mxu0 %v4640_v51 }
 0x29e   : > { %4643 = vmatpush1.bf16.msra.mxu0 %v4642_v47 }
 0x29f   : > { %4645 = vmatprep.subr.bf16.mxu0 %v4644_v0 }
 0x2a2   : > { %4647 = vmatpush1.bf16.msra.mxu0 %v4646_v13 }
 0x2a3   : > { %4649 = vmatprep.subr.bf16.mxu0 %v4648_v53 }
 0x2a6   : > { %4651 = vmatpush1.bf16.msra.mxu0 %v4650_v15 }
 0x2a9   : > { %2059 = vmatmul.mubr.f32.vlgmr.msra.gmra.mrb[16].mxu0 %v6439_v41  ;;  %v6614_v41 = vld [vmem:[%s6033_s7] sm:$0x3f]  ;;  %s7688_s7 = scalar_lea.vmem %s7834_s19, %s4281_s12 }
 0x2aa   : > { %2064 = vmatprep.mubr.f32.mxu0 %v6456_v22  ;;  %v6618_v22 = vrot.slane %v6614_v41, %v6361_v4 }
 0x2ad   : > { %2065 = vmatmul.mubr.f32.gmra.mrb[18].mxu0 %v6459_v23  ;;  %v1748_v23 = vsub.s32 2, %v6349_v30 }
 0x2ae   : > { %2070 = vmatprep.mubr.f32.mxu0 %v6466_v36  ;;  %v1752_v36 = vsub.s32 3, %v6349_v30 }
 0x2b1   : > { %2071 = vmatmul.mubr.f32.gmra.mrb[20].mxu0 %v6479_v48 }
 0x2b2   : > { %2076 = vmatprep.mubr.f32.mxu0 %v6484_v14 }
 0x2b5   : > { %2077 = vmatmul.mubr.f32.gmra.mrb[22].mxu0 %v6497_v20 }
 0x2b6   : > { %2082 = vmatprep.mubr.f32.mxu0 %v6502_v28  ;;  %v1749_v28 = vrot.slane %v6614_v41, %v1748_v23 }
 0x2b9   : > { %2083 = vmatmul.mubr.f32.gmra.mrb[24].mxu0 %v6515_v1 }
 0x2ba   : > { %2088 = vmatprep.mubr.f32.mxu0 %v6520_v16 }
 0x2bd   : > { %2089 = vmatmul.mubr.f32.gmra.mrb[26].mxu0 %v6533_v32  ;;  %v1753_v32 = vrot.slane %v6614_v41, %v1752_v36 }
 0x2be   : > { %2094 = vmatprep.mubr.f32.mxu0 %v6538_v39 }
 0x2c1   : > { %2095 = vmatmul.mubr.f32.gmra.mrb[28].mxu0 %v6549_v9 }
 0x2c2   : > { %2100 = vmatprep.mubr.f32.mxu0 %v6554_v12 }
 0x2c5   : > { %2101 = vmatmul.mubr.f32.gmra.mrb[30].mxu0 %v6563_v43 }
 0x33b   : > { %v1834_v48 = vpop.f32.mrb[0].mxu0  ;;  %v1947_v14 = vpop.f32.mrb[0].mxu1 }
 0x33c   : > { %v1835_v20 = vadd.f32 %v1834_v48, %v6618_v22  ;;  %v6626_v1 = vpop.f32.mrb[1].mxu0  ;;  %v1949_v16 = vpop.f32.mrb[1].mxu1  ;;  %v1948_v12 = vadd.f32 %v1947_v14, %v1749_v28 }
 0x33d   : > { %v1950_v19 = vadd.f32 %v1949_v16, %v1753_v32 }
 0x33e   : > { %4364 = vmatprep.mubr.f32.mxu1 %v1835_v20 }
 0x340   : > { %v1840_v39 = vpop.f32.mrb[2].mxu0  ;;  %v1953_v9 = vpop.f32.mrb[2].mxu1 }
 0x341   : > { %v1954_v43 = vadd.f32 %v1953_v9, %v1749_v28  ;;  %v6631_v7 = vpop.f32.mrb[3].mxu0  ;;  %v1955_v18 = vpop.f32.mrb[3].mxu1  ;;  %v1841_v20 = vadd.f32 %v1840_v39, %v6618_v22  ;;  %v1756_v39 = vsub.s32 4, %v6349_v30 }
 0x342   : > { %v1956_v55 = vadd.f32 %v1955_v18, %v1753_v32  ;;  %v1760_v18 = vsub.s32 5, %v6349_v30 }
 0x343   : > { %v4652_v56 = vpack.c.bf16 %v1954_v43, %v1948_v12 }
 0x344   : > { %v6633_v57 = vpack.c.bf16 %v1956_v55, %v1950_v19  ;;  %v1846_v8 = vpop.f32.mrb[4].mxu0  ;;  %v1959_v42 = vpop.f32.mrb[4].mxu1  ;;  %v1757_v55 = vrot.slane %v6614_v41, %v1756_v39  ;;  %v6682_v39 = vld [vmem:[%s6017_s5 + $0x18] sm:$0xff] }
 0x345   : > { %v6635_v21 = vpop.f32.mrb[5].mxu0  ;;  %v1961_v58 = vpop.f32.mrb[5].mxu1  ;;  %4653 = vmatprep.subr.bf16.mxu1 %v4652_v56  ;;  %v1960_v62 = vadd.f32 %v1959_v42, %v1749_v28  ;;  %v1847_v16 = vadd.f32 %v1846_v8, %v6618_v22  ;;  %v1761_v8 = vrot.slane %v6614_v41, %v1760_v18  ;;  %vm974_vm3 = vcmp.eq.f32.partialorder %v6682_v39, 0.0 }
 0x346   : > { %v1962_v60 = vadd.f32 %v1961_v58, %v1753_v32  ;;  %4655 = vmatpush3.bf16.xpose.msra.mxu1 %v4652_v56 }
 0x348   : > { %v1852_v61 = vpop.f32.mrb[6].mxu0  ;;  %v1965_v45 = vpop.f32.mrb[6].mxu1 }
 0x349   : > { %v1966_v34 = vadd.f32 %v1965_v45, %v1749_v28  ;;  %v6637_v59 = vpop.f32.mrb[7].mxu0  ;;  %v1967_v63 = vpop.f32.mrb[7].mxu1  ;;  %v1853_v9 = vadd.f32 %v1852_v61, %v6618_v22 }
 0x34a   : > { %v1968_v3 = vadd.f32 %v1967_v63, %v1753_v32 }
 0x34b   : > { %v4656_v10 = vpack.c.bf16 %v1966_v34, %v1960_v62 }
 0x34c   : > { %v6639_v44 = vpack.c.bf16 %v1968_v3, %v1962_v60  ;;  %v1858_v11 = vpop.f32.mrb[8].mxu0  ;;  %v1971_v25 = vpop.f32.mrb[8].mxu1 }
 0x34d   : > { %v6641_v26 = vpop.f32.mrb[9].mxu0  ;;  %v1973_v17 = vpop.f32.mrb[9].mxu1  ;;  %4657 = vmatprep.subr.bf16.mxu1 %v4656_v10  ;;  %v1972_v29 = vadd.f32 %v1971_v25, %v1749_v28  ;;  %v1859_v12 = vadd.f32 %v1858_v11, %v6618_v22 }
 0x34e   : > { %v1974_v52 = vadd.f32 %v1973_v17, %v1753_v32  ;;  %4659 = vmatpush3.bf16.xpose.msra.mxu1 %v4656_v10 }
 0x350   : > { %v1864_v50 = vpop.f32.mrb[10].mxu0  ;;  %v1977_v24 = vpop.f32.mrb[10].mxu1 }
 0x351   : > { %v1978_v27 = vadd.f32 %v1977_v24, %v1749_v28  ;;  %v6643_v31 = vpop.f32.mrb[11].mxu0  ;;  %v1979_v51 = vpop.f32.mrb[11].mxu1 }
 0x352   : > { %v1980_v33 = vadd.f32 %v1979_v51, %v1753_v32 }
 0x353   : > { %v4660_v2 = vpack.c.bf16 %v1978_v27, %v1972_v29 }
 0x354   : > { %v6645_v38 = vpack.c.bf16 %v1980_v33, %v1974_v52  ;;  %v1870_v54 = vpop.f32.mrb[12].mxu0  ;;  %v1983_v47 = vpop.f32.mrb[12].mxu1 }
 0x355   : > { %v6647_v0 = vpop.f32.mrb[13].mxu0  ;;  %v1985_v5 = vpop.f32.mrb[13].mxu1  ;;  %4661 = vmatprep.subr.bf16.mxu1 %v4660_v2  ;;  %v1984_v13 = vadd.f32 %v1983_v47, %v1749_v28 }
 0x356   : > { %v1986_v40 = vadd.f32 %v1985_v5, %v1753_v32  ;;  %4663 = vmatpush3.bf16.xpose.msra.mxu1 %v4660_v2 }
 0x358   : > { %v1876_v46 = vpop.f32.mrb[14].mxu0  ;;  %v1989_v35 = vpop.f32.mrb[14].mxu1 }
 0x359   : > { %v1990_v53 = vadd.f32 %v1989_v35, %v1749_v28  ;;  %v6649_v6 = vpop.f32.mrb[15].mxu0  ;;  %v1991_v49 = vpop.f32.mrb[15].mxu1  ;;  %v1865_v28 = vadd.f32 %v1864_v50, %v6618_v22  ;;  %v1877_v43 = vadd.f32 %v1876_v46, %v6618_v22 }
 0x35a   : > { %v1992_v15 = vadd.f32 %v1991_v49, %v1753_v32  ;;  %v1871_v32 = vadd.f32 %v1870_v54, %v6618_v22 }
 0x35b   : > { %v4664_v48 = vpack.c.bf16 %v1990_v53, %v1984_v13 }
 0x35c   : > { %v6651_v14 = vpack.c.bf16 %v1992_v15, %v1986_v40 }
 0x35d   : > { %4665 = vmatprep.subr.bf16.mxu1 %v4664_v48 }
 0x35e   : > { %4667 = vmatpush3.bf16.xpose.msra.mxu1 %v4664_v48 }
 0x365   : > { %4365 = vmatmul.mubr.f32.vlgmr.msra.gmra.mrb[16].mxu1 %v1841_v20 }
 0x366   : > { %4367 = vmatprep.mubr.f32.mxu1 %v1847_v16 }
 0x369   : > { %4368 = vmatmul.mubr.f32.gmra.mrb[18].mxu1 %v1853_v9 }
 0x36a   : > { %4370 = vmatprep.mubr.f32.mxu1 %v1859_v12 }
 0x36d   : > { %4371 = vmatmul.mubr.f32.gmra.mrb[20].mxu1 %v1865_v28 }
 0x36e   : > { %4373 = vmatprep.mubr.f32.mxu1 %v1871_v32  ;;  %v6674_v32 = vld [vmem:[%s6017_s5 + $0x8] sm:$0xff] }
 0x36f   : > { %vm972_vm0 = vcmp.eq.f32.partialorder %v6674_v32, 0.0 }
 0x371   : > { %4374 = vmatmul.mubr.f32.gmra.mrb[22].mxu1 %v1877_v43  ;;  %v6677_v43 = vld [vmem:[%s6017_s5] sm:$0xff] }
 0x372   : > { %vm971_vm1 = vcmp.eq.f32.partialorder %v6677_v43, 0.0 }
 0x37c   : > { %v2060_v19 = vpop.f32.mrb[16].mxu0 }
 0x37d   : > { %v2062_v56 = vpop.f32.mrb[17].mxu0  ;;  %v2061_v58 = vadd.f32 %v2060_v19, %v1757_v55  ;;  %v6685_v19 = vld [vmem:[%s6017_s5 + $0x10] sm:$0xff] }
 0x37e   : > { %v2063_v45 = vadd.f32 %v2062_v56, %v1761_v8  ;;  %vm973_vm4 = vcmp.eq.f32.partialorder %v6685_v19, 0.0 }
 0x380   : > { %v2066_v42 = vpop.f32.mrb[18].mxu0 }
 0x381   : > { %v2067_v60 = vadd.f32 %v2066_v42, %v1757_v55  ;;  %v2068_v61 = vpop.f32.mrb[19].mxu0 }
 0x382   : > { %v2069_v62 = vadd.f32 %v2068_v61, %v1761_v8 }
 0x383   : > { %v4668_v34 = vpack.c.bf16 %v2067_v60, %v2061_v58  ;;  %v6696_v60 = vld [vmem:[%s6017_s5 + $0x28] sm:$0xff] }
 0x384   : > { %v6664_v63 = vpack.c.bf16 %v2069_v62, %v2063_v45  ;;  %v2072_v22 = vpop.f32.mrb[20].mxu0  ;;  %v6699_v45 = vld [vmem:[%s6017_s5 + $0x20] sm:$0xff]  ;;  %vm976_vm5 = vcmp.eq.f32.partialorder %v6696_v60, 0.0 }
 0x385   : > { %v2074_v3 = vpop.f32.mrb[21].mxu0  ;;  %4669 = vmatprep.subr.bf16.mxu1 %v4668_v34  ;;  %v2073_v11 = vadd.f32 %v2072_v22, %v1757_v55  ;;  %vm975_vm6 = vcmp.eq.f32.partialorder %v6699_v45, 0.0 }
 0x386   : > { %4671 = vmatpush3.bf16.msra.mxu1 %v4668_v34  ;;  %v2075_v52 = vadd.f32 %v2074_v3, %v1761_v8 }
 0x388   : > { %v2078_v10 = vpop.f32.mrb[22].mxu0 }
 0x389   : > { %v2079_v25 = vadd.f32 %v2078_v10, %v1757_v55  ;;  %v2080_v17 = vpop.f32.mrb[23].mxu0 }
 0x38a   : > { %v2081_v50 = vadd.f32 %v2080_v17, %v1761_v8  ;;  %v6713_v17 = vld [vmem:[%s6017_s5 + $0x30] sm:$0xff] }
 0x38b   : > { %v4672_v24 = vpack.c.bf16 %v2079_v25, %v2073_v11  ;;  %v6710_v11 = vld [vmem:[%s6017_s5 + $0x38] sm:$0xff]  ;;  %vm977_vm8 = vcmp.eq.f32.partialorder %v6713_v17, 0.0  ;;  %s4282_s5 = sshll.u32 %s7841_s25, 9 }
 0x38c   : > { %v6666_v29 = vpack.c.bf16 %v2081_v50, %v2075_v52  ;;  %v2084_v27 = vpop.f32.mrb[24].mxu0  ;;  %vm978_vm7 = vcmp.eq.f32.partialorder %v6710_v11, 0.0  ;;  %s6842_s4 = scalar_lea.vmem %s7829_s18, %s4282_s5 }
 0x38d   : > { %v2086_v51 = vpop.f32.mrb[25].mxu0  ;;  %4673 = vmatprep.subr.bf16.mxu1 %v4672_v24  ;;  %v2085_v2 = vadd.f32 %v2084_v27, %v1757_v55 }
 0x38e   : > { %4675 = vmatpush3.bf16.msra.mxu1 %v4672_v24  ;;  %v2087_v5 = vadd.f32 %v2086_v51, %v1761_v8 }
 0x390   : > { %v2090_v33 = vpop.f32.mrb[26].mxu0 }
 0x391   : > { %v2091_v54 = vadd.f32 %v2090_v33, %v1757_v55  ;;  %v2092_v47 = vpop.f32.mrb[27].mxu0 }
 0x392   : > { %v2093_v40 = vadd.f32 %v2092_v47, %v1761_v8 }
 0x393   : > { %v4676_v46 = vpack.c.bf16 %v2091_v54, %v2085_v2 }
 0x394   : > { %v6668_v35 = vpack.c.bf16 %v2093_v40, %v2087_v5  ;;  %v2096_v13 = vpop.f32.mrb[28].mxu0 }
 0x395   : > { %v2098_v53 = vpop.f32.mrb[29].mxu0  ;;  %4677 = vmatprep.subr.bf16.mxu1 %v4676_v46  ;;  %v2097_v15 = vadd.f32 %v2096_v13, %v1757_v55 }
 0x396   : > { %4679 = vmatpush3.bf16.msra.mxu1 %v4676_v46  ;;  %v2099_v16 = vadd.f32 %v2098_v53, %v1761_v8 }
 0x398   : > { %v2102_v49 = vpop.f32.mrb[30].mxu0 }
 0x399   : > { %v2103_v48 = vadd.f32 %v2102_v49, %v1757_v55  ;;  %v2104_v20 = vpop.f32.mrb[31].mxu0 }
 0x39a   : > { %v2105_v9 = vadd.f32 %v2104_v20, %v1761_v8 }
 0x39b   : > { %v4680_v12 = vpack.c.bf16 %v2103_v48, %v2097_v15 }
 0x39c   : > { %v6670_v28 = vpack.c.bf16 %v2105_v9, %v2099_v16 }
 0x39d   : > { %4681 = vmatprep.subr.bf16.mxu1 %v4680_v12 }
 0x39e   : > { %4683 = vmatpush3.bf16.msra.mxu1 %v4680_v12 }
 0x39f   : > { %4685 = vmatprep.subr.bf16.mxu1 %v6633_v57 }
 0x438   : > { %v4366_v18 = vpop.f32.mrb[16].mxu1 }
 0x439   : > { %v2213_v55 = vsel %vm972_vm0, -1e+09, %v4366_v18  ;;  %v2173_v56 = vpop.f32.mrb[17].mxu1 }
 0x43a   : > { %v2212_v8 = vsel %vm971_vm1, -1e+09, %v2173_v56  ;;  %v2224_v42 = vsel %vm2220_vm2, %v2213_v55, -inf }
 0x43b   : > { %2225 = vmax.xlane.f32.xlu1 %v2224_v42  ;;  %v2221_v58 = vsel %vm2220_vm2, %v2212_v8, -inf }
 0x43c   : > { %2222 = vmax.xlane.f32.xlu0 %v2221_v58  ;;  %v4369_v61 = vpop.f32.mrb[18].mxu1 }
 0x43d   : > { %v2215_v62 = vsel %vm974_vm3, -1e+09, %v4369_v61  ;;  %v2183_v34 = vpop.f32.mrb[19].mxu1 }
 0x43e   : > { %v2214_v22 = vsel %vm973_vm4, -1e+09, %v2183_v34  ;;  %v2230_v3 = vsel %vm2220_vm2, %v2215_v62, -inf }
 0x43f   : > { %2231 = vmax.xlane.f32.xlu1 %v2230_v3  ;;  %v2227_v10 = vsel %vm2220_vm2, %v2214_v22, -inf }
 0x440   : > { %2228 = vmax.xlane.f32.xlu0 %v2227_v10  ;;  %v4372_v25 = vpop.f32.mrb[20].mxu1 }
 0x441   : > { %v2217_v52 = vsel %vm976_vm5, -1e+09, %v4372_v25  ;;  %v2193_v50 = vpop.f32.mrb[21].mxu1 }
 0x442   : > { %v2216_v24 = vsel %vm975_vm6, -1e+09, %v2193_v50  ;;  %v2236_v27 = vsel %vm2220_vm2, %v2217_v52, -inf }
 0x443   : > { %2237 = vmax.xlane.f32.xlu1 %v2236_v27  ;;  %v2233_v51 = vsel %vm2220_vm2, %v2216_v24, -inf }
 0x444   : > { %2234 = vmax.xlane.f32.xlu0 %v2233_v51  ;;  %v4375_v33 = vpop.f32.mrb[22].mxu1 }
 0x445   : > { %v2219_v2 = vsel %vm978_vm7, -1e+09, %v4375_v33  ;;  %v2203_v54 = vpop.f32.mrb[23].mxu1 }
 0x446   : > { %v2218_v47 = vsel %vm977_vm8, -1e+09, %v2203_v54  ;;  %v2242_v5 = vsel %vm2220_vm2, %v2219_v2, -inf }
 0x447   : > { %2243 = vmax.xlane.f32.xlu1 %v2242_v5  ;;  %v2239_v40 = vsel %vm2220_vm2, %v2218_v47, -inf }
 0x448   : > { %2240 = vmax.xlane.f32.xlu0 %v2239_v40 }
 0x4c8   : > { %v2226_v46 = vpop.xlane.xlu1 %2225 }
 0x4c9   : > { %v2246_v13 = vsub.f32 %v2213_v55, %v2226_v46  ;;  %v2223_v53 = vpop.xlane.xlu0 %2222 }
 0x4ca   : > { %v2245_v49 = vsub.f32 %v2212_v8, %v2223_v53 }
 0x4cb   : > { %v2255_v15 = vmul.f32 1.442695, %v2246_v13 }
 0x4cc   : > { %v2253_v48 = vmul.f32 1.442695, %v2245_v49  ;;  %v2232_v20 = vpop.xlane.xlu1 %2231 }
 0x4cd   : > { %5164 = vpow2.f32 %v2255_v15  ;;  %v2248_v16 = vsub.f32 %v2215_v62, %v2232_v20  ;;  %v2229_v9 = vpop.xlane.xlu0 %2228 }
 0x4ce   : > { %5166 = vpow2.f32 %v2253_v48  ;;  %v2247_v12 = vsub.f32 %v2214_v22, %v2229_v9 }
 0x4cf   : > { %v2259_v18 = vmul.f32 1.442695, %v2248_v16 }
 0x4d0   : > { %v2257_v56 = vmul.f32 1.442695, %v2247_v12  ;;  %v2238_v42 = vpop.xlane.xlu1 %2237 }
 0x4d1   : > { %5168 = vpow2.f32 %v2259_v18  ;;  %v2250_v58 = vsub.f32 %v2217_v52, %v2238_v42  ;;  %v2235_v61 = vpop.xlane.xlu0 %2234 }
 0x4d2   : > { %5170 = vpow2.f32 %v2257_v56  ;;  %v2249_v34 = vsub.f32 %v2216_v24, %v2235_v61 }
 0x4d3   : > { %v2263_v3 = vmul.f32 1.442695, %v2250_v58 }
 0x4d4   : > { %v2261_v55 = vmul.f32 1.442695, %v2249_v34  ;;  %v2244_v10 = vpop.xlane.xlu1 %2243 }
 0x4d5   : > { %5172 = vpow2.f32 %v2263_v3  ;;  %v2252_v8 = vsub.f32 %v2219_v2, %v2244_v10  ;;  %v2241_v25 = vpop.xlane.xlu0 %2240 }
 0x4d6   : > { %5174 = vpow2.f32 %v2261_v55  ;;  %v2251_v50 = vsub.f32 %v2218_v47, %v2241_v25 }
 0x4d7   : > { %v5165_v62 = vpop.eup %5164  ;;  %v2267_v27 = vmul.f32 1.442695, %v2252_v8 }
 0x4d8   : > { %v5167_v51 = vpop.eup %5166  ;;  %v2265_v22 = vmul.f32 1.442695, %v2251_v50  ;;  %v2272_v33 = vsel %vm2220_vm2, %v5165_v62, 0.0 }
 0x4d9   : > { %5176 = vpow2.f32 %v2267_v27  ;;  %2273 = vadd.xlane.f32.xlu1 %v2272_v33  ;;  %v2269_v52 = vsel %vm2220_vm2, %v5167_v51, 0.0 }
 0x4da   : > { %5178 = vpow2.f32 %v2265_v22  ;;  %2270 = vadd.xlane.f32.xlu0 %v2269_v52  ;;  %v1745_v52 = vrot.slane %v6614_v41, %v6364_v37 }
 0x4db   : > { %v5169_v24 = vpop.eup %5168 }
 0x4dc   : > { %v5171_v54 = vpop.eup %5170  ;;  %v2278_v5 = vsel %vm2220_vm2, %v5169_v24, 0.0  ;;  %v1843_v41 = vadd.f32 %v6631_v7, %v1745_v52  ;;  %v1873_v7 = vadd.f32 %v6647_v0, %v1745_v52 }
 0x4dd   : > { %2279 = vadd.xlane.f32.xlu1 %v2278_v5  ;;  %v2275_v2 = vsel %vm2220_vm2, %v5171_v54, 0.0 }
 0x4de   : > { %2276 = vadd.xlane.f32.xlu0 %v2275_v2 }
 0x4df   : > { %v5173_v47 = vpop.eup %5172 }
 0x4e0   : > { %v5175_v40 = vpop.eup %5174  ;;  %v2284_v46 = vsel %vm2220_vm2, %v5173_v47, 0.0 }
 0x4e1   : > { %2285 = vadd.xlane.f32.xlu1 %v2284_v46  ;;  %v2281_v13 = vsel %vm2220_vm2, %v5175_v40, 0.0 }
 0x4e2   : > { %2282 = vadd.xlane.f32.xlu0 %v2281_v13 }
 0x4e3   : > { %v5177_v53 = vpop.eup %5176 }
 0x4e4   : > { %v5179_v49 = vpop.eup %5178  ;;  %v2290_v15 = vsel %vm2220_vm2, %v5177_v53, 0.0 }
 0x4e5   : > { %2291 = vadd.xlane.f32.xlu1 %v2290_v15  ;;  %v2287_v48 = vsel %vm2220_vm2, %v5179_v49, 0.0 }
 0x4e6   : > { %2288 = vadd.xlane.f32.xlu0 %v2287_v48 }
 0x566   : > { %v2274_v20 = vpop.xlane.xlu1 %2273 }
 0x567   : > { %5180 = vrcp.f32 %v2274_v20  ;;  %v2271_v16 = vpop.xlane.xlu0 %2270 }
 0x568   : > { %5182 = vrcp.f32 %v2271_v16 }
 0x56a   : > { %v2280_v9 = vpop.xlane.xlu1 %2279 }
 0x56b   : > { %5184 = vrcp.f32 %v2280_v9  ;;  %v2277_v12 = vpop.xlane.xlu0 %2276 }
 0x56c   : > { %5186 = vrcp.f32 %v2277_v12 }
 0x56e   : > { %v2286_v18 = vpop.xlane.xlu1 %2285 }
 0x56f   : > { %5188 = vrcp.f32 %v2286_v18  ;;  %v2283_v56 = vpop.xlane.xlu0 %2282 }
 0x570   : > { %5190 = vrcp.f32 %v2283_v56 }
 0x571   : > { %v5181_v42 = vpop.eup %5180 }
 0x572   : > { %v5183_v58 = vpop.eup %5182  ;;  %v2292_v61 = vpop.xlane.xlu1 %2291  ;;  %v2302_v55 = vmul.f32 %v5181_v42, %v5165_v62 }
 0x573   : > { %5192 = vrcp.f32 %v2292_v61  ;;  %v2289_v34 = vpop.xlane.xlu0 %2288  ;;  %v2301_v3 = vmul.f32 %v5183_v58, %v5167_v51 }
 0x574   : > { %5194 = vrcp.f32 %v2289_v34 }
 0x575   : > { %v5185_v10 = vpop.eup %5184  ;;  %4392 = vmatprep.mubr.msk.f32.mxu1 %vm2220_vm2, %v2301_v3 }
 0x576   : > { %v5187_v8 = vpop.eup %5186  ;;  %4393 = vmatmul.mubr.msk.f32.vlgmr.msra.gmra.mrb[24].mxu1 %vm2220_vm2, %v2302_v55  ;;  %v2304_v50 = vmul.f32 %v5185_v10, %v5169_v24 }
 0x577   : > { %4687 = vmatpush3.bf16.xpose.msra.mxu1 %v6633_v57  ;;  %v2303_v25 = vmul.f32 %v5187_v8, %v5171_v54  ;;  %v1837_v54 = vadd.f32 %v6626_v1, %v1745_v52  ;;  %v1855_v1 = vadd.f32 %v6637_v59, %v1745_v52 }
 0x578   : > { %4689 = vmatprep.subr.bf16.mxu1 %v6639_v44 }
 0x579   : > { %v5189_v27 = vpop.eup %5188  ;;  %4395 = vmatprep.mubr.msk.f32.mxu1 %vm2220_vm2, %v2303_v25 }
 0x57a   : > { %v5191_v22 = vpop.eup %5190  ;;  %4396 = vmatmul.mubr.msk.f32.gmra.mrb[26].mxu1 %vm2220_vm2, %v2304_v50  ;;  %v2306_v51 = vmul.f32 %v5189_v27, %v5173_v47 }
 0x57b   : > { %v2305_v62 = vmul.f32 %v5191_v22, %v5175_v40 }
 0x57d   : > { %v5193_v33 = vpop.eup %5192  ;;  %4398 = vmatprep.mubr.msk.f32.mxu1 %vm2220_vm2, %v2305_v62 }
 0x57e   : > { %v5195_v5 = vpop.eup %5194  ;;  %4399 = vmatmul.mubr.msk.f32.gmra.mrb[28].mxu1 %vm2220_vm2, %v2306_v51  ;;  %v2308_v24 = vmul.f32 %v5193_v33, %v5177_v53 }
 0x57f   : > { %4691 = vmatpush3.bf16.xpose.msra.mxu1 %v6639_v44  ;;  %v2307_v57 = vmul.f32 %v5195_v5, %v5179_v49  ;;  %v1849_v44 = vadd.f32 %v6635_v21, %v1745_v52  ;;  %v1879_v21 = vadd.f32 %v6649_v6, %v1745_v52 }
 0x580   : > { %4693 = vmatprep.subr.bf16.mxu1 %v6645_v38 }
 0x581   : > { %4401 = vmatprep.mubr.msk.f32.mxu1 %vm2220_vm2, %v2307_v57 }
 0x582   : > { %4402 = vmatmul.mubr.msk.f32.gmra.mrb[30].mxu1 %vm2220_vm2, %v2308_v24 }
 0x583   : > { %4420 = vmatprep.mubr.f32.mxu1 %v1837_v54 }
 0x587   : > { %4695 = vmatpush3.bf16.xpose.msra.mxu1 %v6645_v38  ;;  %v1861_v38 = vadd.f32 %v6641_v26, %v1745_v52 }
 0x588   : > { %4697 = vmatprep.subr.bf16.mxu1 %v6651_v14 }
 0x58f   : > { %4699 = vmatpush3.bf16.xpose.msra.mxu1 %v6651_v14  ;;  %v1867_v14 = vadd.f32 %v6643_v31, %v1745_v52 }
 0x590   : > { %4701 = vmatprep.subr.bf16.mxu1 %v6664_v63 }
 0x596   : > { %4421 = vmatmul.mubr.f32.vlgmr.msra.gmra.mrb[32].mxu1 %v1843_v41 }
 0x597   : > { %4423 = vmatprep.mubr.f32.mxu1 %v1849_v44  ;;  %4703 = vmatpush3.bf16.msra.mxu1 %v6664_v63 }
 0x598   : > { %4705 = vmatprep.subr.bf16.mxu1 %v6666_v29 }
 0x59a   : > { %4424 = vmatmul.mubr.f32.gmra.mrb[34].mxu1 %v1855_v1 }
 0x59b   : > { %4426 = vmatprep.mubr.f32.mxu1 %v1861_v38  ;;  %4707 = vmatpush3.bf16.msra.mxu1 %v6666_v29 }
 0x59c   : > { %4709 = vmatprep.subr.bf16.mxu1 %v6668_v35 }
 0x59e   : > { %4427 = vmatmul.mubr.f32.gmra.mrb[36].mxu1 %v1867_v14 }
 0x59f   : > { %4429 = vmatprep.mubr.f32.mxu1 %v1873_v7  ;;  %4711 = vmatpush3.bf16.msra.mxu1 %v6668_v35 }
 0x5a0   : > { %4713 = vmatprep.subr.bf16.mxu1 %v6670_v28 }
 0x5a2   : > { %4430 = vmatmul.mubr.f32.gmra.mrb[38].mxu1 %v1879_v21 }
 0x5a3   : > { %4715 = vmatpush3.bf16.msra.mxu1 %v6670_v28 }
 0x649   : > { %v6770_v59 = vpop.f32.mrb[24].mxu1 }
 0x64a   : > { %v6772_v26 = vpop.f32.mrb[25].mxu1 }
 0x64d   : > { %v6774_v31 = vpop.f32.mrb[26].mxu1 }
 0x64e   : > { %v6776_v63 = vpop.f32.mrb[27].mxu1 }
 0x651   : > { %v6778_v0 = vpop.f32.mrb[28].mxu1 }
 0x652   : > { %v6780_v29 = vpop.f32.mrb[29].mxu1 }
 0x655   : > { %v6782_v35 = vpop.f32.mrb[30].mxu1 }
 0x656   : > { %v6784_v6 = vpop.f32.mrb[31].mxu1 }
 0x669   : > { %v4422_v2 = vpop.f32.mrb[32].mxu1 }
 0x66a   : > { %v2544_v28 = vsel %vm972_vm0, -1e+09, %v4422_v2  ;;  %v2504_v47 = vpop.f32.mrb[33].mxu1 }
 0x66b   : > { %v2543_v40 = vsel %vm971_vm1, -1e+09, %v2504_v47  ;;  %v2554_v46 = vsel %vm2220_vm2, %v2544_v28, -inf }
 0x66c   : > { %2555 = vmax.xlane.f32.xlu1 %v2554_v46  ;;  %v2551_v13 = vsel %vm2220_vm2, %v2543_v40, -inf }
 0x66d   : > { %2552 = vmax.xlane.f32.xlu0 %v2551_v13  ;;  %v4425_v53 = vpop.f32.mrb[34].mxu1 }
 0x66e   : > { %v2514_v49 = vpop.f32.mrb[35].mxu1  ;;  %v2546_v34 = vsel %vm974_vm3, -1e+09, %v4425_v53 }
 0x66f   : > { %v2545_v55 = vsel %vm973_vm4, -1e+09, %v2514_v49  ;;  %v2560_v10 = vsel %vm2220_vm2, %v2546_v34, -inf }
 0x670   : > { %v2557_v25 = vsel %vm2220_vm2, %v2545_v55, -inf }
 0x671   : > { %v4428_v15 = vpop.f32.mrb[36].mxu1 }
 0x672   : > { %v2524_v48 = vpop.f32.mrb[37].mxu1  ;;  %v2548_v8 = vsel %vm976_vm5, -1e+09, %v4428_v15 }
 0x673   : > { %v2547_v50 = vsel %vm975_vm6, -1e+09, %v2524_v48  ;;  %v2566_v39 = vsel %vm2220_vm2, %v2548_v8, -inf }
 0x674   : > { %v2563_v19 = vsel %vm2220_vm2, %v2547_v50, -inf }
 0x675   : > { %v4431_v20 = vpop.f32.mrb[38].mxu1 }
 0x676   : > { %v2534_v16 = vpop.f32.mrb[39].mxu1  ;;  %v2550_v27 = vsel %vm978_vm7, -1e+09, %v4431_v20 }
 0x677   : > { %v2549_v22 = vsel %vm977_vm8, -1e+09, %v2534_v16  ;;  %v2572_v60 = vsel %vm2220_vm2, %v2550_v27, -inf }
 0x678   : > { %v2569_v62 = vsel %vm2220_vm2, %v2549_v22, -inf }
 0x6f9   : > { %v2556_v9 = vpop.xlane.xlu1 %2555 }
 0x6fa   : > { %v2576_v12 = vsub.f32 %v2544_v28, %v2556_v9  ;;  %v2553_v32 = vpop.xlane.xlu0 %2552 }
 0x6fb   : > { %v2575_v18 = vsub.f32 %v2543_v40, %v2553_v32 }
 0x6fc   : > { %v2585_v56 = vmul.f32 1.442695, %v2576_v12 }
 0x6fd   : > { %v2583_v42 = vmul.f32 1.442695, %v2575_v18 }
 0x6fe   : > { %5196 = vpow2.f32 %v2585_v56 }
 0x6ff   : > { %5198 = vpow2.f32 %v2583_v42 }
 0x708   : > { %v5197_v43 = vpop.eup %5196 }
 0x709   : > { %v5199_v58 = vpop.eup %5198  ;;  %v2602_v61 = vsel %vm2220_vm2, %v5197_v43, 0.0 }
 0x70a   : > { %2603 = vadd.xlane.f32.xlu1 %v2602_v61  ;;  %v2599_v3 = vsel %vm2220_vm2, %v5199_v58, 0.0  ;;  %v1175_v61 = vld [vmem:[%s6842_s4 + $0x18] sm:$0xff] }
 0x70b   : > { %2600 = vadd.xlane.f32.xlu0 %v2599_v3  ;;  %v1172_v3 = vld [vmem:[%s6842_s4] sm:$0xff] }
 0x70e   : > { %2561 = vmax.xlane.f32.xlu1 %v2560_v10 }
 0x70f   : > { %2558 = vmax.xlane.f32.xlu0 %v2557_v25  ;;  %v1179_v25 = vld [vmem:[%s6842_s4 + $0x38] sm:$0xff] }
 0x712   : > { %2567 = vmax.xlane.f32.xlu1 %v2566_v39  ;;  %v1176_v39 = vld [vmem:[%s6842_s4 + $0x20] sm:$0xff] }
 0x713   : > { %2564 = vmax.xlane.f32.xlu0 %v2563_v19 }
 0x716   : > { %2573 = vmax.xlane.f32.xlu1 %v2572_v60  ;;  %v1183_v60 = vld [vmem:[%s6842_s4 + $0x58] sm:$0xff] }
 0x717   : > { %2570 = vmax.xlane.f32.xlu0 %v2569_v62 }
 0x797   : > { %v2604_v45 = vpop.xlane.xlu1 %2603 }
 0x798   : > { %5200 = vrcp.f32 %v2604_v45  ;;  %v2601_v51 = vpop.xlane.xlu0 %2600  ;;  %v1180_v45 = vld [vmem:[%s6842_s4 + $0x40] sm:$0xff] }
 0x799   : > { %5202 = vrcp.f32 %v2601_v51  ;;  %v1182_v51 = vld [vmem:[%s6842_s4 + $0x50] sm:$0xff] }
 0x79b   : > { %v2562_v33 = vpop.xlane.xlu1 %2561 }
 0x79c   : > { %v2578_v11 = vsub.f32 %v2546_v34, %v2562_v33  ;;  %v2559_v52 = vpop.xlane.xlu0 %2558  ;;  %v4726_v33 = vpack.c.bf16 %v1182_v51, %v1180_v45  ;;  %v1215_v45 = vld [vmem:[%s6842_s4 + $0x158] sm:$0xff] }
 0x79d   : > { %v2577_v5 = vsub.f32 %v2545_v55, %v2559_v52  ;;  %v1174_v55 = vld [vmem:[%s6842_s4 + $0x10] sm:$0xff]  ;;  %v1187_v52 = vld [vmem:[%s6842_s4 + $0x78] sm:$0xff] }
 0x79e   : > { %v2589_v57 = vmul.f32 1.442695, %v2578_v11  ;;  %v4718_v10 = vpack.c.bf16 %v1174_v55, %v1172_v3  ;;  %v1185_v11 = vld [vmem:[%s6842_s4 + $0x68] sm:$0xff]  ;;  %v1207_v3 = vld [vmem:[%s6842_s4 + $0x118] sm:$0xff] }
 0x79f   : > { %v2587_v24 = vmul.f32 1.442695, %v2577_v5  ;;  %v2568_v54 = vpop.xlane.xlu1 %2567  ;;  %v4728_v5 = vpack.c.bf16 %v1187_v52, %v1185_v11  ;;  %v1212_v11 = vld [vmem:[%s6842_s4 + $0x140] sm:$0xff]  ;;  %v1214_v52 = vld [vmem:[%s6842_s4 + $0x150] sm:$0xff] }
 0x7a0   : > { %5204 = vpow2.f32 %v2589_v57  ;;  %v2580_v17 = vsub.f32 %v2548_v8, %v2568_v54  ;;  %v2565_v41 = vpop.xlane.xlu0 %2564  ;;  %v1177_v8 = vld [vmem:[%s6842_s4 + $0x28] sm:$0xff]  ;;  %v1184_v57 = vld [vmem:[%s6842_s4 + $0x60] sm:$0xff] }
 0x7a1   : > { %5206 = vpow2.f32 %v2587_v24  ;;  %v2579_v44 = vsub.f32 %v2547_v50, %v2565_v41  ;;  %v4720_v50 = vpack.c.bf16 %v1179_v25, %v1177_v8  ;;  %v1186_v24 = vld [vmem:[%s6842_s4 + $0x70] sm:$0xff]  ;;  %v1191_v41 = vld [vmem:[%s6842_s4 + $0x98] sm:$0xff]  ;;  %v1204_v8 = vld [vmem:[%s6842_s4 + $0x100] sm:$0xff] }
 0x7a2   : > { %v5201_v1 = vpop.eup %5200  ;;  %v2593_v38 = vmul.f32 1.442695, %v2580_v17  ;;  %v4730_v54 = vpack.c.bf16 %v1186_v24, %v1184_v57  ;;  %v1189_v17 = vld [vmem:[%s6842_s4 + $0x88] sm:$0xff]  ;;  %v1206_v25 = vld [vmem:[%s6842_s4 + $0x110] sm:$0xff]  ;;  %v1219_v57 = vld [vmem:[%s6842_s4 + $0x178] sm:$0xff]  ;;  %v4758_v24 = vpack.c.bf16 %v1214_v52, %v1212_v11 }
 0x7a3   : > { %v5203_v14 = vpop.eup %5202  ;;  %v2591_v7 = vmul.f32 1.442695, %v2579_v44  ;;  %v2574_v21 = vpop.xlane.xlu1 %2573  ;;  %v2632_v40 = vmul.f32 %v5201_v1, %v5197_v43  ;;  %v4732_v44 = vpack.c.bf16 %v1191_v41, %v1189_v17  ;;  %v1188_v1 = vld [vmem:[%s6842_s4 + $0x80] sm:$0xff]  ;;  %v1218_v41 = vld [vmem:[%s6842_s4 + $0x170] sm:$0xff] }
 0x7a4   : > { %5208 = vpow2.f32 %v2593_v38  ;;  %v2582_v2 = vsub.f32 %v2550_v27, %v2574_v21  ;;  %v2571_v28 = vpop.xlane.xlu0 %2570  ;;  %v2631_v47 = vmul.f32 %v5203_v14, %v5199_v58  ;;  %v1173_v58 = vld [vmem:[%s6842_s4 + $0x8] sm:$0xff]  ;;  %v1178_v27 = vld [vmem:[%s6842_s4 + $0x30] sm:$0xff]  ;;  %v1195_v21 = vld [vmem:[%s6842_s4 + $0xb8] sm:$0xff] }
 0x7a5   : > { %5210 = vpow2.f32 %v2591_v7  ;;  %v2581_v46 = vsub.f32 %v2549_v22, %v2571_v28  ;;  %v4716_v34 = vpack.c.bf16 %v1175_v61, %v1173_v58  ;;  %v4722_v19 = vpack.c.bf16 %v1178_v27, %v1176_v39  ;;  %v1181_v22 = vld [vmem:[%s6842_s4 + $0x48] sm:$0xff]  ;;  %v1190_v38 = vld [vmem:[%s6842_s4 + $0x90] sm:$0xff]  ;;  %v1192_v28 = vld [vmem:[%s6842_s4 + $0xa0] sm:$0xff] }
 0x7a6   : > { %v2597_v13 = vmul.f32 1.442695, %v2582_v2  ;;  %4448 = vmatprep.mubr.msk.f32.mxu1 %vm2220_vm2, %v2631_v47  ;;  %v4724_v62 = vpack.c.bf16 %v1183_v60, %v1181_v22  ;;  %v4734_v14 = vpack.c.bf16 %v1190_v38, %v1188_v1  ;;  %v1193_v7 = vld [vmem:[%s6842_s4 + $0xa8] sm:$0xff]  ;;  %v1194_v47 = vld [vmem:[%s6842_s4 + $0xb0] sm:$0xff]  ;;  %v1200_v58 = vld [vmem:[%s6842_s4 + $0xe0] sm:$0xff]  ;;  %v4750_v27 = vpack.c.bf16 %v1206_v25, %v1204_v8 }
 0x7a7   : > { %v2595_v53 = vmul.f32 1.442695, %v2581_v46  ;;  %4449 = vmatmul.mubr.msk.f32.vlgmr.msra.gmra.mrb[40].mxu1 %vm2220_vm2, %v2632_v40  ;;  %4717 = vmatprep.subr.bf16.mxu1 %v4716_v34  ;;  %v4736_v2 = vpack.c.bf16 %v1195_v21, %v1193_v7  ;;  %v4738_v40 = vpack.c.bf16 %v1194_v47, %v1192_v28  ;;  %v1197_v46 = vld [vmem:[%s6842_s4 + $0xc8] sm:$0xff]  ;;  %v1202_v61 = vld [vmem:[%s6842_s4 + $0xf0] sm:$0xff]  ;;  %v1211_v39 = vld [vmem:[%s6842_s4 + $0x138] sm:$0xff] }
 0x7a8   : > { %5212 = vpow2.f32 %v2597_v13  ;;  %4719 = vmatpush1.bf16.msra.mxu1 %v4718_v10  ;;  %v1199_v13 = vld [vmem:[%s6842_s4 + $0xd8] sm:$0xff]  ;;  %v1205_v34 = vld [vmem:[%s6842_s4 + $0x108] sm:$0xff]  ;;  %v4746_v55 = vpack.c.bf16 %v1202_v61, %v1200_v58  ;;  %v1208_v22 = vld [vmem:[%s6842_s4 + $0x120] sm:$0xff] }
 0x7a9   : > { %5214 = vpow2.f32 %v2595_v53  ;;  %4721 = vmatprep.subr.bf16.mxu1 %v4720_v50  ;;  %v1196_v53 = vld [vmem:[%s6842_s4 + $0xc0] sm:$0xff]  ;;  %v4748_v10 = vpack.c.bf16 %v1207_v3, %v1205_v34  ;;  %v1209_v50 = vld [vmem:[%s6842_s4 + $0x128] sm:$0xff]  ;;  %v1210_v60 = vld [vmem:[%s6842_s4 + $0x130] sm:$0xff] }
 0x7aa   : > { %v6814_v49 = vpop.eup %5204  ;;  %v4754_v51 = vpack.c.bf16 %v1210_v60, %v1208_v22  ;;  %v1216_v17 = vld [vmem:[%s6842_s4 + $0x160] sm:$0xff]  ;;  %v1223_v1 = vld [vmem:[%s6842_s4 + $0x198] sm:$0xff]  ;;  %v1222_v21 = vld [vmem:[%s6842_s4 + $0x190] sm:$0xff] }
 0x7ab   : > { %v6816_v15 = vpop.eup %5206  ;;  %v2608_v48 = vsel %vm2220_vm2, %v6814_v49, 0.0  ;;  %v4762_v38 = vpack.c.bf16 %v1218_v41, %v1216_v17  ;;  %v1220_v7 = vld [vmem:[%s6842_s4 + $0x180] sm:$0xff]  ;;  %v1227_v28 = vld [vmem:[%s6842_s4 + $0x1b8] sm:$0xff] }
 0x7ac   : > { %2609 = vadd.xlane.f32.xlu1 %v2608_v48  ;;  %v2605_v20 = vsel %vm2220_vm2, %v6816_v15, 0.0  ;;  %4723 = vmatpush1.bf16.msra.mxu1 %v4722_v19  ;;  %v4740_v48 = vpack.c.bf16 %v1199_v13, %v1197_v46  ;;  %v4752_v19 = vpack.c.bf16 %v1211_v39, %v1209_v50  ;;  %v4766_v47 = vpack.c.bf16 %v1222_v21, %v1220_v7  ;;  %v1224_v46 = vld [vmem:[%s6842_s4 + $0x1a0] sm:$0xff]  ;;  %v1226_v13 = vld [vmem:[%s6842_s4 + $0x1b0] sm:$0xff]  ;;  %v1235_v58 = vld [vmem:[%s6842_s4 + $0x1f8] sm:$0xff] }
 0x7ad   : > { %2606 = vadd.xlane.f32.xlu0 %v2605_v20  ;;  %4725 = vmatprep.subr.bf16.mxu1 %v4724_v62  ;;  %v1198_v20 = vld [vmem:[%s6842_s4 + $0xd0] sm:$0xff]  ;;  %v1213_v62 = vld [vmem:[%s6842_s4 + $0x148] sm:$0xff]  ;;  %v1232_v3 = vld [vmem:[%s6842_s4 + $0x1e0] sm:$0xff] }
 0x7ae   : > { %v6822_v16 = vpop.eup %5208 }
 0x7af   : > { %v6824_v9 = vpop.eup %5210  ;;  %v2614_v12 = vsel %vm2220_vm2, %v6822_v16, 0.0 }
 0x7b0   : > { %2615 = vadd.xlane.f32.xlu1 %v2614_v12  ;;  %v2611_v32 = vsel %vm2220_vm2, %v6824_v9, 0.0  ;;  %4727 = vmatpush1.bf16.msra.mxu1 %v4726_v33  ;;  %v1201_v12 = vld [vmem:[%s6842_s4 + $0xe8] sm:$0xff]  ;;  %v4756_v33 = vpack.c.bf16 %v1215_v45, %v1213_v62 }
 0x7b1   : > { %2612 = vadd.xlane.f32.xlu0 %v2611_v32  ;;  %4729 = vmatprep.subr.bf16.mxu1 %v4728_v5  ;;  %v1203_v32 = vld [vmem:[%s6842_s4 + $0xf8] sm:$0xff]  ;;  %v1217_v5 = vld [vmem:[%s6842_s4 + $0x168] sm:$0xff] }
 0x7b2   : > { %v6830_v18 = vpop.eup %5212 }
 0x7b3   : > { %v6832_v56 = vpop.eup %5214  ;;  %v2620_v42 = vsel %vm2220_vm2, %v6830_v18, 0.0 }
 0x7b4   : > { %2621 = vadd.xlane.f32.xlu1 %v2620_v42  ;;  %v2617_v43 = vsel %vm2220_vm2, %v6832_v56, 0.0  ;;  %4731 = vmatpush1.bf16.msra.mxu1 %v4730_v54  ;;  %v4742_v42 = vpack.c.bf16 %v1198_v20, %v1196_v53  ;;  %v4760_v54 = vpack.c.bf16 %v1219_v57, %v1217_v5  ;;  %v1229_v53 = vld [vmem:[%s6842_s4 + $0x1c8] sm:$0xff]  ;;  %v4770_v20 = vpack.c.bf16 %v1226_v13, %v1224_v46 }
 0x7b5   : > { %2618 = vadd.xlane.f32.xlu0 %v2617_v43  ;;  %4733 = vmatprep.subr.bf16.mxu1 %v4732_v44  ;;  %v4744_v43 = vpack.c.bf16 %v1203_v32, %v1201_v12  ;;  %v1221_v44 = vld [vmem:[%s6842_s4 + $0x188] sm:$0xff]  ;;  %v1228_v32 = vld [vmem:[%s6842_s4 + $0x1c0] sm:$0xff] }
 0x7b6   : > { %v5295_v46 = vld [vmem:[%s6070_s15 + $0x28] sm:$0xff] }
 0x7b8   : > { %4735 = vmatpush1.bf16.msra.mxu1 %v4734_v14  ;;  %v4764_v14 = vpack.c.bf16 %v1223_v1, %v1221_v44 }
 0x7b9   : > { %4737 = vmatprep.subr.bf16.mxu1 %v4736_v2  ;;  %v1225_v2 = vld [vmem:[%s6842_s4 + $0x1a8] sm:$0xff] }
 0x7bc   : > { %4739 = vmatpush1.bf16.msra.mxu1 %v4738_v40  ;;  %v4768_v40 = vpack.c.bf16 %v1227_v28, %v1225_v2 }
 0x7bd   : > { %4741 = vmatprep.subr.bf16.mxu1 %v4740_v48  ;;  %v1231_v48 = vld [vmem:[%s6842_s4 + $0x1d8] sm:$0xff] }
 0x7be   : > { %v4772_v12 = vpack.c.bf16 %v1231_v48, %v1229_v53  ;;  %v5296_v53 = vld [vmem:[%s6070_s15 + $0x10] sm:$0xff] }
 0x7c0   : > { %4743 = vmatpush1.bf16.msra.mxu1 %v4742_v42  ;;  %v1230_v42 = vld [vmem:[%s6842_s4 + $0x1d0] sm:$0xff] }
 0x7c1   : > { %4745 = vmatprep.subr.bf16.mxu1 %v4744_v43  ;;  %v1233_v43 = vld [vmem:[%s6842_s4 + $0x1e8] sm:$0xff]  ;;  %v4774_v61 = vpack.c.bf16 %v1230_v42, %v1228_v32  ;;  %v5298_v32 = vld [vmem:[%s6070_s15 + $0x40] sm:$0xff] }
 0x7c2   : > { %v4776_v34 = vpack.c.bf16 %v1235_v58, %v1233_v43  ;;  %v5299_v43 = vld [vmem:[%s6070_s15 + $0x48] sm:$0xff] }
 0x7c4   : > { %4747 = vmatpush1.bf16.msra.mxu1 %v4746_v55  ;;  %v1234_v55 = vld [vmem:[%s6842_s4 + $0x1f0] sm:$0xff] }
 0x7c5   : > { %4749 = vmatprep.subr.bf16.mxu1 %v4748_v10  ;;  %v4778_v10 = vpack.c.bf16 %v1234_v55, %v1232_v3  ;;  %v5300_v3 = vld [vmem:[%s6070_s15 + $0x30] sm:$0xff] }
 0x7c8   : > { %4751 = vmatpush1.bf16.msra.mxu1 %v4750_v27 }
 0x7c9   : > { %4753 = vmatprep.subr.bf16.mxu1 %v4752_v19 }
 0x7cc   : > { %4755 = vmatpush1.bf16.msra.mxu1 %v4754_v51 }
 0x7cd   : > { %4757 = vmatprep.subr.bf16.mxu1 %v4756_v33 }
 0x7d0   : > { %4759 = vmatpush1.bf16.msra.mxu1 %v4758_v24 }
 0x7d1   : > { %4761 = vmatprep.subr.bf16.mxu1 %v4760_v54 }
 0x7d4   : > { %4763 = vmatpush1.bf16.msra.mxu1 %v4762_v38  ;;  %v5292_v38 = vld [vmem:[%s6070_s15] sm:$0xff] }
 0x7d5   : > { %4765 = vmatprep.subr.bf16.mxu1 %v4764_v14  ;;  %v5293_v14 = vld [vmem:[%s6070_s15 + $0x8] sm:$0xff] }
 0x7d8   : > { %4767 = vmatpush1.bf16.msra.mxu1 %v4766_v47  ;;  %v5294_v47 = vld [vmem:[%s6070_s15 + $0x20] sm:$0xff] }
 0x7d9   : > { %4769 = vmatprep.subr.bf16.mxu1 %v4768_v40 }
 0x7dc   : > { %4771 = vmatpush1.bf16.msra.mxu1 %v4770_v20  ;;  %v5297_v20 = vld [vmem:[%s6070_s15 + $0x18] sm:$0xff] }
 0x7dd   : > { %4773 = vmatprep.subr.bf16.mxu1 %v4772_v12 }
 0x7e0   : > { %4775 = vmatpush1.bf16.msra.mxu1 %v4774_v61 }
 0x7e1   : > { %4777 = vmatprep.subr.bf16.mxu1 %v4776_v34 }
 0x7e4   : > { %4779 = vmatpush1.bf16.msra.mxu1 %v4778_v10  ;;  %v5301_v10 = vld [vmem:[%s6070_s15 + $0x38] sm:$0xff] }
 0x839   : > { %v2610_v8 = vpop.xlane.xlu1 %2609 }
 0x83a   : > { %5216 = vrcp.f32 %v2610_v8  ;;  %v2607_v25 = vpop.xlane.xlu0 %2606 }
 0x83b   : > { %5218 = vrcp.f32 %v2607_v25  ;;  %v5302_v25 = vld [vmem:[%s6070_s15 + $0x60] sm:$0xff] }
 0x83d   : > { %v2616_v50 = vpop.xlane.xlu1 %2615 }
 0x83e   : > { %5220 = vrcp.f32 %v2616_v50  ;;  %v2613_v39 = vpop.xlane.xlu0 %2612 }
 0x83f   : > { %5222 = vrcp.f32 %v2613_v39  ;;  %v5303_v39 = vld [vmem:[%s6070_s15 + $0x68] sm:$0xff] }
 0x841   : > { %v2622_v27 = vpop.xlane.xlu1 %2621 }
 0x842   : > { %5224 = vrcp.f32 %v2622_v27  ;;  %v2619_v19 = vpop.xlane.xlu0 %2618 }
 0x843   : > { %5226 = vrcp.f32 %v2619_v19 }
 0x844   : > { %v5217_v22 = vpop.eup %5216 }
 0x845   : > { %v5219_v60 = vpop.eup %5218  ;;  %v2634_v45 = vmul.f32 %v5217_v22, %v6814_v49 }
 0x846   : > { %v2633_v62 = vmul.f32 %v5219_v60, %v6816_v15  ;;  %v5304_v60 = vld [vmem:[%s6070_s15 + $0x50] sm:$0xff] }
 0x848   : > { %v5221_v51 = vpop.eup %5220  ;;  %4451 = vmatprep.mubr.msk.f32.mxu1 %vm2220_vm2, %v2633_v62 }
 0x849   : > { %v5223_v33 = vpop.eup %5222  ;;  %4452 = vmatmul.mubr.msk.f32.gmra.mrb[42].mxu1 %vm2220_vm2, %v2634_v45  ;;  %v2636_v52 = vmul.f32 %v5221_v51, %v6822_v16  ;;  %v5305_v45 = vld [vmem:[%s6070_s15 + $0x58] sm:$0xff] }
 0x84a   : > { %v2635_v11 = vmul.f32 %v5223_v33, %v6824_v9 }
 0x84c   : > { %v5225_v5 = vpop.eup %5224  ;;  %4454 = vmatprep.mubr.msk.f32.mxu1 %vm2220_vm2, %v2635_v11 }
 0x84d   : > { %v5227_v57 = vpop.eup %5226  ;;  %4455 = vmatmul.mubr.msk.f32.gmra.mrb[44].mxu1 %vm2220_vm2, %v2636_v52  ;;  %v2638_v49 = vmul.f32 %v5225_v5, %v6830_v18  ;;  %v5306_v52 = vld [vmem:[%s6070_s15 + $0x70] sm:$0xff] }
 0x84e   : > { %v2637_v15 = vmul.f32 %v5227_v57, %v6832_v56  ;;  %v5307_v57 = vld [vmem:[%s6070_s15 + $0x78] sm:$0xff]  ;;  %s7831_s15 = sld [smem:[#allocation30_spill]] }
 0x850   : > { %4457 = vmatprep.mubr.msk.f32.mxu1 %vm2220_vm2, %v2637_v15 }
 0x851   : > { %4458 = vmatmul.mubr.msk.f32.gmra.mrb[46].mxu1 %vm2220_vm2, %v2638_v49 }
 0x854   : > { %s933_s20 = scalar_lea.vmem %s7831_s15, %s6347_s30 }
 0x87a   : > { %v4450_v24 = vpop.f32.mrb[40].mxu1 }
 0x87b   : > { %v2729_v54 = vpop.f32.mrb[41].mxu1 }
 0x87c   : > { %2843 = vmatprep.mubr.f32.mxu1 %v2729_v54  ;;  %v1242_v54 = vld [vmem:[%s6043_s21 + $0x28] sm:$0xff] }
 0x87d   : > { %2844 = vmatmul.mubr.f32.vlgmr.msra.gmra.mrb[48].mxu1 %v6772_v26 }
 0x87e   : > { %2849 = vmatprep.mubr.f32.mxu1 %v4450_v24  ;;  %v1238_v24 = vld [vmem:[%s6043_s21 + $0x8] sm:$0xff] }
 0x881   : > { %2850 = vmatmul.mubr.f32.gmra.mrb[50].mxu1 %v6770_v59  ;;  %v1236_v59 = vld [vmem:[%s6035_s16] sm:$0x3] }
 0x882   : > { %v2772_v26 = vrot.slane %v1236_v59, %v6361_v4 }
 0x91c   : > { %v4453_v16 = vpop.f32.mrb[42].mxu1 }
 0x91d   : > { %v2739_v9 = vpop.f32.mrb[43].mxu1 }
 0x91e   : > { %2855 = vmatprep.mubr.f32.mxu1 %v2739_v9  ;;  %v4780_v9 = vpack.c.bf16 %v1242_v54, %v1238_v24  ;;  %v1263_v54 = vld [vmem:[%s6043_s21 + $0xd0] sm:$0xff] }
 0x91f   : > { %2856 = vmatmul.mubr.f32.gmra.mrb[52].mxu1 %v6776_v63 }
 0x920   : > { %v4456_v56 = vpop.f32.mrb[44].mxu1  ;;  %2859 = vmatprep.mubr.f32.mxu1 %v4453_v16  ;;  %v1240_v16 = vld [vmem:[%s6043_s21 + $0x18] sm:$0xff]  ;;  %4781 = vmatprep.subr.bf16.mxu0 %v4780_v9  ;;  %v1270_v9 = vld [vmem:[%s6043_s21 + $0x108] sm:$0xff] }
 0x921   : > { %v2749_v18 = vpop.f32.mrb[45].mxu1 }
 0x923   : > { %2860 = vmatmul.mubr.f32.gmra.mrb[54].mxu1 %v6774_v31  ;;  %v2776_v31 = vrot.slane %v1236_v59, %v6364_v37 }
 0x924   : > { %v4459_v17 = vpop.f32.mrb[46].mxu1  ;;  %2863 = vmatprep.mubr.f32.mxu1 %v2749_v18  ;;  %v1237_v18 = vld [vmem:[%s6043_s21] sm:$0xff] }
 0x925   : > { %v2759_v41 = vpop.f32.mrb[47].mxu1 }
 0x927   : > { %2864 = vmatmul.mubr.f32.gmra.mrb[56].mxu1 %v6780_v29 }
 0x928   : > { %2867 = vmatprep.mubr.f32.mxu1 %v4456_v56  ;;  %v1244_v56 = vld [vmem:[%s6043_s21 + $0x38] sm:$0xff] }
 0x92b   : > { %2868 = vmatmul.mubr.f32.gmra.mrb[58].mxu1 %v6778_v0 }
 0x92c   : > { %2871 = vmatprep.mubr.f32.mxu1 %v2759_v41  ;;  %v4844_v41 = vpack.c.bf16 %v1244_v56, %v1240_v16  ;;  %v1267_v16 = vld [vmem:[%s6043_s21 + $0xf0] sm:$0xff]  ;;  %v1274_v56 = vld [vmem:[%s6043_s21 + $0x128] sm:$0xff] }
 0x92e   : > { %4845 = vmatprep.subr.bf16.mxu1 %v4844_v41 }
 0x92f   : > { %2872 = vmatmul.mubr.f32.gmra.mrb[60].mxu1 %v6784_v6 }
 0x930   : > { %2875 = vmatprep.mubr.f32.mxu1 %v4459_v17  ;;  %v1241_v17 = vld [vmem:[%s6043_s21 + $0x20] sm:$0xff] }
 0x931   : > { %v4782_v59 = vpack.c.bf16 %v1241_v17, %v1237_v18  ;;  %v1272_v18 = vld [vmem:[%s6043_s21 + $0x118] sm:$0xff] }
 0x932   : > { %v1276_v17 = vld [vmem:[%s6043_s21 + $0x138] sm:$0xff] }
 0x933   : > { %2876 = vmatmul.mubr.f32.gmra.mrb[62].mxu1 %v6782_v35  ;;  %4783 = vmatpush1.bf16.msra.mxu0 %v4782_v59  ;;  %v4858_v59 = vpack.c.bf16 %v1267_v16, %v1263_v54 }
 0x950   : > { %v2845_v63 = vpop.f32.mrb[48].mxu1 }
 0x951   : > { %v2846_v44 = vadd.f32 %v2845_v63, %v2772_v26  ;;  %v2847_v29 = vpop.f32.mrb[49].mxu1  ;;  %v1246_v63 = vld [vmem:[%s6043_s21 + $0x48] sm:$0xff] }
 0x952   : > { %v2848_v1 = vadd.f32 %v2847_v29, %v2776_v31  ;;  %v1250_v29 = vld [vmem:[%s6043_s21 + $0x68] sm:$0xff] }
 0x953   : > { %v6932_v0 = vadd.f32 %v5292_v38, %v2846_v44  ;;  %v6940_v40 = vadd.f32 %v5294_v47, %v2846_v44  ;;  %v6952_v42 = vadd.f32 %v5298_v32, %v2846_v44  ;;  %v6968_v50 = vadd.f32 %v5302_v25, %v2846_v44  ;;  %v1252_v38 = vld [vmem:[%s6043_s21 + $0x78] sm:$0xff]  ;;  %v1251_v47 = vld [vmem:[%s6043_s21 + $0x70] sm:$0xff] }
 0x954   : > { %v2851_v6 = vpop.f32.mrb[50].mxu1  ;;  %v6935_v35 = vadd.f32 %v5293_v14, %v2848_v1  ;;  %v6943_v13 = vadd.f32 %v5295_v46, %v2848_v1  ;;  %v6955_v58 = vadd.f32 %v5299_v43, %v2848_v1  ;;  %v6971_v27 = vadd.f32 %v5303_v39, %v2848_v1  ;;  %v1248_v1 = vld [vmem:[%s6043_s21 + $0x58] sm:$0xff]  ;;  %v1254_v46 = vld [vmem:[%s6043_s21 + $0x88] sm:$0xff]  ;;  %v1255_v25 = vld [vmem:[%s6043_s21 + $0x90] sm:$0xff] }
 0x955   : > { %v2852_v7 = vadd.f32 %v2851_v6, %v2772_v26  ;;  %v2853_v21 = vpop.f32.mrb[51].mxu1  ;;  %v1239_v26 = vld [vmem:[%s6043_s21 + $0x10] sm:$0xff]  ;;  %v4784_v6 = vpack.c.bf16 %v1250_v29, %v1246_v63  ;;  %v4848_v14 = vpack.c.bf16 %v1252_v38, %v1248_v1  ;;  %v1256_v43 = vld [vmem:[%s6043_s21 + $0x98] sm:$0xff]  ;;  %v1273_v63 = vld [vmem:[%s6043_s21 + $0x120] sm:$0xff]  ;;  %v4860_v29 = vpack.c.bf16 %v1276_v17, %v1272_v18 }
 0x956   : > { %v2854_v2 = vadd.f32 %v2853_v21, %v2776_v31  ;;  %v2898_v28 = vadd.f32 %v6935_v35, %v6932_v0  ;;  %v2904_v34 = vadd.f32 %v6943_v13, %v6940_v40  ;;  %v2910_v22 = vadd.f32 %v6955_v58, %v6952_v42  ;;  %v1243_v31 = vld [vmem:[%s6043_s21 + $0x30] sm:$0xff]  ;;  %v1249_v21 = vld [vmem:[%s6043_s21 + $0x60] sm:$0xff]  ;;  %v1278_v38 = vld [vmem:[%s6043_s21 + $0x148] sm:$0xff] }
 0x957   : > { %v6946_v48 = vadd.f32 %v5296_v53, %v2852_v7  ;;  %v6962_v55 = vadd.f32 %v5300_v3, %v2852_v7  ;;  %v6978_v62 = vadd.f32 %v5304_v60, %v2852_v7  ;;  %v2916_v11 = vadd.f32 %v6971_v27, %v6968_v50  ;;  %v1258_v53 = vld [vmem:[%s6043_s21 + $0xa8] sm:$0xff]  ;;  %4785 = vmatprep.subr.bf16.mxu0 %v4784_v6  ;;  %v1259_v39 = vld [vmem:[%s6043_s21 + $0xb0] sm:$0xff] }
 0x958   : > { %2899 = vadd.xlane.f32.xlu0 %v2898_v28  ;;  %v6949_v12 = vadd.f32 %v5297_v20, %v2854_v2  ;;  %v6965_v8 = vadd.f32 %v5301_v10, %v2854_v2  ;;  %v6981_v51 = vadd.f32 %v5305_v45, %v2854_v2  ;;  %v6988_v5 = vadd.f32 %v5306_v52, %v2852_v7  ;;  %v1245_v7 = vld [vmem:[%s6043_s21 + $0x40] sm:$0xff]  ;;  %v1266_v60 = vld [vmem:[%s6043_s21 + $0xe8] sm:$0xff]  ;;  %v1264_v45 = vld [vmem:[%s6043_s21 + $0xd8] sm:$0xff] }
 0x959   : > { %v6991_v15 = vadd.f32 %v5307_v57, %v2854_v2  ;;  %v4846_v44 = vpack.c.bf16 %v1243_v31, %v1239_v26  ;;  %v1247_v2 = vld [vmem:[%s6043_s21 + $0x50] sm:$0xff]  ;;  %v4786_v28 = vpack.c.bf16 %v1249_v21, %v1245_v7  ;;  %v4788_v32 = vpack.c.bf16 %v1258_v53, %v1254_v46  ;;  %v1257_v10 = vld [vmem:[%s6043_s21 + $0xa0] sm:$0xff]  ;;  %v1268_v52 = vld [vmem:[%s6043_s21 + $0xf8] sm:$0xff] }
 0x95a   : > { %v2901_v61 = vadd.f32 %v6949_v12, %v6946_v48  ;;  %v2907_v19 = vadd.f32 %v6965_v8, %v6962_v55  ;;  %v2913_v33 = vadd.f32 %v6981_v51, %v6978_v62  ;;  %v4850_v20 = vpack.c.bf16 %v1251_v47, %v1247_v2  ;;  %v1261_v57 = vld [vmem:[%s6043_s21 + $0xc0] sm:$0xff]  ;;  %v1275_v1 = vld [vmem:[%s6043_s21 + $0x130] sm:$0xff]  ;;  %v1282_v6 = vld [vmem:[%s6043_s21 + $0x168] sm:$0xff] }
 0x95b   : > { %v2919_v49 = vadd.f32 %v6991_v15, %v6988_v5  ;;  %4847 = vmatpush1.bf16.msra.mxu1 %v4846_v44  ;;  %4787 = vmatpush1.bf16.msra.mxu0 %v4786_v28  ;;  %v4856_v24 = vpack.c.bf16 %v1268_v52, %v1264_v45  ;;  %v4796_v26 = vpack.c.bf16 %v1274_v56, %v1270_v9  ;;  %v1269_v31 = vld [vmem:[%s6043_s21 + $0x100] sm:$0xff]  ;;  %v1271_v44 = vld [vmem:[%s6043_s21 + $0x110] sm:$0xff]  ;;  %v1284_v7 = vld [vmem:[%s6043_s21 + $0x178] sm:$0xff] }
 0x95c   : > { %2902 = vadd.xlane.f32.xlu1 %v2901_v61  ;;  %2905 = vadd.xlane.f32.xlu0 %v2904_v34  ;;  %v1260_v61 = vld [vmem:[%s6043_s21 + $0xb8] sm:$0xff]  ;;  %v1253_v34 = vld [vmem:[%s6043_s21 + $0x80] sm:$0xff]  ;;  %v4798_v21 = vpack.c.bf16 %v1273_v63, %v1269_v31  ;;  %v4862_v2 = vpack.c.bf16 %v1275_v1, %v1271_v44  ;;  %v4800_v28 = vpack.c.bf16 %v1282_v6, %v1278_v38  ;;  %v1279_v53 = vld [vmem:[%s6043_s21 + $0x150] sm:$0xff] }
 0x95d   : > { %4849 = vmatprep.subr.bf16.mxu1 %v4848_v14  ;;  %v4852_v3 = vpack.c.bf16 %v1260_v61, %v1256_v43  ;;  %4789 = vmatprep.subr.bf16.mxu0 %v4788_v32  ;;  %v1280_v14 = vld [vmem:[%s6043_s21 + $0x158] sm:$0xff]  ;;  %v1277_v47 = vld [vmem:[%s6043_s21 + $0x140] sm:$0xff]  ;;  %v1283_v32 = vld [vmem:[%s6043_s21 + $0x170] sm:$0xff] }
 0x95e   : > { %v1281_v46 = vld [vmem:[%s6043_s21 + $0x160] sm:$0xff]  ;;  %v1286_v43 = vld [vmem:[%s6043_s21 + $0x188] sm:$0xff] }
 0x95f   : > { %4851 = vmatpush1.bf16.msra.mxu1 %v4850_v20  ;;  %v4864_v20 = vpack.c.bf16 %v1284_v7, %v1280_v14  ;;  %v1290_v61 = vld [vmem:[%s6043_s21 + $0x1a8] sm:$0xff] }
 0x960   : > { %2908 = vadd.xlane.f32.xlu1 %v2907_v19  ;;  %2911 = vadd.xlane.f32.xlu0 %v2910_v22  ;;  %v4790_v19 = vpack.c.bf16 %v1257_v10, %v1253_v34  ;;  %v1262_v22 = vld [vmem:[%s6043_s21 + $0xc8] sm:$0xff]  ;;  %v1288_v34 = vld [vmem:[%s6043_s21 + $0x198] sm:$0xff]  ;;  %v4802_v10 = vpack.c.bf16 %v1281_v46, %v1277_v47 }
 0x961   : > { %4853 = vmatprep.subr.bf16.mxu1 %v4852_v3  ;;  %v1292_v3 = vld [vmem:[%s6043_s21 + $0x1b8] sm:$0xff]  ;;  %v1298_v52 = vld [vmem:[%s6043_s21 + $0x1e8] sm:$0xff] }
 0x962   : > { %4791 = vmatpush1.bf16.msra.mxu0 %v4790_v19  ;;  %v1285_v19 = vld [vmem:[%s6043_s21 + $0x180] sm:$0xff]  ;;  %v4868_v45 = vpack.c.bf16 %v1292_v3, %v1288_v34 }
 0x964   : > { %2914 = vadd.xlane.f32.xlu1 %v2913_v33  ;;  %2917 = vadd.xlane.f32.xlu0 %v2916_v11  ;;  %v4854_v33 = vpack.c.bf16 %v1259_v39, %v1255_v25  ;;  %v4792_v11 = vpack.c.bf16 %v1266_v60, %v1262_v22  ;;  %v4866_v25 = vpack.c.bf16 %v1283_v32, %v1279_v53  ;;  %v1289_v22 = vld [vmem:[%s6043_s21 + $0x1a0] sm:$0xff]  ;;  %v1287_v60 = vld [vmem:[%s6043_s21 + $0x190] sm:$0xff] }
 0x965   : > { %v4804_v39 = vpack.c.bf16 %v1290_v61, %v1286_v43 }
 0x966   : > { %4855 = vmatpush1.bf16.msra.mxu1 %v4854_v33  ;;  %4793 = vmatprep.subr.bf16.mxu0 %v4792_v11  ;;  %v1291_v33 = vld [vmem:[%s6043_s21 + $0x1b0] sm:$0xff]  ;;  %v1294_v11 = vld [vmem:[%s6043_s21 + $0x1c8] sm:$0xff] }
 0x967   : > { %4857 = vmatprep.subr.bf16.mxu1 %v4856_v24  ;;  %v4806_v24 = vpack.c.bf16 %v1289_v22, %v1285_v19  ;;  %v4870_v54 = vpack.c.bf16 %v1291_v33, %v1287_v60  ;;  %v4808_v16 = vpack.c.bf16 %v1298_v52, %v1294_v11 }
 0x968   : > { %2920 = vadd.xlane.f32.xlu1 %v2919_v49  ;;  %v1265_v49 = vld [vmem:[%s6043_s21 + $0xe0] sm:$0xff] }
 0x969   : > { %v4794_v41 = vpack.c.bf16 %v1265_v49, %v1261_v57  ;;  %v1296_v57 = vld [vmem:[%s6043_s21 + $0x1d8] sm:$0xff] }
 0x96a   : > { %4859 = vmatpush1.bf16.msra.mxu1 %v4858_v59  ;;  %v1300_v49 = vld [vmem:[%s6043_s21 + $0x1f8] sm:$0xff] }
 0x96b   : > { %4795 = vmatpush1.bf16.msra.mxu0 %v4794_v41  ;;  %4861 = vmatprep.subr.bf16.mxu1 %v4860_v29  ;;  %v4872_v9 = vpack.c.bf16 %v1300_v49, %v1296_v57 }
 0x96c   : > { %4797 = vmatprep.subr.bf16.mxu0 %v4796_v26 }
 0x96e   : > { %4863 = vmatpush1.bf16.msra.mxu1 %v4862_v2 }
 0x96f   : > { %4799 = vmatpush1.bf16.msra.mxu0 %v4798_v21  ;;  %4865 = vmatprep.subr.bf16.mxu1 %v4864_v20 }
 0x970   : > { %4801 = vmatprep.subr.bf16.mxu0 %v4800_v28 }
 0x972   : > { %4867 = vmatpush1.bf16.msra.mxu1 %v4866_v25 }
 0x973   : > { %4803 = vmatpush1.bf16.msra.mxu0 %v4802_v10  ;;  %4869 = vmatprep.subr.bf16.mxu1 %v4868_v45 }
 0x974   : > { %4805 = vmatprep.subr.bf16.mxu0 %v4804_v39 }
 0x976   : > { %4871 = vmatpush1.bf16.msra.mxu1 %v4870_v54 }
 0x977   : > { %4807 = vmatpush1.bf16.msra.mxu0 %v4806_v24  ;;  %4873 = vmatprep.subr.bf16.mxu1 %v4872_v9 }
 0x978   : > { %4809 = vmatprep.subr.bf16.mxu0 %v4808_v16 }
 0x9e5   : > { %v2900_v56 = vpop.xlane.xlu0 %2899 }
 0x9e6   : > { %v2922_v18 = vmul.f32 0.00390625, %v2900_v56 }
 0x9e8   : > { %v7056_v17 = vsub.f32 %v6932_v0, %v2922_v18  ;;  %v7059_v41 = vsub.f32 %v6935_v35, %v2922_v18 }
 0x9e9   : > { %v2903_v59 = vpop.xlane.xlu1 %2902  ;;  %v2906_v26 = vpop.xlane.xlu0 %2905 }
 0x9ea   : > { %v2923_v31 = vmul.f32 0.00390625, %v2903_v59  ;;  %v2924_v63 = vmul.f32 0.00390625, %v2906_v26  ;;  %v2946_v44 = vmul.f32 %v7056_v17, %v7056_v17  ;;  %v2947_v29 = vmul.f32 %v7059_v41, %v7059_v41 }
 0x9ec   : > { %v7066_v1 = vsub.f32 %v6946_v48, %v2923_v31  ;;  %v7069_v38 = vsub.f32 %v6949_v12, %v2923_v31  ;;  %v7072_v6 = vsub.f32 %v6940_v40, %v2924_v63  ;;  %v7075_v14 = vsub.f32 %v6943_v13, %v2924_v63 }
 0x9ed   : > { %v2909_v7 = vpop.xlane.xlu1 %2908  ;;  %v2912_v21 = vpop.xlane.xlu0 %2911  ;;  %v2962_v2 = vadd.f32 %v2947_v29, %v2946_v44 }
 0x9ee   : > { %v2925_v28 = vmul.f32 0.00390625, %v2909_v7  ;;  %v2926_v47 = vmul.f32 0.00390625, %v2912_v21  ;;  %v2948_v46 = vmul.f32 %v7066_v1, %v7066_v1  ;;  %v2949_v53 = vmul.f32 %v7069_v38, %v7069_v38 }
 0x9ef   : > { %2963 = vadd.xlane.f32.xlu0 %v2962_v2  ;;  %v2950_v20 = vmul.f32 %v7072_v6, %v7072_v6  ;;  %v2951_v32 = vmul.f32 %v7075_v14, %v7075_v14 }
 0x9f0   : > { %v7086_v43 = vsub.f32 %v6962_v55, %v2925_v28  ;;  %v7089_v61 = vsub.f32 %v6965_v8, %v2925_v28  ;;  %v7092_v34 = vsub.f32 %v6952_v42, %v2926_v47  ;;  %v7095_v3 = vsub.f32 %v6955_v58, %v2926_v47 }
 0x9f1   : > { %v2915_v10 = vpop.xlane.xlu1 %2914  ;;  %v2918_v25 = vpop.xlane.xlu0 %2917  ;;  %v2965_v60 = vadd.f32 %v2949_v53, %v2948_v46  ;;  %v2968_v45 = vadd.f32 %v2951_v32, %v2950_v20 }
 0x9f2   : > { %v2927_v39 = vmul.f32 0.00390625, %v2915_v10  ;;  %v2928_v19 = vmul.f32 0.00390625, %v2918_v25  ;;  %v2857_v22 = vpop.f32.mrb[52].mxu1  ;;  %v2952_v54 = vmul.f32 %v7086_v43, %v7086_v43  ;;  %v2953_v16 = vmul.f32 %v7089_v61, %v7089_v61  ;;  %v1293_v25 = vld [vmem:[%s6043_s21 + $0x1c0] sm:$0xff] }
 0x9f3   : > { %v2858_v33 = vpop.f32.mrb[53].mxu1  ;;  %2966 = vadd.xlane.f32.xlu1 %v2965_v60  ;;  %2969 = vadd.xlane.f32.xlu0 %v2968_v45  ;;  %v2954_v9 = vmul.f32 %v7092_v34, %v7092_v34  ;;  %v2955_v56 = vmul.f32 %v7095_v3, %v7095_v3  ;;  %v1299_v45 = vld [vmem:[%s6043_s21 + $0x1f0] sm:$0xff] }
 0x9f4   : > { %v7098_v11 = vsub.f32 %v6978_v62, %v2927_v39  ;;  %v7101_v52 = vsub.f32 %v6981_v51, %v2927_v39  ;;  %v7104_v57 = vsub.f32 %v6968_v50, %v2928_v19  ;;  %v7107_v49 = vsub.f32 %v6971_v27, %v2928_v19  ;;  %v1297_v39 = vld [vmem:[%s6043_s21 + $0x1e0] sm:$0xff]  ;;  %v1295_v19 = vld [vmem:[%s6043_s21 + $0x1d0] sm:$0xff] }
 0x9f5   : > { %v2921_v24 = vpop.xlane.xlu1 %2920  ;;  %v2971_v26 = vadd.f32 %v2953_v16, %v2952_v54  ;;  %v2974_v31 = vadd.f32 %v2955_v56, %v2954_v9  ;;  %v4810_v60 = vpack.c.bf16 %v1297_v39, %v1293_v25  ;;  %v1302_v16 = vld [vmem:[%s6043_s21 + $0x208] sm:$0xff]  ;;  %v1304_v56 = vld [vmem:[%s6043_s21 + $0x218] sm:$0xff] }
 0x9f6   : > { %v2861_v18 = vpop.f32.mrb[54].mxu1  ;;  %v2929_v59 = vmul.f32 0.00390625, %v2921_v24  ;;  %v2956_v44 = vmul.f32 %v7098_v11, %v7098_v11  ;;  %v2957_v29 = vmul.f32 %v7101_v52, %v7101_v52  ;;  %v2958_v7 = vmul.f32 %v7104_v57, %v7104_v57  ;;  %v1306_v9 = vld [vmem:[%s6043_s21 + $0x228] sm:$0xff]  ;;  %v1316_v25 = vld [vmem:[%s6043_s21 + $0x278] sm:$0xff] }
 0x9f7   : > { %v2862_v63 = vpop.f32.mrb[55].mxu1  ;;  %v2959_v21 = vmul.f32 %v7107_v49, %v7107_v49  ;;  %2972 = vadd.xlane.f32.xlu1 %v2971_v26  ;;  %2975 = vadd.xlane.f32.xlu0 %v2974_v31  ;;  %v4874_v24 = vpack.c.bf16 %v1299_v45, %v1295_v19  ;;  %v4812_v18 = vpack.c.bf16 %v1306_v9, %v1302_v16  ;;  %v1301_v26 = vld [vmem:[%s6043_s21 + $0x200] sm:$0xff]  ;;  %v1311_v45 = vld [vmem:[%s6043_s21 + $0x250] sm:$0xff]  ;;  %v1318_v9 = vld [vmem:[%s6043_s21 + $0x288] sm:$0xff] }
 0x9f8   : > { %v7126_v2 = vsub.f32 %v6988_v5, %v2929_v59  ;;  %v7129_v28 = vsub.f32 %v6991_v15, %v2929_v59  ;;  %v2977_v46 = vadd.f32 %v2957_v29, %v2956_v44  ;;  %4811 = vmatpush1.bf16.msra.mxu0 %v4810_v60  ;;  %v1308_v59 = vld [vmem:[%s6043_s21 + $0x238] sm:$0xff]  ;;  %v1305_v31 = vld [vmem:[%s6043_s21 + $0x220] sm:$0xff]  ;;  %v1303_v29 = vld [vmem:[%s6043_s21 + $0x210] sm:$0xff] }
 0x9f9   : > { %v2980_v53 = vadd.f32 %v2959_v21, %v2958_v7  ;;  %4875 = vmatpush1.bf16.msra.mxu1 %v4874_v24  ;;  %v4876_v63 = vpack.c.bf16 %v1308_v59, %v1304_v56  ;;  %v4814_v44 = vpack.c.bf16 %v1305_v31, %v1301_v26  ;;  %v1307_v7 = vld [vmem:[%s6043_s21 + $0x230] sm:$0xff]  ;;  %4813 = vmatprep.subr.bf16.mxu0 %v4812_v18  ;;  %v1313_v60 = vld [vmem:[%s6043_s21 + $0x260] sm:$0xff]  ;;  %v1322_v56 = vld [vmem:[%s6043_s21 + $0x2a8] sm:$0xff] }
 0x9fa   : > { %v2865_v47 = vpop.f32.mrb[56].mxu1  ;;  %v2960_v32 = vmul.f32 %v7126_v2, %v7126_v2  ;;  %v2961_v10 = vmul.f32 %v7129_v28, %v7129_v28  ;;  %v1320_v18 = vld [vmem:[%s6043_s21 + $0x298] sm:$0xff]  ;;  %v4820_v59 = vpack.c.bf16 %v1322_v56, %v1318_v9  ;;  %v1317_v31 = vld [vmem:[%s6043_s21 + $0x280] sm:$0xff] }
 0x9fb   : > { %v2866_v20 = vpop.f32.mrb[57].mxu1  ;;  %2978 = vadd.xlane.f32.xlu1 %v2977_v46  ;;  %2981 = vadd.xlane.f32.xlu0 %v2980_v53  ;;  %v4878_v47 = vpack.c.bf16 %v1307_v7, %v1303_v29  ;;  %v1310_v53 = vld [vmem:[%s6043_s21 + $0x248] sm:$0xff]  ;;  %v1324_v26 = vld [vmem:[%s6043_s21 + $0x2b8] sm:$0xff]  ;;  %v1319_v7 = vld [vmem:[%s6043_s21 + $0x290] sm:$0xff] }
 0x9fc   : > { %v2983_v22 = vadd.f32 %v2961_v10, %v2960_v32  ;;  %4877 = vmatprep.subr.bf16.mxu1 %v4876_v63  ;;  %4815 = vmatpush1.bf16.msra.mxu0 %v4814_v44  ;;  %v1314_v20 = vld [vmem:[%s6043_s21 + $0x268] sm:$0xff]  ;;  %v1312_v32 = vld [vmem:[%s6043_s21 + $0x258] sm:$0xff]  ;;  %v1321_v63 = vld [vmem:[%s6043_s21 + $0x2a0] sm:$0xff]  ;;  %v4884_v44 = vpack.c.bf16 %v1324_v26, %v1320_v18 }
 0x9fd   : > { %4879 = vmatpush1.bf16.msra.mxu1 %v4878_v47  ;;  %v4816_v10 = vpack.c.bf16 %v1314_v20, %v1310_v53  ;;  %v4880_v39 = vpack.c.bf16 %v1316_v25, %v1312_v32  ;;  %v4822_v29 = vpack.c.bf16 %v1321_v63, %v1317_v31  ;;  %v1330_v53 = vld [vmem:[%s6043_s21 + $0x2e8] sm:$0xff]  ;;  %v1328_v20 = vld [vmem:[%s6043_s21 + $0x2d8] sm:$0xff]  ;;  %v1325_v25 = vld [vmem:[%s6043_s21 + $0x2c0] sm:$0xff] }
 0x9fe   : > { %v2869_v33 = vpop.f32.mrb[58].mxu1  ;;  %v1340_v56 = vld [vmem:[%s6043_s21 + $0x338] sm:$0xff]  ;;  %v1333_v18 = vld [vmem:[%s6043_s21 + $0x300] sm:$0xff]  ;;  %v1335_v63 = vld [vmem:[%s6043_s21 + $0x310] sm:$0xff] }
 0x9ff   : > { %v2870_v54 = vpop.f32.mrb[59].mxu1  ;;  %2984 = vadd.xlane.f32.xlu1 %v2983_v22  ;;  %4817 = vmatprep.subr.bf16.mxu0 %v4816_v10  ;;  %v1309_v22 = vld [vmem:[%s6043_s21 + $0x240] sm:$0xff]  ;;  %v1332_v10 = vld [vmem:[%s6043_s21 + $0x2f8] sm:$0xff] }
 0xa00   : > { %4881 = vmatprep.subr.bf16.mxu1 %v4880_v39  ;;  %v4818_v24 = vpack.c.bf16 %v1313_v60, %v1309_v22  ;;  %v1315_v54 = vld [vmem:[%s6043_s21 + $0x270] sm:$0xff]  ;;  %v1329_v39 = vld [vmem:[%s6043_s21 + $0x2e0] sm:$0xff] }
 0xa01   : > { %v4882_v16 = vpack.c.bf16 %v1315_v54, %v1311_v45  ;;  %v4826_v22 = vpack.c.bf16 %v1329_v39, %v1325_v25  ;;  %v1327_v60 = vld [vmem:[%s6043_s21 + $0x2d0] sm:$0xff]  ;;  %v1338_v54 = vld [vmem:[%s6043_s21 + $0x328] sm:$0xff] }
 0xa02   : > { %v2873_v21 = vpop.f32.mrb[60].mxu1  ;;  %4819 = vmatpush1.bf16.msra.mxu0 %v4818_v24  ;;  %v1331_v45 = vld [vmem:[%s6043_s21 + $0x2f0] sm:$0xff]  ;;  %v1334_v24 = vld [vmem:[%s6043_s21 + $0x308] sm:$0xff] }
 0xa03   : > { %v2874_v46 = vpop.f32.mrb[61].mxu1  ;;  %4883 = vmatpush1.bf16.msra.mxu1 %v4882_v16  ;;  %v1323_v21 = vld [vmem:[%s6043_s21 + $0x2b0] sm:$0xff]  ;;  %4821 = vmatprep.subr.bf16.mxu0 %v4820_v59  ;;  %v1336_v16 = vld [vmem:[%s6043_s21 + $0x318] sm:$0xff]  ;;  %v4828_v9 = vpack.c.bf16 %v1338_v54, %v1334_v24  ;;  %v1337_v59 = vld [vmem:[%s6043_s21 + $0x320] sm:$0xff] }
 0xa04   : > { %v4886_v47 = vpack.c.bf16 %v1323_v21, %v1319_v7  ;;  %4885 = vmatprep.subr.bf16.mxu1 %v4884_v44  ;;  %v1326_v46 = vld [vmem:[%s6043_s21 + $0x2c8] sm:$0xff]  ;;  %v4892_v26 = vpack.c.bf16 %v1340_v56, %v1336_v16  ;;  %v4830_v31 = vpack.c.bf16 %v1337_v59, %v1333_v18  ;;  %v1339_v44 = vld [vmem:[%s6043_s21 + $0x330] sm:$0xff]  ;;  %v1356_v54 = vld [vmem:[%s6043_s21 + $0x3b8] sm:$0xff] }
 0xa05   : > { %v4824_v32 = vpack.c.bf16 %v1330_v53, %v1326_v46  ;;  %v1342_v7 = vld [vmem:[%s6043_s21 + $0x348] sm:$0xff]  ;;  %v1348_v53 = vld [vmem:[%s6043_s21 + $0x378] sm:$0xff]  ;;  %v1343_v39 = vld [vmem:[%s6043_s21 + $0x350] sm:$0xff] }
 0xa06   : > { %v2877_v19 = vpop.f32.mrb[62].mxu1  ;;  %4823 = vmatpush1.bf16.msra.mxu0 %v4822_v29  ;;  %v4894_v29 = vpack.c.bf16 %v1339_v44, %v1335_v63  ;;  %v1346_v21 = vld [vmem:[%s6043_s21 + $0x368] sm:$0xff]  ;;  %v1349_v16 = vld [vmem:[%s6043_s21 + $0x380] sm:$0xff]  ;;  %v1351_v59 = vld [vmem:[%s6043_s21 + $0x390] sm:$0xff] }
 0xa07   : > { %v2878_v33 = vpop.f32.mrb[63].mxu1  ;;  %4887 = vmatpush1.bf16.msra.mxu1 %v4886_v47  ;;  %v4888_v19 = vpack.c.bf16 %v1332_v10, %v1328_v20  ;;  %4825 = vmatprep.subr.bf16.mxu0 %v4824_v32  ;;  %v1344_v47 = vld [vmem:[%s6043_s21 + $0x358] sm:$0xff]  ;;  %v4832_v46 = vpack.c.bf16 %v1346_v21, %v1342_v7  ;;  %v1341_v20 = vld [vmem:[%s6043_s21 + $0x340] sm:$0xff]  ;;  %v1358_v63 = vld [vmem:[%s6043_s21 + $0x3c8] sm:$0xff] }
 0xa08   : > { %v4890_v33 = vpack.c.bf16 %v1331_v45, %v1327_v60  ;;  %v1345_v32 = vld [vmem:[%s6043_s21 + $0x360] sm:$0xff]  ;;  %v4896_v10 = vpack.c.bf16 %v1348_v53, %v1344_v47  ;;  %v1350_v60 = vld [vmem:[%s6043_s21 + $0x388] sm:$0xff]  ;;  %v1364_v21 = vld [vmem:[%s6043_s21 + $0x3f8] sm:$0xff] }
 0xa09   : > { %4889 = vmatprep.subr.bf16.mxu1 %v4888_v19  ;;  %v4834_v25 = vpack.c.bf16 %v1345_v32, %v1341_v20  ;;  %v1347_v19 = vld [vmem:[%s6043_s21 + $0x370] sm:$0xff]  ;;  %v1354_v45 = vld [vmem:[%s6043_s21 + $0x3a8] sm:$0xff]  ;;  %v1357_v47 = vld [vmem:[%s6043_s21 + $0x3c0] sm:$0xff] }
 0xa0a   : > { %4827 = vmatpush1.bf16.msra.mxu0 %v4826_v22  ;;  %v4898_v22 = vpack.c.bf16 %v1347_v19, %v1343_v39  ;;  %v4836_v24 = vpack.c.bf16 %v1354_v45, %v1350_v60  ;;  %v1362_v44 = vld [vmem:[%s6043_s21 + $0x3e8] sm:$0xff]  ;;  %v1359_v32 = vld [vmem:[%s6043_s21 + $0x3d0] sm:$0xff]  ;;  %v1369_v19 = vld [vmem:[%s6051_s0 + $0x18] sm:$0xff] }
 0xa0b   : > { %4891 = vmatpush1.bf16.msra.mxu1 %v4890_v33  ;;  %4829 = vmatprep.subr.bf16.mxu0 %v4828_v9  ;;  %v1352_v33 = vld [vmem:[%s6043_s21 + $0x398] sm:$0xff]  ;;  %v1353_v9 = vld [vmem:[%s6043_s21 + $0x3a0] sm:$0xff]  ;;  %v4840_v7 = vpack.c.bf16 %v1362_v44, %v1358_v63  ;;  %v1367_v39 = vld [vmem:[%s6051_s0 + $0x8] sm:$0xff] }
 0xa0c   : > { %4893 = vmatprep.subr.bf16.mxu1 %v4892_v26  ;;  %v4900_v56 = vpack.c.bf16 %v1356_v54, %v1352_v33  ;;  %v4838_v18 = vpack.c.bf16 %v1353_v9, %v1349_v16  ;;  %v1355_v26 = vld [vmem:[%s6043_s21 + $0x3b0] sm:$0xff] }
 0xa0e   : > { %4831 = vmatpush1.bf16.msra.mxu0 %v4830_v31  ;;  %v4902_v31 = vpack.c.bf16 %v1355_v26, %v1351_v59 }
 0xa0f   : > { %4895 = vmatpush1.bf16.msra.mxu1 %v4894_v29  ;;  %4833 = vmatprep.subr.bf16.mxu0 %v4832_v46  ;;  %v1360_v29 = vld [vmem:[%s6043_s21 + $0x3d8] sm:$0xff]  ;;  %v1361_v46 = vld [vmem:[%s6043_s21 + $0x3e0] sm:$0xff] }
 0xa10   : > { %4897 = vmatprep.subr.bf16.mxu1 %v4896_v10  ;;  %v4904_v53 = vpack.c.bf16 %v1364_v21, %v1360_v29  ;;  %v4842_v20 = vpack.c.bf16 %v1361_v46, %v1357_v47  ;;  %v1363_v10 = vld [vmem:[%s6043_s21 + $0x3f0] sm:$0xff] }
 0xa12   : > { %4835 = vmatpush1.bf16.msra.mxu0 %v4834_v25  ;;  %v4906_v25 = vpack.c.bf16 %v1363_v10, %v1359_v32 }
 0xa13   : > { %4899 = vmatpush1.bf16.msra.mxu1 %v4898_v22  ;;  %4837 = vmatprep.subr.bf16.mxu0 %v4836_v24  ;;  %v4908_v22 = vpack.c.bf16 %v1369_v19, %v1367_v39 }
 0xa14   : > { %4901 = vmatprep.subr.bf16.mxu1 %v4900_v56 }
 0xa16   : > { %4839 = vmatpush1.bf16.msra.mxu0 %v4838_v18 }
 0xa17   : > { %4903 = vmatpush1.bf16.msra.mxu1 %v4902_v31  ;;  %4841 = vmatprep.subr.bf16.mxu0 %v4840_v7  ;;  %v2896_v31 = vld [vmem:[%s929_s23] sm:$0x3] }
 0xa18   : > { %4905 = vmatprep.subr.bf16.mxu1 %v4904_v53  ;;  %v7224_v32 = vrot.slane %v2896_v31, %v6364_v37 }
 0xa1a   : > { %4843 = vmatpush1.bf16.msra.mxu0 %v4842_v20  ;;  %v7221_v20 = vrot.slane %v2896_v31, %v6361_v4 }
 0xa1b   : > { %4907 = vmatpush1.bf16.msra.mxu1 %v4906_v25  ;;  %4909 = vmatprep.subr.bf16.mxu0 %v4908_v22 }
 0xa7c   : > { %v2964_v60 = vpop.xlane.xlu0 %2963 }
 0xa7d   : > { %v2986_v45 = vmul.f32 0.003921569, %v2964_v60 }
 0xa7f   : > { %5228 = vrsqrt.f32 %v2986_v45  ;;  %vm2996_vm9 = vcmp.eq.f32.partialorder %v2986_v45, inf  ;;  %v2999_v46 = vand.u32 2147483648, %v2986_v45  ;;  %vm2998_vm10 = vcmp.eq.f32.partialorder %v2986_v45, 0.0 }
 0xa80   : > { %v2967_v33 = vpop.xlane.xlu1 %2966  ;;  %v2970_v54 = vpop.xlane.xlu0 %2969 }
 0xa81   : > { %v2987_v24 = vmul.f32 0.003921569, %v2967_v33  ;;  %v2988_v16 = vmul.f32 0.003921569, %v2970_v54 }
 0xa83   : > { %5230 = vrsqrt.f32 %v2987_v24  ;;  %vm3003_vm11 = vcmp.eq.f32.partialorder %v2987_v24, inf  ;;  %vm3005_vm12 = vcmp.eq.f32.partialorder %v2987_v24, 0.0  ;;  %v3006_v60 = vand.u32 2147483648, %v2987_v24 }
 0xa84   : > { %5232 = vrsqrt.f32 %v2988_v16  ;;  %v2973_v9 = vpop.xlane.xlu1 %2972  ;;  %v2976_v56 = vpop.xlane.xlu0 %2975  ;;  %vm3010_vm13 = vcmp.eq.f32.partialorder %v2988_v16, inf  ;;  %vm3012_vm14 = vcmp.eq.f32.partialorder %v2988_v16, 0.0 }
 0xa85   : > { %v7209_v18 = vmul.f32 0.003921569, %v2973_v9  ;;  %v7211_v59 = vmul.f32 0.003921569, %v2976_v56  ;;  %v3013_v56 = vand.u32 2147483648, %v2988_v16 }
 0xa87   : > { %5234 = vrsqrt.f32 %v7209_v18  ;;  %vm3017_vm15 = vcmp.eq.f32.partialorder %v7209_v18, inf  ;;  %vm3019_vm0 = vcmp.eq.f32.partialorder %v7209_v18, 0.0  ;;  %vm3024_vm1 = vcmp.eq.f32.partialorder %v7211_v59, inf }
 0xa88   : > { %5236 = vrsqrt.f32 %v7211_v59  ;;  %v2979_v44 = vpop.xlane.xlu1 %2978  ;;  %v2982_v29 = vpop.xlane.xlu0 %2981  ;;  %vm3026_vm2 = vcmp.eq.f32.partialorder %v7211_v59, 0.0 }
 0xa89   : > { %v5229_v26 = vpop.eup %5228  ;;  %v7215_v7 = vmul.f32 0.003921569, %v2979_v44  ;;  %v7217_v21 = vmul.f32 0.003921569, %v2982_v29 }
 0xa8a   : > { %v2995_v63 = vmul.f32 %v5229_v26, %v2986_v45 }
 0xa8b   : > { %5238 = vrsqrt.f32 %v7215_v7  ;;  %vm3031_vm3 = vcmp.eq.f32.partialorder %v7215_v7, inf  ;;  %vm3033_vm4 = vcmp.eq.f32.partialorder %v7215_v7, 0.0  ;;  %vm3038_vm5 = vcmp.eq.f32.partialorder %v7217_v21, inf }
 0xa8c   : > { %v2997_v47 = vsel %vm2996_vm9, %v2986_v45, %v2995_v63  ;;  %5240 = vrsqrt.f32 %v7217_v21  ;;  %v2985_v10 = vpop.xlane.xlu1 %2984  ;;  %v3061_v63 = vmul.f32 %v7221_v20, %v7056_v17  ;;  %vm3040_vm6 = vcmp.eq.f32.partialorder %v7217_v21, 0.0 }
 0xa8d   : > { %v5231_v53 = vpop.eup %5230  ;;  %v7227_v19 = vmul.f32 0.003921569, %v2985_v10  ;;  %v3000_v22 = vsel %vm2998_vm10, %v2999_v46, %v2997_v47 }
 0xa8e   : > { %v5233_v25 = vpop.eup %5232  ;;  %v3002_v39 = vmul.f32 %v5231_v53, %v2987_v24  ;;  %v3077_v54 = vadd.f32 1e-06, %v3000_v22  ;;  %v3020_v53 = vand.u32 2147483648, %v7209_v18  ;;  %v3063_v22 = vmul.f32 %v7221_v20, %v7066_v1 }
 0xa8f   : > { %v3009_v33 = vmul.f32 %v5233_v25, %v2988_v16  ;;  %5242 = vrsqrt.f32 %v7227_v19  ;;  %v2897_v25 = vld [vmem:[%s933_s20] sm:$0x3]  ;;  %vm3045_vm7 = vcmp.eq.f32.partialorder %v7227_v19, inf  ;;  %vm3047_vm8 = vcmp.eq.f32.partialorder %v7227_v19, 0.0 }
 0xa90   : > { %v3004_v9 = vsel %vm3003_vm11, %v2987_v24, %v3002_v39  ;;  %5244 = vrcp.f32 %v3077_v54  ;;  %v3062_v24 = vmul.f32 %v7224_v32, %v7059_v41  ;;  %v3027_v39 = vand.u32 2147483648, %v7211_v59 }
 0xa91   : > { %v3011_v45 = vsel %vm3010_vm13, %v2988_v16, %v3009_v33  ;;  %v3007_v26 = vsel %vm3005_vm12, %v3006_v60, %v3004_v9  ;;  %v5235_v31 = vpop.eup %5234 }
 0xa92   : > { %v3078_v44 = vadd.f32 1e-06, %v3007_v26  ;;  %v3014_v29 = vsel %vm3012_vm14, %v3013_v56, %v3011_v45  ;;  %v5237_v47 = vpop.eup %5236  ;;  %v3016_v46 = vmul.f32 %v5235_v31, %v7209_v18  ;;  %v7252_v56 = vrot.slane %v2897_v25, %v6361_v4 }
 0xa93   : > { %v3079_v16 = vadd.f32 1e-06, %v3014_v29  ;;  %v3023_v10 = vmul.f32 %v5237_v47, %v7211_v59  ;;  %v3034_v26 = vand.u32 2147483648, %v7215_v7  ;;  %v3041_v47 = vand.u32 2147483648, %v7217_v21 }
 0xa94   : > { %5246 = vrcp.f32 %v3078_v44  ;;  %v3018_v17 = vsel %vm3017_vm15, %v7209_v18, %v3016_v46  ;;  %v7263_v46 = vrot.slane %v2897_v25, %v6364_v37  ;;  %v3064_v25 = vmul.f32 %v7224_v32, %v7069_v38 }
 0xa95   : > { %5248 = vrcp.f32 %v3079_v16  ;;  %v5239_v41 = vpop.eup %5238  ;;  %v3025_v60 = vsel %vm3024_vm1, %v7211_v59, %v3023_v10  ;;  %v3021_v33 = vsel %vm3019_vm0, %v3020_v53, %v3018_v17  ;;  %v1366_v53 = vld [vmem:[%s6051_s0] sm:$0xff]  ;;  %v1368_v10 = vld [vmem:[%s6051_s0 + $0x10] sm:$0xff] }
 0xa96   : > { %v5241_v54 = vpop.eup %5240  ;;  %v3030_v9 = vmul.f32 %v5239_v41, %v7215_v7  ;;  %v3080_v18 = vadd.f32 1e-06, %v3021_v33  ;;  %v3028_v45 = vsel %vm3026_vm2, %v3027_v39, %v3025_v60 }
 0xa97   : > { %v3037_v1 = vmul.f32 %v5241_v54, %v7217_v21  ;;  %v3081_v31 = vadd.f32 1e-06, %v3028_v45  ;;  %v3066_v54 = vmul.f32 %v7224_v32, %v7075_v14  ;;  %v1371_v45 = vld [vmem:[%s6051_s0 + $0x28] sm:$0xff] }
 0xa98   : > { %v3032_v59 = vsel %vm3031_vm3, %v7215_v7, %v3030_v9  ;;  %5250 = vrcp.f32 %v3080_v18  ;;  %v4910_v18 = vpack.c.bf16 %v1368_v10, %v1366_v53  ;;  %v1372_v53 = vld [vmem:[%s6051_s0 + $0x30] sm:$0xff] }
 0xa99   : > { %v5243_v44 = vpop.eup %5242  ;;  %v3039_v29 = vsel %vm3038_vm5, %v7217_v21, %v3037_v1  ;;  %v3035_v16 = vsel %vm3033_vm4, %v3034_v26, %v3032_v59  ;;  %5252 = vrcp.f32 %v3081_v31  ;;  %v1373_v21 = vld [vmem:[%s6051_s0 + $0x38] sm:$0xff] }
 0xa9a   : > { %v5245_v17 = vpop.eup %5244  ;;  %v3044_v7 = vmul.f32 %v5243_v44, %v7227_v19  ;;  %v3082_v39 = vadd.f32 1e-06, %v3035_v16  ;;  %v3042_v33 = vsel %vm3040_vm6, %v3041_v47, %v3039_v29  ;;  %v4912_v47 = vpack.c.bf16 %v1373_v21, %v1371_v45  ;;  %v1370_v16 = vld [vmem:[%s6051_s0 + $0x20] sm:$0xff]  ;;  %v1376_v21 = vld [vmem:[%s6051_s0 + $0x50] sm:$0xff] }
 0xa9b   : > { %v3087_v41 = vmul.f32 %v5245_v17, %v3062_v24  ;;  %v3086_v60 = vmul.f32 %v5245_v17, %v3061_v63  ;;  %v3048_v24 = vand.u32 2147483648, %v7227_v19  ;;  %v3083_v59 = vadd.f32 1e-06, %v3042_v33  ;;  %v1374_v45 = vld [vmem:[%s6051_s0 + $0x40] sm:$0xff] }
 0xa9c   : > { %v3046_v9 = vsel %vm3045_vm7, %v7227_v19, %v3044_v7  ;;  %5254 = vrcp.f32 %v3082_v39  ;;  %v3065_v19 = vmul.f32 %v7221_v20, %v7072_v6  ;;  %v1377_v7 = vld [vmem:[%s6051_s0 + $0x58] sm:$0xff]  ;;  %v3068_v39 = vmul.f32 %v7224_v32, %v7089_v61 }
 0xa9d   : > { %v3121_v63 = vadd.f32 %v7263_v46, %v3087_v41  ;;  %v3120_v1 = vadd.f32 %v7252_v56, %v3086_v60  ;;  %v3049_v29 = vsel %vm3047_vm8, %v3048_v24, %v3046_v9  ;;  %5256 = vrcp.f32 %v3083_v59  ;;  %v1381_v24 = vld [vmem:[%s6051_s0 + $0x78] sm:$0xff] }
 0xa9e   : > { %v5247_v26 = vpop.eup %5246  ;;  %v3084_v60 = vadd.f32 1e-06, %v3049_v29  ;;  %v4914_v33 = vpack.c.bf16 %v1372_v53, %v1370_v16  ;;  %v3067_v61 = vmul.f32 %v7221_v20, %v7086_v43  ;;  %v1380_v29 = vld [vmem:[%s6051_s0 + $0x70] sm:$0xff]  ;;  %v1383_v16 = vld [vmem:[%s6051_s0 + $0x88] sm:$0xff]  ;;  %v1385_v53 = vld [vmem:[%s6051_s0 + $0x98] sm:$0xff] }
 0xa9f   : > { %v5249_v38 = vpop.eup %5248  ;;  %v3090_v31 = vmul.f32 %v5247_v26, %v3064_v25  ;;  %v3089_v14 = vmul.f32 %v5247_v26, %v3063_v22  ;;  %3221 = vmatprep.mubr.f32.mxu0 %v3121_v63  ;;  %3334 = vmatprep.mubr.f32.mxu1 %v3121_v63  ;;  %v1375_v22 = vld [vmem:[%s6051_s0 + $0x48] sm:$0xff]  ;;  %v3070_v63 = vmul.f32 %v7224_v32, %v7095_v3 }
 0xaa0   : > { %v3093_v44 = vmul.f32 %v5249_v38, %v3066_v54  ;;  %3222 = vmatmul.mubr.f32.vlgmr.msra.gmra.mrb[32].mxu0 %v3120_v1  ;;  %3335 = vmatmul.mubr.f32.vlgmr.msra.gmra.mrb[64].mxu1 %v3120_v1  ;;  %v3092_v6 = vmul.f32 %v5249_v38, %v3065_v19  ;;  %v4916_v9 = vpack.c.bf16 %v1377_v7, %v1375_v22  ;;  %5258 = vrcp.f32 %v3084_v60 }
 0xaa1   : > { %v3123_v10 = vadd.f32 %v7263_v46, %v3090_v31  ;;  %v3122_v17 = vadd.f32 %v7252_v56, %v3089_v14  ;;  %4911 = vmatpush1.bf16.msra.mxu0 %v4910_v18  ;;  %v1379_v18 = vld [vmem:[%s6051_s0 + $0x68] sm:$0xff]  ;;  %v4918_v31 = vpack.c.bf16 %v1376_v21, %v1374_v45  ;;  %v3069_v3 = vmul.f32 %v7221_v20, %v7092_v34 }
 0xaa2   : > { %v5251_v41 = vpop.eup %5250  ;;  %v3125_v25 = vadd.f32 %v7263_v46, %v3093_v44  ;;  %4913 = vmatprep.subr.bf16.mxu0 %v4912_v47  ;;  %v3124_v1 = vadd.f32 %v7252_v56, %v3092_v6  ;;  %v4920_v59 = vpack.c.bf16 %v1381_v24, %v1379_v18  ;;  %v1378_v44 = vld [vmem:[%s6051_s0 + $0x60] sm:$0xff]  ;;  %v3072_v19 = vmul.f32 %v7224_v32, %v7101_v52  ;;  %v1384_v6 = vld [vmem:[%s6051_s0 + $0x90] sm:$0xff] }
 0xaa3   : > { %3227 = vmatprep.mubr.f32.mxu0 %v3123_v10  ;;  %3340 = vmatprep.mubr.f32.mxu1 %v3123_v10  ;;  %v3096_v54 = vmul.f32 %v5251_v41, %v3068_v39  ;;  %v5253_v26 = vpop.eup %5252  ;;  %v3095_v38 = vmul.f32 %v5251_v41, %v3067_v61  ;;  %v4922_v22 = vpack.c.bf16 %v1380_v29, %v1378_v44  ;;  %v1382_v41 = vld [vmem:[%s6051_s0 + $0x80] sm:$0xff]  ;;  %v1388_v24 = vld [vmem:[%s6051_s0 + $0xb0] sm:$0xff] }
 0xaa4   : > { %3228 = vmatmul.mubr.f32.gmra.mrb[34].mxu0 %v3122_v17  ;;  %3341 = vmatmul.mubr.f32.gmra.mrb[66].mxu1 %v3122_v17  ;;  %v3099_v14 = vmul.f32 %v5253_v26, %v3070_v63  ;;  %v3098_v17 = vmul.f32 %v5253_v26, %v3069_v3  ;;  %v4924_v39 = vpack.c.bf16 %v1385_v53, %v1383_v16  ;;  %v1386_v18 = vld [vmem:[%s6051_s0 + $0xa0] sm:$0xff]  ;;  %v1392_v3 = vld [vmem:[%s6051_s0 + $0xd0] sm:$0xff]  ;;  %v1397_v16 = vld [vmem:[%s6051_s0 + $0xf8] sm:$0xff] }
 0xaa5   : > { %3233 = vmatprep.mubr.f32.mxu0 %v3125_v25  ;;  %3346 = vmatprep.mubr.f32.mxu1 %v3125_v25  ;;  %v3127_v43 = vadd.f32 %v7263_v46, %v3096_v54  ;;  %v3126_v10 = vadd.f32 %v7252_v56, %v3095_v38  ;;  %v3071_v52 = vmul.f32 %v7221_v20, %v7098_v11  ;;  %v1389_v25 = vld [vmem:[%s6051_s0 + $0xb8] sm:$0xff] }
 0xaa6   : > { %4915 = vmatpush1.bf16.msra.mxu0 %v4914_v33  ;;  %v5255_v47 = vpop.eup %5254  ;;  %v3129_v34 = vadd.f32 %v7263_v46, %v3099_v14  ;;  %v1387_v33 = vld [vmem:[%s6051_s0 + $0xa8] sm:$0xff]  ;;  %v3074_v54 = vmul.f32 %v7224_v32, %v7107_v49  ;;  %v4926_v21 = vpack.c.bf16 %v1384_v6, %v1382_v41  ;;  %v3073_v49 = vmul.f32 %v7221_v20, %v7104_v57  ;;  %v1393_v38 = vld [vmem:[%s6051_s0 + $0xd8] sm:$0xff]  ;;  %v1398_v6 = vld [vmem:[%s6051_s0 + $0x100] sm:$0xff] }
 0xaa7   : > { %4917 = vmatprep.subr.bf16.mxu0 %v4916_v9  ;;  %v3102_v7 = vmul.f32 %v5255_v47, %v3072_v19  ;;  %v5257_v60 = vpop.eup %5256  ;;  %v3128_v9 = vadd.f32 %v7252_v56, %v3098_v17  ;;  %v3101_v45 = vmul.f32 %v5255_v47, %v3071_v52  ;;  %v4928_v61 = vpack.c.bf16 %v1389_v25, %v1387_v33  ;;  %v1390_v47 = vld [vmem:[%s6051_s0 + $0xc0] sm:$0xff]  ;;  %v1403_v52 = vld [vmem:[%s6051_s0 + $0x128] sm:$0xff]  ;;  %v1405_v33 = vld [vmem:[%s6051_s0 + $0x138] sm:$0xff] }
 0xaa8   : > { %3234 = vmatmul.mubr.f32.gmra.mrb[36].mxu0 %v3124_v1  ;;  %3347 = vmatmul.mubr.f32.gmra.mrb[68].mxu1 %v3124_v1  ;;  %v3105_v26 = vmul.f32 %v5257_v60, %v3074_v54  ;;  %v1391_v1 = vld [vmem:[%s6051_s0 + $0xc8] sm:$0xff]  ;;  %v3104_v14 = vmul.f32 %v5257_v60, %v3073_v49  ;;  %v1400_v60 = vld [vmem:[%s6051_s0 + $0x110] sm:$0xff]  ;;  %v1402_v54 = vld [vmem:[%s6051_s0 + $0x120] sm:$0xff] }
 0xaa9   : > { %3239 = vmatprep.mubr.f32.mxu0 %v3127_v43  ;;  %3352 = vmatprep.mubr.f32.mxu1 %v3127_v43  ;;  %v3131_v11 = vadd.f32 %v7263_v46, %v3102_v7  ;;  %v3130_v43 = vadd.f32 %v7252_v56, %v3101_v45  ;;  %v4932_v29 = vpack.c.bf16 %v1393_v38, %v1391_v1  ;;  %v1401_v7 = vld [vmem:[%s6051_s0 + $0x118] sm:$0xff]  ;;  %v1407_v45 = vld [vmem:[%s6051_s0 + $0x148] sm:$0xff]  ;;  %v1410_v38 = vld [vmem:[%s6051_s0 + $0x160] sm:$0xff] }
 0xaaa   : > { %4919 = vmatpush1.bf16.msra.mxu0 %v4918_v31  ;;  %v5259_v63 = vpop.eup %5258  ;;  %v3076_v31 = vmul.f32 %v7224_v32, %v7129_v28  ;;  %v3133_v57 = vadd.f32 %v7263_v46, %v3105_v26  ;;  %v3075_v28 = vmul.f32 %v7221_v20, %v7126_v2  ;;  %v1395_v32 = vld [vmem:[%s6051_s0 + $0xe8] sm:$0xff]  ;;  %v3132_v53 = vadd.f32 %v7252_v56, %v3104_v14  ;;  %v1394_v2 = vld [vmem:[%s6051_s0 + $0xe0] sm:$0xff]  ;;  %v1396_v20 = vld [vmem:[%s6051_s0 + $0xf0] sm:$0xff] }
 0xaab   : > { %4921 = vmatprep.subr.bf16.mxu0 %v4920_v59  ;;  %v4930_v59 = vpack.c.bf16 %v1388_v24, %v1386_v18  ;;  %v4942_v25 = vpack.c.bf16 %v1400_v60, %v1398_v6  ;;  %v1408_v18 = vld [vmem:[%s6051_s0 + $0x150] sm:$0xff]  ;;  %v1411_v24 = vld [vmem:[%s6051_s0 + $0x168] sm:$0xff]  ;;  %v1417_v14 = vld [vmem:[%s6051_s0 + $0x198] sm:$0xff] }
 0xaac   : > { %3240 = vmatmul.mubr.f32.gmra.mrb[38].mxu0 %v3126_v10  ;;  %3353 = vmatmul.mubr.f32.gmra.mrb[70].mxu1 %v3126_v10  ;;  %v3108_v44 = vmul.f32 %v5259_v63, %v3076_v31  ;;  %v3107_v19 = vmul.f32 %v5259_v63, %v3075_v28  ;;  %v4934_v10 = vpack.c.bf16 %v1392_v3, %v1390_v47  ;;  %v1413_v63 = vld [vmem:[%s6051_s0 + $0x178] sm:$0xff]  ;;  %v1412_v31 = vld [vmem:[%s6051_s0 + $0x170] sm:$0xff]  ;;  %v1419_v47 = vld [vmem:[%s6051_s0 + $0x1a8] sm:$0xff] }
 0xaad   : > { %3245 = vmatprep.mubr.f32.mxu0 %v3129_v34  ;;  %3358 = vmatprep.mubr.f32.mxu1 %v3129_v34  ;;  %v1399_v34 = vld [vmem:[%s6051_s0 + $0x108] sm:$0xff]  ;;  %v4952_v1 = vpack.c.bf16 %v1413_v63, %v1411_v24  ;;  %v1421_v3 = vld [vmem:[%s6051_s0 + $0x1b8] sm:$0xff]  ;;  %v1428_v6 = vld [vmem:[%s6051_s0 + $0x1f0] sm:$0xff] }
 0xaae   : > { %4923 = vmatpush1.bf16.msra.mxu0 %v4922_v22  ;;  %v3135_v17 = vadd.f32 %v7263_v46, %v3108_v44  ;;  %v4936_v22 = vpack.c.bf16 %v1397_v16, %v1395_v32  ;;  %v4938_v46 = vpack.c.bf16 %v1396_v20, %v1394_v2  ;;  %v4940_v41 = vpack.c.bf16 %v1401_v7, %v1399_v34  ;;  %v1414_v44 = vld [vmem:[%s6051_s0 + $0x180] sm:$0xff]  ;;  %v1424_v20 = vld [vmem:[%s6051_s0 + $0x1d0] sm:$0xff]  ;;  %v1427_v7 = vld [vmem:[%s6051_s0 + $0x1e8] sm:$0xff] }
 0xaaf   : > { %4925 = vmatprep.subr.bf16.mxu0 %v4924_v39  ;;  %v3134_v39 = vadd.f32 %v7252_v56, %v3107_v19  ;;  %v4944_v56 = vpack.c.bf16 %v1405_v33, %v1403_v52  ;;  %v4960_v32 = vpack.c.bf16 %v1421_v3, %v1419_v47  ;;  %v1418_v16 = vld [vmem:[%s6051_s0 + $0x1a0] sm:$0xff]  ;;  %v1423_v19 = vld [vmem:[%s6051_s0 + $0x1c8] sm:$0xff]  ;;  %v1433_v33 = vld [vmem:[%s6051_s0 + $0x218] sm:$0xff] }
 0xab0   : > { %3246 = vmatmul.mubr.f32.gmra.mrb[40].mxu0 %v3128_v9  ;;  %3359 = vmatmul.mubr.f32.gmra.mrb[72].mxu1 %v3128_v9  ;;  %v1404_v9 = vld [vmem:[%s6051_s0 + $0x130] sm:$0xff]  ;;  %v1422_v2 = vld [vmem:[%s6051_s0 + $0x1c0] sm:$0xff]  ;;  %v1431_v52 = vld [vmem:[%s6051_s0 + $0x208] sm:$0xff] }
 0xab1   : > { %3251 = vmatprep.mubr.f32.mxu0 %v3131_v11  ;;  %3364 = vmatprep.mubr.f32.mxu1 %v3131_v11  ;;  %v4946_v11 = vpack.c.bf16 %v1404_v9, %v1402_v54  ;;  %v4966_v34 = vpack.c.bf16 %v1424_v20, %v1422_v2  ;;  %v1432_v24 = vld [vmem:[%s6051_s0 + $0x210] sm:$0xff]  ;;  %v1434_v3 = vld [vmem:[%s6051_s0 + $0x220] sm:$0xff] }
 0xab2   : > { %4927 = vmatpush1.bf16.msra.mxu0 %v4926_v21  ;;  %v1409_v21 = vld [vmem:[%s6051_s0 + $0x158] sm:$0xff] }
 0xab3   : > { %4929 = vmatprep.subr.bf16.mxu0 %v4928_v61  ;;  %v4948_v26 = vpack.c.bf16 %v1409_v21, %v1407_v45  ;;  %v1406_v61 = vld [vmem:[%s6051_s0 + $0x140] sm:$0xff] }
 0xab4   : > { %3252 = vmatmul.mubr.f32.gmra.mrb[42].mxu0 %v3130_v43  ;;  %3365 = vmatmul.mubr.f32.gmra.mrb[74].mxu1 %v3130_v43  ;;  %v4950_v49 = vpack.c.bf16 %v1408_v18, %v1406_v61  ;;  %v1415_v43 = vld [vmem:[%s6051_s0 + $0x188] sm:$0xff]  ;;  %v1430_v18 = vld [vmem:[%s6051_s0 + $0x200] sm:$0xff] }
 0xab5   : > { %3257 = vmatprep.mubr.f32.mxu0 %v3133_v57  ;;  %3370 = vmatprep.mubr.f32.mxu1 %v3133_v57  ;;  %v4956_v57 = vpack.c.bf16 %v1417_v14, %v1415_v43  ;;  %v4974_v14 = vpack.c.bf16 %v1432_v24, %v1430_v18 }
 0xab6   : > { %4931 = vmatpush1.bf16.msra.mxu0 %v4930_v59  ;;  %v4954_v59 = vpack.c.bf16 %v1412_v31, %v1410_v38 }
 0xab7   : > { %4933 = vmatprep.subr.bf16.mxu0 %v4932_v29  ;;  %v1416_v29 = vld [vmem:[%s6051_s0 + $0x190] sm:$0xff] }
 0xab8   : > { %3258 = vmatmul.mubr.f32.gmra.mrb[44].mxu0 %v3132_v53  ;;  %3371 = vmatmul.mubr.f32.gmra.mrb[76].mxu1 %v3132_v53  ;;  %v4958_v28 = vpack.c.bf16 %v1416_v29, %v1414_v44  ;;  %v1420_v53 = vld [vmem:[%s6051_s0 + $0x1b0] sm:$0xff] }
 0xab9   : > { %3263 = vmatprep.mubr.f32.mxu0 %v3135_v17  ;;  %3376 = vmatprep.mubr.f32.mxu1 %v3135_v17  ;;  %v4962_v17 = vpack.c.bf16 %v1420_v53, %v1418_v16  ;;  %v1439_v16 = vld [vmem:[%s6051_s0 + $0x248] sm:$0xff]  ;;  %v1441_v53 = vld [vmem:[%s6051_s0 + $0x258] sm:$0xff] }
 0xaba   : > { %4935 = vmatpush1.bf16.msra.mxu0 %v4934_v10  ;;  %v1425_v10 = vld [vmem:[%s6051_s0 + $0x1d8] sm:$0xff] }
 0xabb   : > { %4937 = vmatprep.subr.bf16.mxu0 %v4936_v22  ;;  %v4964_v22 = vpack.c.bf16 %v1425_v10, %v1423_v19 }
 0xabc   : > { %3264 = vmatmul.mubr.f32.gmra.mrb[46].mxu0 %v3134_v39  ;;  %3377 = vmatmul.mubr.f32.gmra.mrb[78].mxu1 %v3134_v39  ;;  %v1429_v39 = vld [vmem:[%s6051_s0 + $0x1f8] sm:$0xff] }
 0xabe   : > { %4939 = vmatpush1.bf16.msra.mxu0 %v4938_v46  ;;  %v4968_v46 = vpack.c.bf16 %v1429_v39, %v1427_v7  ;;  %v4980_v39 = vpack.c.bf16 %v1441_v53, %v1439_v16 }
 0xabf   : > { %4941 = vmatprep.subr.bf16.mxu0 %v4940_v41  ;;  %v1426_v41 = vld [vmem:[%s6051_s0 + $0x1e0] sm:$0xff] }
 0xac0   : > { %v4970_v60 = vpack.c.bf16 %v1428_v6, %v1426_v41  ;;  %v1440_v41 = vld [vmem:[%s6051_s0 + $0x250] sm:$0xff] }
 0xac2   : > { %4943 = vmatpush1.bf16.msra.mxu0 %v4942_v25  ;;  %v4972_v25 = vpack.c.bf16 %v1433_v33, %v1431_v52  ;;  %v1445_v52 = vld [vmem:[%s6051_s0 + $0x278] sm:$0xff] }
 0xac3   : > { %4945 = vmatprep.subr.bf16.mxu0 %v4944_v56  ;;  %v7378_v56 = vld [vmem:[%s6045_s13] sm:$0xf] }
 0xac4   : > { %v7382_v54 = vrot.slane %v7378_v56, %v6361_v4  ;;  %v7386_v9 = vrot.slane %v7378_v56, %v6364_v37 }
 0xac6   : > { %4947 = vmatpush1.bf16.msra.mxu0 %v4946_v11 }
 0xac7   : > { %4949 = vmatprep.subr.bf16.mxu0 %v4948_v26 }
 0xaca   : > { %4951 = vmatpush1.bf16.msra.mxu0 %v4950_v49  ;;  %v1435_v49 = vld [vmem:[%s6051_s0 + $0x228] sm:$0xff] }
 0xacb   : > { %4953 = vmatprep.subr.bf16.mxu0 %v4952_v1  ;;  %v1437_v1 = vld [vmem:[%s6051_s0 + $0x238] sm:$0xff] }
 0xacc   : > { %v4976_v47 = vpack.c.bf16 %v1437_v1, %v1435_v49  ;;  %v1442_v1 = vld [vmem:[%s6051_s0 + $0x260] sm:$0xff] }
 0xace   : > { %4955 = vmatpush1.bf16.msra.mxu0 %v4954_v59 }
 0xacf   : > { %4957 = vmatprep.subr.bf16.mxu0 %v4956_v57 }
 0xad2   : > { %4959 = vmatpush1.bf16.msra.mxu0 %v4958_v28  ;;  %v1436_v28 = vld [vmem:[%s6051_s0 + $0x230] sm:$0xff] }
 0xad3   : > { %4961 = vmatprep.subr.bf16.mxu0 %v4960_v32 }
 0xad6   : > { %4963 = vmatpush1.bf16.msra.mxu0 %v4962_v17 }
 0xad7   : > { %4965 = vmatprep.subr.bf16.mxu0 %v4964_v22  ;;  %v4978_v22 = vpack.c.bf16 %v1436_v28, %v1434_v3 }
 0xada   : > { %4967 = vmatpush1.bf16.msra.mxu0 %v4966_v34 }
 0xadb   : > { %4969 = vmatprep.subr.bf16.mxu0 %v4968_v46  ;;  %v1438_v46 = vld [vmem:[%s6051_s0 + $0x240] sm:$0xff] }
 0xade   : > { %4971 = vmatpush1.bf16.msra.mxu0 %v4970_v60  ;;  %v1443_v60 = vld [vmem:[%s6051_s0 + $0x268] sm:$0xff] }
 0xadf   : > { %4973 = vmatprep.subr.bf16.mxu0 %v4972_v25  ;;  %v4984_v49 = vpack.c.bf16 %v1445_v52, %v1443_v60 }
 0xb73   : > { %v3223_v45 = vpop.f32.mrb[32].mxu0  ;;  %v7388_v21 = vpop.f32.mrb[64].mxu1 }
 0xb74   : > { %v3224_v11 = vadd.f32 %v3223_v45, %v7382_v54  ;;  %v3225_v26 = vpop.f32.mrb[33].mxu0  ;;  %v7391_v61 = vpop.f32.mrb[65].mxu1 }
 0xb75   : > { %v3226_v63 = vadd.f32 %v3225_v26, %v7386_v9 }
 0xb76   : > { %v3383_v59 = vmax.f32 %v3224_v11, 0.0  ;;  %v4982_v11 = vpack.c.bf16 %v1440_v41, %v1438_v46 }
 0xb77   : > { %v3384_v38 = vmax.f32 %v3226_v63, 0.0  ;;  %v3229_v31 = vpop.f32.mrb[34].mxu0  ;;  %v7398_v43 = vpop.f32.mrb[66].mxu1 }
 0xb78   : > { %v3230_v57 = vadd.f32 %v3229_v31, %v7382_v54  ;;  %v3231_v44 = vpop.f32.mrb[35].mxu0  ;;  %v7401_v29 = vpop.f32.mrb[67].mxu1 }
 0xb79   : > { %v3232_v32 = vadd.f32 %v3231_v44, %v7386_v9  ;;  %3490 = vmatprep.mubr.f32.mxu0 %v3384_v38  ;;  %v1444_v38 = vld [vmem:[%s6051_s0 + $0x270] sm:$0xff] }
 0xb7a   : > { %3491 = vmatmul.mubr.f32.vlgmr.msra.gmra.mrb[48].mxu0 %v3383_v59  ;;  %v3387_v2 = vmax.f32 %v3230_v57, 0.0  ;;  %v1449_v59 = vld [vmem:[%s6051_s0 + $0x298] sm:$0xff]  ;;  %v4986_v3 = vpack.c.bf16 %v1444_v38, %v1442_v1 }
 0xb7b   : > { %v3388_v19 = vmax.f32 %v3232_v32, 0.0  ;;  %4975 = vmatpush1.bf16.msra.mxu0 %v4974_v14  ;;  %v3235_v10 = vpop.f32.mrb[36].mxu0  ;;  %v7408_v17 = vpop.f32.mrb[68].mxu1  ;;  %v1447_v14 = vld [vmem:[%s6051_s0 + $0x288] sm:$0xff]  ;;  %v1457_v1 = vld [vmem:[%s6051_s0 + $0x2d8] sm:$0xff] }
 0xb7c   : > { %v3236_v20 = vadd.f32 %v3235_v10, %v7382_v54  ;;  %v3237_v34 = vpop.f32.mrb[37].mxu0  ;;  %v7411_v7 = vpop.f32.mrb[69].mxu1  ;;  %4977 = vmatprep.subr.bf16.mxu0 %v4976_v47  ;;  %v1446_v10 = vld [vmem:[%s6051_s0 + $0x280] sm:$0xff] }
 0xb7d   : > { %v3238_v6 = vadd.f32 %v3237_v34, %v7386_v9  ;;  %3496 = vmatprep.mubr.f32.mxu0 %v3388_v19  ;;  %v4988_v19 = vpack.c.bf16 %v1449_v59, %v1447_v14  ;;  %v1453_v34 = vld [vmem:[%s6051_s0 + $0x2b8] sm:$0xff] }
 0xb7e   : > { %3497 = vmatmul.mubr.f32.gmra.mrb[50].mxu0 %v3387_v2  ;;  %v3391_v26 = vmax.f32 %v3236_v20, 0.0  ;;  %v1451_v20 = vld [vmem:[%s6051_s0 + $0x2a8] sm:$0xff] }
 0xb7f   : > { %v3392_v33 = vmax.f32 %v3238_v6, 0.0  ;;  %4979 = vmatpush1.bf16.msra.mxu0 %v4978_v22  ;;  %v3241_v25 = vpop.f32.mrb[38].mxu0  ;;  %v7418_v45 = vpop.f32.mrb[70].mxu1  ;;  %v1448_v22 = vld [vmem:[%s6051_s0 + $0x290] sm:$0xff] }
 0xb80   : > { %v3242_v18 = vadd.f32 %v3241_v25, %v7382_v54  ;;  %v3243_v24 = vpop.f32.mrb[39].mxu0  ;;  %v7421_v63 = vpop.f32.mrb[71].mxu1  ;;  %4981 = vmatprep.subr.bf16.mxu0 %v4980_v39  ;;  %v4990_v6 = vpack.c.bf16 %v1448_v22, %v1446_v10  ;;  %v7458_v10 = vrot.slane %v7378_v56, %v1752_v36 }
 0xb81   : > { %v3244_v31 = vadd.f32 %v3243_v24, %v7386_v9  ;;  %3502 = vmatprep.mubr.f32.mxu0 %v3392_v33 }
 0xb82   : > { %3503 = vmatmul.mubr.f32.gmra.mrb[52].mxu0 %v3391_v26  ;;  %v3395_v28 = vmax.f32 %v3242_v18, 0.0  ;;  %v1450_v26 = vld [vmem:[%s6051_s0 + $0x2a0] sm:$0xff]  ;;  %v1452_v18 = vld [vmem:[%s6051_s0 + $0x2b0] sm:$0xff]  ;;  %v3351_v30 = vadd.f32 %v7411_v7, %v7458_v10 }
 0xb83   : > { %v3396_v57 = vmax.f32 %v3244_v31, 0.0  ;;  %4983 = vmatpush1.bf16.msra.mxu0 %v4982_v11  ;;  %v3247_v44 = vpop.f32.mrb[40].mxu0  ;;  %v7428_v47 = vpop.f32.mrb[72].mxu1  ;;  %v4992_v11 = vpack.c.bf16 %v1453_v34, %v1451_v20  ;;  %v4994_v59 = vpack.c.bf16 %v1452_v18, %v1450_v26  ;;  %v1461_v20 = vld [vmem:[%s6051_s0 + $0x2f8] sm:$0xff]  ;;  %v1458_v26 = vld [vmem:[%s6051_s0 + $0x2e0] sm:$0xff]  ;;  %v1460_v18 = vld [vmem:[%s6051_s0 + $0x2f0] sm:$0xff] }
 0xb84   : > { %v3248_v32 = vadd.f32 %v3247_v44, %v7382_v54  ;;  %v3249_v16 = vpop.f32.mrb[41].mxu0  ;;  %v7431_v53 = vpop.f32.mrb[73].mxu1  ;;  %4985 = vmatprep.subr.bf16.mxu0 %v4984_v49  ;;  %v1455_v49 = vld [vmem:[%s6051_s0 + $0x2c8] sm:$0xff] }
 0xb85   : > { %v3250_v2 = vadd.f32 %v3249_v16, %v7386_v9  ;;  %3506 = vmatprep.mubr.f32.mxu0 %v3396_v57  ;;  %v1454_v16 = vld [vmem:[%s6051_s0 + $0x2c0] sm:$0xff] }
 0xb86   : > { %3507 = vmatmul.mubr.f32.gmra.mrb[54].mxu0 %v3395_v28  ;;  %v3399_v60 = vmax.f32 %v3248_v32, 0.0  ;;  %v4996_v32 = vpack.c.bf16 %v1457_v1, %v1455_v49  ;;  %v1463_v1 = vld [vmem:[%s6051_s0 + $0x308] sm:$0xff] }
 0xb87   : > { %v3400_v39 = vmax.f32 %v3250_v2, 0.0  ;;  %4987 = vmatpush1.bf16.msra.mxu0 %v4986_v3  ;;  %v3253_v46 = vpop.f32.mrb[42].mxu0  ;;  %v7438_v41 = vpop.f32.mrb[74].mxu1  ;;  %v1459_v2 = vld [vmem:[%s6051_s0 + $0x2e8] sm:$0xff] }
 0xb88   : > { %v3254_v52 = vadd.f32 %v3253_v46, %v7382_v54  ;;  %v3255_v33 = vpop.f32.mrb[43].mxu0  ;;  %v7441_v25 = vpop.f32.mrb[75].mxu1  ;;  %4989 = vmatprep.subr.bf16.mxu0 %v4988_v19  ;;  %v1456_v19 = vld [vmem:[%s6051_s0 + $0x2d0] sm:$0xff] }
 0xb89   : > { %v3256_v24 = vadd.f32 %v3255_v33, %v7386_v9  ;;  %3510 = vmatprep.mubr.f32.mxu0 %v3400_v39 }
 0xb8a   : > { %3511 = vmatmul.mubr.f32.gmra.mrb[56].mxu0 %v3399_v60  ;;  %v3403_v57 = vmax.f32 %v3254_v52, 0.0 }
 0xb8b   : > { %v3404_v38 = vmax.f32 %v3256_v24, 0.0  ;;  %4991 = vmatpush1.bf16.msra.mxu0 %v4990_v6  ;;  %v3259_v31 = vpop.f32.mrb[44].mxu0  ;;  %v7448_v14 = vpop.f32.mrb[76].mxu1  ;;  %v4998_v6 = vpack.c.bf16 %v1456_v19, %v1454_v16  ;;  %v3339_v24 = vadd.f32 %v7391_v61, %v7458_v10  ;;  %v1464_v61 = vld [vmem:[%s6051_s0 + $0x310] sm:$0xff] }
 0xb8c   : > { %v3260_v44 = vadd.f32 %v3259_v31, %v7382_v54  ;;  %v3261_v3 = vpop.f32.mrb[45].mxu0  ;;  %v7451_v28 = vpop.f32.mrb[77].mxu1  ;;  %4993 = vmatprep.subr.bf16.mxu0 %v4992_v11  ;;  %v5000_v11 = vpack.c.bf16 %v1461_v20, %v1459_v2  ;;  %v5002_v31 = vpack.c.bf16 %v1460_v18, %v1458_v26  ;;  %v1468_v2 = vld [vmem:[%s6051_s0 + $0x330] sm:$0xff]  ;;  %v1471_v20 = vld [vmem:[%s6051_s0 + $0x348] sm:$0xff] }
 0xb8d   : > { %v3262_v22 = vadd.f32 %v3261_v3, %v7386_v9  ;;  %3514 = vmatprep.mubr.f32.mxu0 %v3404_v38  ;;  %v1465_v38 = vld [vmem:[%s6051_s0 + $0x318] sm:$0xff]  ;;  %v3386_v3 = vmax.f32 %v3339_v24, 0.0  ;;  %v1474_v24 = vld [vmem:[%s6051_s0 + $0x360] sm:$0xff] }
 0xb8e   : > { %3515 = vmatmul.mubr.f32.gmra.mrb[58].mxu0 %v3403_v57  ;;  %v3407_v60 = vmax.f32 %v3260_v44, 0.0  ;;  %v5004_v57 = vpack.c.bf16 %v1465_v38, %v1463_v1  ;;  %v1462_v44 = vld [vmem:[%s6051_s0 + $0x300] sm:$0xff]  ;;  %v1479_v1 = vld [vmem:[%s6051_s0 + $0x388] sm:$0xff]  ;;  %v1481_v38 = vld [vmem:[%s6051_s0 + $0x398] sm:$0xff] }
 0xb8f   : > { %v3408_v34 = vmax.f32 %v3262_v22, 0.0  ;;  %4995 = vmatpush1.bf16.msra.mxu0 %v4994_v59  ;;  %v3265_v39 = vpop.f32.mrb[46].mxu0  ;;  %v7463_v46 = vpop.f32.mrb[78].mxu1  ;;  %v5006_v16 = vpack.c.bf16 %v1464_v61, %v1462_v44  ;;  %v1466_v22 = vld [vmem:[%s6051_s0 + $0x320] sm:$0xff]  ;;  %v1483_v44 = vld [vmem:[%s6051_s0 + $0x3a8] sm:$0xff]  ;;  %v1485_v61 = vld [vmem:[%s6051_s0 + $0x3b8] sm:$0xff] }
 0xb90   : > { %v3266_v36 = vadd.f32 %v3265_v39, %v7382_v54  ;;  %v3267_v52 = vpop.f32.mrb[47].mxu0  ;;  %v7466_v33 = vpop.f32.mrb[79].mxu1  ;;  %4997 = vmatprep.subr.bf16.mxu0 %v4996_v32  ;;  %v1469_v32 = vld [vmem:[%s6051_s0 + $0x338] sm:$0xff]  ;;  %v5010_v39 = vpack.c.bf16 %v1468_v2, %v1466_v22 }
 0xb91   : > { %v3268_v49 = vadd.f32 %v3267_v52, %v7386_v9  ;;  %3518 = vmatprep.mubr.f32.mxu0 %v3408_v34  ;;  %v1467_v9 = vld [vmem:[%s6051_s0 + $0x328] sm:$0xff]  ;;  %v1473_v34 = vld [vmem:[%s6051_s0 + $0x358] sm:$0xff] }
 0xb92   : > { %3519 = vmatmul.mubr.f32.gmra.mrb[60].mxu0 %v3407_v60  ;;  %v3411_v59 = vmax.f32 %v3266_v36, 0.0  ;;  %v5008_v19 = vpack.c.bf16 %v1469_v32, %v1467_v9  ;;  %v1470_v60 = vld [vmem:[%s6051_s0 + $0x340] sm:$0xff]  ;;  %v1472_v36 = vld [vmem:[%s6051_s0 + $0x350] sm:$0xff]  ;;  %v1475_v52 = vld [vmem:[%s6051_s0 + $0x368] sm:$0xff]  ;;  %v5024_v9 = vpack.c.bf16 %v1485_v61, %v1483_v44 }
 0xb93   : > { %v3412_v54 = vmax.f32 %v3268_v49, 0.0  ;;  %4999 = vmatpush1.bf16.msra.mxu0 %v4998_v6  ;;  %v5012_v6 = vpack.c.bf16 %v1473_v34, %v1471_v20  ;;  %v5014_v26 = vpack.c.bf16 %v1472_v36, %v1470_v60  ;;  %v1476_v49 = vld [vmem:[%s6051_s0 + $0x370] sm:$0xff]  ;;  %v1482_v32 = vld [vmem:[%s6051_s0 + $0x3a0] sm:$0xff]  ;;  %v1489_v22 = vld [vmem:[%s6051_s0 + $0x3d8] sm:$0xff] }
 0xb94   : > { %5001 = vmatprep.subr.bf16.mxu0 %v5000_v11  ;;  %v1477_v11 = vld [vmem:[%s6051_s0 + $0x378] sm:$0xff]  ;;  %v1486_v34 = vld [vmem:[%s6051_s0 + $0x3c0] sm:$0xff] }
 0xb95   : > { %3522 = vmatprep.mubr.f32.mxu0 %v3412_v54  ;;  %v5016_v18 = vpack.c.bf16 %v1477_v11, %v1475_v52  ;;  %v5018_v54 = vpack.c.bf16 %v1476_v49, %v1474_v24  ;;  %v1493_v60 = vld [vmem:[%s6051_s0 + $0x3f8] sm:$0xff]  ;;  %v3148_v52 = vrot.slane %v7378_v56, %v1748_v23 }
 0xb96   : > { %3523 = vmatmul.mubr.f32.gmra.mrb[62].mxu0 %v3411_v59  ;;  %v1478_v59 = vld [vmem:[%s6051_s0 + $0x380] sm:$0xff] }
 0xb97   : > { %5003 = vmatpush1.bf16.msra.mxu0 %v5002_v31  ;;  %3591 = vmatprep.mubr.f32.mxu0 %v3386_v3  ;;  %v5020_v31 = vpack.c.bf16 %v1481_v38, %v1479_v1  ;;  %v3337_v49 = vadd.f32 %v7388_v21, %v3148_v52  ;;  %v3345_v1 = vadd.f32 %v7401_v29, %v7458_v10 }
 0xb98   : > { %5005 = vmatprep.subr.bf16.mxu0 %v5004_v57  ;;  %v1480_v57 = vld [vmem:[%s6051_s0 + $0x390] sm:$0xff]  ;;  %v3349_v56 = vadd.f32 %v7408_v17, %v3148_v52  ;;  %v3357_v21 = vadd.f32 %v7421_v63, %v7458_v10  ;;  %v3361_v61 = vadd.f32 %v7428_v47, %v3148_v52  ;;  %v3369_v17 = vadd.f32 %v7441_v25, %v7458_v10 }
 0xb99   : > { %v5022_v3 = vpack.c.bf16 %v1480_v57, %v1478_v59  ;;  %v3385_v38 = vmax.f32 %v3337_v49, 0.0  ;;  %v3394_v59 = vmax.f32 %v3351_v30, 0.0  ;;  %v3355_v57 = vadd.f32 %v7418_v45, %v3148_v52 }
 0xb9a   : > { %v3393_v29 = vmax.f32 %v3349_v56, 0.0  ;;  %v3398_v44 = vmax.f32 %v3357_v21, 0.0  ;;  %v3401_v63 = vmax.f32 %v3361_v61, 0.0  ;;  %v3375_v45 = vadd.f32 %v7451_v28, %v7458_v10 }
 0xb9b   : > { %5007 = vmatpush1.bf16.msra.mxu0 %v5006_v16  ;;  %v1484_v16 = vld [vmem:[%s6051_s0 + $0x3b0] sm:$0xff]  ;;  %v3397_v7 = vmax.f32 %v3355_v57, 0.0  ;;  %v3381_v47 = vadd.f32 %v7466_v33, %v7458_v10 }
 0xb9c   : > { %5009 = vmatprep.subr.bf16.mxu0 %v5008_v19  ;;  %v1487_v19 = vld [vmem:[%s6051_s0 + $0x3c8] sm:$0xff]  ;;  %v5026_v2 = vpack.c.bf16 %v1484_v16, %v1482_v32  ;;  %v3406_v32 = vmax.f32 %v3369_v17, 0.0  ;;  %v3373_v16 = vadd.f32 %v7448_v14, %v3148_v52 }
 0xb9d   : > { %v5028_v20 = vpack.c.bf16 %v1489_v22, %v1487_v19  ;;  %v3410_v19 = vmax.f32 %v3375_v45, 0.0  ;;  %v3379_v22 = vadd.f32 %v7463_v46, %v3148_v52 }
 0xb9e   : > { %v3409_v25 = vmax.f32 %v3373_v16, 0.0 }
 0xb9f   : > { %5011 = vmatpush1.bf16.msra.mxu0 %v5010_v39  ;;  %v1488_v39 = vld [vmem:[%s6051_s0 + $0x3d0] sm:$0xff] }
 0xba0   : > { %5013 = vmatprep.subr.bf16.mxu0 %v5012_v6  ;;  %v1491_v6 = vld [vmem:[%s6051_s0 + $0x3e8] sm:$0xff]  ;;  %v5030_v36 = vpack.c.bf16 %v1488_v39, %v1486_v34 }
 0xba1   : > { %v5032_v11 = vpack.c.bf16 %v1493_v60, %v1491_v6 }
 0xba3   : > { %5015 = vmatpush1.bf16.msra.mxu0 %v5014_v26  ;;  %v1490_v26 = vld [vmem:[%s6051_s0 + $0x3e0] sm:$0xff] }
 0xba4   : > { %5017 = vmatprep.subr.bf16.mxu0 %v5016_v18  ;;  %v1492_v18 = vld [vmem:[%s6051_s0 + $0x3f0] sm:$0xff] }
 0xba5   : > { %v5034_v24 = vpack.c.bf16 %v1492_v18, %v1490_v26  ;;  %v1494_v18 = vld [vmem:[%s6054_s2] sm:$0x3]  ;;  %s7832_s2 = sld [smem:[#allocation31_spill]] }
 0xba6   : > { %v3419_v46 = vrot.slane %v1494_v18, %v6361_v4 }
 0xba7   : > { %5019 = vmatpush1.bf16.msra.mxu0 %v5018_v54  ;;  %v3343_v54 = vadd.f32 %v7398_v43, %v3148_v52  ;;  %v3363_v43 = vadd.f32 %v7431_v53, %v7458_v10 }
 0xba8   : > { %5021 = vmatprep.subr.bf16.mxu0 %v5020_v31  ;;  %v3390_v31 = vmax.f32 %v3345_v1, 0.0 }
 0xba9   : > { %v3389_v23 = vmax.f32 %v3343_v54, 0.0 }
 0xbab   : > { %5023 = vmatpush1.bf16.msra.mxu0 %v5022_v3  ;;  %v3402_v3 = vmax.f32 %v3363_v43, 0.0  ;;  %s937_s28 = scalar_lea.vmem %s7832_s2, %s6347_s30 }
 0xbac   : > { %5025 = vmatprep.subr.bf16.mxu0 %v5024_v9  ;;  %v3367_v9 = vadd.f32 %v7438_v41, %v3148_v52  ;;  %v3413_v41 = vmax.f32 %v3379_v22, 0.0  ;;  %v3423_v52 = vrot.slane %v1494_v18, %v6364_v37 }
 0xbae   : > { %v3405_v53 = vmax.f32 %v3367_v9, 0.0 }
 0xbaf   : > { %5027 = vmatpush1.bf16.msra.mxu0 %v5026_v2  ;;  %v3414_v2 = vmax.f32 %v3381_v47, 0.0 }
 0xbb0   : > { %5029 = vmatprep.subr.bf16.mxu0 %v5028_v20 }
 0xbb3   : > { %5031 = vmatpush1.bf16.msra.mxu0 %v5030_v36 }
 0xbb4   : > { %5033 = vmatprep.subr.bf16.mxu0 %v5032_v11 }
 0xbb7   : > { %5035 = vmatpush1.bf16.msra.mxu0 %v5034_v24 }
 0xbba   : > { %3592 = vmatmul.mubr.f32.vlgmr.msra.gmra.mrb[48].mxu0 %v3385_v38 }
 0xbbb   : > { %3597 = vmatprep.mubr.f32.mxu0 %v3390_v31 }
 0xbbe   : > { %3598 = vmatmul.mubr.f32.gmra.mrb[50].mxu0 %v3389_v23 }
 0xbbf   : > { %3603 = vmatprep.mubr.f32.mxu0 %v3394_v59 }
 0xbc2   : > { %3604 = vmatmul.mubr.f32.gmra.mrb[64].mxu0 %v3393_v29 }
 0xbc3   : > { %3607 = vmatprep.mubr.f32.mxu0 %v3398_v44 }
 0xbc6   : > { %3608 = vmatmul.mubr.f32.gmra.mrb[66].mxu0 %v3397_v7 }
 0xbc7   : > { %3611 = vmatprep.mubr.f32.mxu0 %v3402_v3 }
 0xbca   : > { %3612 = vmatmul.mubr.f32.gmra.mrb[68].mxu0 %v3401_v63 }
 0xbcb   : > { %3615 = vmatprep.mubr.f32.mxu0 %v3406_v32 }
 0xbce   : > { %3616 = vmatmul.mubr.f32.gmra.mrb[70].mxu0 %v3405_v53 }
 0xbcf   : > { %3619 = vmatprep.mubr.f32.mxu0 %v3410_v19 }
 0xbd2   : > { %3620 = vmatmul.mubr.f32.gmra.mrb[72].mxu0 %v3409_v25 }
 0xbd3   : > { %3623 = vmatprep.mubr.f32.mxu0 %v3414_v2 }
 0xbd6   : > { %3624 = vmatmul.mubr.f32.gmra.mrb[74].mxu0 %v3413_v41 }
 0xc55   : > { %v3504_v28 = vpop.f32.mrb[52].mxu0 }
 0xc56   : > { %v3505_v20 = vpop.f32.mrb[53].mxu0 }
 0xc59   : > { %v3508_v34 = vpop.f32.mrb[54].mxu0 }
 0xc5a   : > { %v3509_v39 = vpop.f32.mrb[55].mxu0 }
 0xc5d   : > { %v3512_v14 = vpop.f32.mrb[56].mxu0 }
 0xc5e   : > { %v3513_v6 = vpop.f32.mrb[57].mxu0 }
 0xc61   : > { %v3516_v60 = vpop.f32.mrb[58].mxu0 }
 0xc62   : > { %v3517_v36 = vpop.f32.mrb[59].mxu0 }
 0xc65   : > { %v3520_v10 = vpop.f32.mrb[60].mxu0 }
 0xc66   : > { %v3521_v33 = vpop.f32.mrb[61].mxu0 }
 0xc69   : > { %v3524_v11 = vpop.f32.mrb[62].mxu0 }
 0xc6a   : > { %v3525_v26 = vpop.f32.mrb[63].mxu0 }
 0xc8d   : > { %v3593_v24 = vpop.f32.mrb[48].mxu0 }
 0xc8e   : > { %v5036_v49 = vadd.f32 %v3593_v24, %v3419_v46  ;;  %v3595_v1 = vpop.f32.mrb[49].mxu0 }
 0xc8f   : > { %v5037_v38 = vadd.f32 %v3595_v1, %v3423_v52 }
 0xc90   : > { %v3628_v54 = vadd.f32 %v5036_v49, %v6932_v0  ;;  %v3632_v29 = vadd.f32 %v5036_v49, %v6940_v40  ;;  %v3636_v0 = vadd.f32 %v5036_v49, %v6952_v42 }
 0xc91   : > { %v3599_v31 = vpop.f32.mrb[50].mxu0  ;;  %v3629_v30 = vadd.f32 %v5037_v38, %v6935_v35  ;;  %v3633_v57 = vadd.f32 %v5037_v38, %v6943_v13  ;;  %v3637_v3 = vadd.f32 %v5037_v38, %v6955_v58  ;;  %v3641_v32 = vadd.f32 %v5037_v38, %v6971_v27 }
 0xc92   : > { %v5038_v23 = vadd.f32 %v3599_v31, %v3419_v46  ;;  %v3601_v56 = vpop.f32.mrb[51].mxu0 }
 0xc93   : > { %v5039_v59 = vadd.f32 %v3601_v56, %v3423_v52  ;;  %v3646_v21 = vadd.f32 %v3629_v30, %v3628_v54  ;;  %v3652_v17 = vadd.f32 %v3633_v57, %v3632_v29  ;;  %v3658_v45 = vadd.f32 %v3637_v3, %v3636_v0 }
 0xc94   : > { %v3630_v44 = vadd.f32 %v5038_v23, %v6946_v48  ;;  %v3634_v63 = vadd.f32 %v5038_v23, %v6962_v55  ;;  %v3640_v48 = vadd.f32 %v5036_v49, %v6968_v50  ;;  %v3638_v42 = vadd.f32 %v5038_v23, %v6978_v62 }
 0xc95   : > { %v3605_v43 = vpop.f32.mrb[64].mxu0  ;;  %3647 = vadd.xlane.f32.xlu0 %v3646_v21  ;;  %v3631_v7 = vadd.f32 %v5039_v59, %v6949_v12  ;;  %v3635_v9 = vadd.f32 %v5039_v59, %v6965_v8  ;;  %v3639_v58 = vadd.f32 %v5039_v59, %v6981_v51  ;;  %v7548_v19 = vadd.f32 %v5038_v23, %v6988_v5 }
 0xc96   : > { %v3606_v61 = vpop.f32.mrb[65].mxu0  ;;  %v3664_v8 = vadd.f32 %v3641_v32, %v3640_v48  ;;  %v7551_v47 = vadd.f32 %v5039_v59, %v6991_v15 }
 0xc97   : > { %v3649_v35 = vadd.f32 %v3631_v7, %v3630_v44  ;;  %v3655_v12 = vadd.f32 %v3635_v9, %v3634_v63  ;;  %v3661_v16 = vadd.f32 %v3639_v58, %v3638_v42 }
 0xc98   : > { %v3667_v62 = vadd.f32 %v7551_v47, %v7548_v19 }
 0xc99   : > { %v3609_v40 = vpop.f32.mrb[66].mxu0  ;;  %3650 = vadd.xlane.f32.xlu1 %v3649_v35  ;;  %3653 = vadd.xlane.f32.xlu0 %v3652_v17 }
 0xc9a   : > { %v3610_v13 = vpop.f32.mrb[67].mxu0 }
 0xc9d   : > { %v3613_v53 = vpop.f32.mrb[68].mxu0  ;;  %3656 = vadd.xlane.f32.xlu1 %v3655_v12  ;;  %3659 = vadd.xlane.f32.xlu0 %v3658_v45 }
 0xc9e   : > { %v3614_v55 = vpop.f32.mrb[69].mxu0 }
 0xca1   : > { %v3617_v50 = vpop.f32.mrb[70].mxu0  ;;  %3662 = vadd.xlane.f32.xlu1 %v3661_v16  ;;  %3665 = vadd.xlane.f32.xlu0 %v3664_v8 }
 0xca2   : > { %v3618_v27 = vpop.f32.mrb[71].mxu0 }
 0xca5   : > { %v3621_v51 = vpop.f32.mrb[72].mxu0  ;;  %3668 = vadd.xlane.f32.xlu1 %v3667_v62 }
 0xca6   : > { %v3622_v25 = vpop.f32.mrb[73].mxu0 }
 0xca9   : > { %v3625_v22 = vpop.f32.mrb[74].mxu0 }
 0xcaa   : > { %v3626_v2 = vpop.f32.mrb[75].mxu0 }
 0xd22   : > { %v3648_v41 = vpop.xlane.xlu0 %3647 }
 0xd23   : > { %v3670_v28 = vmul.f32 0.00390625, %v3648_v41 }
 0xd25   : > { %v7555_v20 = vsub.f32 %v3628_v54, %v3670_v28  ;;  %v7557_v5 = vsub.f32 %v3629_v30, %v3670_v28 }
 0xd26   : > { %v3651_v15 = vpop.xlane.xlu1 %3650  ;;  %v3654_v34 = vpop.xlane.xlu0 %3653 }
 0xd27   : > { %v3671_v39 = vmul.f32 0.00390625, %v3651_v15  ;;  %v3672_v14 = vmul.f32 0.00390625, %v3654_v34  ;;  %v3694_v6 = vmul.f32 %v7555_v20, %v7555_v20  ;;  %v3695_v60 = vmul.f32 %v7557_v5, %v7557_v5 }
 0xd29   : > { %v7563_v36 = vsub.f32 %v3630_v44, %v3671_v39  ;;  %v7565_v10 = vsub.f32 %v3631_v7, %v3671_v39  ;;  %v7567_v33 = vsub.f32 %v3632_v29, %v3672_v14  ;;  %v7569_v11 = vsub.f32 %v3633_v57, %v3672_v14  ;;  %v3644_v14 = vld [vmem:[%s937_s28] sm:$0x3] }
 0xd2a   : > { %v3657_v26 = vpop.xlane.xlu1 %3656  ;;  %v3660_v18 = vpop.xlane.xlu0 %3659  ;;  %v3710_v46 = vadd.f32 %v3695_v60, %v3694_v6  ;;  %v3645_v6 = vld [vmem:[%s941_s24] sm:$0x3] }
 0xd2b   : > { %v3673_v52 = vmul.f32 0.00390625, %v3657_v26  ;;  %v3674_v24 = vmul.f32 0.00390625, %v3660_v18  ;;  %v3696_v49 = vmul.f32 %v7563_v36, %v7563_v36  ;;  %v3697_v1 = vmul.f32 %v7565_v10, %v7565_v10 }
 0xd2c   : > { %3711 = vadd.xlane.f32.xlu0 %v3710_v46  ;;  %v3698_v38 = vmul.f32 %v7567_v33, %v7567_v33  ;;  %v3699_v54 = vmul.f32 %v7569_v11, %v7569_v11 }
 0xd2d   : > { %v7579_v31 = vsub.f32 %v3634_v63, %v3673_v52  ;;  %v7581_v30 = vsub.f32 %v3635_v9, %v3673_v52  ;;  %v7583_v23 = vsub.f32 %v3636_v0, %v3674_v24  ;;  %v7585_v56 = vsub.f32 %v3637_v3, %v3674_v24 }
 0xd2e   : > { %v3663_v59 = vpop.xlane.xlu1 %3662  ;;  %v3666_v21 = vpop.xlane.xlu0 %3665  ;;  %v3713_v44 = vadd.f32 %v3697_v1, %v3696_v49  ;;  %v3716_v43 = vadd.f32 %v3699_v54, %v3698_v38  ;;  %v7640_v1 = vrot.slane %v3644_v14, %v6361_v4 }
 0xd2f   : > { %v3675_v29 = vmul.f32 0.00390625, %v3663_v59  ;;  %v3676_v57 = vmul.f32 0.00390625, %v3666_v21  ;;  %v3700_v3 = vmul.f32 %v7579_v31, %v7579_v31  ;;  %v3701_v63 = vmul.f32 %v7581_v30, %v7581_v30 }
 0xd30   : > { %3714 = vadd.xlane.f32.xlu1 %v3713_v44  ;;  %3717 = vadd.xlane.f32.xlu0 %v3716_v43  ;;  %v3702_v9 = vmul.f32 %v7583_v23, %v7583_v23  ;;  %v3703_v40 = vmul.f32 %v7585_v56, %v7585_v56  ;;  %v7644_v59 = vrot.slane %v3644_v14, %v6364_v37 }
 0xd31   : > { %v7587_v7 = vsub.f32 %v3638_v42, %v3675_v29  ;;  %v7589_v61 = vsub.f32 %v3639_v58, %v3675_v29  ;;  %v7591_v35 = vsub.f32 %v3640_v48, %v3676_v57  ;;  %v7593_v17 = vsub.f32 %v3641_v32, %v3676_v57 }
 0xd32   : > { %v3669_v0 = vpop.xlane.xlu1 %3668  ;;  %v3719_v48 = vadd.f32 %v3701_v63, %v3700_v3  ;;  %v3722_v12 = vadd.f32 %v3703_v40, %v3702_v9  ;;  %v7647_v21 = vrot.slane %v3645_v6, %v6361_v4  ;;  %v7651_v43 = vrot.slane %v3645_v6, %v6364_v37 }
 0xd33   : > { %v3677_v13 = vmul.f32 0.00390625, %v3669_v0  ;;  %v3704_v32 = vmul.f32 %v7587_v7, %v7587_v7  ;;  %v3705_v45 = vmul.f32 %v7589_v61, %v7589_v61  ;;  %v3706_v42 = vmul.f32 %v7591_v35, %v7591_v35 }
 0xd34   : > { %v3707_v58 = vmul.f32 %v7593_v17, %v7593_v17  ;;  %3720 = vadd.xlane.f32.xlu1 %v3719_v48  ;;  %3723 = vadd.xlane.f32.xlu0 %v3722_v12 }
 0xd35   : > { %v7612_v53 = vsub.f32 %v7548_v19, %v3677_v13  ;;  %v7615_v55 = vsub.f32 %v7551_v47, %v3677_v13  ;;  %v3725_v16 = vadd.f32 %v3705_v45, %v3704_v32  ;;  %v3809_v13 = vmul.f32 %v7640_v1, %v7555_v20 }
 0xd36   : > { %v3728_v8 = vadd.f32 %v3707_v58, %v3706_v42  ;;  %v3810_v32 = vmul.f32 %v7644_v59, %v7557_v5  ;;  %v3811_v45 = vmul.f32 %v7640_v1, %v7563_v36 }
 0xd37   : > { %v3708_v50 = vmul.f32 %v7612_v53, %v7612_v53  ;;  %v3709_v27 = vmul.f32 %v7615_v55, %v7615_v55 }
 0xd38   : > { %3726 = vadd.xlane.f32.xlu1 %v3725_v16  ;;  %3729 = vadd.xlane.f32.xlu0 %v3728_v8  ;;  %v3812_v8 = vmul.f32 %v7644_v59, %v7565_v10 }
 0xd39   : > { %v3731_v62 = vadd.f32 %v3709_v27, %v3708_v50 }
 0xd3c   : > { %3732 = vadd.xlane.f32.xlu1 %v3731_v62 }
 0xdb9   : > { %v3712_v19 = vpop.xlane.xlu0 %3711 }
 0xdba   : > { %v3734_v51 = vmul.f32 0.003921569, %v3712_v19 }
 0xdbc   : > { %5260 = vrsqrt.f32 %v3734_v51  ;;  %vm3744_vm9 = vcmp.eq.f32.partialorder %v3734_v51, inf  ;;  %v3747_v46 = vand.u32 2147483648, %v3734_v51  ;;  %vm3746_vm10 = vcmp.eq.f32.partialorder %v3734_v51, 0.0 }
 0xdbd   : > { %v3715_v47 = vpop.xlane.xlu1 %3714  ;;  %v3718_v22 = vpop.xlane.xlu0 %3717 }
 0xdbe   : > { %v3735_v25 = vmul.f32 0.003921569, %v3715_v47  ;;  %v3736_v2 = vmul.f32 0.003921569, %v3718_v22 }
 0xdc0   : > { %5262 = vrsqrt.f32 %v3735_v25  ;;  %vm3751_vm11 = vcmp.eq.f32.partialorder %v3735_v25, inf  ;;  %vm3753_vm12 = vcmp.eq.f32.partialorder %v3735_v25, 0.0  ;;  %v3754_v63 = vand.u32 2147483648, %v3735_v25 }
 0xdc1   : > { %5264 = vrsqrt.f32 %v3736_v2  ;;  %v3721_v41 = vpop.xlane.xlu1 %3720  ;;  %v3724_v28 = vpop.xlane.xlu0 %3723  ;;  %vm3758_vm13 = vcmp.eq.f32.partialorder %v3736_v2, inf  ;;  %v3761_v4 = vand.u32 2147483648, %v3736_v2  ;;  %vm3760_vm14 = vcmp.eq.f32.partialorder %v3736_v2, 0.0 }
 0xdc2   : > { %v7629_v15 = vmul.f32 0.003921569, %v3721_v41  ;;  %v7631_v34 = vmul.f32 0.003921569, %v3724_v28 }
 0xdc4   : > { %5266 = vrsqrt.f32 %v7629_v15  ;;  %vm3765_vm15 = vcmp.eq.f32.partialorder %v7629_v15, inf  ;;  %vm3767_vm0 = vcmp.eq.f32.partialorder %v7629_v15, 0.0  ;;  %v3768_v20 = vand.u32 2147483648, %v7629_v15 }
 0xdc5   : > { %5268 = vrsqrt.f32 %v7631_v34  ;;  %v3727_v26 = vpop.xlane.xlu1 %3726  ;;  %v3730_v18 = vpop.xlane.xlu0 %3729  ;;  %vm3772_vm1 = vcmp.eq.f32.partialorder %v7631_v34, inf  ;;  %v3775_v62 = vand.u32 2147483648, %v7631_v34  ;;  %vm3774_vm2 = vcmp.eq.f32.partialorder %v7631_v34, 0.0 }
 0xdc6   : > { %v5261_v39 = vpop.eup %5260  ;;  %v7635_v52 = vmul.f32 0.003921569, %v3727_v26  ;;  %v7637_v24 = vmul.f32 0.003921569, %v3730_v18 }
 0xdc7   : > { %v3743_v60 = vmul.f32 %v5261_v39, %v3734_v51 }
 0xdc8   : > { %5270 = vrsqrt.f32 %v7635_v52  ;;  %vm3779_vm3 = vcmp.eq.f32.partialorder %v7635_v52, inf  ;;  %vm3781_vm4 = vcmp.eq.f32.partialorder %v7635_v52, 0.0  ;;  %v3782_v28 = vand.u32 2147483648, %v7635_v52 }
 0xdc9   : > { %v3745_v49 = vsel %vm3744_vm9, %v3734_v51, %v3743_v60  ;;  %5272 = vrsqrt.f32 %v7637_v24  ;;  %v3733_v57 = vpop.xlane.xlu1 %3732  ;;  %vm3786_vm5 = vcmp.eq.f32.partialorder %v7637_v24, inf  ;;  %vm3788_vm6 = vcmp.eq.f32.partialorder %v7637_v24, 0.0 }
 0xdca   : > { %v3748_v38 = vsel %vm3746_vm10, %v3747_v46, %v3745_v49  ;;  %v5263_v54 = vpop.eup %5262  ;;  %v7653_v3 = vmul.f32 0.003921569, %v3733_v57  ;;  %v3789_v14 = vand.u32 2147483648, %v7637_v24 }
 0xdcb   : > { %v3825_v29 = vadd.f32 1e-06, %v3748_v38  ;;  %v5265_v44 = vpop.eup %5264  ;;  %v3750_v0 = vmul.f32 %v5263_v54, %v3735_v25 }
 0xdcc   : > { %v3757_v9 = vmul.f32 %v5265_v44, %v3736_v2  ;;  %vm3793_vm7 = vcmp.eq.f32.partialorder %v7653_v3, inf  ;;  %v3796_v57 = vand.u32 2147483648, %v7653_v3  ;;  %vm3795_vm8 = vcmp.eq.f32.partialorder %v7653_v3, 0.0 }
 0xdcd   : > { %5274 = vrcp.f32 %v3825_v29  ;;  %v3752_v40 = vsel %vm3751_vm11, %v3735_v25, %v3750_v0 }
 0xdce   : > { %5276 = vrsqrt.f32 %v7653_v3  ;;  %v3755_v48 = vsel %vm3753_vm12, %v3754_v63, %v3752_v40  ;;  %v3759_v12 = vsel %vm3758_vm13, %v3736_v2, %v3757_v9  ;;  %v5267_v37 = vpop.eup %5266  ;;  %v3814_v9 = vmul.f32 %v7644_v59, %v7569_v11 }
 0xdcf   : > { %v3826_v42 = vadd.f32 1e-06, %v3755_v48  ;;  %v3762_v58 = vsel %vm3760_vm14, %v3761_v4, %v3759_v12  ;;  %v5269_v16 = vpop.eup %5268  ;;  %v3764_v27 = vmul.f32 %v5267_v37, %v7629_v15  ;;  %v3815_v11 = vmul.f32 %v7640_v1, %v7579_v31 }
 0xdd0   : > { %v3827_v50 = vadd.f32 1e-06, %v3762_v58  ;;  %v3771_v5 = vmul.f32 %v5269_v16, %v7631_v34 }
 0xdd1   : > { %5278 = vrcp.f32 %v3826_v42  ;;  %v3766_v36 = vsel %vm3765_vm15, %v7629_v15, %v3764_v27 }
 0xdd2   : > { %5280 = vrcp.f32 %v3827_v50  ;;  %v5271_v10 = vpop.eup %5270  ;;  %v3769_v19 = vsel %vm3767_vm0, %v3768_v20, %v3766_v36  ;;  %v3773_v51 = vsel %vm3772_vm1, %v7631_v34, %v3771_v5  ;;  %v3818_v50 = vmul.f32 %v7644_v59, %v7585_v56 }
 0xdd3   : > { %v5273_v47 = vpop.eup %5272  ;;  %v3828_v25 = vadd.f32 1e-06, %v3769_v19  ;;  %v3776_v22 = vsel %vm3774_vm2, %v3775_v62, %v3773_v51  ;;  %v3778_v2 = vmul.f32 %v5271_v10, %v7635_v52  ;;  %v3819_v36 = vmul.f32 %v7640_v1, %v7587_v7 }
 0xdd4   : > { %v3829_v41 = vadd.f32 1e-06, %v3776_v22  ;;  %v3785_v15 = vmul.f32 %v5273_v47, %v7637_v24  ;;  %v3821_v47 = vmul.f32 %v7640_v1, %v7591_v35  ;;  %v3822_v7 = vmul.f32 %v7644_v59, %v7593_v17 }
 0xdd5   : > { %5282 = vrcp.f32 %v3828_v25  ;;  %v3780_v34 = vsel %vm3779_vm3, %v7635_v52, %v3778_v2  ;;  %v3823_v2 = vmul.f32 %v7640_v1, %v7612_v53 }
 0xdd6   : > { %5284 = vrcp.f32 %v3829_v41  ;;  %v3783_v18 = vsel %vm3781_vm4, %v3782_v28, %v3780_v34  ;;  %v3787_v52 = vsel %vm3786_vm5, %v7637_v24, %v3785_v15  ;;  %v3813_v24 = vmul.f32 %v7640_v1, %v7567_v33 }
 0xdd7   : > { %v5275_v39 = vpop.eup %5274  ;;  %v3830_v46 = vadd.f32 1e-06, %v3783_v18  ;;  %v3790_v29 = vsel %vm3788_vm6, %v3789_v14, %v3787_v52  ;;  %v3824_v41 = vmul.f32 %v7644_v59, %v7615_v55 }
 0xdd8   : > { %v5277_v6 = vpop.eup %5276  ;;  %v3834_v60 = vmul.f32 %v5275_v39, %v3809_v13  ;;  %v3835_v26 = vmul.f32 %v5275_v39, %v3810_v32  ;;  %v3831_v44 = vadd.f32 1e-06, %v3790_v29 }
 0xdd9   : > { %v3792_v49 = vmul.f32 %v5277_v6, %v7653_v3  ;;  %5286 = vrcp.f32 %v3830_v46 }
 0xdda   : > { %v3868_v38 = vadd.f32 %v7647_v21, %v3834_v60  ;;  %v3869_v54 = vadd.f32 %v7651_v43, %v3835_v26  ;;  %5288 = vrcp.f32 %v3831_v44 }
 0xddb   : > { %v3794_v0 = vsel %vm3793_vm7, %v7653_v3, %v3792_v49  ;;  %v5279_v63 = vpop.eup %5278 }
 0xddc   : > { %3884 = vst [vmem:[%s7688_s7] sm:$0xff] %v3868_v38  ;;  %3885 = vst [vmem:[%s7688_s7 + $0x8] sm:$0xff] %v3869_v54  ;;  %v3797_v40 = vsel %vm3795_vm8, %v3796_v57, %v3794_v0  ;;  %v5281_v4 = vpop.eup %5280  ;;  %v3837_v13 = vmul.f32 %v5279_v63, %v3811_v45  ;;  %v3838_v48 = vmul.f32 %v5279_v63, %v3812_v8 }
 0xddd   : > { %v3832_v12 = vadd.f32 1e-06, %v3797_v40  ;;  %v3840_v37 = vmul.f32 %v5281_v4, %v3813_v24  ;;  %v3841_v3 = vmul.f32 %v5281_v4, %v3814_v9  ;;  %v3816_v45 = vmul.f32 %v7644_v59, %v7581_v30 }
 0xdde   : > { %v3870_v32 = vadd.f32 %v7647_v21, %v3837_v13  ;;  %v3871_v33 = vadd.f32 %v7651_v43, %v3838_v48  ;;  %v3817_v8 = vmul.f32 %v7640_v1, %v7583_v23  ;;  %v3820_v23 = vmul.f32 %v7644_v59, %v7589_v61 }
 0xddf   : > { %5290 = vrcp.f32 %v3832_v12  ;;  %v3872_v42 = vadd.f32 %v7647_v21, %v3840_v37  ;;  %v3873_v58 = vadd.f32 %v7651_v43, %v3841_v3  ;;  %v5283_v16 = vpop.eup %5282 }
 0xde0   : > { %3886 = vst [vmem:[%s7688_s7 + $0x10] sm:$0xff] %v3870_v32  ;;  %3887 = vst [vmem:[%s7688_s7 + $0x18] sm:$0xff] %v3871_v33  ;;  %v5285_v27 = vpop.eup %5284  ;;  %v3843_v31 = vmul.f32 %v5283_v16, %v3815_v11  ;;  %v3844_v30 = vmul.f32 %v5283_v16, %v3816_v45 }
 0xde1   : > { %3888 = vst [vmem:[%s7688_s7 + $0x20] sm:$0xff] %v3872_v42  ;;  %3889 = vst [vmem:[%s7688_s7 + $0x28] sm:$0xff] %v3873_v58  ;;  %v3846_v20 = vmul.f32 %v5285_v27, %v3817_v8  ;;  %v3847_v5 = vmul.f32 %v5285_v27, %v3818_v50 }
 0xde2   : > { %v3874_v56 = vadd.f32 %v7647_v21, %v3843_v31  ;;  %v3875_v62 = vadd.f32 %v7651_v43, %v3844_v30 }
 0xde3   : > { %v5287_v10 = vpop.eup %5286  ;;  %v3876_v19 = vadd.f32 %v7647_v21, %v3846_v20  ;;  %v3877_v51 = vadd.f32 %v7651_v43, %v3847_v5 }
 0xde4   : > { %3890 = vst [vmem:[%s7688_s7 + $0x30] sm:$0xff] %v3874_v56  ;;  %3891 = vst [vmem:[%s7688_s7 + $0x38] sm:$0xff] %v3875_v62  ;;  %v3849_v61 = vmul.f32 %v5287_v10, %v3819_v36  ;;  %v3850_v25 = vmul.f32 %v5287_v10, %v3820_v23  ;;  %v5289_v22 = vpop.eup %5288 }
 0xde5   : > { %3892 = vst [vmem:[%s7688_s7 + $0x40] sm:$0xff] %v3876_v19  ;;  %3893 = vst [vmem:[%s7688_s7 + $0x48] sm:$0xff] %v3877_v51  ;;  %v3852_v28 = vmul.f32 %v5289_v22, %v3821_v47  ;;  %v3853_v15 = vmul.f32 %v5289_v22, %v3822_v7 }
 0xde6   : > { %v3878_v35 = vadd.f32 %v7647_v21, %v3849_v61  ;;  %v3879_v17 = vadd.f32 %v7651_v43, %v3850_v25 }
 0xde7   : > { %v3880_v34 = vadd.f32 %v7647_v21, %v3852_v28  ;;  %v3881_v53 = vadd.f32 %v7651_v43, %v3853_v15 }
 0xde8   : > { %3894 = vst [vmem:[%s7688_s7 + $0x50] sm:$0xff] %v3878_v35  ;;  %3895 = vst [vmem:[%s7688_s7 + $0x58] sm:$0xff] %v3879_v17 }
 0xde9   : > { %v5291_v39 = vpop.eup %5290  ;;  %3896 = vst [vmem:[%s7688_s7 + $0x60] sm:$0xff] %v3880_v34  ;;  %3897 = vst [vmem:[%s7688_s7 + $0x68] sm:$0xff] %v3881_v53 }
 0xdea   : > { %v3855_v1 = vmul.f32 %v5291_v39, %v3823_v2  ;;  %v3856_v14 = vmul.f32 %v5291_v39, %v3824_v41 }
 0xdec   : > { %v3882_v55 = vadd.f32 %v7647_v21, %v3855_v1  ;;  %v3883_v59 = vadd.f32 %v7651_v43, %v3856_v14 }
 0xdee   : > { %3898 = vst [vmem:[%s7688_s7 + $0x70] sm:$0xff] %v3882_v55  ;;  %3899 = vst [vmem:[%s7688_s7 + $0x78] sm:$0xff] %v3883_v59 }
 0xdef PF: > { %s7835_s24 = sld [smem:[#allocation21_spill]]  ;;  %s7836_s25 = sld [smem:[#allocation20_spill]] }
 0xdf0   : > { %s7837_s23 = sld [smem:[#allocation22_spill]]  ;;  %s7838_s21 = smov %s5590_s22 }
 0xdf5   : > { %p38_p2 = scmp.ge.s32.totalorder %s7835_s24, 7   ;;  %s7839_s22 = smov %s7836_s25 }
 0xdf7   :  { %40 = sbr.rel (!%p38_p2) target bundleno = 23 (0x17), region = 233 }
 0xdfe   :  { %3921 = vsyncpa [#allocation3], 1 }
 0xdff   :  { %3923 = vsyncpa [#allocation3 + $0x1], 1 }
 0xe00   :  { %3924 = vsyncpa [#allocation5], 1 }
 0xe01   :  { %3926 = vsyncpa [#allocation5 + $0x1], 1 }
 0xe02   :  { %3927 = vsyncpa [#allocation8], 1 }
 0xe03   :  { %3929 = vsyncpa [#allocation8 + $0x1], 1 }
 0xe04   :  { %3930 = vsyncpa [#allocation11], 1 }
 0xe05   :  { %3932 = vsyncpa [#allocation11 + $0x1], 1 }
 0xe06   :  { %3933 = vsyncpa [#allocation14], 1 }
 0xe07   :  { %3935 = vsyncpa [#allocation14 + $0x1], 1 }

</bundles_post_ra>
